<compile_context>
chip_gen: v7x
topology: tpu7x:2x2x1
jax: 0.10.0
libtpu: 0.0.40
codegen_flags: <defaults>
</compile_context>

<pallas_src>
import jax
import jax.numpy as jnp
from jax.experimental import pallas as pl
from jax.experimental.pallas import tpu as pltpu


# Lane-padded channel widths shared by params and kernel.
PAD_C1 = 128            # conv layer-1 out channels 40 -> 128
PAD_C2 = 128            # conv layer-2 out channels 80 -> 128
PAD_C3 = 256            # conv layer-3 out channels 160 -> 256
PAD_GAT = 128           # GAT hidden 64 -> 128
PAD_OUT = 128           # logits 2 -> 128
CAT_W = 2 * PAD_C3 + PAD_GAT   # 640 = pro(256) | smi(256) | gat(128), lane-dense


# ----------------------------------------------------------------------------
# Single fused kernel: BLOCK_B batch elements per grid step.
# ----------------------------------------------------------------------------
def make_fused_kernel(Bblk, N, Lp, Ls, KP=(4, 8, 12), KS=(4, 6, 8)):

    def conv_branch(x_bf, L, Ks, w1, b1, w2, b2, w3, b3, cat_ref, col0):
        """3-layer Conv1d tower + per-element global max pool on stacked rows.

        x_bf: (Bblk*L, 64) bf16 — the Bblk embedded sequences stacked along M.
        Rows whose receptive field crosses an element boundary are computed
        but dropped by the per-element max below, so every layer runs as one
        full-height MXU matmul.
        """
        K1, K2, K3 = Ks
        M = Bblk * L
        M1 = M - K1 + 1
        M2 = M1 - K2 + 1
        M3 = M2 - K3 + 1
        L_out = L - (K1 + K2 + K3) + 3          # valid conv outputs per element

        # Layer 1 as a sum over taps (no lane-unaligned concat of 64-wide
        # pieces); slices are taken in f32 and cast to bf16 per slice.
        x32 = x_bf.astype(jnp.float32)
        h1 = jnp.dot(x32[0:M1].astype(jnp.bfloat16), w1[0:64],
                     preferred_element_type=jnp.float32)
        for k in range(1, K1):
            h1 = h1 + jnp.dot(x32[k:k + M1].astype(jnp.bfloat16),
                              w1[k * 64:(k + 1) * 64],
                              preferred_element_type=jnp.float32)
        h1 = jnp.maximum(h1 + b1, 0.0)                        # (M1, 128)

        # Layers 2/3: im2col-as-matmul; slices cast to bf16 BEFORE the concat
        # so the (M, K*128) patch intermediates are half-size.
        p2 = jnp.concatenate(
            [h1[k:k + M2].astype(jnp.bfloat16) for k in range(K2)], axis=-1)
        h2 = jnp.dot(p2, w2, preferred_element_type=jnp.float32) + b2
        h2 = jnp.maximum(h2, 0.0)                             # (M2, 128)

        p3 = jnp.concatenate(
            [h2[k:k + M3].astype(jnp.bfloat16) for k in range(K3)], axis=-1)
        h3 = jnp.dot(p3, w3, preferred_element_type=jnp.float32) + b3  # (M3, 256)

        # Per-element MaxPool1d over that element's own (valid) rows only,
        # written straight into the lane-dense concat scratch.
        for e in range(Bblk):
            cat_ref[e:e + 1, col0:col0 + PAD_C3] = jnp.max(
                h3[e * L:e * L + L_out], axis=0, keepdims=True)

    def kernel(cmp_ref, bd_ref, pro_ref, smi_ref,
               gw_ref, gas_ref, gad_ref,
               pw1_ref, pb1_ref, pw2_ref, pb2_ref, pw3_ref, pb3_ref,
               sw1_ref, sb1_ref, sw2_ref, sb2_ref, sw3_ref, sb3_ref,
               fw1_ref, fb1_ref, fw2_ref, fb2_ref,
               out_ref, cat_ref):
        BN = Bblk * N

        # ---------------- GAT branch: Bblk graphs batched into one attention -
        # TODO(synk): GAT class is not defined in the reference source; a
        # standard single-head GAT (W, LeakyReLU(0.2) attention, adjacency-
        # masked softmax, ELU, 64-dim output) is used so concat width = 384.
        x = cmp_ref[...]                                       # (BN, Fin) bf16
        h = jnp.dot(x, gw_ref[...], preferred_element_type=jnp.float32)  # (BN,128)
        e_src = jnp.sum(h * gas_ref[...], axis=-1, keepdims=True)        # (BN,1)
        e_dst = jnp.sum(h * gad_ref[...], axis=-1, keepdims=True)        # (BN,1)
        logits = e_src + jnp.transpose(e_dst)                  # (BN, BN)
        logits = jnp.where(logits > 0, logits, 0.2 * logits)   # LeakyReLU(0.2)
        bd = bd_ref[0].astype(jnp.float32)                     # block-diag adjacency
        logits = jnp.where(bd > 0, logits, -1e9)               # mask (needs self loops)
        logits = logits - jnp.max(logits, axis=-1, keepdims=True)
        p = jnp.exp(logits)
        attn = p / jnp.sum(p, axis=-1, keepdims=True)          # exact softmax
        g = jnp.dot(attn.astype(jnp.bfloat16), h.astype(jnp.bfloat16),
                    preferred_element_type=jnp.float32)        # (BN, 128)
        g = jnp.where(g > 0, g, jnp.exp(jnp.minimum(g, 0.0)) - 1.0)   # ELU
        for i in range(Bblk):                                  # node-wise max per graph
            cat_ref[i:i + 1, 2 * PAD_C3:2 * PAD_C3 + PAD_GAT] = jnp.max(
                g[i * N:(i + 1) * N], axis=0, keepdims=True)

        # ---------------- conv branches (conv+BN+ReLU, conv+BN+ReLU, conv) ---
        conv_branch(pro_ref[...], Lp, KP,
                    pw1_ref[...], pb1_ref[...], pw2_ref[...], pb2_ref[...],
                    pw3_ref[...], pb3_ref[...], cat_ref, 0)
        conv_branch(smi_ref[...], Ls, KS,
                    sw1_ref[...], sb1_ref[...], sw2_ref[...], sb2_ref[...],
                    sw3_ref[...], sb3_ref[...], cat_ref, PAD_C3)

        # ---------------- output MLP (concat is the lane-dense scratch) ------
        cat = cat_ref[...].astype(jnp.bfloat16)                # (Bblk, 640)
        h1 = jnp.dot(cat, fw1_ref[...],
                     preferred_element_type=jnp.float32) + fb1_ref[...]   # (Bblk,512)
        h1 = jnp.maximum(h1, 0.0)                              # Dropout = identity
        out = jnp.dot(h1.astype(jnp.bfloat16), fw2_ref[...],
                      preferred_element_type=jnp.float32) + fb2_ref[...]  # (Bblk,128)
        out_ref[...] = out[None]                               # (1, Bblk, 128)

    return kernel


def _rep_spec(a):
    """Replicated (grid-invariant) operand: constant index_map, single buffer."""
    zeros = (0,) * a.ndim
    try:
        return pl.BlockSpec(a.shape, lambda b: zeros,
                            pipeline_mode=pl.Buffered(1))
    except (TypeError, AttributeError):     # older API without pipeline_mode
        return pl.BlockSpec(a.shape, lambda b: zeros)


# ----------------------------------------------------------------------------
# Wrapper: embedding gather + block-diagonal adjacency in JAX, one pallas_call.
# ----------------------------------------------------------------------------
def cnn_forward(params, compound, adj, smi_ids, prot_ids, block_b=2):
    B, N, Fin = compound.shape
    Lp = prot_ids.shape[1]
    Ls = smi_ids.shape[1]
    assert B % block_b == 0, "batch must be a multiple of the batch block"
    assert Lp % 8 == 0 and Ls % 8 == 0 and N % 8 == 0
    n_steps = B // block_b                  # keep >= 2 so v7x uses both TCs
    BN = block_b * N

    # Embedding gathers (padding_idx=0 row is zero); pass bf16 to halve HBM
    # traffic.  Layer-1 im2col now happens inside the kernel (no 4x inflation).
    pro_embed = params["pro_emb"][prot_ids].reshape(B * Lp, 64).astype(jnp.bfloat16)
    smi_embed = params["smi_emb"][smi_ids].reshape(B * Ls, 64).astype(jnp.bfloat16)
    compound_f = compound.reshape(B * N, Fin).astype(jnp.bfloat16)

    # Block-diagonal adjacency per grid step so the block_b graphs share one
    # attention matmul in-kernel (off-diagonal blocks masked).  bf16 keeps the
    # per-step bytes the same as the original f32 per-graph adjacency.
    adj4 = adj.reshape(n_steps, block_b, N, N)
    eye = jnp.eye(block_b, dtype=adj.dtype)
    adj_bd = (adj4[:, :, :, None, :] * eye[None, :, None, :, None]) \
        .reshape(n_steps, BN, BN).astype(jnp.bfloat16)

    kernel = make_fused_kernel(block_b, N, Lp, Ls)

    weights = (params["gat_w"], params["gat_asrc"], params["gat_adst"],
               params["pro_w1"], params["pro_b1"], params["pro_w2"], params["pro_b2"],
               params["pro_w3"], params["pro_b3"],
               params["smi_w1"], params["smi_b1"], params["smi_w2"], params["smi_b2"],
               params["smi_w3"], params["smi_b3"],
               params["fw1"], params["fb1"], params["fw2"], params["fb2"])

    in_specs = [
        pl.BlockSpec((BN, Fin), lambda b: (b, 0)),
        pl.BlockSpec((1, BN, BN), lambda b: (b, 0, 0)),
        pl.BlockSpec((block_b * Lp, 64), lambda b: (b, 0)),
        pl.BlockSpec((block_b * Ls, 64), lambda b: (b, 0)),
    ] + [_rep_spec(a) for a in weights]

    # NOTE: for real protein lengths / larger block_b, add
    # vmem_limit_bytes=... to CompilerParams (review: block_b ~8 on v5e/v6e,
    # 2-4 on v7x against their 128 / 64 MiB VMEM).
    out = pl.pallas_call(
        kernel,
        out_shape=jax.ShapeDtypeStruct((n_steps, block_b, 128), jnp.float32),
        grid=(n_steps,),
        in_specs=in_specs,
        out_specs=pl.BlockSpec((1, block_b, 128), lambda b: (b, 0, 0)),
        scratch_shapes=[pltpu.VMEM((block_b, CAT_W), jnp.float32)],
        compiler_params=pltpu.CompilerParams(
            dimension_semantics=("parallel",)),
    )(compound_f, adj_bd, pro_embed, smi_embed, *weights)
    return out.reshape(B, 128)[:, :2]                          # (B, 2) real logits


# ----------------------------------------------------------------------------
# Deterministic parameters; eval-mode BN folded; channels zero-padded to lanes.
# ----------------------------------------------------------------------------
def make_params(key, atom_feat, gat_hid, smi_vocab, pro_vocab):
    ks = jax.random.split(key, 24)
    s = 0.05

    def nrm(k, shape):
        return jax.random.normal(k, shape, jnp.float32) * s

    C1, C2, C3 = 40, 80, 160

    p = {}
    # embeddings (padding_idx=0 -> zero row)
    p["smi_emb"] = nrm(ks[0], (smi_vocab, 64)).at[0].set(0.0)
    p["pro_emb"] = nrm(ks[1], (pro_vocab, 64)).at[0].set(0.0)

    def conv_params(kw, kb, K, cin, cout, cin_pad, cout_pad, with_bn):
        w = nrm(kw, (K, cin, cout))
        b = nrm(kb, (cout,))
        if with_bn:
            # General eval-mode BN fold: w' = w*gamma/sqrt(var+eps),
            # b' = (b-mean)*gamma/sqrt(var+eps) + beta (fresh running stats here).
            gamma = jnp.ones((cout,))
            beta = jnp.zeros((cout,))
            mean = jnp.zeros((cout,))
            var = jnp.ones((cout,))
            scale = gamma / jnp.sqrt(var + 1e-5)
            w = w * scale[None, None, :]
            b = (b - mean) * scale + beta
        wp = jnp.zeros((K, cin_pad, cout_pad), jnp.float32).at[:, :cin, :cout].set(w)
        wp = wp.reshape(K * cin_pad, cout_pad).astype(jnp.bfloat16)
        bp = jnp.zeros((1, cout_pad), jnp.float32).at[0, :cout].set(b)
        return wp, bp

    # protein CNN: k = 4, 8, 12 ; channels 64 -> 40 -> 80 -> 160
    p["pro_w1"], p["pro_b1"] = conv_params(ks[2], ks[3], 4, 64, C1, 64, PAD_C1, True)
    p["pro_w2"], p["pro_b2"] = conv_params(ks[4], ks[5], 8, C1, C2, PAD_C1, PAD_C2, True)
    p["pro_w3"], p["pro_b3"] = conv_params(ks[6], ks[7], 12, C2, C3, PAD_C2, PAD_C3, False)
    # SMILES CNN: k = 4, 6, 8
    p["smi_w1"], p["smi_b1"] = conv_params(ks[8], ks[9], 4, 64, C1, 64, PAD_C1, True)
    p["smi_w2"], p["smi_b2"] = conv_params(ks[10], ks[11], 6, C1, C2, PAD_C1, PAD_C2, True)
    p["smi_w3"], p["smi_b3"] = conv_params(ks[12], ks[13], 8, C2, C3, PAD_C2, PAD_C3, False)

    # GAT (hidden padded 64 -> 128)
    gw = nrm(ks[14], (atom_feat, gat_hid))
    p["gat_w"] = jnp.zeros((atom_feat, PAD_GAT), jnp.float32) \
        .at[:, :gat_hid].set(gw).astype(jnp.bfloat16)
    p["gat_asrc"] = jnp.zeros((1, PAD_GAT), jnp.float32).at[0, :gat_hid].set(
        nrm(ks[15], (gat_hid,)))
    p["gat_adst"] = jnp.zeros((1, PAD_GAT), jnp.float32).at[0, :gat_hid].set(
        nrm(ks[16], (gat_hid,)))

    # output MLP: Linear(384,512) laid out on the padded concat
    # [pro 160->256 | smi 160->256 | gat 64->128] = 640 rows.
    w1p = nrm(ks[17], (C3, 512))
    w1s = nrm(ks[18], (C3, 512))
    w1g = nrm(ks[19], (gat_hid, 512))
    fw1 = jnp.zeros((CAT_W, 512), jnp.float32)
    fw1 = fw1.at[0:C3].set(w1p)
    fw1 = fw1.at[PAD_C3:PAD_C3 + C3].set(w1s)
    fw1 = fw1.at[2 * PAD_C3:2 * PAD_C3 + gat_hid].set(w1g)
    p["fw1"] = fw1.astype(jnp.bfloat16)
    p["fb1"] = nrm(ks[20], (1, 512))
    w2 = nrm(ks[21], (512, 2))
    p["fw2"] = jnp.zeros((512, PAD_OUT), jnp.float32).at[:, :2].set(w2).astype(jnp.bfloat16)
    p["fb2"] = jnp.zeros((1, PAD_OUT), jnp.float32).at[0, :2].set(nrm(ks[22], (2,)))
    return p


if __name__ == "__main__":
    key = jax.random.PRNGKey(0)
    B = 4                 # batch (multiple of BLOCK_B; grid length B//BLOCK_B >= 2)
    BLOCK_B = 2           # batch elements per grid step (batch-blocked grid)
    MAX_DRUG_LEN = 64     # small stand-in for hp.MAX_DRUG_LEN
    MAX_PROT_LEN = 128    # small stand-in for hp.MAX_PROTEIN_LEN
    SMI_VOCAB = 64        # hp.smi_emb
    PRO_VOCAB = 32        # hp.pro_emb
    N_ATOM = 16
    ATOM_FEAT = 32
    GAT_HID = 64          # 160 + 160 + 64 = 384 matches nn.Linear(384, 512)

    k_par, k_smi, k_pro, k_cmp, k_adj = jax.random.split(key, 5)
    params = make_params(k_par, ATOM_FEAT, GAT_HID, SMI_VOCAB, PRO_VOCAB)

    smi_ids = jax.random.randint(k_smi, (B, MAX_DRUG_LEN), 0, SMI_VOCAB, jnp.int32)
    prot_ids = jax.random.randint(k_pro, (B, MAX_PROT_LEN), 0, PRO_VOCAB, jnp.int32)
    compound = jax.random.normal(k_cmp, (B, N_ATOM, ATOM_FEAT), jnp.float32)
    adj_rnd = (jax.random.uniform(k_adj, (B, N_ATOM, N_ATOM)) > 0.7).astype(jnp.float32)
    adj = jnp.maximum(adj_rnd, jnp.transpose(adj_rnd, (0, 2, 1)))
    adj = jnp.maximum(adj, jnp.eye(N_ATOM, dtype=jnp.float32)[None])  # self loops

    fwd = jax.jit(cnn_forward, static_argnames=("block_b",))
    out = fwd(params, compound, adj, smi_ids, prot_ids, block_b=BLOCK_B)
    out = jax.block_until_ready(out)
    assert out.shape == (B, 2) and out.dtype == jnp.float32
    print("KERNEL_OK")
</pallas_src>

<mosaic_0001>
module attributes {stable_mosaic.version = 11 : i64} {
  func.func @kernel(%arg0: i32, %arg1: memref<32x32xbf16, #tpu.memory_space<vmem>>, %arg2: memref<1x32x32xbf16, #tpu.memory_space<vmem>>, %arg3: memref<256x64xbf16, #tpu.memory_space<vmem>>, %arg4: memref<128x64xbf16, #tpu.memory_space<vmem>>, %arg5: memref<32x128xbf16, #tpu.memory_space<vmem>>, %arg6: memref<1x128xf32, #tpu.memory_space<vmem>>, %arg7: memref<1x128xf32, #tpu.memory_space<vmem>>, %arg8: memref<256x128xbf16, #tpu.memory_space<vmem>>, %arg9: memref<1x128xf32, #tpu.memory_space<vmem>>, %arg10: memref<1024x128xbf16, #tpu.memory_space<vmem>>, %arg11: memref<1x128xf32, #tpu.memory_space<vmem>>, %arg12: memref<1536x256xbf16, #tpu.memory_space<vmem>>, %arg13: memref<1x256xf32, #tpu.memory_space<vmem>>, %arg14: memref<256x128xbf16, #tpu.memory_space<vmem>>, %arg15: memref<1x128xf32, #tpu.memory_space<vmem>>, %arg16: memref<768x128xbf16, #tpu.memory_space<vmem>>, %arg17: memref<1x128xf32, #tpu.memory_space<vmem>>, %arg18: memref<1024x256xbf16, #tpu.memory_space<vmem>>, %arg19: memref<1x256xf32, #tpu.memory_space<vmem>>, %arg20: memref<640x512xbf16, #tpu.memory_space<vmem>>, %arg21: memref<1x512xf32, #tpu.memory_space<vmem>>, %arg22: memref<512x128xbf16, #tpu.memory_space<vmem>>, %arg23: memref<1x128xf32, #tpu.memory_space<vmem>>, %arg24: memref<1x2x128xf32, #tpu.memory_space<vmem>>, %arg25: memref<2x640xf32, #tpu.memory_space<vmem>>) attributes {dimension_semantics = [#tpu.dimension_semantics<parallel>], iteration_bounds = array<i64: 2>, scalar_prefetch = 0 : i64, scratch_operands = 1 : i64, tpu.core_type = #tpu.core_type<tc>, window_params = [{transform_indices = @transform_0, window_bounds = array<i64: 32, 32>}, {transform_indices = @transform_1, window_bounds = array<i64: 1, 32, 32>}, {transform_indices = @transform_2, window_bounds = array<i64: 256, 64>}, {transform_indices = @transform_3, window_bounds = array<i64: 128, 64>}, {pipeline_mode = #tpu.pipeline_mode<synchronous>, transform_indices = @transform_4, window_bounds = array<i64: 32, 128>}, {pipeline_mode = #tpu.pipeline_mode<synchronous>, transform_indices = @transform_5, window_bounds = array<i64: 1, 128>}, {pipeline_mode = #tpu.pipeline_mode<synchronous>, transform_indices = @transform_6, window_bounds = array<i64: 1, 128>}, {pipeline_mode = #tpu.pipeline_mode<synchronous>, transform_indices = @transform_7, window_bounds = array<i64: 256, 128>}, {pipeline_mode = #tpu.pipeline_mode<synchronous>, transform_indices = @transform_8, window_bounds = array<i64: 1, 128>}, {pipeline_mode = #tpu.pipeline_mode<synchronous>, transform_indices = @transform_9, window_bounds = array<i64: 1024, 128>}, {pipeline_mode = #tpu.pipeline_mode<synchronous>, transform_indices = @transform_10, window_bounds = array<i64: 1, 128>}, {pipeline_mode = #tpu.pipeline_mode<synchronous>, transform_indices = @transform_11, window_bounds = array<i64: 1536, 256>}, {pipeline_mode = #tpu.pipeline_mode<synchronous>, transform_indices = @transform_12, window_bounds = array<i64: 1, 256>}, {pipeline_mode = #tpu.pipeline_mode<synchronous>, transform_indices = @transform_13, window_bounds = array<i64: 256, 128>}, {pipeline_mode = #tpu.pipeline_mode<synchronous>, transform_indices = @transform_14, window_bounds = array<i64: 1, 128>}, {pipeline_mode = #tpu.pipeline_mode<synchronous>, transform_indices = @transform_15, window_bounds = array<i64: 768, 128>}, {pipeline_mode = #tpu.pipeline_mode<synchronous>, transform_indices = @transform_16, window_bounds = array<i64: 1, 128>}, {pipeline_mode = #tpu.pipeline_mode<synchronous>, transform_indices = @transform_17, window_bounds = array<i64: 1024, 256>}, {pipeline_mode = #tpu.pipeline_mode<synchronous>, transform_indices = @transform_18, window_bounds = array<i64: 1, 256>}, {pipeline_mode = #tpu.pipeline_mode<synchronous>, transform_indices = @transform_19, window_bounds = array<i64: 640, 512>}, {pipeline_mode = #tpu.pipeline_mode<synchronous>, transform_indices = @transform_20, window_bounds = array<i64: 1, 512>}, {pipeline_mode = #tpu.pipeline_mode<synchronous>, transform_indices = @transform_21, window_bounds = array<i64: 512, 128>}, {pipeline_mode = #tpu.pipeline_mode<synchronous>, transform_indices = @transform_22, window_bounds = array<i64: 1, 128>}, {transform_indices = @transform_23, window_bounds = array<i64: 1, 2, 128>}]} {
    %c0 = arith.constant 0 : index
    %c0_0 = arith.constant 0 : index
    %0 = vector.load %arg1[%c0, %c0_0] : memref<32x32xbf16, #tpu.memory_space<vmem>>, vector<32x32xbf16>
    %c0_1 = arith.constant 0 : index
    %c0_2 = arith.constant 0 : index
    %1 = vector.load %arg5[%c0_1, %c0_2] : memref<32x128xbf16, #tpu.memory_space<vmem>>, vector<32x128xbf16>
    %cst = arith.constant dense<0.000000e+00> : vector<32x128xf32>
    %2 = tpu.matmul %0, %1, %cst {dimension_numbers = #tpu.dot_dimension_numbers<[1], [0], [0], [1], [0, 0, 1, 1], [], []>} : vector<32x32xbf16>, vector<32x128xbf16>, vector<32x128xf32> -> vector<32x128xf32>
    %c0_3 = arith.constant 0 : index
    %c0_4 = arith.constant 0 : index
    %3 = vector.load %arg6[%c0_3, %c0_4] : memref<1x128xf32, #tpu.memory_space<vmem>>, vector<1x128xf32>
    %4 = vector.broadcast %3 : vector<1x128xf32> to vector<32x128xf32>
    %5 = arith.mulf %2, %4 : vector<32x128xf32>
    %cst_5 = arith.constant dense<0.000000e+00> : vector<32xf32>
    %6 = vector.multi_reduction <add>, %5, %cst_5 [1] : vector<32x128xf32> to vector<32xf32>
    %7 = vector.shape_cast %6 : vector<32xf32> to vector<32x1xf32>
    %c0_6 = arith.constant 0 : index
    %c0_7 = arith.constant 0 : index
    %8 = vector.load %arg7[%c0_6, %c0_7] : memref<1x128xf32, #tpu.memory_space<vmem>>, vector<1x128xf32>
    %9 = vector.broadcast %8 : vector<1x128xf32> to vector<32x128xf32>
    %10 = arith.mulf %2, %9 : vector<32x128xf32>
    %cst_8 = arith.constant dense<0.000000e+00> : vector<32xf32>
    %11 = vector.multi_reduction <add>, %10, %cst_8 [1] : vector<32x128xf32> to vector<32xf32>
    %12 = vector.shape_cast %11 : vector<32xf32> to vector<32x1xf32>
    %13 = tpu.transpose %12, [1, 0] : vector<32x1xf32> -> vector<1x32xf32>
    %14 = vector.broadcast %7 : vector<32x1xf32> to vector<32x32xf32>
    %15 = vector.broadcast %13 : vector<1x32xf32> to vector<32x32xf32>
    %16 = arith.addf %14, %15 : vector<32x32xf32>
    %cst_9 = arith.constant 0.000000e+00 : f32
    %17 = vector.broadcast %cst_9 : f32 to vector<32x32xf32>
    %18 = arith.cmpf ogt, %16, %17 : vector<32x32xf32>
    %cst_10 = arith.constant 2.000000e-01 : f32
    %19 = vector.broadcast %cst_10 : f32 to vector<32x32xf32>
    %20 = arith.mulf %19, %16 : vector<32x32xf32>
    %21 = arith.select %18, %16, %20 : vector<32x32xi1>, vector<32x32xf32>
    %c0_11 = arith.constant 0 : index
    %c0_12 = arith.constant 0 : index
    %c0_13 = arith.constant 0 : index
    %22 = vector.load %arg2[%c0_11, %c0_12, %c0_13] : memref<1x32x32xbf16, #tpu.memory_space<vmem>>, vector<1x32x32xbf16>
    %23 = vector.shape_cast %22 : vector<1x32x32xbf16> to vector<32x32xbf16>
    %24 = arith.extf %23 : vector<32x32xbf16> to vector<32x32xf32>
    %cst_14 = arith.constant 0.000000e+00 : f32
    %25 = vector.broadcast %cst_14 : f32 to vector<32x32xf32>
    %26 = arith.cmpf ogt, %24, %25 : vector<32x32xf32>
    %cst_15 = arith.constant -1.000000e+09 : f32
    %27 = vector.broadcast %cst_15 : f32 to vector<32x32xf32>
    %28 = arith.select %26, %21, %27 : vector<32x32xi1>, vector<32x32xf32>
    %cst_16 = arith.constant dense<0xFF800000> : vector<32xf32>
    %29 = vector.multi_reduction <maximumf>, %28, %cst_16 [1] : vector<32x32xf32> to vector<32xf32>
    %30 = vector.shape_cast %29 : vector<32xf32> to vector<32x1xf32>
    %31 = vector.broadcast %30 : vector<32x1xf32> to vector<32x32xf32>
    %32 = arith.subf %28, %31 : vector<32x32xf32>
    %33 = math.exp %32 : vector<32x32xf32>
    %cst_17 = arith.constant dense<0.000000e+00> : vector<32xf32>
    %34 = vector.multi_reduction <add>, %33, %cst_17 [1] : vector<32x32xf32> to vector<32xf32>
    %35 = vector.shape_cast %34 : vector<32xf32> to vector<32x1xf32>
    %36 = vector.broadcast %35 : vector<32x1xf32> to vector<32x32xf32>
    %37 = arith.divf %33, %36 : vector<32x32xf32>
    %38 = arith.truncf %37 : vector<32x32xf32> to vector<32x32xbf16>
    %39 = arith.truncf %2 : vector<32x128xf32> to vector<32x128xbf16>
    %cst_18 = arith.constant dense<0.000000e+00> : vector<32x128xf32>
    %40 = tpu.matmul %38, %39, %cst_18 {dimension_numbers = #tpu.dot_dimension_numbers<[1], [0], [0], [1], [0, 0, 1, 1], [], []>} : vector<32x32xbf16>, vector<32x128xbf16>, vector<32x128xf32> -> vector<32x128xf32>
    %cst_19 = arith.constant 0.000000e+00 : f32
    %41 = vector.broadcast %cst_19 : f32 to vector<32x128xf32>
    %42 = arith.cmpf ogt, %40, %41 : vector<32x128xf32>
    %cst_20 = arith.constant 0.000000e+00 : f32
    %43 = vector.broadcast %cst_20 : f32 to vector<32x128xf32>
    %44 = arith.minimumf %40, %43 : vector<32x128xf32>
    %45 = math.exp %44 : vector<32x128xf32>
    %cst_21 = arith.constant 1.000000e+00 : f32
    %46 = vector.broadcast %cst_21 : f32 to vector<32x128xf32>
    %47 = arith.subf %45, %46 : vector<32x128xf32>
    %48 = arith.select %42, %40, %47 : vector<32x128xi1>, vector<32x128xf32>
    %49 = vector.extract_strided_slice %48 {offsets = [0, 0], sizes = [16, 128], strides = [1, 1]} : vector<32x128xf32> to vector<16x128xf32>
    %cst_22 = arith.constant dense<0xFF800000> : vector<128xf32>
    %50 = vector.multi_reduction <maximumf>, %49, %cst_22 [0] : vector<16x128xf32> to vector<128xf32>
    %51 = vector.shape_cast %50 : vector<128xf32> to vector<1x128xf32>
    %c0_23 = arith.constant 0 : index
    %c512 = arith.constant 512 : index
    %52 = vector.load %arg25[%c0_23, %c512] : memref<2x640xf32, #tpu.memory_space<vmem>>, vector<1x128xf32>
    tpu.vector_store %arg25[%c0_23, %c512], %51 {strides = array<i32>} : memref<2x640xf32, #tpu.memory_space<vmem>>, vector<1x128xf32>,
    %53 = vector.extract_strided_slice %48 {offsets = [16, 0], sizes = [16, 128], strides = [1, 1]} : vector<32x128xf32> to vector<16x128xf32>
    %cst_24 = arith.constant dense<0xFF800000> : vector<128xf32>
    %54 = vector.multi_reduction <maximumf>, %53, %cst_24 [0] : vector<16x128xf32> to vector<128xf32>
    %55 = vector.shape_cast %54 : vector<128xf32> to vector<1x128xf32>
    %c1 = arith.constant 1 : index
    %c512_25 = arith.constant 512 : index
    %56 = vector.load %arg25[%c1, %c512_25] : memref<2x640xf32, #tpu.memory_space<vmem>>, vector<1x128xf32>
    tpu.vector_store %arg25[%c1, %c512_25], %55 {strides = array<i32>} : memref<2x640xf32, #tpu.memory_space<vmem>>, vector<1x128xf32>,
    %c0_26 = arith.constant 0 : index
    %c0_27 = arith.constant 0 : index
    %57 = vector.load %arg3[%c0_26, %c0_27] : memref<256x64xbf16, #tpu.memory_space<vmem>>, vector<256x64xbf16>
    %c0_28 = arith.constant 0 : index
    %c0_29 = arith.constant 0 : index
    %58 = vector.load %arg8[%c0_28, %c0_29] : memref<256x128xbf16, #tpu.memory_space<vmem>>, vector<256x128xbf16>
    %c0_30 = arith.constant 0 : index
    %c0_31 = arith.constant 0 : index
    %59 = vector.load %arg9[%c0_30, %c0_31] : memref<1x128xf32, #tpu.memory_space<vmem>>, vector<1x128xf32>
    %c0_32 = arith.constant 0 : index
    %c0_33 = arith.constant 0 : index
    %60 = vector.load %arg10[%c0_32, %c0_33] : memref<1024x128xbf16, #tpu.memory_space<vmem>>, vector<1024x128xbf16>
    %c0_34 = arith.constant 0 : index
    %c0_35 = arith.constant 0 : index
    %61 = vector.load %arg11[%c0_34, %c0_35] : memref<1x128xf32, #tpu.memory_space<vmem>>, vector<1x128xf32>
    %c0_36 = arith.constant 0 : index
    %c0_37 = arith.constant 0 : index
    %62 = vector.load %arg12[%c0_36, %c0_37] : memref<1536x256xbf16, #tpu.memory_space<vmem>>, vector<1536x256xbf16>
    %c0_38 = arith.constant 0 : index
    %c0_39 = arith.constant 0 : index
    %63 = vector.load %arg13[%c0_38, %c0_39] : memref<1x256xf32, #tpu.memory_space<vmem>>, vector<1x256xf32>
    %64 = arith.extf %57 : vector<256x64xbf16> to vector<256x64xf32>
    %65 = vector.extract_strided_slice %64 {offsets = [0, 0], sizes = [253, 64], strides = [1, 1]} : vector<256x64xf32> to vector<253x64xf32>
    %66 = arith.truncf %65 : vector<253x64xf32> to vector<253x64xbf16>
    %67 = vector.extract_strided_slice %58 {offsets = [0, 0], sizes = [64, 128], strides = [1, 1]} : vector<256x128xbf16> to vector<64x128xbf16>
    %cst_40 = arith.constant dense<0.000000e+00> : vector<253x128xf32>
    %68 = tpu.matmul %66, %67, %cst_40 {dimension_numbers = #tpu.dot_dimension_numbers<[1], [0], [0], [1], [0, 0, 1, 1], [], []>} : vector<253x64xbf16>, vector<64x128xbf16>, vector<253x128xf32> -> vector<253x128xf32>
    %69 = vector.extract_strided_slice %64 {offsets = [1, 0], sizes = [253, 64], strides = [1, 1]} : vector<256x64xf32> to vector<253x64xf32>
    %70 = arith.truncf %69 : vector<253x64xf32> to vector<253x64xbf16>
    %71 = vector.extract_strided_slice %58 {offsets = [64, 0], sizes = [64, 128], strides = [1, 1]} : vector<256x128xbf16> to vector<64x128xbf16>
    %cst_41 = arith.constant dense<0.000000e+00> : vector<253x128xf32>
    %72 = tpu.matmul %70, %71, %cst_41 {dimension_numbers = #tpu.dot_dimension_numbers<[1], [0], [0], [1], [0, 0, 1, 1], [], []>} : vector<253x64xbf16>, vector<64x128xbf16>, vector<253x128xf32> -> vector<253x128xf32>
    %73 = arith.addf %68, %72 : vector<253x128xf32>
    %74 = vector.extract_strided_slice %64 {offsets = [2, 0], sizes = [253, 64], strides = [1, 1]} : vector<256x64xf32> to vector<253x64xf32>
    %75 = arith.truncf %74 : vector<253x64xf32> to vector<253x64xbf16>
    %76 = vector.extract_strided_slice %58 {offsets = [128, 0], sizes = [64, 128], strides = [1, 1]} : vector<256x128xbf16> to vector<64x128xbf16>
    %cst_42 = arith.constant dense<0.000000e+00> : vector<253x128xf32>
    %77 = tpu.matmul %75, %76, %cst_42 {dimension_numbers = #tpu.dot_dimension_numbers<[1], [0], [0], [1], [0, 0, 1, 1], [], []>} : vector<253x64xbf16>, vector<64x128xbf16>, vector<253x128xf32> -> vector<253x128xf32>
    %78 = arith.addf %73, %77 : vector<253x128xf32>
    %79 = vector.extract_strided_slice %64 {offsets = [3, 0], sizes = [253, 64], strides = [1, 1]} : vector<256x64xf32> to vector<253x64xf32>
    %80 = arith.truncf %79 : vector<253x64xf32> to vector<253x64xbf16>
    %81 = vector.extract_strided_slice %58 {offsets = [192, 0], sizes = [64, 128], strides = [1, 1]} : vector<256x128xbf16> to vector<64x128xbf16>
    %cst_43 = arith.constant dense<0.000000e+00> : vector<253x128xf32>
    %82 = tpu.matmul %80, %81, %cst_43 {dimension_numbers = #tpu.dot_dimension_numbers<[1], [0], [0], [1], [0, 0, 1, 1], [], []>} : vector<253x64xbf16>, vector<64x128xbf16>, vector<253x128xf32> -> vector<253x128xf32>
    %83 = arith.addf %78, %82 : vector<253x128xf32>
    %84 = vector.broadcast %59 : vector<1x128xf32> to vector<253x128xf32>
    %85 = arith.addf %83, %84 : vector<253x128xf32>
    %cst_44 = arith.constant 0.000000e+00 : f32
    %86 = vector.broadcast %cst_44 : f32 to vector<253x128xf32>
    %87 = arith.maximumf %85, %86 : vector<253x128xf32>
    %88 = vector.extract_strided_slice %87 {offsets = [0, 0], sizes = [246, 128], strides = [1, 1]} : vector<253x128xf32> to vector<246x128xf32>
    %89 = arith.truncf %88 : vector<246x128xf32> to vector<246x128xbf16>
    %90 = vector.extract_strided_slice %87 {offsets = [1, 0], sizes = [246, 128], strides = [1, 1]} : vector<253x128xf32> to vector<246x128xf32>
    %91 = arith.truncf %90 : vector<246x128xf32> to vector<246x128xbf16>
    %92 = vector.extract_strided_slice %87 {offsets = [2, 0], sizes = [246, 128], strides = [1, 1]} : vector<253x128xf32> to vector<246x128xf32>
    %93 = arith.truncf %92 : vector<246x128xf32> to vector<246x128xbf16>
    %94 = vector.extract_strided_slice %87 {offsets = [3, 0], sizes = [246, 128], strides = [1, 1]} : vector<253x128xf32> to vector<246x128xf32>
    %95 = arith.truncf %94 : vector<246x128xf32> to vector<246x128xbf16>
    %96 = vector.extract_strided_slice %87 {offsets = [4, 0], sizes = [246, 128], strides = [1, 1]} : vector<253x128xf32> to vector<246x128xf32>
    %97 = arith.truncf %96 : vector<246x128xf32> to vector<246x128xbf16>
    %98 = vector.extract_strided_slice %87 {offsets = [5, 0], sizes = [246, 128], strides = [1, 1]} : vector<253x128xf32> to vector<246x128xf32>
    %99 = arith.truncf %98 : vector<246x128xf32> to vector<246x128xbf16>
    %100 = vector.extract_strided_slice %87 {offsets = [6, 0], sizes = [246, 128], strides = [1, 1]} : vector<253x128xf32> to vector<246x128xf32>
    %101 = arith.truncf %100 : vector<246x128xf32> to vector<246x128xbf16>
    %102 = vector.extract_strided_slice %87 {offsets = [7, 0], sizes = [246, 128], strides = [1, 1]} : vector<253x128xf32> to vector<246x128xf32>
    %103 = arith.truncf %102 : vector<246x128xf32> to vector<246x128xbf16>
    %104 = tpu.concatenate %89, %91, %93, %95, %97, %99, %101, %103 in 1 : vector<246x128xbf16>, vector<246x128xbf16>, vector<246x128xbf16>, vector<246x128xbf16>, vector<246x128xbf16>, vector<246x128xbf16>, vector<246x128xbf16>, vector<246x128xbf16> -> vector<246x1024xbf16>
    %cst_45 = arith.constant dense<0.000000e+00> : vector<246x128xf32>
    %105 = tpu.matmul %104, %60, %cst_45 {dimension_numbers = #tpu.dot_dimension_numbers<[1], [0], [0], [1], [0, 0, 1, 1], [], []>} : vector<246x1024xbf16>, vector<1024x128xbf16>, vector<246x128xf32> -> vector<246x128xf32>
    %106 = vector.broadcast %61 : vector<1x128xf32> to vector<246x128xf32>
    %107 = arith.addf %105, %106 : vector<246x128xf32>
    %cst_46 = arith.constant 0.000000e+00 : f32
    %108 = vector.broadcast %cst_46 : f32 to vector<246x128xf32>
    %109 = arith.maximumf %107, %108 : vector<246x128xf32>
    %110 = vector.extract_strided_slice %109 {offsets = [0, 0], sizes = [235, 128], strides = [1, 1]} : vector<246x128xf32> to vector<235x128xf32>
    %111 = arith.truncf %110 : vector<235x128xf32> to vector<235x128xbf16>
    %112 = vector.extract_strided_slice %109 {offsets = [1, 0], sizes = [235, 128], strides = [1, 1]} : vector<246x128xf32> to vector<235x128xf32>
    %113 = arith.truncf %112 : vector<235x128xf32> to vector<235x128xbf16>
    %114 = vector.extract_strided_slice %109 {offsets = [2, 0], sizes = [235, 128], strides = [1, 1]} : vector<246x128xf32> to vector<235x128xf32>
    %115 = arith.truncf %114 : vector<235x128xf32> to vector<235x128xbf16>
    %116 = vector.extract_strided_slice %109 {offsets = [3, 0], sizes = [235, 128], strides = [1, 1]} : vector<246x128xf32> to vector<235x128xf32>
    %117 = arith.truncf %116 : vector<235x128xf32> to vector<235x128xbf16>
    %118 = vector.extract_strided_slice %109 {offsets = [4, 0], sizes = [235, 128], strides = [1, 1]} : vector<246x128xf32> to vector<235x128xf32>
    %119 = arith.truncf %118 : vector<235x128xf32> to vector<235x128xbf16>
    %120 = vector.extract_strided_slice %109 {offsets = [5, 0], sizes = [235, 128], strides = [1, 1]} : vector<246x128xf32> to vector<235x128xf32>
    %121 = arith.truncf %120 : vector<235x128xf32> to vector<235x128xbf16>
    %122 = vector.extract_strided_slice %109 {offsets = [6, 0], sizes = [235, 128], strides = [1, 1]} : vector<246x128xf32> to vector<235x128xf32>
    %123 = arith.truncf %122 : vector<235x128xf32> to vector<235x128xbf16>
    %124 = vector.extract_strided_slice %109 {offsets = [7, 0], sizes = [235, 128], strides = [1, 1]} : vector<246x128xf32> to vector<235x128xf32>
    %125 = arith.truncf %124 : vector<235x128xf32> to vector<235x128xbf16>
    %126 = vector.extract_strided_slice %109 {offsets = [8, 0], sizes = [235, 128], strides = [1, 1]} : vector<246x128xf32> to vector<235x128xf32>
    %127 = arith.truncf %126 : vector<235x128xf32> to vector<235x128xbf16>
    %128 = vector.extract_strided_slice %109 {offsets = [9, 0], sizes = [235, 128], strides = [1, 1]} : vector<246x128xf32> to vector<235x128xf32>
    %129 = arith.truncf %128 : vector<235x128xf32> to vector<235x128xbf16>
    %130 = vector.extract_strided_slice %109 {offsets = [10, 0], sizes = [235, 128], strides = [1, 1]} : vector<246x128xf32> to vector<235x128xf32>
    %131 = arith.truncf %130 : vector<235x128xf32> to vector<235x128xbf16>
    %132 = vector.extract_strided_slice %109 {offsets = [11, 0], sizes = [235, 128], strides = [1, 1]} : vector<246x128xf32> to vector<235x128xf32>
    %133 = arith.truncf %132 : vector<235x128xf32> to vector<235x128xbf16>
    %134 = tpu.concatenate %111, %113, %115, %117, %119, %121, %123, %125, %127, %129, %131, %133 in 1 : vector<235x128xbf16>, vector<235x128xbf16>, vector<235x128xbf16>, vector<235x128xbf16>, vector<235x128xbf16>, vector<235x128xbf16>, vector<235x128xbf16>, vector<235x128xbf16>, vector<235x128xbf16>, vector<235x128xbf16>, vector<235x128xbf16>, vector<235x128xbf16> -> vector<235x1536xbf16>
    %cst_47 = arith.constant dense<0.000000e+00> : vector<235x256xf32>
    %135 = tpu.matmul %134, %62, %cst_47 {dimension_numbers = #tpu.dot_dimension_numbers<[1], [0], [0], [1], [0, 0, 1, 1], [], []>} : vector<235x1536xbf16>, vector<1536x256xbf16>, vector<235x256xf32> -> vector<235x256xf32>
    %136 = vector.broadcast %63 : vector<1x256xf32> to vector<235x256xf32>
    %137 = arith.addf %135, %136 : vector<235x256xf32>
    %138 = vector.extract_strided_slice %137 {offsets = [0, 0], sizes = [107, 256], strides = [1, 1]} : vector<235x256xf32> to vector<107x256xf32>
    %cst_48 = arith.constant dense<0xFF800000> : vector<256xf32>
    %139 = vector.multi_reduction <maximumf>, %138, %cst_48 [0] : vector<107x256xf32> to vector<256xf32>
    %140 = vector.shape_cast %139 : vector<256xf32> to vector<1x256xf32>
    %c0_49 = arith.constant 0 : index
    %c0_50 = arith.constant 0 : index
    %141 = vector.load %arg25[%c0_49, %c0_50] : memref<2x640xf32, #tpu.memory_space<vmem>>, vector<1x256xf32>
    tpu.vector_store %arg25[%c0_49, %c0_50], %140 {strides = array<i32>} : memref<2x640xf32, #tpu.memory_space<vmem>>, vector<1x256xf32>,
    %142 = vector.extract_strided_slice %137 {offsets = [128, 0], sizes = [107, 256], strides = [1, 1]} : vector<235x256xf32> to vector<107x256xf32>
    %cst_51 = arith.constant dense<0xFF800000> : vector<256xf32>
    %143 = vector.multi_reduction <maximumf>, %142, %cst_51 [0] : vector<107x256xf32> to vector<256xf32>
    %144 = vector.shape_cast %143 : vector<256xf32> to vector<1x256xf32>
    %c1_52 = arith.constant 1 : index
    %c0_53 = arith.constant 0 : index
    %145 = vector.load %arg25[%c1_52, %c0_53] : memref<2x640xf32, #tpu.memory_space<vmem>>, vector<1x256xf32>
    tpu.vector_store %arg25[%c1_52, %c0_53], %144 {strides = array<i32>} : memref<2x640xf32, #tpu.memory_space<vmem>>, vector<1x256xf32>,
    %c0_54 = arith.constant 0 : index
    %c0_55 = arith.constant 0 : index
    %146 = vector.load %arg4[%c0_54, %c0_55] : memref<128x64xbf16, #tpu.memory_space<vmem>>, vector<128x64xbf16>
    %c0_56 = arith.constant 0 : index
    %c0_57 = arith.constant 0 : index
    %147 = vector.load %arg14[%c0_56, %c0_57] : memref<256x128xbf16, #tpu.memory_space<vmem>>, vector<256x128xbf16>
    %c0_58 = arith.constant 0 : index
    %c0_59 = arith.constant 0 : index
    %148 = vector.load %arg15[%c0_58, %c0_59] : memref<1x128xf32, #tpu.memory_space<vmem>>, vector<1x128xf32>
    %c0_60 = arith.constant 0 : index
    %c0_61 = arith.constant 0 : index
    %149 = vector.load %arg16[%c0_60, %c0_61] : memref<768x128xbf16, #tpu.memory_space<vmem>>, vector<768x128xbf16>
    %c0_62 = arith.constant 0 : index
    %c0_63 = arith.constant 0 : index
    %150 = vector.load %arg17[%c0_62, %c0_63] : memref<1x128xf32, #tpu.memory_space<vmem>>, vector<1x128xf32>
    %c0_64 = arith.constant 0 : index
    %c0_65 = arith.constant 0 : index
    %151 = vector.load %arg18[%c0_64, %c0_65] : memref<1024x256xbf16, #tpu.memory_space<vmem>>, vector<1024x256xbf16>
    %c0_66 = arith.constant 0 : index
    %c0_67 = arith.constant 0 : index
    %152 = vector.load %arg19[%c0_66, %c0_67] : memref<1x256xf32, #tpu.memory_space<vmem>>, vector<1x256xf32>
    %153 = arith.extf %146 : vector<128x64xbf16> to vector<128x64xf32>
    %154 = vector.extract_strided_slice %153 {offsets = [0, 0], sizes = [125, 64], strides = [1, 1]} : vector<128x64xf32> to vector<125x64xf32>
    %155 = arith.truncf %154 : vector<125x64xf32> to vector<125x64xbf16>
    %156 = vector.extract_strided_slice %147 {offsets = [0, 0], sizes = [64, 128], strides = [1, 1]} : vector<256x128xbf16> to vector<64x128xbf16>
    %cst_68 = arith.constant dense<0.000000e+00> : vector<125x128xf32>
    %157 = tpu.matmul %155, %156, %cst_68 {dimension_numbers = #tpu.dot_dimension_numbers<[1], [0], [0], [1], [0, 0, 1, 1], [], []>} : vector<125x64xbf16>, vector<64x128xbf16>, vector<125x128xf32> -> vector<125x128xf32>
    %158 = vector.extract_strided_slice %153 {offsets = [1, 0], sizes = [125, 64], strides = [1, 1]} : vector<128x64xf32> to vector<125x64xf32>
    %159 = arith.truncf %158 : vector<125x64xf32> to vector<125x64xbf16>
    %160 = vector.extract_strided_slice %147 {offsets = [64, 0], sizes = [64, 128], strides = [1, 1]} : vector<256x128xbf16> to vector<64x128xbf16>
    %cst_69 = arith.constant dense<0.000000e+00> : vector<125x128xf32>
    %161 = tpu.matmul %159, %160, %cst_69 {dimension_numbers = #tpu.dot_dimension_numbers<[1], [0], [0], [1], [0, 0, 1, 1], [], []>} : vector<125x64xbf16>, vector<64x128xbf16>, vector<125x128xf32> -> vector<125x128xf32>
    %162 = arith.addf %157, %161 : vector<125x128xf32>
    %163 = vector.extract_strided_slice %153 {offsets = [2, 0], sizes = [125, 64], strides = [1, 1]} : vector<128x64xf32> to vector<125x64xf32>
    %164 = arith.truncf %163 : vector<125x64xf32> to vector<125x64xbf16>
    %165 = vector.extract_strided_slice %147 {offsets = [128, 0], sizes = [64, 128], strides = [1, 1]} : vector<256x128xbf16> to vector<64x128xbf16>
    %cst_70 = arith.constant dense<0.000000e+00> : vector<125x128xf32>
    %166 = tpu.matmul %164, %165, %cst_70 {dimension_numbers = #tpu.dot_dimension_numbers<[1], [0], [0], [1], [0, 0, 1, 1], [], []>} : vector<125x64xbf16>, vector<64x128xbf16>, vector<125x128xf32> -> vector<125x128xf32>
    %167 = arith.addf %162, %166 : vector<125x128xf32>
    %168 = vector.extract_strided_slice %153 {offsets = [3, 0], sizes = [125, 64], strides = [1, 1]} : vector<128x64xf32> to vector<125x64xf32>
    %169 = arith.truncf %168 : vector<125x64xf32> to vector<125x64xbf16>
    %170 = vector.extract_strided_slice %147 {offsets = [192, 0], sizes = [64, 128], strides = [1, 1]} : vector<256x128xbf16> to vector<64x128xbf16>
    %cst_71 = arith.constant dense<0.000000e+00> : vector<125x128xf32>
    %171 = tpu.matmul %169, %170, %cst_71 {dimension_numbers = #tpu.dot_dimension_numbers<[1], [0], [0], [1], [0, 0, 1, 1], [], []>} : vector<125x64xbf16>, vector<64x128xbf16>, vector<125x128xf32> -> vector<125x128xf32>
    %172 = arith.addf %167, %171 : vector<125x128xf32>
    %173 = vector.broadcast %148 : vector<1x128xf32> to vector<125x128xf32>
    %174 = arith.addf %172, %173 : vector<125x128xf32>
    %cst_72 = arith.constant 0.000000e+00 : f32
    %175 = vector.broadcast %cst_72 : f32 to vector<125x128xf32>
    %176 = arith.maximumf %174, %175 : vector<125x128xf32>
    %177 = vector.extract_strided_slice %176 {offsets = [0, 0], sizes = [120, 128], strides = [1, 1]} : vector<125x128xf32> to vector<120x128xf32>
    %178 = arith.truncf %177 : vector<120x128xf32> to vector<120x128xbf16>
    %179 = vector.extract_strided_slice %176 {offsets = [1, 0], sizes = [120, 128], strides = [1, 1]} : vector<125x128xf32> to vector<120x128xf32>
    %180 = arith.truncf %179 : vector<120x128xf32> to vector<120x128xbf16>
    %181 = vector.extract_strided_slice %176 {offsets = [2, 0], sizes = [120, 128], strides = [1, 1]} : vector<125x128xf32> to vector<120x128xf32>
    %182 = arith.truncf %181 : vector<120x128xf32> to vector<120x128xbf16>
    %183 = vector.extract_strided_slice %176 {offsets = [3, 0], sizes = [120, 128], strides = [1, 1]} : vector<125x128xf32> to vector<120x128xf32>
    %184 = arith.truncf %183 : vector<120x128xf32> to vector<120x128xbf16>
    %185 = vector.extract_strided_slice %176 {offsets = [4, 0], sizes = [120, 128], strides = [1, 1]} : vector<125x128xf32> to vector<120x128xf32>
    %186 = arith.truncf %185 : vector<120x128xf32> to vector<120x128xbf16>
    %187 = vector.extract_strided_slice %176 {offsets = [5, 0], sizes = [120, 128], strides = [1, 1]} : vector<125x128xf32> to vector<120x128xf32>
    %188 = arith.truncf %187 : vector<120x128xf32> to vector<120x128xbf16>
    %189 = tpu.concatenate %178, %180, %182, %184, %186, %188 in 1 : vector<120x128xbf16>, vector<120x128xbf16>, vector<120x128xbf16>, vector<120x128xbf16>, vector<120x128xbf16>, vector<120x128xbf16> -> vector<120x768xbf16>
    %cst_73 = arith.constant dense<0.000000e+00> : vector<120x128xf32>
    %190 = tpu.matmul %189, %149, %cst_73 {dimension_numbers = #tpu.dot_dimension_numbers<[1], [0], [0], [1], [0, 0, 1, 1], [], []>} : vector<120x768xbf16>, vector<768x128xbf16>, vector<120x128xf32> -> vector<120x128xf32>
    %191 = vector.broadcast %150 : vector<1x128xf32> to vector<120x128xf32>
    %192 = arith.addf %190, %191 : vector<120x128xf32>
    %cst_74 = arith.constant 0.000000e+00 : f32
    %193 = vector.broadcast %cst_74 : f32 to vector<120x128xf32>
    %194 = arith.maximumf %192, %193 : vector<120x128xf32>
    %195 = vector.extract_strided_slice %194 {offsets = [0, 0], sizes = [113, 128], strides = [1, 1]} : vector<120x128xf32> to vector<113x128xf32>
    %196 = arith.truncf %195 : vector<113x128xf32> to vector<113x128xbf16>
    %197 = vector.extract_strided_slice %194 {offsets = [1, 0], sizes = [113, 128], strides = [1, 1]} : vector<120x128xf32> to vector<113x128xf32>
    %198 = arith.truncf %197 : vector<113x128xf32> to vector<113x128xbf16>
    %199 = vector.extract_strided_slice %194 {offsets = [2, 0], sizes = [113, 128], strides = [1, 1]} : vector<120x128xf32> to vector<113x128xf32>
    %200 = arith.truncf %199 : vector<113x128xf32> to vector<113x128xbf16>
    %201 = vector.extract_strided_slice %194 {offsets = [3, 0], sizes = [113, 128], strides = [1, 1]} : vector<120x128xf32> to vector<113x128xf32>
    %202 = arith.truncf %201 : vector<113x128xf32> to vector<113x128xbf16>
    %203 = vector.extract_strided_slice %194 {offsets = [4, 0], sizes = [113, 128], strides = [1, 1]} : vector<120x128xf32> to vector<113x128xf32>
    %204 = arith.truncf %203 : vector<113x128xf32> to vector<113x128xbf16>
    %205 = vector.extract_strided_slice %194 {offsets = [5, 0], sizes = [113, 128], strides = [1, 1]} : vector<120x128xf32> to vector<113x128xf32>
    %206 = arith.truncf %205 : vector<113x128xf32> to vector<113x128xbf16>
    %207 = vector.extract_strided_slice %194 {offsets = [6, 0], sizes = [113, 128], strides = [1, 1]} : vector<120x128xf32> to vector<113x128xf32>
    %208 = arith.truncf %207 : vector<113x128xf32> to vector<113x128xbf16>
    %209 = vector.extract_strided_slice %194 {offsets = [7, 0], sizes = [113, 128], strides = [1, 1]} : vector<120x128xf32> to vector<113x128xf32>
    %210 = arith.truncf %209 : vector<113x128xf32> to vector<113x128xbf16>
    %211 = tpu.concatenate %196, %198, %200, %202, %204, %206, %208, %210 in 1 : vector<113x128xbf16>, vector<113x128xbf16>, vector<113x128xbf16>, vector<113x128xbf16>, vector<113x128xbf16>, vector<113x128xbf16>, vector<113x128xbf16>, vector<113x128xbf16> -> vector<113x1024xbf16>
    %cst_75 = arith.constant dense<0.000000e+00> : vector<113x256xf32>
    %212 = tpu.matmul %211, %151, %cst_75 {dimension_numbers = #tpu.dot_dimension_numbers<[1], [0], [0], [1], [0, 0, 1, 1], [], []>} : vector<113x1024xbf16>, vector<1024x256xbf16>, vector<113x256xf32> -> vector<113x256xf32>
    %213 = vector.broadcast %152 : vector<1x256xf32> to vector<113x256xf32>
    %214 = arith.addf %212, %213 : vector<113x256xf32>
    %215 = vector.extract_strided_slice %214 {offsets = [0, 0], sizes = [49, 256], strides = [1, 1]} : vector<113x256xf32> to vector<49x256xf32>
    %cst_76 = arith.constant dense<0xFF800000> : vector<256xf32>
    %216 = vector.multi_reduction <maximumf>, %215, %cst_76 [0] : vector<49x256xf32> to vector<256xf32>
    %217 = vector.shape_cast %216 : vector<256xf32> to vector<1x256xf32>
    %c0_77 = arith.constant 0 : index
    %c256 = arith.constant 256 : index
    %218 = vector.load %arg25[%c0_77, %c256] : memref<2x640xf32, #tpu.memory_space<vmem>>, vector<1x256xf32>
    tpu.vector_store %arg25[%c0_77, %c256], %217 {strides = array<i32>} : memref<2x640xf32, #tpu.memory_space<vmem>>, vector<1x256xf32>,
    %219 = vector.extract_strided_slice %214 {offsets = [64, 0], sizes = [49, 256], strides = [1, 1]} : vector<113x256xf32> to vector<49x256xf32>
    %cst_78 = arith.constant dense<0xFF800000> : vector<256xf32>
    %220 = vector.multi_reduction <maximumf>, %219, %cst_78 [0] : vector<49x256xf32> to vector<256xf32>
    %221 = vector.shape_cast %220 : vector<256xf32> to vector<1x256xf32>
    %c1_79 = arith.constant 1 : index
    %c256_80 = arith.constant 256 : index
    %222 = vector.load %arg25[%c1_79, %c256_80] : memref<2x640xf32, #tpu.memory_space<vmem>>, vector<1x256xf32>
    tpu.vector_store %arg25[%c1_79, %c256_80], %221 {strides = array<i32>} : memref<2x640xf32, #tpu.memory_space<vmem>>, vector<1x256xf32>,
    %c0_81 = arith.constant 0 : index
    %c0_82 = arith.constant 0 : index
    %223 = vector.load %arg25[%c0_81, %c0_82] : memref<2x640xf32, #tpu.memory_space<vmem>>, vector<2x640xf32>
    %224 = arith.truncf %223 : vector<2x640xf32> to vector<2x640xbf16>
    %c0_83 = arith.constant 0 : index
    %c0_84 = arith.constant 0 : index
    %225 = vector.load %arg20[%c0_83, %c0_84] : memref<640x512xbf16, #tpu.memory_space<vmem>>, vector<640x512xbf16>
    %cst_85 = arith.constant dense<0.000000e+00> : vector<2x512xf32>
    %226 = tpu.matmul %224, %225, %cst_85 {dimension_numbers = #tpu.dot_dimension_numbers<[1], [0], [0], [1], [0, 0, 1, 1], [], []>} : vector<2x640xbf16>, vector<640x512xbf16>, vector<2x512xf32> -> vector<2x512xf32>
    %c0_86 = arith.constant 0 : index
    %c0_87 = arith.constant 0 : index
    %227 = vector.load %arg21[%c0_86, %c0_87] : memref<1x512xf32, #tpu.memory_space<vmem>>, vector<1x512xf32>
    %228 = vector.broadcast %227 : vector<1x512xf32> to vector<2x512xf32>
    %229 = arith.addf %226, %228 : vector<2x512xf32>
    %cst_88 = arith.constant 0.000000e+00 : f32
    %230 = vector.broadcast %cst_88 : f32 to vector<2x512xf32>
    %231 = arith.maximumf %229, %230 : vector<2x512xf32>
    %232 = arith.truncf %231 : vector<2x512xf32> to vector<2x512xbf16>
    %c0_89 = arith.constant 0 : index
    %c0_90 = arith.constant 0 : index
    %233 = vector.load %arg22[%c0_89, %c0_90] : memref<512x128xbf16, #tpu.memory_space<vmem>>, vector<512x128xbf16>
    %cst_91 = arith.constant dense<0.000000e+00> : vector<2x128xf32>
    %234 = tpu.matmul %232, %233, %cst_91 {dimension_numbers = #tpu.dot_dimension_numbers<[1], [0], [0], [1], [0, 0, 1, 1], [], []>} : vector<2x512xbf16>, vector<512x128xbf16>, vector<2x128xf32> -> vector<2x128xf32>
    %c0_92 = arith.constant 0 : index
    %c0_93 = arith.constant 0 : index
    %235 = vector.load %arg23[%c0_92, %c0_93] : memref<1x128xf32, #tpu.memory_space<vmem>>, vector<1x128xf32>
    %236 = vector.broadcast %235 : vector<1x128xf32> to vector<2x128xf32>
    %237 = arith.addf %234, %236 : vector<2x128xf32>
    %238 = vector.shape_cast %237 : vector<2x128xf32> to vector<1x2x128xf32>
    %c0_94 = arith.constant 0 : index
    %c0_95 = arith.constant 0 : index
    %c0_96 = arith.constant 0 : index
    %239 = vector.load %arg24[%c0_94, %c0_95, %c0_96] : memref<1x2x128xf32, #tpu.memory_space<vmem>>, vector<1x2x128xf32>
    tpu.vector_store %arg24[%c0_94, %c0_95, %c0_96], %238 {strides = array<i32>} : memref<1x2x128xf32, #tpu.memory_space<vmem>>, vector<1x2x128xf32>,
    return
  }
  func.func @transform_0(%arg0: i32) -> (i32, i32) {
    %c0_i32 = arith.constant 0 : i32
    %c0_i32_0 = arith.constant 0 : i32
    return %arg0, %c0_i32 : i32, i32
  }
  func.func @transform_1(%arg0: i32) -> (i32, i32, i32) {
    %c0_i32 = arith.constant 0 : i32
    %c0_i32_0 = arith.constant 0 : i32
    %c0_i32_1 = arith.constant 0 : i32
    return %arg0, %c0_i32, %c0_i32_0 : i32, i32, i32
  }
  func.func @transform_2(%arg0: i32) -> (i32, i32) {
    %c0_i32 = arith.constant 0 : i32
    %c0_i32_0 = arith.constant 0 : i32
    return %arg0, %c0_i32 : i32, i32
  }
  func.func @transform_3(%arg0: i32) -> (i32, i32) {
    %c0_i32 = arith.constant 0 : i32
    %c0_i32_0 = arith.constant 0 : i32
    return %arg0, %c0_i32 : i32, i32
  }
  func.func @transform_4(%arg0: i32) -> (i32, i32) {
    %c0_i32 = arith.constant 0 : i32
    %c0_i32_0 = arith.constant 0 : i32
    %c0_i32_1 = arith.constant 0 : i32
    return %c0_i32, %c0_i32_0 : i32, i32
  }
  func.func @transform_5(%arg0: i32) -> (i32, i32) {
    %c0_i32 = arith.constant 0 : i32
    %c0_i32_0 = arith.constant 0 : i32
    %c0_i32_1 = arith.constant 0 : i32
    return %c0_i32, %c0_i32_0 : i32, i32
  }
  func.func @transform_6(%arg0: i32) -> (i32, i32) {
    %c0_i32 = arith.constant 0 : i32
    %c0_i32_0 = arith.constant 0 : i32
    %c0_i32_1 = arith.constant 0 : i32
    return %c0_i32, %c0_i32_0 : i32, i32
  }
  func.func @transform_7(%arg0: i32) -> (i32, i32) {
    %c0_i32 = arith.constant 0 : i32
    %c0_i32_0 = arith.constant 0 : i32
    %c0_i32_1 = arith.constant 0 : i32
    return %c0_i32, %c0_i32_0 : i32, i32
  }
  func.func @transform_8(%arg0: i32) -> (i32, i32) {
    %c0_i32 = arith.constant 0 : i32
    %c0_i32_0 = arith.constant 0 : i32
    %c0_i32_1 = arith.constant 0 : i32
    return %c0_i32, %c0_i32_0 : i32, i32
  }
  func.func @transform_9(%arg0: i32) -> (i32, i32) {
    %c0_i32 = arith.constant 0 : i32
    %c0_i32_0 = arith.constant 0 : i32
    %c0_i32_1 = arith.constant 0 : i32
    return %c0_i32, %c0_i32_0 : i32, i32
  }
  func.func @transform_10(%arg0: i32) -> (i32, i32) {
    %c0_i32 = arith.constant 0 : i32
    %c0_i32_0 = arith.constant 0 : i32
    %c0_i32_1 = arith.constant 0 : i32
    return %c0_i32, %c0_i32_0 : i32, i32
  }
  func.func @transform_11(%arg0: i32) -> (i32, i32) {
    %c0_i32 = arith.constant 0 : i32
    %c0_i32_0 = arith.constant 0 : i32
    %c0_i32_1 = arith.constant 0 : i32
    return %c0_i32, %c0_i32_0 : i32, i32
  }
  func.func @transform_12(%arg0: i32) -> (i32, i32) {
    %c0_i32 = arith.constant 0 : i32
    %c0_i32_0 = arith.constant 0 : i32
    %c0_i32_1 = arith.constant 0 : i32
    return %c0_i32, %c0_i32_0 : i32, i32
  }
  func.func @transform_13(%arg0: i32) -> (i32, i32) {
    %c0_i32 = arith.constant 0 : i32
    %c0_i32_0 = arith.constant 0 : i32
    %c0_i32_1 = arith.constant 0 : i32
    return %c0_i32, %c0_i32_0 : i32, i32
  }
  func.func @transform_14(%arg0: i32) -> (i32, i32) {
    %c0_i32 = arith.constant 0 : i32
    %c0_i32_0 = arith.constant 0 : i32
    %c0_i32_1 = arith.constant 0 : i32
    return %c0_i32, %c0_i32_0 : i32, i32
  }
  func.func @transform_15(%arg0: i32) -> (i32, i32) {
    %c0_i32 = arith.constant 0 : i32
    %c0_i32_0 = arith.constant 0 : i32
    %c0_i32_1 = arith.constant 0 : i32
    return %c0_i32, %c0_i32_0 : i32, i32
  }
  func.func @transform_16(%arg0: i32) -> (i32, i32) {
    %c0_i32 = arith.constant 0 : i32
    %c0_i32_0 = arith.constant 0 : i32
    %c0_i32_1 = arith.constant 0 : i32
    return %c0_i32, %c0_i32_0 : i32, i32
  }
  func.func @transform_17(%arg0: i32) -> (i32, i32) {
    %c0_i32 = arith.constant 0 : i32
    %c0_i32_0 = arith.constant 0 : i32
    %c0_i32_1 = arith.constant 0 : i32
    return %c0_i32, %c0_i32_0 : i32, i32
  }
  func.func @transform_18(%arg0: i32) -> (i32, i32) {
    %c0_i32 = arith.constant 0 : i32
    %c0_i32_0 = arith.constant 0 : i32
    %c0_i32_1 = arith.constant 0 : i32
    return %c0_i32, %c0_i32_0 : i32, i32
  }
  func.func @transform_19(%arg0: i32) -> (i32, i32) {
    %c0_i32 = arith.constant 0 : i32
    %c0_i32_0 = arith.constant 0 : i32
    %c0_i32_1 = arith.constant 0 : i32
    return %c0_i32, %c0_i32_0 : i32, i32
  }
  func.func @transform_20(%arg0: i32) -> (i32, i32) {
    %c0_i32 = arith.constant 0 : i32
    %c0_i32_0 = arith.constant 0 : i32
    %c0_i32_1 = arith.constant 0 : i32
    return %c0_i32, %c0_i32_0 : i32, i32
  }
  func.func @transform_21(%arg0: i32) -> (i32, i32) {
    %c0_i32 = arith.constant 0 : i32
    %c0_i32_0 = arith.constant 0 : i32
    %c0_i32_1 = arith.constant 0 : i32
    return %c0_i32, %c0_i32_0 : i32, i32
  }
  func.func @transform_22(%arg0: i32) -> (i32, i32) {
    %c0_i32 = arith.constant 0 : i32
    %c0_i32_0 = arith.constant 0 : i32
    %c0_i32_1 = arith.constant 0 : i32
    return %c0_i32, %c0_i32_0 : i32, i32
  }
  func.func @transform_23(%arg0: i32) -> (i32, i32, i32) {
    %c0_i32 = arith.constant 0 : i32
    %c0_i32_0 = arith.constant 0 : i32
    %c0_i32_1 = arith.constant 0 : i32
    return %arg0, %c0_i32, %c0_i32_0 : i32, i32, i32
  }
}

</mosaic_0001>

<bundles_post_ra>
// kernel: cnn_forward.1
= control target key start
LH: loop header
LB: loop body
LE: loop exit
PB: predicated region body
PF: predicated region fallthrough
CT: control target
= control target key end

     0   :  { %s22006_s0 = inlined_call_operand.vmem [shape: bf16[64,32], index: 0, kind: input, shape index: {}]   ;;  %s22007_s1 = inlined_call_operand.vmem [shape: bf16[2,32,32], index: 1, kind: input, shape index: {}]   ;;  %s22008_s2 = inlined_call_operand.vmem [shape: bf16[512,64], index: 2, kind: input, shape index: {}]   ;;  %s22009_s3 = inlined_call_operand.vmem [shape: bf16[256,64], index: 3, kind: input, shape index: {}]   ;;  %s22010_s4 = inlined_call_operand.vmem [shape: bf16[32,128], index: 4, kind: input, shape index: {}]   ;;  %s22011_s5 = inlined_call_operand.vmem [shape: f32[1,128], index: 5, kind: input, shape index: {}]   ;;  %s22012_s6 = inlined_call_operand.vmem [shape: f32[1,128], index: 6, kind: input, shape index: {}]   ;;  %s22013_s7 = inlined_call_operand.vmem [shape: bf16[256,128], index: 7, kind: input, shape index: {}]   ;;  %s22014_s8 = inlined_call_operand.vmem [shape: f32[1,128], index: 8, kind: input, shape index: {}]   ;;  %s22015_s9 = inlined_call_operand.vmem [shape: bf16[1024,128], index: 9, kind: input, shape index: {}]   ;;  %s22016_s10 = inlined_call_operand.hbm [shape: f32[1,128], index: 10, kind: input, shape index: {}]   ;;  %s22017_s11 = inlined_call_operand.vmem [shape: bf16[1536,256], index: 11, kind: input, shape index: {}]   ;;  %s22018_s12 = inlined_call_operand.hbm [shape: f32[1,256], index: 12, kind: input, shape index: {}]   ;;  %s22019_s13 = inlined_call_operand.vmem [shape: bf16[256,128], index: 13, kind: input, shape index: {}]   ;;  %s22020_s14 = inlined_call_operand.hbm [shape: f32[1,128], index: 14, kind: input, shape index: {}]   ;;  %s22021_s15 = inlined_call_operand.vmem [shape: bf16[768,128], index: 15, kind: input, shape index: {}]   ;;  %s22022_s16 = inlined_call_operand.hbm [shape: f32[1,128], index: 16, kind: input, shape index: {}]   ;;  %s22023_s17 = inlined_call_operand.hbm [shape: bf16[1024,256], index: 17, kind: input, shape index: {}]   ;;  %s22024_s18 = inlined_call_operand.hbm [shape: f32[1,256], index: 18, kind: input, shape index: {}]   ;;  %s22025_s19 = inlined_call_operand.vmem [shape: bf16[640,512], index: 19, kind: input, shape index: {}]   ;;  %s22026_s20 = inlined_call_operand.vmem [shape: f32[1,512], index: 20, kind: input, shape index: {}]   ;;  %s22027_s21 = inlined_call_operand.vmem [shape: bf16[512,128], index: 21, kind: input, shape index: {}]   ;;  %s22028_s22 = inlined_call_operand.vmem [shape: f32[1,128], index: 22, kind: input, shape index: {}]   ;;  %s22029_s23 = inlined_call_operand.vmem [shape: f32[2,2,128], index: 23, kind: output, shape index: {}]  }
   0x1   :  { %22152 = sst [smem:[#allocation107_spill]] %s22006_s0 }
   0x2   :  { %22153 = sst [smem:[#allocation108_spill]] %s22007_s1 }
   0x3   :  { %22154 = sst [smem:[#allocation109_spill]] %s22008_s2 }
   0x4   :  { %22155 = sst [smem:[#allocation110_spill]] %s22009_s3 }
   0x5   :  { %22156 = sst [smem:[#allocation111_spill]] %s22010_s4 }
   0x6   :  { %22157 = sst [smem:[#allocation112_spill]] %s22011_s5 }
   0x7   :  { %22158 = sst [smem:[#allocation113_spill]] %s22012_s6 }
   0x8   :  { %22159 = sst [smem:[#allocation114_spill]] %s22013_s7 }
   0x9   :  { %22160 = sst [smem:[#allocation115_spill]] %s22016_s10 }
   0xa   :  { %22161 = sst [smem:[#allocation116_spill]] %s22028_s22 }
   0xb   :  { %22162 = sst [smem:[#allocation117_spill]] %s22029_s23 }
   0xc   :  { %28 = vsyncpa [#allocation4], 0 }
   0xd   :  { %29 = vsyncpa [#allocation6], 0 }
   0xe   :  { %30 = vsyncpa [#allocation9], 0 }
   0xf   :  { %31 = vsyncpa [#allocation12], 0  ;;  %s16518_s4 = smov 0  }
  0x10 LB: > { %22163 = sst [smem:[#allocation17_spill]] %s16385_s4  ;;  %s16387_s30 = smov [#allocation5]   ;;  %s16385_s4 = sphi %s16518_s4, %s37_s4  }
  0x11   : > { %s616_s24 = sshll.u32 %s16387_s30, 4  ;;  %s16524_s25 = sadd.s32 4294967295, %s16385_s4   ;;  %s16529_s24 = int_to_ptr.vmem [resolvable:$true] %s616_s24 }
  0x12   : > { %p12610_p0 = scmp.ge.s32.totalorder %s16385_s4, 1  ;;  %p571_p1 = scmp.lt.s32.totalorder %s16385_s4, 3 }
  0x13   : > { %p22033_p2 = scmp.eq.s32.totalorder %s16524_s25, 0  ;;  %s16388_s1 = smov [#allocation8]  }
  0x14   : > { %p16531_p3 = pnand %p12610_p0, %p571_p1  ;;  %s644_s26 = sshll.u32 %s16388_s1, 4  ;;  %s16537_s26 = int_to_ptr.vmem [resolvable:$true] %s644_s26 }
  0x15   : > { %s16389_s2 = smov [#allocation3]   ;;  %s16390_s7 = smov [#allocation7]  }
  0x16   : > { %s22164_s5 = scalar_select %p16531_p3, 1, 0 }
  0x17   : > { %p15190_p4 = pneg %p16531_p3  ;;  %s602_s6 = sshll.u32 %s16389_s2, 4  ;;  %s16545_s6 = int_to_ptr.vmem [resolvable:$true] %s602_s6 }
  0x18   : > { %s630_s28 = sshll.u32 %s16390_s7, 4  ;;  %s16195_s0 = scalar_lea.hbm %s22018_s12, 32  ;;  %s16547_s28 = int_to_ptr.vmem [resolvable:$true] %s630_s28 }
  0x19   : > { %p16541_p5 = pnand %p22033_p2, %p15190_p4  ;;  %p16196_p6 = scmp.ne.s32.totalorder %s22018_s12, %s16195_s0 }
  0x1a   : > { %p16202_p10 = scmp.lt.u32.totalorder %s16195_s0, %s22018_s12 }
  0x1b   : > { %p16557_p7 = pneg %p16541_p5 }
  0x1d   : > { %p16198_p8 = pnand %p16557_p7, %p16196_p6 }
  0x1f   : > { %p16199_p9 = pneg %p16198_p8 }
  0x21   : > { %p16204_p11 = pnand %p16202_p10, %p16199_p9 }
  0x23   : > { %16207 = shalt.err (!%p16204_p11)
}
  0x24   : > { %s16208_s29 = scalar_lea.vmem %s16529_s24, 32  ;;  %p16216_p1 = scmp.lt.s32.totalorder %s16529_s24, %s16529_s24 }
  0x25   : > { %p16209_p12 = scmp.ne.s32.totalorder %s16529_s24, %s16208_s29  ;;  %p16217_p4 = scmp.lt.s32.totalorder %s16208_s29, %s16208_s29 }
  0x27   : > { %p16211_p13 = pnand %p16209_p12, %p16557_p7  ;;  %p16218_p6 = por %p16217_p4, %p16216_p1 }
  0x29   : > { %p16212_p0 = pneg %p16211_p13 }
  0x2b   : > { %p16219_p8 = pnand %p16218_p6, %p16212_p0 }
  0x2d   : > { %16222 = shalt.err (!%p16219_p8)
}
  0x2e   : > { %15196 = dma.hbm_to_vmem [thread:$0]  (!%p16541_p5), %s22018_s12, 32, %s16529_s24, [#allocation6]  }
  0x2f   : > { %s16223_s1 = scalar_lea.hbm %s22022_s16, 16 }
  0x30   : > { %p16224_p9 = scmp.ne.s32.totalorder %s22022_s16, %s16223_s1  ;;  %p16230_p12 = scmp.lt.u32.totalorder %s16223_s1, %s22022_s16 }
  0x32   : > { %p16226_p10 = pnand %p16224_p9, %p16557_p7 }
  0x34   : > { %p16227_p11 = pneg %p16226_p10 }
  0x36   : > { %p16232_p13 = pnand %p16230_p12, %p16227_p11 }
  0x38   : > { %16235 = shalt.err (!%p16232_p13)
}
  0x39   : > { %s16236_s24 = scalar_lea.vmem %s16537_s26, 16  ;;  %s16243_s23 = scalar_lea.vmem %s16537_s26, 32 }
  0x3a   : > { %p16237_p0 = scmp.ne.s32.totalorder %s16537_s26, %s16236_s24  ;;  %p16244_p6 = scmp.lt.s32.totalorder %s16537_s26, %s16537_s26 }
  0x3b   : > { %p16245_p8 = scmp.lt.s32.totalorder %s16243_s23, %s16236_s24 }
  0x3c   : > { %p16239_p1 = pnand %p16237_p0, %p16557_p7 }
  0x3d   : > { %p16246_p9 = por %p16245_p8, %p16244_p6 }
  0x3e   : > { %p16240_p4 = pneg %p16239_p1 }
  0x40   : > { %p16247_p10 = pnand %p16246_p9, %p16240_p4 }
  0x42   : > { %16250 = shalt.err (!%p16247_p10)
}
  0x43   : > { %15202 = dma.hbm_to_vmem [thread:$0]  (!%p16541_p5), %s22022_s16, 16, %s16537_s26, [#allocation9]  }
  0x44   : > { %s22167_s10 = sld [smem:[#allocation115_spill]] }
  0x4a   : > { %s16251_s30 = scalar_lea.hbm %s22167_s10, 16 }
  0x4b   : > { %p16252_p11 = scmp.ne.s32.totalorder %s22167_s10, %s16251_s30  ;;  %p16258_p0 = scmp.lt.u32.totalorder %s16251_s30, %s22167_s10 }
  0x4d   : > { %p16254_p12 = pnand %p16252_p11, %p16557_p7 }
  0x4f   : > { %p16255_p13 = pneg %p16254_p12 }
  0x51   : > { %p16260_p1 = pnand %p16258_p0, %p16255_p13 }
  0x53   : > { %16263 = shalt.err (!%p16260_p1)
}
  0x54   : > { %s16264_s26 = scalar_lea.vmem %s16545_s6, 16  ;;  %s16271_s23 = scalar_lea.vmem %s16545_s6, 32 }
  0x55   : > { %p16265_p4 = scmp.ne.s32.totalorder %s16545_s6, %s16264_s26  ;;  %p16272_p9 = scmp.lt.s32.totalorder %s16545_s6, %s16545_s6 }
  0x56   : > { %p16273_p10 = scmp.lt.s32.totalorder %s16271_s23, %s16264_s26 }
  0x57   : > { %p16267_p6 = pnand %p16265_p4, %p16557_p7 }
  0x58   : > { %p16274_p11 = por %p16273_p10, %p16272_p9 }
  0x59   : > { %p16268_p8 = pneg %p16267_p6 }
  0x5b   : > { %p16275_p12 = pnand %p16274_p11, %p16268_p8 }
  0x5d   : > { %16278 = shalt.err (!%p16275_p12)
}
  0x5e   : > { %15193 = dma.hbm_to_vmem [thread:$0]  (!%p16541_p5), %s22167_s10, 16, %s16545_s6, [#allocation4]  }
  0x5f   : > { %s16279_s30 = scalar_lea.hbm %s22020_s14, 16 }
  0x60   : > { %p16280_p13 = scmp.ne.s32.totalorder %s22020_s14, %s16279_s30  ;;  %p16286_p4 = scmp.lt.u32.totalorder %s16279_s30, %s22020_s14 }
  0x62   : > { %p16282_p0 = pnand %p16280_p13, %p16557_p7 }
  0x64   : > { %p16283_p1 = pneg %p16282_p0 }
  0x66   : > { %p16288_p6 = pnand %p16286_p4, %p16283_p1 }
  0x68   : > { %16291 = shalt.err (!%p16288_p6)
}
  0x69   : > { %s16292_s6 = scalar_lea.vmem %s16547_s28, 16  ;;  %s16299_s26 = scalar_lea.vmem %s16547_s28, 32 }
  0x6a   : > { %p16293_p8 = scmp.ne.s32.totalorder %s16547_s28, %s16292_s6  ;;  %p16300_p11 = scmp.lt.s32.totalorder %s16547_s28, %s16547_s28 }
  0x6b   : > { %p16301_p12 = scmp.lt.s32.totalorder %s16299_s26, %s16292_s6 }
  0x6c   : > { %p16295_p9 = pnand %p16293_p8, %p16557_p7 }
  0x6d   : > { %p16302_p13 = por %p16301_p12, %p16300_p11 }
  0x6e   : > { %p16296_p10 = pneg %p16295_p9 }
  0x70   : > { %p16303_p0 = pnand %p16302_p13, %p16296_p10 }
  0x72   : > { %16306 = shalt.err (!%p16303_p0)
}
  0x73   : > { %15199 = dma.hbm_to_vmem [thread:$0]  (!%p16541_p5), %s22020_s14, 16, %s16547_s28, [#allocation6]  }
  0x74   : > { %s16391_s4 = smov [#allocation10]   ;;  %s16307_s1 = scalar_lea.hbm %s22023_s17, 16384 }
  0x75   : > { %s654_s3 = sshll.u32 %s16391_s4, 4  ;;  %p16308_p1 = scmp.ne.s32.totalorder %s22023_s17, %s16307_s1  ;;  %s655_s3 = int_to_ptr.vmem [resolvable:$true] %s654_s3 }
  0x76   : > { %p16314_p8 = scmp.lt.u32.totalorder %s16307_s1, %s22023_s17 }
  0x77   : > { %p16310_p4 = pnand %p16308_p1, %p16557_p7 }
  0x79   : > { %p16311_p6 = pneg %p16310_p4 }
  0x7b   : > { %p16316_p9 = pnand %p16314_p8, %p16311_p6 }
  0x7d   : > { %16319 = shalt.err (!%p16316_p9)
}
  0x7e   : > { %s16320_s28 = scalar_lea.vmem %s655_s3, 16384  ;;  %p16328_p13 = scmp.lt.s32.totalorder %s655_s3, %s655_s3 }
  0x7f   : > { %p16321_p10 = scmp.ne.s32.totalorder %s655_s3, %s16320_s28  ;;  %p16329_p0 = scmp.lt.s32.totalorder %s16320_s28, %s16320_s28 }
  0x81   : > { %p16323_p11 = pnand %p16321_p10, %p16557_p7  ;;  %p16330_p2 = por %p16329_p0, %p16328_p13 }
  0x83   : > { %p16324_p12 = pneg %p16323_p11 }
  0x85   : > { %p16331_p3 = pnand %p16330_p2, %p16324_p12 }
  0x87   : > { %16334 = shalt.err (!%p16331_p3)
}
  0x88   : > { %s16392_s26 = smov 128   ;;  %s16393_s23 = smov 8  }
  0x89   : > { %15205 = dma.hbm_to_vmem [thread:$0]  (!%p16541_p5), %s22023_s17, 16384, %s655_s3, [#allocation9], %s16392_s26, %s16392_s26, %s16393_s23  }
  0x8a   : > { %s16394_s0 = smov [#allocation11]   ;;  %s16335_s29 = scalar_lea.hbm %s22024_s18, 32 }
  0x8b   : > { %s668_s30 = sshll.u32 %s16394_s0, 4  ;;  %p16336_p2 = scmp.ne.s32.totalorder %s22024_s18, %s16335_s29  ;;  %s669_s30 = int_to_ptr.vmem [resolvable:$true] %s668_s30 }
  0x8c   : > { %p16342_p4 = scmp.lt.u32.totalorder %s16335_s29, %s22024_s18 }
  0x8d   : > { %p16338_p3 = pnand %p16336_p2, %p16557_p7 }
  0x8f   : > { %p16339_p1 = pneg %p16338_p3 }
  0x91   : > { %p16344_p6 = pnand %p16342_p4, %p16339_p1 }
  0x93   : > { %16347 = shalt.err (!%p16344_p6)
}
  0x94   : > { %s16348_s3 = scalar_lea.vmem %s669_s30, 32  ;;  %p16356_p11 = scmp.lt.s32.totalorder %s669_s30, %s669_s30 }
  0x95   : > { %p16349_p8 = scmp.ne.s32.totalorder %s669_s30, %s16348_s3  ;;  %p16357_p12 = scmp.lt.s32.totalorder %s16348_s3, %s16348_s3 }
  0x97   : > { %p16351_p9 = pnand %p16349_p8, %p16557_p7  ;;  %p16358_p13 = por %p16357_p12, %p16356_p11 }
  0x99   : > { %p16352_p10 = pneg %p16351_p9 }
  0x9b   : > { %p16359_p0 = pnand %p16358_p13, %p16352_p10 }
  0x9d   : > { %16362 = shalt.err (!%p16359_p0)
}
  0x9e   : > { %15208 = dma.hbm_to_vmem [thread:$0]  (!%p16541_p5), %s22024_s18, 32, %s669_s30, [#allocation12]  }
  0x9f   : > { %p22168_p2 = scmp.ne.s32.totalorder %s22164_s5, 0 }
  0xa1   : > { %728 = sbr.rel (%p22168_p2) target bundleno = 3366 (0xd26), region = 112 }
  0xa8   : > { %p22169_p3 = scmp.eq.s32.totalorder %s16524_s25, 0 }
  0xaa   : > { %16368 = dma.done.wait (%p22169_p3), [#allocation4], 16   ;;  %p22170_p7 = pmov %p22169_p3 }
  0xab   : > { %p22171_p1 = pmov %p22169_p3 }
  0xac   : > { %16370 = vsyncadd (%p22170_p7), [#allocation4], 4294967280 }
  0xad   : > { %16372 = dma.done.wait (%p22171_p1), [#allocation6], 48   ;;  %p22172_p4 = pmov %p22171_p1 }
  0xae   : > { %p22173_p6 = pmov %p22171_p1 }
  0xaf   : > { %16374 = vsyncadd (%p22172_p4), [#allocation6], 4294967248 }
  0xb0   : > { %16376 = dma.done.wait (%p22173_p6), [#allocation9], 16400   ;;  %p22174_p5 = pmov %p22171_p1 }
  0xb1   : > { %p22175_p8 = pmov %p22171_p1 }
  0xb2   : > { %16378 = vsyncadd (%p22174_p5), [#allocation9], 4294950896 }
  0xb3   : > { %16380 = dma.done.wait (%p22175_p8), [#allocation12], 32   ;;  %p22176_p9 = pmov %p22171_p1 }
  0xb4   : > { %s12625_s10 = sshll.u32 %s16524_s25, 2  ;;  %s22177_s22 = sld [smem:[#allocation107_spill]]  ;;  %vm884_vm0 = vcmask 261120   ;;  %vm1624_vm1 = vsmask.f32 7424  ;;  %vm1776_vm2 = vcmask 523264  }
  0xb5   : > { %16382 = vsyncadd (%p22176_p9), [#allocation12], 4294967264  ;;  %p827_p10 = scmp.lt.s32.totalorder %s12625_s10, 7  ;;  %s22178_s1 = sld [smem:[#allocation111_spill]]  ;;  %vm2219_vm3 = vcmask 1046528   ;;  %vm3223_vm14 = vcmask 1045504  }
  0xb6   : > { %s22179_s28 = sld [smem:[#allocation113_spill]]  ;;  %s22180_s23 = sld [smem:[#allocation112_spill]]  ;;  %vm2516_vm4 = vsmask.f32 6400  ;;  %vm3271_vm13 = vsmask.f32 5376 }
  0xb7   : > { %s22680_s10 = smov (!%p827_p10, %s12625_s10), 7  ;;  %s22181_s27 = sld [smem:[#allocation114_spill]]  ;;  %vm3399_vm15 = vsmask.f32 4352 }
  0xb8   : > { %s12626_s5 = sshll.u32 %s22680_s10, 2  ;;  %s22182_s3 = sld [smem:[#allocation109_spill]] }
  0xb9   : > { %p832_p12 = scmp.lt.s32.totalorder %s16524_s25, 1 }
  0xba   : > { %s830_s4 = scalar_lea.vmem %s22177_s22, %s12626_s5 }
  0xbb   : > { %v15241_v0 = vld [vmem:[%s22178_s1] sm:$0xff]   ;;  %v15242_v1 = vld [vmem:[%s22178_s1 + $0x8] sm:$0xff]   ;;  %s16962_s29 = scalar_select %p832_p12, %s16524_s25, 1 }
  0xbc   : > { %14262 = vmatprep.subr.bf16.mxu0 %v15241_v0  ;;  %v15243_v2 = vld [vmem:[%s830_s4] sm:$0xff]   ;;  %v15244_v3 = vld [vmem:[%s830_s4 + $0x8] sm:$0xff]   ;;  %s12629_s4 = sshll.u32 %s16524_s25, 5 }
  0xbd   : > { %14263 = vmatpush3.bf16.msra.mxu0 %v15241_v0  ;;  %14266 = vmatprep.mubr.msk.bf16.mxu0 %vm884_vm0, %v15243_v2  ;;  %v12641_v4 = vld [vmem:[%s22179_s28] ss:$0 sm:$0xff]  ;;  %v15246_v21 = vld [vmem:[%s22181_s27 + $0x28] sm:$0xff]   ;;  %p838_p11 = scmp.lt.s32.totalorder %s12629_s4, 63  ;;  %v15247_v22 = vld [vmem:[%s22181_s27 + $0x30] sm:$0xff]   ;;  %s13432_s24 = sshll.u32 %s16962_s29, 4 }
  0xbe   : > { %14264 = vmatprep.subr.bf16.mxu0 %v15242_v1  ;;  %v12640_v14 = vld [vmem:[%s22180_s23] ss:$0 sm:$0xff]  ;;  %v15248_v23 = vld [vmem:[%s22181_s27 + $0x38] sm:$0xff]   ;;  %v15255_v43 = vld [vmem:[%s22181_s27 + $0x8] sm:$0xff]   ;;  %s22291_s28 = sld [smem:[#allocation110_spill]]  ;;  %s12633_s6 = sshll.u32 %s16962_s29, 1 }
  0xbf   : > { %v15245_v20 = vld [vmem:[%s22181_s27 + $0x20] sm:$0xff]   ;;  %s22682_s4 = smov (!%p838_p11, %s12629_s4), 63  ;;  %v15258_v55 = vld [vmem:[%s22181_s27 + $0x10] sm:$0xff]  }
  0xc0   : > { %s12630_s7 = sshll.u32 %s22682_s4, 2  ;;  %v15254_v31 = vld [vmem:[%s22181_s27] sm:$0xff]   ;;  %s12631_s4 = sshll.u32 %s16524_s25, 4 }
  0xc1   : > { %14265 = vmatpush3.bf16.msra.mxu0 %v15242_v1  ;;  %s16738_s26 = scalar_lea.vmem %s22182_s3, %s12630_s7  ;;  %s22184_s3 = sld [smem:[#allocation108_spill]] }
  0xc2   : > { %14278 = vmatprep.subr.bf16.mxu0 %v15245_v20  ;;  %v16741_v24 = vld [vmem:[%s16738_s26] sm:$0xff]   ;;  %v16744_v25 = vld [vmem:[%s16738_s26 + $0x8] sm:$0xff]   ;;  %v16747_v26 = vld [vmem:[%s16738_s26 + $0x10] sm:$0xff]   ;;  %p844_p13 = scmp.lt.s32.totalorder %s12631_s4, 31 }
  0xc3   : > { %v1626_v27 = vshrl.u32 %v16741_v24, 16  ;;  %v1628_v28 = vshll.u32 %v16741_v24, 16  ;;  %v1633_v29 = vshll.u32 %v16744_v25, 16  ;;  %v1637_v30 = vshrl.u32 %v16744_v25, 16  ;;  %v16758_v33 = vld [vmem:[%s16738_s26 + $0x18] sm:$0xff]   ;;  %v16762_v35 = vld [vmem:[%s16738_s26 + $0x20] sm:$0xff]  }
  0xc4   : > { %14267 = vmatmul.mubr.msk.bf16.vlgmr.msra.gmra.mrb[0].mxu0 %vm884_vm0, %v15244_v3  ;;  %v1641_v32 = vshll.u32 %v16747_v26, 16  ;;  %v1645_v34 = vshrl.u32 %v16747_v26, 16  ;;  %v1649_v39 = vshll.u32 %v16758_v33, 16  ;;  %v1657_v42 = vshll.u32 %v16762_v35, 16  ;;  %v16780_v44 = vld [vmem:[%s16738_s26 + $0x28] sm:$0xff]   ;;  %v16794_v53 = vld [vmem:[%s16738_s26 + $0x30] sm:$0xff]  }
  0xc5   : > { %14279 = vmatpush3.bf16.msra.mxu0 %v15245_v20  ;;  %v1630_v36 = vrot.slane %v1628_v28, 1  ;;  %v1635_v37 = vrot.slane %v1633_v29, 1  ;;  %v1653_v47 = vshrl.u32 %v16758_v33, 16  ;;  %v1661_v50 = vshrl.u32 %v16762_v35, 16  ;;  %v15259_v3 = vld [vmem:[%s22181_s27 + $0x18] sm:$0xff]   ;;  %s22684_s4 = smov (!%p844_p13, %s12631_s4), 31 }
  0xc6   : > { %14280 = vmatprep.subr.bf16.mxu0 %v15246_v21  ;;  %v1643_v38 = vrot.slane %v1641_v32, 1  ;;  %v1651_v46 = vrot.slane %v1649_v39, 1  ;;  %v1665_v51 = vshll.u32 %v16780_v44, 16  ;;  %v1659_v54 = vrot.slane %v1657_v42, 1  ;;  %s12632_s7 = sshll.u32 %s22684_s4, 2 }
  0xc7   : > { %v1631_v40 = vor.u32 %v1630_v36, %v1626_v27  ;;  %v1639_v41 = vor.u32 %v1637_v30, %v1635_v37  ;;  %v1669_v60 = vshrl.u32 %v16780_v44, 16  ;;  %v1673_v61 = vshll.u32 %v16794_v53, 16  ;;  %s836_s23 = scalar_lea.vmem %s22184_s3, %s13432_s24  ;;  %s18197_s3 = scalar_lea.vmem %s22291_s28, %s12632_s7 }
  0xc8   : > { %v1647_v45 = vor.u32 %v1645_v34, %v1643_v38  ;;  %v1655_v56 = vor.u32 %v1653_v47, %v1651_v46  ;;  %v1667_v57 = vrot.slane %v1665_v51, 1  ;;  %v1663_v58 = vor.u32 %v1661_v50, %v1659_v54  ;;  %s22676_s24 = sld [smem:[#allocation116_spill]] }
  0xc9   : > { %14281 = vmatpush3.bf16.msra.mxu0 %v15246_v21  ;;  %v1636_v48 = vsel %vm1624_vm1, %v1631_v40, %v1635_v37  ;;  %v1644_v49 = vsel %vm1624_vm1, %v1639_v41, %v1643_v38  ;;  %v16819_v0 = vrot.slane %v1673_v61, 1  ;;  %v16893_v21 = vld [vmem:[%s16738_s26 + $0x68] sm:$0xff]   ;;  %v2223_v36 = vrot.slane %v16747_v26, 1 }
  0xca   : > { %14282 = vmatprep.subr.bf16.mxu0 %v15247_v22  ;;  %14286 = vmatprep.mubr.msk.bf16.mxu0 %vm1776_vm2, %v1636_v48  ;;  %v1652_v52 = vsel %vm1624_vm1, %v1647_v45, %v1651_v46  ;;  %v1660_v59 = vsel %vm1624_vm1, %v1655_v56, %v1659_v54  ;;  %v1668_v62 = vsel %vm1624_vm1, %v1663_v58, %v1667_v57  ;;  %v2225_v37 = vrot.slane %v16758_v33, 1  ;;  %v15274_v41 = vld [vmem:[%s22181_s27 + $0x68] sm:$0xff]  }
  0xcb   : > { %v1671_v63 = vor.u32 %v1669_v60, %v1667_v57  ;;  %v2229_v45 = vrot.slane %v16780_v44, 1 }
  0xcc   : > { %v2226_v40 = vsel %vm2219_vm3, %v2223_v36, %v2225_v37 }
  0xcd   : > { %14283 = vmatpush3.bf16.msra.mxu0 %v15247_v22  ;;  %v1676_v1 = vsel %vm1624_vm1, %v1671_v63, %v16819_v0  ;;  %v16896_v22 = vld [vmem:[%s16738_s26 + $0x70] sm:$0xff]  }
  0xce   : > { %14284 = vmatprep.subr.bf16.mxu0 %v15248_v23 }
  0xd1   : > { %14285 = vmatpush3.bf16.msra.mxu0 %v15248_v23  ;;  %v2220_v23 = vrot.slane %v16741_v24, 1 }
  0xd2   : > { %14318 = vmatprep.subr.bf16.mxu0 %v15254_v31 }
  0xd4   : > { %14287 = vmatmul.mubr.msk.bf16.vlgmr.msra.gmra.mrb[4].mxu0 %vm1776_vm2, %v1644_v49  ;;  %v15276_v49 = vld [vmem:[%s22181_s27 + $0x78] sm:$0xff]  }
  0xd5   : > { %14290 = vmatprep.mubr.msk.bf16.mxu0 %vm1776_vm2, %v1652_v52  ;;  %14319 = vmatpush3.bf16.msra.mxu0 %v15254_v31  ;;  %v2221_v31 = vrot.slane %v16744_v25, 1  ;;  %v2231_v52 = vrot.slane %v16794_v53, 1 }
  0xd6   : > { %14320 = vmatprep.subr.bf16.mxu0 %v15255_v43 }
  0xd7   : > { %v2224_v38 = vsel %vm2219_vm3, %v2221_v31, %v2223_v36 }
  0xd9   : > { %14321 = vmatpush3.bf16.msra.mxu0 %v15255_v43  ;;  %v2227_v43 = vrot.slane %v16762_v35, 1 }
  0xda   : > { %14322 = vmatprep.subr.bf16.mxu0 %v15258_v55 }
  0xdb   : > { %v2228_v46 = vsel %vm2219_vm3, %v2225_v37, %v2227_v43  ;;  %v2230_v48 = vsel %vm2219_vm3, %v2227_v43, %v2229_v45 }
  0xdc   : > { %14291 = vmatmul.mubr.msk.bf16.gmra.mrb[8].mxu0 %vm1776_vm2, %v1660_v59 }
  0xdd   : > { %14294 = vmatprep.mubr.msk.bf16.mxu0 %vm1776_vm2, %v1668_v62  ;;  %14323 = vmatpush3.bf16.msra.mxu0 %v15258_v55  ;;  %v2232_v55 = vsel %vm2219_vm3, %v2229_v45, %v2231_v52 }
  0xde   : > { %14324 = vmatprep.subr.bf16.mxu0 %v15259_v3 }
  0xe1   : > { %14325 = vmatpush3.bf16.msra.mxu0 %v15259_v3 }
  0xe4   : > { %14295 = vmatmul.mubr.msk.bf16.gmra.mrb[12].mxu0 %vm1776_vm2, %v1676_v1 }
  0xe5   : > { %14326 = vmatprep.mubr.msk.bf16.mxu0 %vm1776_vm2, %v16741_v24 }
  0xec   : > { %14327 = vmatmul.mubr.msk.bf16.vlgmr.msra.gmra.mrb[4].mxu0 %vm1776_vm2, %v16744_v25  ;;  %v2528_v25 = vrot.slane %v1653_v47, 1  ;;  %v2533_v47 = vrot.slane %v1657_v42, 2 }
  0xed   : > { %14330 = vmatprep.mubr.msk.bf16.mxu0 %vm1776_vm2, %v16747_v26  ;;  %v15275_v26 = vld [vmem:[%s22181_s27 + $0x70] sm:$0xff]  }
  0xf4   : > { %14331 = vmatmul.mubr.msk.bf16.gmra.mrb[8].mxu0 %vm1776_vm2, %v16758_v33 }
  0xf5   : > { %14334 = vmatprep.mubr.msk.bf16.mxu0 %vm1776_vm2, %v16762_v35 }
  0xfc   : > { %14335 = vmatmul.mubr.msk.bf16.gmra.mrb[12].mxu0 %vm1776_vm2, %v16780_v44 }
  0xfd   : > { %14338 = vmatprep.mubr.msk.bf16.mxu0 %vm1776_vm2, %v16794_v53 }
 0x197   : > { %v14268_v5 = vpop.f32.mrb[0].mxu0 }
 0x198   : > { %v925_v6 = vpop.f32.mrb[1].mxu0  ;;  %v968_v7 = vmul.f32 %v14268_v5, %v12641_v4  ;;  %v949_v19 = vmul.f32 %v14268_v5, %v12640_v14 }
 0x199   : > { %v14269_v8 = vpop.f32.mrb[2].mxu0  ;;  %v966_v9 = vmul.f32 %v12641_v4, %v925_v6  ;;  %v947_v17 = vmul.f32 %v12640_v14, %v925_v6 }
 0x19a   : > { %v1093_v10 = vpack.c.bf16 %v14269_v8, %v14268_v5  ;;  %974 = vadd.xlane.f32.xlu1 %v968_v7  ;;  %v928_v11 = vpop.f32.mrb[3].mxu0  ;;  %v969_v13 = vmul.f32 %v14269_v8, %v12641_v4  ;;  %v950_v18 = vmul.f32 %v14269_v8, %v12640_v14  ;;  %v2525_v7 = vrot.slane %v1641_v32, 2  ;;  %v16905_v32 = vld [vmem:[%s16738_s26 + $0x78] sm:$0xff]  }
 0x19b   : > { %970 = vadd.xlane.f32.xlu0 %v966_v9  ;;  %v1092_v12 = vpack.c.bf16 %v928_v11, %v925_v6  ;;  %v967_v15 = vmul.f32 %v12641_v4, %v928_v11  ;;  %v948_v16 = vmul.f32 %v12640_v14, %v928_v11  ;;  %v2524_v8 = vrot.slane %v1645_v34, 1  ;;  %v15268_v11 = vld [vmem:[%s22181_s27 + $0x48] sm:$0xff]   ;;  %v15271_v14 = vld [vmem:[%s22181_s27 + $0x50] sm:$0xff]  }
 0x19c   : > { %v2222_v34 = vsel %vm2219_vm3, %v2220_v23, %v2221_v31  ;;  %v2520_v23 = vrot.slane %v1637_v30, 1  ;;  %v2521_v31 = vrot.slane %v1633_v29, 2 }
 0x19d   : > { %14270 = vmatprep.subr.bf16.mxu1 %v1092_v12  ;;  %v16845_v9 = vor.u32 %v2525_v7, %v2524_v8  ;;  %v2247_v8 = vrot.slane %v16896_v22, 1 }
 0x19e   : > { %976 = vadd.xlane.f32.xlu1 %v969_v13  ;;  %14271 = vmatpush3.bf16.msra.mxu1 %v1092_v12  ;;  %v16854_v12 = vld [vmem:[%s16738_s26 + $0x38] sm:$0xff]   ;;  %v16857_v13 = vld [vmem:[%s16738_s26 + $0x40] sm:$0xff]  }
 0x19f   : > { %14272 = vmatprep.subr.bf16.mxu1 %v1093_v10  ;;  %972 = vadd.xlane.f32.xlu0 %v967_v15  ;;  %v15272_v15 = vld [vmem:[%s22181_s27 + $0x58] sm:$0xff]   ;;  %v2233_v54 = vrot.slane %v16854_v12, 1  ;;  %v2235_v57 = vrot.slane %v16857_v13, 1  ;;  %v22053_v44 = vshrl.u32 %v16854_v12, 16 }
 0x1a0   : > { %14339 = vmatmul.mubr.msk.bf16.gmra.mrb[16].mxu0 %vm1776_vm2, %v16854_v12 }
 0x1a1   : > { %14342 = vmatprep.mubr.msk.bf16.mxu0 %vm1776_vm2, %v16857_v13  ;;  %v2234_v56 = vsel %vm2219_vm3, %v2231_v52, %v2233_v54  ;;  %v2236_v59 = vsel %vm2219_vm3, %v2233_v54, %v2235_v57 }
 0x1a2   : > { %14273 = vmatpush3.bf16.msra.mxu1 %v1093_v10  ;;  %953 = vadd.xlane.f32.xlu1 %v948_v16  ;;  %v15267_v10 = vld [vmem:[%s22181_s27 + $0x40] sm:$0xff]   ;;  %v16870_v16 = vld [vmem:[%s16738_s26 + $0x48] sm:$0xff]  }
 0x1a3   : > { %951 = vadd.xlane.f32.xlu0 %v947_v17  ;;  %14534 = vmatprep.subr.bf16.mxu1 %v15245_v20  ;;  %v16873_v17 = vld [vmem:[%s16738_s26 + $0x50] sm:$0xff]   ;;  %v16886_v20 = vld [vmem:[%s16738_s26 + $0x60] sm:$0xff]   ;;  %v2237_v58 = vrot.slane %v16870_v16, 1 }
 0x1a4   : > { %14358 = vmatprep.subr.bf16.mxu0 %v15267_v10  ;;  %v2239_v63 = vrot.slane %v16873_v17, 1 }
 0x1a5   : > { %14359 = vmatpush3.bf16.msra.mxu0 %v15267_v10  ;;  %v2238_v62 = vsel %vm2219_vm3, %v2235_v57, %v2237_v58  ;;  %v2249_v10 = vrot.slane %v16905_v32, 1 }
 0x1a6   : > { %957 = vadd.xlane.f32.xlu1 %v950_v18  ;;  %14360 = vmatprep.subr.bf16.mxu0 %v15268_v11  ;;  %v15273_v18 = vld [vmem:[%s22181_s27 + $0x60] sm:$0xff]  }
 0x1a7   : > { %955 = vadd.xlane.f32.xlu0 %v949_v19  ;;  %v16883_v19 = vld [vmem:[%s16738_s26 + $0x58] sm:$0xff]  }
 0x1a8   : > { %14343 = vmatmul.mubr.msk.bf16.gmra.mrb[20].mxu0 %vm1776_vm2, %v16870_v16  ;;  %v2241_v1 = vrot.slane %v16883_v19, 1 }
 0x1a9   : > { %14361 = vmatpush3.bf16.msra.mxu0 %v15268_v11  ;;  %14346 = vmatprep.mubr.msk.bf16.mxu0 %vm1776_vm2, %v16873_v17 }
 0x1aa   : > { %14362 = vmatprep.subr.bf16.mxu0 %v15271_v14  ;;  %v2242_v3 = vsel %vm2219_vm3, %v2239_v63, %v2241_v1 }
 0x1ad   : > { %14363 = vmatpush3.bf16.msra.mxu0 %v15271_v14  ;;  %v2250_v14 = vsel %vm2219_vm3, %v2247_v8, %v2249_v10 }
 0x1ae   : > { %14364 = vmatprep.subr.bf16.mxu0 %v15272_v15 }
 0x1b0   : > { %14347 = vmatmul.mubr.msk.bf16.gmra.mrb[24].mxu0 %vm1776_vm2, %v16883_v19 }
 0x1b1   : > { %14365 = vmatpush3.bf16.msra.mxu0 %v15272_v15  ;;  %14350 = vmatprep.mubr.msk.bf16.mxu0 %vm1776_vm2, %v16886_v20  ;;  %v2517_v15 = vrot.slane %v1626_v27, 1 }
 0x1b2   : > { %14398 = vmatprep.subr.bf16.mxu0 %v15273_v18 }
 0x1b8   : > { %14351 = vmatmul.mubr.msk.bf16.gmra.mrb[28].mxu0 %vm1776_vm2, %v16893_v21 }
 0x1b9   : > { %14354 = vmatprep.mubr.msk.bf16.mxu0 %vm1776_vm2, %v16896_v22 }
 0x1c0   : > { %14355 = vmatmul.mubr.msk.bf16.gmra.mrb[32].mxu0 %vm1776_vm2, %v16905_v32 }
 0x1c1   : > { %14366 = vmatprep.mubr.msk.bf16.mxu0 %vm1776_vm2, %v2222_v34  ;;  %v22035_v34 = vlaneseq }
 0x1c3   : > { %v16976_v27 = vshrl.u32 %v22035_v34, 7 }
 0x1c5   : > { %22183 = vst [vmem:[#allocation18_spill] sm:$0xff] %v16976_v27  ;;  %v16987_v30 = vsub.s32 0, %v16976_v27 }
 0x1c7   : > { %22185 = vst [vmem:[#allocation19_spill] sm:$0xff] %v16987_v30 }
 0x1c8   : > { %14367 = vmatmul.mubr.msk.bf16.vlgmr.msra.gmra.mrb[4].mxu0 %vm1776_vm2, %v2224_v38  ;;  %v2522_v38 = vor.u32 %v2521_v31, %v2520_v23  ;;  %v22056_v23 = vshrl.u32 %v16794_v53, 16  ;;  %v2536_v31 = vrot.slane %v1669_v60, 1  ;;  %v22055_v60 = vshll.u32 %v16854_v12, 16 }
 0x1c9   : > { %14370 = vmatprep.mubr.msk.bf16.mxu0 %vm1776_vm2, %v2226_v40  ;;  %14399 = vmatpush3.bf16.msra.mxu0 %v15273_v18  ;;  %v2518_v18 = vrot.slane %v1628_v28, 2  ;;  %v2529_v28 = vrot.slane %v1649_v39, 2  ;;  %v13434_v40 = vld [vmem:[%s836_s23] sm:$0xff]   ;;  %v2532_v39 = vrot.slane %v1661_v50, 1 }
 0x1ca   : > { %14400 = vmatprep.subr.bf16.mxu0 %v15274_v41  ;;  %v2527_v33 = vsel %vm2516_vm4, %v2522_v38, %v16845_v9 }
 0x1cb   : > { %v2519_v37 = vor.u32 %v2518_v18, %v2517_v15  ;;  %v2534_v35 = vor.u32 %v2533_v47, %v2532_v39 }
 0x1cd   : > { %14401 = vmatpush3.bf16.msra.mxu0 %v15274_v41  ;;  %v2523_v24 = vsel %vm2516_vm4, %v2519_v37, %v2522_v38  ;;  %v2530_v41 = vor.u32 %v2529_v28, %v2528_v25  ;;  %v2540_v37 = vrot.slane %v22056_v23, 1  ;;  %v2541_v38 = vrot.slane %v1673_v61, 2 }
 0x1ce   : > { %14402 = vmatprep.subr.bf16.mxu0 %v15275_v26  ;;  %v22051_v61 = vshll.u32 %v16870_v16, 16 }
 0x1cf   : > { %v2542_v25 = vor.u32 %v2541_v38, %v2540_v37  ;;  %v22040_v37 = vshll.u32 %v16896_v22, 16  ;;  %v22038_v38 = vshrl.u32 %v16896_v22, 16 }
 0x1d0   : > { %14371 = vmatmul.mubr.msk.bf16.gmra.mrb[8].mxu0 %vm1776_vm2, %v2228_v46  ;;  %v2553_v47 = vrot.slane %v22051_v61, 2 }
 0x1d1   : > { %14374 = vmatprep.mubr.msk.bf16.mxu0 %vm1776_vm2, %v2230_v48  ;;  %14403 = vmatpush3.bf16.msra.mxu0 %v15275_v26  ;;  %v13435_v26 = vunpack.c.l.bf16 %v13434_v40  ;;  %v13436_v48 = vunpack.c.h.bf16 %v13434_v40  ;;  %v22052_v40 = vshrl.u32 %v16857_v13, 16 }
 0x1d2   : > { %14404 = vmatprep.subr.bf16.mxu0 %v15276_v49 }
 0x1d3   : > { %vm1038_vm5 = vcmp.gt.f32.partialorder %v13435_v26, 0.0  ;;  %vm1039_vm8 = vcmp.gt.f32.partialorder %v13436_v48, 0.0  ;;  %v2544_v26 = vrot.slane %v22053_v44, 1  ;;  %v2548_v48 = vrot.slane %v22052_v40, 1 }
 0x1d5   : > { %14405 = vmatpush3.bf16.msra.mxu0 %v15276_v49 }
 0x1d8   : > { %14375 = vmatmul.mubr.msk.bf16.gmra.mrb[12].mxu0 %vm1776_vm2, %v2232_v55  ;;  %v13441_v55 = vld [vmem:[%s836_s23 + $0x8] sm:$0xff]   ;;  %s22677_s23 = sld [smem:[#allocation117_spill]] }
 0x1d9   : > { %14378 = vmatprep.mubr.msk.bf16.mxu0 %vm1776_vm2, %v2234_v56  ;;  %v2531_v56 = vsel %vm2516_vm4, %v16845_v9, %v2530_v41  ;;  %v13439_v50 = vunpack.c.l.bf16 %v13441_v55 }
 0x1db   : > { %vm1040_vm10 = vcmp.gt.f32.partialorder %v13439_v50, 0.0 }
 0x1de   : > { %s852_s10 = scalar_lea.vmem %s22677_s23, %s12633_s6 }
 0x1e0   : > { %14379 = vmatmul.mubr.msk.bf16.gmra.mrb[16].mxu0 %vm1776_vm2, %v2236_v59 }
 0x1e1   : > { %14382 = vmatprep.mubr.msk.bf16.mxu0 %vm1776_vm2, %v2238_v62 }
 0x227   : > { %v975_v5 = vpop.xlane.xlu1 %974 }
 0x228   : > { %v971_v2 = vpop.xlane.xlu0 %970 }
 0x229   : > { %978 = vxpose.xlu0.b32.start [1/4] (short) (narrow) %v971_v2, 8  ;;  %v2240_v2 = vsel %vm2219_vm3, %v2237_v58, %v2239_v63 }
 0x22a   : > { %14383 = vmatmul.mubr.msk.bf16.gmra.mrb[20].mxu0 %vm1776_vm2, %v2240_v2 }
 0x22b   : > { %v977_v6 = vpop.xlane.xlu1 %976  ;;  %14386 = vmatprep.mubr.msk.bf16.mxu0 %vm1776_vm2, %v2242_v3 }
 0x22c   : > { %v973_v4 = vpop.xlane.xlu0 %972 }
 0x22d   : > { %979 = vxpose.xlu0.b32.cont [2/4] (short) (narrow) %v973_v4, 8  ;;  %v2243_v4 = vrot.slane %v16886_v20, 1 }
 0x22f   : > { %v954_v43 = vpop.xlane.xlu1 %953 }
 0x230   : > { %v952_v36 = vpop.xlane.xlu0 %951 }
 0x231   : > { %980 = vxpose.xlu0.b32.cont [3/4] (short) (narrow) %v975_v5, 8  ;;  %v2245_v5 = vrot.slane %v16893_v21, 1 }
 0x233   : > { %v2246_v7 = vsel %vm2219_vm3, %v2243_v4, %v2245_v5  ;;  %v2248_v11 = vsel %vm2219_vm3, %v2245_v5, %v2247_v8  ;;  %v958_v59 = vpop.xlane.xlu1 %957 }
 0x234   : > { %v956_v29 = vpop.xlane.xlu0 %955 }
 0x235   : > { %981 = vxpose.xlu0.b32.end [4/4] (short) (narrow) %v977_v6, 8  ;;  %v2244_v6 = vsel %vm2219_vm3, %v2241_v1, %v2243_v4  ;;  %v2535_v4 = vsel %vm2516_vm4, %v2530_v41, %v2534_v35  ;;  %v22049_v41 = vshrl.u32 %v16870_v16, 16 }
 0x236   : > { %14387 = vmatmul.mubr.msk.bf16.gmra.mrb[24].mxu0 %vm1776_vm2, %v2244_v6 }
 0x237   : > { %14390 = vmatprep.mubr.msk.bf16.mxu0 %vm1776_vm2, %v2246_v7  ;;  %v13440_v7 = vunpack.c.h.bf16 %v13441_v55  ;;  %v2552_v39 = vrot.slane %v22049_v41, 1  ;;  %v22045_v55 = vshrl.u32 %v16883_v19, 16 }
 0x239   : > { %vm1041_vm12 = vcmp.gt.f32.partialorder %v13440_v7, 0.0 }
 0x23e   : > { %14391 = vmatmul.mubr.msk.bf16.gmra.mrb[28].mxu0 %vm1776_vm2, %v2248_v11 }
 0x23f   : > { %14394 = vmatprep.mubr.msk.bf16.mxu0 %vm1776_vm2, %v2250_v14 }
 0x246   : > { %14395 = vmatmul.mubr.msk.bf16.gmra.mrb[32].mxu0 %vm1776_vm2, %v2249_v10 }
 0x247   : > { %14406 = vmatprep.mubr.msk.bf16.mxu0 %vm1776_vm2, %v2523_v24 }
 0x24e   : > { %14407 = vmatmul.mubr.msk.bf16.vlgmr.msra.gmra.mrb[4].mxu0 %vm1776_vm2, %v2527_v33 }
 0x24f   : > { %14410 = vmatprep.mubr.msk.bf16.mxu0 %vm1776_vm2, %v2531_v56  ;;  %v2554_v56 = vor.u32 %v2553_v47, %v2552_v39 }
 0x256   : > { %14411 = vmatmul.mubr.msk.bf16.gmra.mrb[8].mxu0 %vm1776_vm2, %v2535_v4 }
 0x2a9   : > { %v994_v45 = vpop.trf.xlu0 }
 0x2aa   : > { %v1013_v46 = vrot.slane %v994_v45, %v16987_v30  ;;  %v22048_v45 = vshrl.u32 %v16873_v17, 16 }
 0x2ac   : > { %v1014_v49 = vadd.f32 %v1013_v46, %v952_v36  ;;  %v1015_v52 = vadd.f32 %v1013_v46, %v954_v43  ;;  %v1016_v54 = vadd.f32 %v1013_v46, %v956_v29  ;;  %v1017_v1 = vadd.f32 %v1013_v46, %v958_v59 }
 0x2ad   : > { %v2537_v36 = vrot.slane %v1665_v51, 2  ;;  %v22054_v51 = vshll.u32 %v16857_v13, 16  ;;  %v22050_v43 = vshll.u32 %v16873_v17, 16  ;;  %v2545_v46 = vrot.slane %v22055_v60, 2 }
 0x2ae   : > { %vm1018_vm6 = vcmp.gt.f32.partialorder %v1014_v49, 0.0  ;;  %v1022_v57 = vmul.f32 0.2, %v1014_v49  ;;  %vm1019_vm7 = vcmp.gt.f32.partialorder %v1015_v52, 0.0  ;;  %v1023_v58 = vmul.f32 0.2, %v1015_v52 }
 0x2af   : > { %v1024_v63 = vmul.f32 0.2, %v1016_v54  ;;  %vm1020_vm9 = vcmp.gt.f32.partialorder %v1016_v54, 0.0  ;;  %v1025_v6 = vmul.f32 0.2, %v1017_v1  ;;  %vm1021_vm11 = vcmp.gt.f32.partialorder %v1017_v1, 0.0 }
 0x2b0   : > { %v1026_v42 = vsel %vm1018_vm6, %v1014_v49, %v1022_v57  ;;  %v1027_v62 = vsel %vm1019_vm7, %v1015_v52, %v1023_v58  ;;  %v2538_v24 = vor.u32 %v2537_v36, %v2536_v31  ;;  %v2549_v33 = vrot.slane %v22054_v51, 2 }
 0x2b1   : > { %v17002_v2 = vsel %vm1038_vm5, %v1026_v42, -1e+09  ;;  %v17006_v3 = vsel %vm1039_vm8, %v1027_v62, -1e+09  ;;  %v1028_v5 = vsel %vm1020_vm9, %v1016_v54, %v1024_v63  ;;  %v1029_v11 = vsel %vm1021_vm11, %v1017_v1, %v1025_v6 }
 0x2b2   : > { %v1046_v9 = vsel %vm884_vm0, %v17002_v2, -inf  ;;  %v1049_v8 = vsel %vm884_vm0, %v17006_v3, -inf  ;;  %v17012_v10 = vsel %vm1040_vm10, %v1028_v5, -1e+09  ;;  %v17016_v15 = vsel %vm1041_vm12, %v1029_v11, -1e+09 }
 0x2b3   : > { %1047 = vmax.xlane.f32.xlu1 %v1046_v9  ;;  %v1052_v14 = vsel %vm884_vm0, %v17012_v10, -inf  ;;  %v1055_v18 = vsel %vm884_vm0, %v17016_v15, -inf  ;;  %v2539_v28 = vsel %vm2516_vm4, %v2534_v35, %v2538_v24  ;;  %v2543_v29 = vsel %vm2516_vm4, %v2538_v24, %v2542_v25 }
 0x2b4   : > { %14414 = vmatprep.mubr.msk.bf16.mxu0 %vm1776_vm2, %v2539_v28  ;;  %v2546_v49 = vor.u32 %v2545_v46, %v2544_v26  ;;  %v2550_v52 = vor.u32 %v2549_v33, %v2548_v48  ;;  %v22047_v54 = vshll.u32 %v16883_v19, 16  ;;  %v2556_v57 = vrot.slane %v22048_v45, 1 }
 0x2b5   : > { %14415 = vmatmul.mubr.msk.bf16.gmra.mrb[12].mxu0 %vm1776_vm2, %v2543_v29  ;;  %v2557_v58 = vrot.slane %v22050_v43, 2  ;;  %v2560_v35 = vrot.slane %v22045_v55, 1  ;;  %v22046_v1 = vshll.u32 %v16886_v20, 16  ;;  %v22044_v9 = vshrl.u32 %v16886_v20, 16 }
 0x2b6   : > { %v2547_v59 = vsel %vm2516_vm4, %v2542_v25, %v2546_v49  ;;  %v2551_v50 = vsel %vm2516_vm4, %v2546_v49, %v2550_v52  ;;  %v2561_v42 = vrot.slane %v22047_v54, 2  ;;  %v2555_v62 = vsel %vm2516_vm4, %v2550_v52, %v2554_v56 }
 0x2b7   : > { %1050 = vmax.xlane.f32.xlu1 %v1049_v8  ;;  %14418 = vmatprep.mubr.msk.bf16.mxu0 %vm1776_vm2, %v2547_v59  ;;  %v2558_v63 = vor.u32 %v2557_v58, %v2556_v57  ;;  %v22042_v5 = vshll.u32 %v16893_v21, 16  ;;  %v22039_v6 = vshrl.u32 %v16893_v21, 16  ;;  %v2564_v8 = vrot.slane %v22044_v9, 1 }
 0x2b8   : > { %v2562_v4 = vor.u32 %v2561_v42, %v2560_v35  ;;  %v2565_v11 = vrot.slane %v22046_v1, 2  ;;  %v22037_v25 = vshll.u32 %v16905_v32, 16  ;;  %v22036_v28 = vshrl.u32 %v16905_v32, 16 }
 0x2b9   : > { %v2559_v7 = vsel %vm2516_vm4, %v2554_v56, %v2558_v63  ;;  %v2569_v31 = vrot.slane %v22042_v5, 2  ;;  %v2572_v26 = vrot.slane %v22038_v38, 1  ;;  %v2573_v46 = vrot.slane %v22040_v37, 2 }
 0x2ba   : > { %v2566_v36 = vor.u32 %v2565_v11, %v2564_v8  ;;  %v2576_v33 = vrot.slane %v22036_v28, 1  ;;  %v2577_v39 = vrot.slane %v22037_v25, 2  ;;  %vm3351_vm8 = vcmask 1044480  }
 0x2bb   : > { %1053 = vmax.xlane.f32.xlu1 %v1052_v14  ;;  %v2563_v14 = vsel %vm2516_vm4, %v2558_v63, %v2562_v4  ;;  %v2574_v47 = vor.u32 %v2573_v46, %v2572_v26  ;;  %v15279_v26 = vld [vmem:[%s22015_s9 + $0x148] sm:$0xff]  }
 0x2bc   : > { %v2567_v29 = vsel %vm2516_vm4, %v2562_v4, %v2566_v36  ;;  %v2578_v49 = vor.u32 %v2577_v39, %v2576_v33  ;;  %v15280_v46 = vld [vmem:[%s22015_s9 + $0x108] sm:$0xff]   ;;  %v15282_v33 = vld [vmem:[%s22015_s9 + $0x110] sm:$0xff]   ;;  %v15283_v39 = vld [vmem:[%s22015_s9 + $0x158] sm:$0xff]  }
 0x2bd   : > { %14419 = vmatmul.mubr.msk.bf16.gmra.mrb[16].mxu0 %vm1776_vm2, %v2551_v50 }
 0x2be   : > { %14422 = vmatprep.mubr.msk.bf16.mxu0 %vm1776_vm2, %v2555_v62  ;;  %v2579_v56 = vsel %vm2516_vm4, %v2574_v47, %v2578_v49 }
 0x2bf   : > { %1056 = vmax.xlane.f32.xlu1 %v1055_v18  ;;  %v2568_v18 = vrot.slane %v22039_v6, 1 }
 0x2c1   : > { %v2570_v24 = vor.u32 %v2569_v31, %v2568_v18 }
 0x2c3   : > { %v2571_v48 = vsel %vm2516_vm4, %v2566_v36, %v2570_v24  ;;  %v2575_v52 = vsel %vm2516_vm4, %v2570_v24, %v2574_v47  ;;  %v15277_v24 = vld [vmem:[%s22015_s9 + $0x140] sm:$0xff]   ;;  %v15284_v47 = vld [vmem:[%s22015_s9 + $0x118] sm:$0xff]  }
 0x2c4   : > { %13754 = vmatprep.subr.bf16.mxu0 %v15277_v24 }
 0x2c5   : > { %14423 = vmatmul.mubr.msk.bf16.gmra.mrb[20].mxu0 %vm1776_vm2, %v2559_v7 }
 0x2c6   : > { %14426 = vmatprep.mubr.msk.bf16.mxu0 %vm1776_vm2, %v2563_v14 }
 0x2cd   : > { %14427 = vmatmul.mubr.msk.bf16.gmra.mrb[24].mxu0 %vm1776_vm2, %v2567_v29  ;;  %v15278_v29 = vld [vmem:[%s22015_s9 + $0x100] sm:$0xff]  }
 0x2ce   : > { %14430 = vmatprep.mubr.msk.bf16.mxu0 %vm1776_vm2, %v2571_v48  ;;  %13755 = vmatpush3.bf16.msra.mxu0 %v15278_v29  ;;  %v15281_v48 = vld [vmem:[%s22015_s9 + $0x150] sm:$0xff]  }
 0x2cf   : > { %13756 = vmatprep.subr.bf16.mxu0 %v15279_v26  ;;  %v15289_v29 = vld [vmem:[%s22015_s9 + $0x170] sm:$0xff]  }
 0x2d0   : > { %v15290_v26 = vld [vmem:[%s22015_s9 + $0x130] sm:$0xff]  }
 0x2d2   : > { %13757 = vmatpush3.bf16.msra.mxu0 %v15280_v46  ;;  %v15291_v46 = vld [vmem:[%s22015_s9 + $0x178] sm:$0xff]  }
 0x2d3   : > { %13758 = vmatprep.subr.bf16.mxu0 %v15281_v48 }
 0x2d5   : > { %14431 = vmatmul.mubr.msk.bf16.gmra.mrb[28].mxu0 %vm1776_vm2, %v2575_v52 }
 0x2d6   : > { %14434 = vmatprep.mubr.msk.bf16.mxu0 %vm1776_vm2, %v2579_v56  ;;  %13759 = vmatpush3.bf16.msra.mxu0 %v15282_v33 }
 0x2d7   : > { %13760 = vmatprep.subr.bf16.mxu0 %v15283_v39 }
 0x2da   : > { %13761 = vmatpush3.bf16.msra.mxu0 %v15284_v47 }
 0x2dd   : > { %14435 = vmatmul.mubr.msk.bf16.gmra.mrb[32].mxu0 %vm1776_vm2, %v2578_v49  ;;  %v17153_v49 = vld [vmem:[%s22014_s8] ss:$0 sm:$0xff] }
 0x321   : > { %v14408_v52 = vpop.f32.mrb[4].mxu0 }
 0x322   : > { %v2853_v56 = vadd.f32 %v14408_v52, %v17153_v49 }
 0x340   : > { %v1048_v57 = vpop.xlane.xlu1 %1047 }
 0x341   : > { %v1058_v58 = vsub.f32 %v17002_v2, %v1048_v57  ;;  %v15285_v57 = vld [vmem:[%s22015_s9 + $0x160] sm:$0xff]  }
 0x342   : > { %13762 = vmatprep.subr.bf16.mxu0 %v15285_v57 }
 0x343   : > { %v1062_v59 = vmul.f32 1.442695, %v1058_v58  ;;  %v2686_v58 = vpop.f32.mrb[5].mxu0 }
 0x344   : > { %v1051_v50 = vpop.xlane.xlu1 %1050 }
 0x345   : > { %16166 = vpow2.f32 %v1062_v59  ;;  %v1059_v35 = vsub.f32 %v17006_v3, %v1051_v50  ;;  %v15286_v59 = vld [vmem:[%s22015_s9 + $0x120] sm:$0xff]   ;;  %v2851_v50 = vadd.f32 %v17153_v49, %v2686_v58 }
 0x346   : > { %13763 = vmatpush3.bf16.msra.mxu0 %v15286_v59  ;;  %v15292_v59 = vld [vmem:[%s22015_s9 + $0x138] sm:$0xff]  }
 0x347   : > { %v1064_v42 = vmul.f32 1.442695, %v1059_v35  ;;  %v14409_v35 = vpop.f32.mrb[6].mxu0 }
 0x348   : > { %v1054_v62 = vpop.xlane.xlu1 %1053 }
 0x349   : > { %16168 = vpow2.f32 %v1064_v42  ;;  %v1060_v63 = vsub.f32 %v17012_v10, %v1054_v62  ;;  %v2885_v42 = vmax.f32 %v2853_v56, 0.0  ;;  %v2854_v62 = vadd.f32 %v14409_v35, %v17153_v49 }
 0x34b   : > { %v1066_v4 = vmul.f32 1.442695, %v1060_v63  ;;  %v2689_v63 = vpop.f32.mrb[7].mxu0 }
 0x34c   : > { %v1057_v7 = vpop.xlane.xlu1 %1056  ;;  %v14412_v24 = vpop.f32.mrb[8].mxu0 }
 0x34d   : > { %16170 = vpow2.f32 %v1066_v4  ;;  %v1061_v8 = vsub.f32 %v17016_v15, %v1057_v7  ;;  %v2883_v4 = vmax.f32 %v2851_v50, 0.0  ;;  %v2852_v7 = vadd.f32 %v17153_v49, %v2689_v63  ;;  %v2702_v33 = vpop.f32.mrb[9].mxu0 }
 0x34e   : > { %v2857_v48 = vadd.f32 %v14412_v24, %v17153_v49  ;;  %v2855_v39 = vadd.f32 %v17153_v49, %v2702_v33  ;;  %v14413_v47 = vpop.f32.mrb[10].mxu0 }
 0x34f   : > { %v17110_v11 = vpop.eup %16166  ;;  %v1068_v14 = vmul.f32 1.442695, %v1061_v8  ;;  %v15287_v8 = vld [vmem:[%s22015_s9 + $0x168] sm:$0xff]   ;;  %v2858_v57 = vadd.f32 %v14413_v47, %v17153_v49  ;;  %v2705_v58 = vpop.f32.mrb[11].mxu0 }
 0x350   : > { %v1070_v2 = vsel %vm884_vm0, %v17110_v11, 0.0  ;;  %13764 = vmatprep.subr.bf16.mxu0 %v15287_v8  ;;  %v2889_v56 = vmax.f32 %v2857_v48, 0.0 }
 0x351   : > { %16172 = vpow2.f32 %v1068_v14  ;;  %1071 = vadd.xlane.f32.xlu1 %v1070_v2  ;;  %v2886_v14 = vmax.f32 %v2854_v62, 0.0  ;;  %v15288_v2 = vld [vmem:[%s22015_s9 + $0x128] sm:$0xff]   ;;  %v2856_v62 = vadd.f32 %v17153_v49, %v2705_v58 }
 0x352   : > { %13765 = vmatpush3.bf16.msra.mxu0 %v15288_v2 }
 0x353   : > { %v17114_v18 = vpop.eup %16168  ;;  %13766 = vmatprep.subr.bf16.mxu0 %v15289_v29  ;;  %v2888_v2 = vmax.f32 %v2856_v62, 0.0 }
 0x354   : > { %v1073_v3 = vsel %vm884_vm0, %v17114_v18, 0.0 }
 0x355   : > { %1074 = vadd.xlane.f32.xlu1 %v1073_v3  ;;  %v2884_v3 = vmax.f32 %v2852_v7, 0.0 }
 0x356   : > { %13767 = vmatpush3.bf16.msra.mxu0 %v15290_v26 }
 0x357   : > { %v17118_v10 = vpop.eup %16170  ;;  %13768 = vmatprep.subr.bf16.mxu0 %v15291_v46 }
 0x358   : > { %v1076_v31 = vsel %vm884_vm0, %v17118_v10, 0.0 }
 0x359   : > { %1077 = vadd.xlane.f32.xlu1 %v1076_v31  ;;  %v17171_v31 = vpack.c.bf16 %v2886_v14, %v2885_v42  ;;  %v2887_v42 = vmax.f32 %v2855_v39, 0.0 }
 0x35a   : > { %13769 = vmatpush3.bf16.msra.mxu0 %v15292_v59 }
 0x35b   : > { %v17122_v15 = vpop.eup %16172  ;;  %22186 = vst [vmem:[#allocation20_spill] sm:$0xff] %v17171_v31  ;;  %v17197_v35 = vshll.u32 %v17171_v31, 16  ;;  %v17201_v63 = vshrl.u32 %v17171_v31, 16  ;;  %v17210_v46 = vpack.c.bf16 %v2888_v2, %v2887_v42  ;;  %v3225_v33 = vrot.slane %v17171_v31, 2 }
 0x35c   : > { %v1079_v36 = vsel %vm884_vm0, %v17122_v15, 0.0 }
 0x35d   : > { %1080 = vadd.xlane.f32.xlu1 %v1079_v36  ;;  %v17173_v36 = vpack.c.bf16 %v2884_v3, %v2883_v4  ;;  %22189 = vst [vmem:[#allocation23_spill] sm:$0xff] %v17197_v35  ;;  %22190 = vst [vmem:[#allocation24_spill] sm:$0xff] %v17201_v63  ;;  %v2890_v4 = vmax.f32 %v2858_v57, 0.0  ;;  %v3276_v14 = vrot.slane %v17197_v35, 3  ;;  %v3275_v3 = vrot.slane %v17201_v63, 2 }
 0x35e   : > { %22192 = vst [vmem:[#allocation26_spill] sm:$0xff] %v17210_v46  ;;  %v17216_v57 = vshll.u32 %v17210_v46, 16  ;;  %v3227_v62 = vrot.slane %v17210_v46, 2 }
 0x35f   : > { %22187 = vst [vmem:[#allocation21_spill] sm:$0xff] %v17173_v36  ;;  %v17187_v52 = vshrl.u32 %v17173_v36, 16  ;;  %v17194_v50 = vshll.u32 %v17173_v36, 16  ;;  %v17207_v24 = vpack.c.bf16 %v2890_v4, %v2889_v56  ;;  %v3224_v26 = vrot.slane %v17173_v36, 2 }
 0x360   : > { %v3277_v48 = vor.u32 %v3276_v14, %v3275_v3  ;;  %v17219_v56 = vshrl.u32 %v17210_v46, 16  ;;  %v3280_v59 = vrot.slane %v17216_v57, 3  ;;  %v3228_v2 = vsel %vm3223_vm14, %v3225_v33, %v3227_v62 }
 0x361   : > { %22188 = vst [vmem:[#allocation22_spill] sm:$0xff] %v17194_v50  ;;  %v3272_v7 = vrot.slane %v17187_v52, 2  ;;  %v3273_v8 = vrot.slane %v17194_v50, 3  ;;  %22191 = vst [vmem:[#allocation25_spill] sm:$0xff] %v17207_v24  ;;  %v3226_v47 = vsel %vm3223_vm14, %v3224_v26, %v3225_v33  ;;  %v17229_v26 = vshll.u32 %v17207_v24, 16 }
 0x362   : > { %v3279_v58 = vrot.slane %v17219_v56, 2 }
 0x363   : > { %v3274_v29 = vor.u32 %v3273_v8, %v3272_v7  ;;  %v3412_v27 = vrot.slane %v17229_v26, 4 }
 0x364   : > { %v3281_v42 = vor.u32 %v3280_v59, %v3279_v58  ;;  %v17233_v59 = vshrl.u32 %v17207_v24, 16 }
 0x365   : > { %v3278_v39 = vsel %vm3271_vm13, %v3274_v29, %v3277_v48 }
 0x366   : > { %4221 = vmatprep.mubr.bf16.mxu0 %v3278_v39  ;;  %v3282_v7 = vsel %vm3271_vm13, %v3277_v48, %v3281_v42 }
 0x367   : > { %4222 = vmatmul.mubr.bf16.vlgmr.msra.gmra.mrb[36].mxu0 %v3226_v47 }
 0x368   : > { %4229 = vmatprep.mubr.bf16.mxu0 %v3282_v7  ;;  %v3284_v7 = vrot.slane %v17229_v26, 3 }
 0x36f   : > { %4230 = vmatmul.mubr.bf16.gmra.mrb[40].mxu0 %v3228_v2 }
 0x388   : > { %v14416_v4 = vpop.f32.mrb[12].mxu0 }
 0x389   : > { %v2861_v8 = vadd.f32 %v14416_v4, %v17153_v49  ;;  %v2718_v14 = vpop.f32.mrb[13].mxu0 }
 0x38a   : > { %v2859_v3 = vadd.f32 %v17153_v49, %v2718_v14  ;;  %v14417_v29 = vpop.f32.mrb[14].mxu0  ;;  %v3283_v14 = vrot.slane %v17233_v59, 2 }
 0x38b   : > { %v2893_v39 = vmax.f32 %v2861_v8, 0.0  ;;  %v2862_v47 = vadd.f32 %v14417_v29, %v17153_v49  ;;  %v2721_v58 = vpop.f32.mrb[15].mxu0  ;;  %v3229_v8 = vrot.slane %v17207_v24, 2 }
 0x38c   : > { %v2891_v48 = vmax.f32 %v2859_v3, 0.0  ;;  %v2860_v4 = vadd.f32 %v17153_v49, %v2721_v58  ;;  %v3285_v25 = vor.u32 %v3284_v7, %v3283_v14 }
 0x38d   : > { %v2894_v33 = vmax.f32 %v2862_v47, 0.0  ;;  %v3230_v3 = vsel %vm3223_vm14, %v3227_v62, %v3229_v8 }
 0x38e   : > { %v2892_v34 = vmax.f32 %v2860_v4, 0.0  ;;  %v3286_v38 = vsel %vm3271_vm13, %v3281_v42, %v3285_v25 }
 0x38f   : > { %v17238_v28 = vpack.c.bf16 %v2894_v33, %v2893_v39  ;;  %4237 = vmatprep.mubr.bf16.mxu0 %v3286_v38  ;;  %v22041_v38 = vrot.slane %v17216_v57, 1  ;;  %v2958_v33 = vrot.slane %v17229_v26, 1 }
 0x390   : > { %v17241_v29 = vpack.c.bf16 %v2892_v34, %v2891_v48  ;;  %4238 = vmatmul.mubr.bf16.gmra.mrb[44].mxu0 %v3230_v3 }
 0x391   : > { %22193 = vst [vmem:[#allocation27_spill] sm:$0xff] %v17238_v28  ;;  %v17258_v62 = vshll.u32 %v17238_v28, 16  ;;  %v17261_v7 = vshrl.u32 %v17238_v28, 16  ;;  %v22043_v6 = vrot.slane %v17238_v28, 2 }
 0x392   : > { %22194 = vst [vmem:[#allocation28_spill] sm:$0xff] %v17241_v29  ;;  %v17246_v2 = vshll.u32 %v17241_v29, 16  ;;  %v17249_v47 = vshrl.u32 %v17241_v29, 16  ;;  %v3231_v34 = vrot.slane %v17241_v29, 2 }
 0x393   : > { %v3291_v14 = vrot.slane %v17261_v7, 2  ;;  %v3292_v3 = vrot.slane %v17258_v62, 3  ;;  %v2974_v5 = vrot.slane %v17258_v62, 1 }
 0x394   : > { %v3287_v39 = vrot.slane %v17249_v47, 2  ;;  %v3288_v58 = vrot.slane %v17246_v2, 3  ;;  %v3232_v42 = vsel %vm3223_vm14, %v3229_v8, %v3231_v34  ;;  %v2962_v8 = vor.u32 %v17233_v59, %v2958_v33 }
 0x396   : > { %v3289_v4 = vor.u32 %v3288_v58, %v3287_v39  ;;  %v2966_v39 = vrot.slane %v17246_v2, 1  ;;  %v17271_v58 = vor.u32 %v3292_v3, %v3291_v14  ;;  %v3145_v3 = vrot.slane %v17219_v56, 1 }
 0x398   : > { %v3290_v48 = vsel %vm3271_vm13, %v3285_v25, %v3289_v4  ;;  %v2954_v25 = vor.u32 %v17219_v56, %v22041_v38  ;;  %v3294_v37 = vsel %vm3271_vm13, %v3289_v4, %v17271_v58  ;;  %v3234_v38 = vsel %vm3223_vm14, %v3231_v34, %v22043_v6 }
 0x399   : > { %4245 = vmatprep.mubr.bf16.mxu0 %v3290_v48  ;;  %v2970_v14 = vor.u32 %v17249_v47, %v2966_v39  ;;  %v3149_v4 = vrot.slane %v17233_v59, 1  ;;  %v3150_v34 = vrot.slane %v17229_v26, 2 }
 0x39a   : > { %4246 = vmatmul.mubr.bf16.gmra.mrb[48].mxu0 %v3232_v42  ;;  %v17274_v48 = vsel %vm1624_vm1, %v2954_v25, %v2958_v33  ;;  %v17278_v42 = vsel %vm1624_vm1, %v2962_v8, %v2966_v39  ;;  %v17288_v33 = vor.u32 %v17261_v7, %v2974_v5  ;;  %v3146_v25 = vrot.slane %v17216_v57, 2 }
 0x39b   : > { %4253 = vmatprep.mubr.bf16.mxu0 %v3294_v37  ;;  %v17293_v8 = vsel %vm1624_vm1, %v2970_v14, %v2974_v5  ;;  %v3154_v39 = vrot.slane %v17246_v2, 2  ;;  %v3151_v6 = vor.u32 %v3150_v34, %v3149_v4  ;;  %v17308_v5 = vpop.f32.mrb[16].mxu0  ;;  %v3157_v14 = vrot.slane %v17261_v7, 1 }
 0x39c   : > { %v17295_v37 = vor.u32 %v3146_v25, %v3145_v3  ;;  %v3158_v3 = vrot.slane %v17258_v62, 2  ;;  %v17318_v4 = vpop.f32.mrb[17].mxu0 }
 0x39d   : > { %v17320_v34 = vpop.f32.mrb[18].mxu0 }
 0x39e   : > { %22195 = vst [vmem:[#allocation29_spill] sm:$0xff] %v17295_v37  ;;  %v17303_v55 = vsel %vm2516_vm4, %v17295_v37, %v3151_v6  ;;  %v17312_v25 = vor.u32 %v3158_v3, %v3157_v14  ;;  %v3407_v3 = vrot.slane %v17219_v56, 3  ;;  %v3411_v56 = vrot.slane %v17233_v59, 3 }
 0x39f   : > { %22196 = vst [vmem:[#allocation30_spill] sm:$0xff] %v17303_v55 }
 0x3a0   : > { %22198 = vst [vmem:[#allocation32_spill] sm:$0xff] %v17312_v25  ;;  %v3413_v37 = vor.u32 %v3412_v27, %v3411_v56  ;;  %v3420_v27 = vrot.slane %v17258_v62, 4 }
 0x3a2   : > { %4254 = vmatmul.mubr.bf16.gmra.mrb[52].mxu0 %v3234_v38  ;;  %v3153_v38 = vrot.slane %v17249_v47, 1 }
 0x3a4   : > { %v3155_v9 = vor.u32 %v3154_v39, %v3153_v38  ;;  %v17322_v38 = vpop.f32.mrb[19].mxu0 }
 0x3a6   : > { %v17306_v1 = vsel %vm2516_vm4, %v3151_v6, %v3155_v9  ;;  %v17316_v54 = vsel %vm2516_vm4, %v3155_v9, %v17312_v25  ;;  %v17324_v6 = vpop.f32.mrb[20].mxu0  ;;  %v3408_v9 = vrot.slane %v17216_v57, 4 }
 0x3a7   : > { %22197 = vst [vmem:[#allocation31_spill] sm:$0xff] %v17306_v1  ;;  %22199 = vst [vmem:[#allocation33_spill] sm:$0xff] %v17316_v54  ;;  %v17326_v39 = vpop.f32.mrb[21].mxu0  ;;  %v3415_v54 = vrot.slane %v17249_v47, 3 }
 0x3a8   : > { %v17328_v45 = vpop.f32.mrb[22].mxu0  ;;  %v17340_v40 = vor.u32 %v3408_v9, %v3407_v3  ;;  %v3416_v3 = vrot.slane %v17246_v2, 4  ;;  %v3419_v2 = vrot.slane %v17261_v7, 3  ;;  %v22207_v7 = vshrl.u32 %v16794_v53, 16  ;;  %v16191_v53 = vld [vmem:[%s22181_s27 + $0x28] sm:$0xff]  }
 0x3a9   : > { %v17330_v41 = vpop.f32.mrb[23].mxu0 }
 0x3aa   : > { %v17332_v14 = vpop.f32.mrb[24].mxu0  ;;  %22200 = vst [vmem:[#allocation34_spill] sm:$0xff] %v17340_v40  ;;  %v17366_v59 = vsel %vm3399_vm15, %v17340_v40, %v3413_v37 }
 0x3ab   : > { %v17336_v43 = vpop.f32.mrb[25].mxu0  ;;  %22204 = vst [vmem:[#allocation38_spill] sm:$0xff] %v17366_v59 }
 0x3ac   : > { %v17338_v61 = vpop.f32.mrb[26].mxu0 }
 0x3ad   : > { %v17342_v44 = vpop.f32.mrb[27].mxu0 }
 0x3ae   : > { %v17344_v51 = vpop.f32.mrb[28].mxu0 }
 0x3af   : > { %v17346_v60 = vpop.f32.mrb[29].mxu0 }
 0x3b0   : > { %22201 = vst [vmem:[#allocation35_spill] sm:$0xff] %v17346_v60  ;;  %v17348_v23 = vpop.f32.mrb[30].mxu0 }
 0x3b1   : > { %22202 = vst [vmem:[#allocation36_spill] sm:$0xff] %v17348_v23  ;;  %v17350_v30 = vpop.f32.mrb[31].mxu0  ;;  %v3417_v23 = vor.u32 %v3416_v3, %v3415_v54 }
 0x3b2   : > { %v17355_v1 = vpop.f32.mrb[32].mxu0 }
 0x3b3   : > { %v17358_v55 = vpop.f32.mrb[33].mxu0  ;;  %v17369_v26 = vsel %vm3399_vm15, %v3413_v37, %v3417_v23 }
 0x3b4   : > { %v17360_v25 = vpop.f32.mrb[34].mxu0  ;;  %22205 = vst [vmem:[#allocation39_spill] sm:$0xff] %v17369_v26 }
 0x3b5   : > { %22203 = vst [vmem:[#allocation37_spill] sm:$0xff] %v17360_v25  ;;  %v17362_v60 = vpop.f32.mrb[35].mxu0  ;;  %v17373_v25 = vor.u32 %v3420_v27, %v3419_v2  ;;  %v1679_v2 = vor.u32 %v22207_v7, %v16819_v0  ;;  %v16192_v0 = vld [vmem:[%s22181_s27 + $0x30] sm:$0xff]  }
 0x3b7   : > { %v17377_v54 = vsel %vm3399_vm15, %v3417_v23, %v17373_v25  ;;  %v22208_v23 = vshll.u32 %v16854_v12, 16 }
 0x3b8   : > { %22206 = vst [vmem:[#allocation40_spill] sm:$0xff] %v17377_v54 }
 0x3b9   : > { %v1683_v27 = vrot.slane %v22208_v23, 1  ;;  %v22213_v23 = vshll.u32 %v16873_v17, 16 }
 0x3de   : > { %v1072_v9 = vpop.xlane.xlu1 %1071 }
 0x3df   : > { %16174 = vrcp.f32 %v1072_v9 }
 0x3e2   : > { %v1075_v47 = vpop.xlane.xlu1 %1074 }
 0x3e3   : > { %16176 = vrcp.f32 %v1075_v47 }
 0x3e6   : > { %v1078_v56 = vpop.xlane.xlu1 %1077 }
 0x3e7   : > { %16178 = vrcp.f32 %v1078_v56 }
 0x3e9   : > { %v16175_v59 = vpop.eup %16174 }
 0x3ea   : > { %v1081_v3 = vpop.xlane.xlu1 %1080  ;;  %v1083_v37 = vmul.f32 %v16175_v59, %v17110_v11  ;;  %v1684_v11 = vsel %vm1624_vm1, %v1679_v2, %v1683_v27 }
 0x3eb   : > { %16180 = vrcp.f32 %v1081_v3 }
 0x3ed   : > { %v16177_v9 = vpop.eup %16176 }
 0x3ee   : > { %v1085_v47 = vmul.f32 %v16177_v9, %v17114_v18  ;;  %v16190_v18 = vld [vmem:[%s22181_s27 + $0x20] sm:$0xff]  }
 0x3f0   : > { %v1090_v26 = vpack.c.bf16 %v1085_v47, %v1083_v37  ;;  %v22212_v37 = vshll.u32 %v16870_v16, 16 }
 0x3f1   : > { %v16179_v62 = vpop.eup %16178 }
 0x3f2   : > { %14274 = vmatprep.mubr.msk.bf16.mxu1 %vm884_vm0, %v1090_v26  ;;  %v1087_v54 = vmul.f32 %v16179_v62, %v17118_v10  ;;  %v16193_v26 = vld [vmem:[%s22181_s27 + $0x38] sm:$0xff]   ;;  %v1699_v47 = vrot.slane %v22212_v37, 1  ;;  %v15293_v62 = vld [vmem:[%s22015_s9 + $0x40] sm:$0xff]  }
 0x3f5   : > { %v16181_v56 = vpop.eup %16180 }
 0x3f6   : > { %v1089_v3 = vmul.f32 %v16181_v56, %v17122_v15  ;;  %v22210_v15 = vshrl.u32 %v16854_v12, 16  ;;  %v15294_v12 = vld [vmem:[%s22015_s9] sm:$0xff]   ;;  %v22214_v56 = vshrl.u32 %v16870_v16, 16  ;;  %v15298_v16 = vld [vmem:[%s22015_s9 + $0x10] sm:$0xff]  }
 0x3f8   : > { %v1091_v40 = vpack.c.bf16 %v1089_v3, %v1087_v54  ;;  %v1687_v59 = vor.u32 %v22210_v15, %v1683_v27  ;;  %v22211_v54 = vshrl.u32 %v16857_v13, 16  ;;  %v1707_v27 = vrot.slane %v22213_v23, 1 }
 0x3f9   : > { %v1703_v3 = vor.u32 %v22214_v56, %v1699_v47  ;;  %v22221_v56 = vshll.u32 %v16896_v22, 16 }
 0x3fa   : > { %14275 = vmatmul.mubr.msk.bf16.vlgmr.msra.gmra.mrb[0].mxu1 %vm884_vm0, %v1091_v40  ;;  %v22209_v40 = vshll.u32 %v16857_v13, 16  ;;  %v15295_v13 = vld [vmem:[%s22015_s9 + $0x48] sm:$0xff]  }
 0x3fb   : > { %14538 = vmatpush3.bf16.msra.mxu1 %v16190_v18  ;;  %14298 = vmatprep.mubr.msk.bf16.mxu1 %vm1776_vm2, %v1684_v11  ;;  %v15296_v11 = vld [vmem:[%s22015_s9 + $0x8] sm:$0xff]   ;;  %v22215_v18 = vshrl.u32 %v16873_v17, 16  ;;  %v1708_v15 = vsel %vm1624_vm1, %v1703_v3, %v1707_v27  ;;  %v15299_v17 = vld [vmem:[%s22015_s9 + $0x58] sm:$0xff]   ;;  %v1739_v3 = vrot.slane %v22221_v56, 1 }
 0x3fc   : > { %14535 = vmatprep.subr.bf16.mxu1 %v16191_v53  ;;  %v1691_v10 = vrot.slane %v22209_v40, 1 }
 0x3fe   : > { %v1695_v9 = vor.u32 %v22211_v54, %v1691_v10  ;;  %v1692_v7 = vsel %vm1624_vm1, %v1687_v59, %v1691_v10  ;;  %v15297_v10 = vld [vmem:[%s22015_s9 + $0x50] sm:$0xff]  }
 0x3ff   : > { %14539 = vmatpush3.bf16.msra.mxu1 %v16191_v53  ;;  %v1711_v53 = vor.u32 %v22215_v18, %v1707_v27 }
 0x400   : > { %14536 = vmatprep.subr.bf16.mxu1 %v16192_v0  ;;  %v1700_v2 = vsel %vm1624_vm1, %v1695_v9, %v1699_v47  ;;  %v22218_v9 = vshrl.u32 %v16883_v19, 16  ;;  %v15300_v47 = vld [vmem:[%s22015_s9 + $0x18] sm:$0xff]  }
 0x403   : > { %14540 = vmatpush3.bf16.msra.mxu1 %v16192_v0  ;;  %v22216_v0 = vshll.u32 %v16883_v19, 16  ;;  %v15302_v19 = vld [vmem:[%s22015_s9 + $0x20] sm:$0xff]  }
 0x404   : > { %14537 = vmatprep.subr.bf16.mxu1 %v16193_v26 }
 0x405   : > { %v1715_v40 = vrot.slane %v22216_v0, 1  ;;  %v22223_v0 = vshrl.u32 %v16896_v22, 16  ;;  %v15307_v22 = vld [vmem:[%s22015_s9 + $0x78] sm:$0xff]  }
 0x407   : > { %14541 = vmatpush3.bf16.msra.mxu1 %v16193_v26  ;;  %v1716_v59 = vsel %vm1624_vm1, %v1711_v53, %v1715_v40  ;;  %v22217_v26 = vshll.u32 %v16886_v20, 16  ;;  %v1719_v37 = vor.u32 %v22218_v9, %v1715_v40  ;;  %v15304_v53 = vld [vmem:[%s22015_s9 + $0x28] sm:$0xff]   ;;  %v1743_v40 = vor.u32 %v22223_v0, %v1739_v3  ;;  %v15309_v9 = vld [vmem:[%s22015_s9 + $0xc0] sm:$0xff]  }
 0x408   : > { %13530 = vmatprep.subr.bf16.mxu1 %v15293_v62  ;;  %v22219_v62 = vshrl.u32 %v16886_v20, 16  ;;  %v15303_v20 = vld [vmem:[%s22015_s9 + $0x68] sm:$0xff]  }
 0x409   : > { %v1723_v54 = vrot.slane %v22217_v26, 1  ;;  %v2937_v26 = vrot.slane %v17194_v50, 1 }
 0x40a   : > { %14299 = vmatmul.mubr.msk.bf16.vlgmr.msra.gmra.mrb[4].mxu1 %vm1776_vm2, %v1692_v7 }
 0x40b   : > { %14302 = vmatprep.mubr.msk.bf16.mxu1 %vm1776_vm2, %v1700_v2  ;;  %13531 = vmatpush3.bf16.msra.mxu1 %v15294_v12  ;;  %v1727_v7 = vor.u32 %v22219_v62, %v1723_v54  ;;  %v22220_v12 = vshll.u32 %v16893_v21, 16  ;;  %v1724_v23 = vsel %vm1624_vm1, %v1719_v37, %v1723_v54  ;;  %v15308_v54 = vld [vmem:[%s22015_s9 + $0x38] sm:$0xff]   ;;  %v22225_v37 = vshrl.u32 %v16905_v32, 16 }
 0x40c   : > { %13532 = vmatprep.subr.bf16.mxu1 %v15295_v13  ;;  %v15301_v13 = vld [vmem:[%s22015_s9 + $0x60] sm:$0xff]   ;;  %v2938_v62 = vor.u32 %v2937_v26, %v17187_v52 }
 0x40d   : > { %v1731_v2 = vrot.slane %v22220_v12, 1 }
 0x40f   : > { %13533 = vmatpush3.bf16.msra.mxu1 %v15296_v11  ;;  %v1732_v27 = vsel %vm1624_vm1, %v1727_v7, %v1731_v2  ;;  %v22222_v11 = vshrl.u32 %v16893_v21, 16  ;;  %v15306_v21 = vld [vmem:[%s22015_s9 + $0x30] sm:$0xff]   ;;  %v2942_v7 = vrot.slane %v17197_v35, 1 }
 0x410   : > { %13534 = vmatprep.subr.bf16.mxu1 %v15297_v10  ;;  %v22224_v10 = vshll.u32 %v16905_v32, 16  ;;  %v22226_v32 = vrot.slane %v17216_v57, 1  ;;  %v15311_v57 = vld [vmem:[%s22015_s9 + $0xc8] sm:$0xff]  }
 0x411   : > { %v1735_v18 = vor.u32 %v22222_v11, %v1731_v2  ;;  %v2943_v12 = vsel %vm1624_vm1, %v2938_v62, %v2942_v7  ;;  %v2946_v2 = vor.u32 %v17201_v63, %v2942_v7 }
 0x412   : > { %14303 = vmatmul.mubr.msk.bf16.gmra.mrb[8].mxu1 %vm1776_vm2, %v1708_v15  ;;  %v1747_v15 = vrot.slane %v22224_v10, 1 }
 0x413   : > { %14306 = vmatprep.mubr.msk.bf16.mxu1 %vm1776_vm2, %v1716_v59  ;;  %13535 = vmatpush3.bf16.msra.mxu1 %v15298_v16  ;;  %v15305_v16 = vld [vmem:[%s22015_s9 + $0x70] sm:$0xff]   ;;  %v1740_v59 = vsel %vm1624_vm1, %v1735_v18, %v1739_v3  ;;  %v15315_v3 = vld [vmem:[%s22015_s9 + $0xd8] sm:$0xff]  }
 0x414   : > { %13536 = vmatprep.subr.bf16.mxu1 %v15299_v17  ;;  %v1748_v17 = vsel %vm1624_vm1, %v1743_v40, %v1747_v15 }
 0x417   : > { %13537 = vmatpush3.bf16.msra.mxu1 %v15300_v47  ;;  %v1751_v47 = vor.u32 %v22225_v37, %v1747_v15 }
 0x418   : > { %13538 = vmatprep.subr.bf16.mxu1 %v15301_v13  ;;  %v15310_v13 = vld [vmem:[%s22015_s9 + $0x80] sm:$0xff]  }
 0x41a   : > { %14307 = vmatmul.mubr.msk.bf16.gmra.mrb[12].mxu1 %vm1776_vm2, %v1724_v23  ;;  %v2951_v23 = vsel %vm1624_vm1, %v2946_v2, %v22226_v32  ;;  %v15317_v2 = vld [vmem:[%s22015_s9 + $0xe0] sm:$0xff]  }
 0x41b   : > { %14310 = vmatprep.mubr.msk.bf16.mxu1 %vm1776_vm2, %v1732_v27  ;;  %13539 = vmatpush3.bf16.msra.mxu1 %v15302_v19  ;;  %v15312_v19 = vld [vmem:[%s22015_s9 + $0x88] sm:$0xff]  }
 0x41c   : > { %13540 = vmatprep.subr.bf16.mxu1 %v15303_v20 }
 0x41f   : > { %13541 = vmatpush3.bf16.msra.mxu1 %v15304_v53  ;;  %v15316_v53 = vld [vmem:[%s22015_s9 + $0x98] sm:$0xff]  }
 0x420   : > { %13542 = vmatprep.subr.bf16.mxu1 %v15305_v16 }
 0x422   : > { %14311 = vmatmul.mubr.msk.bf16.gmra.mrb[16].mxu1 %vm1776_vm2, %v1740_v59 }
 0x423   : > { %14314 = vmatprep.mubr.msk.bf16.mxu1 %vm1776_vm2, %v1748_v17  ;;  %13543 = vmatpush3.bf16.msra.mxu1 %v15306_v21 }
 0x424   : > { %13544 = vmatprep.subr.bf16.mxu1 %v15307_v22 }
 0x427   : > { %13545 = vmatpush3.bf16.msra.mxu1 %v15308_v54 }
 0x428   : > { %13642 = vmatprep.subr.bf16.mxu1 %v15309_v9 }
 0x42a   : > { %14315 = vmatmul.mubr.msk.bf16.gmra.mrb[20].mxu1 %vm1776_vm2, %v1751_v47 }
 0x42b   : > { %3901 = vmatprep.mubr.bf16.mxu1 %v2943_v12 }
 0x432   : > { %3902 = vmatmul.mubr.bf16.vlgmr.msra.gmra.mrb[24].mxu1 %v17173_v36 }
 0x433   : > { %3909 = vmatprep.mubr.bf16.mxu1 %v2951_v23  ;;  %13643 = vmatpush3.bf16.msra.mxu1 %v15310_v13  ;;  %v15318_v13 = vld [vmem:[%s22015_s9 + $0xa0] sm:$0xff]  }
 0x434   : > { %13644 = vmatprep.subr.bf16.mxu1 %v15311_v57 }
 0x437   : > { %13645 = vmatpush3.bf16.msra.mxu1 %v15312_v19 }
 0x43a   : > { %3910 = vmatmul.mubr.bf16.gmra.mrb[28].mxu1 %v17171_v31 }
 0x43b   : > { %3917 = vmatprep.mubr.bf16.mxu1 %v17274_v48  ;;  %v15313_v48 = vld [vmem:[%s22015_s9 + $0xd0] sm:$0xff]  }
 0x43c   : > { %13646 = vmatprep.subr.bf16.mxu1 %v15313_v48 }
 0x442   : > { %3918 = vmatmul.mubr.bf16.gmra.mrb[32].mxu1 %v17210_v46 }
 0x443   : > { %3925 = vmatprep.mubr.bf16.mxu1 %v17278_v42  ;;  %v15314_v42 = vld [vmem:[%s22015_s9 + $0x90] sm:$0xff]  }
 0x444   : > { %13647 = vmatpush3.bf16.msra.mxu1 %v15314_v42 }
 0x445   : > { %13648 = vmatprep.subr.bf16.mxu1 %v15315_v3  ;;  %v15321_v3 = vld [vmem:[%s22015_s9 + $0xf0] sm:$0xff]  }
 0x448   : > { %13649 = vmatpush3.bf16.msra.mxu1 %v15316_v53  ;;  %v15323_v53 = vld [vmem:[%s22015_s9 + $0xf8] sm:$0xff]  }
 0x449   : > { %13650 = vmatprep.subr.bf16.mxu1 %v15317_v2 }
 0x44a   : > { %3926 = vmatmul.mubr.bf16.gmra.mrb[36].mxu1 %v17207_v24 }
 0x44b   : > { %3933 = vmatprep.mubr.bf16.mxu1 %v17293_v8  ;;  %v13770_v8 = vpop.f32.mrb[36].mxu0 }
 0x44c   : > { %v13771_v27 = vpop.f32.mrb[37].mxu0  ;;  %13651 = vmatpush3.bf16.msra.mxu1 %v15318_v13 }
 0x44d   : > { %v17537_v20 = vadd.f32 %v13771_v27, %v13770_v8  ;;  %v13773_v56 = vpop.f32.mrb[38].mxu0  ;;  %v15319_v27 = vld [vmem:[%s22015_s9 + $0xe8] sm:$0xff]  }
 0x44e   : > { %v13774_v11 = vpop.f32.mrb[39].mxu0  ;;  %13652 = vmatprep.subr.bf16.mxu1 %v15319_v27 }
 0x44f   : > { %22227 = vst [vmem:[#allocation41_spill] sm:$0xff] %v17537_v20  ;;  %v17542_v18 = vadd.f32 %v13774_v11, %v13773_v56  ;;  %v13776_v0 = vpop.f32.mrb[40].mxu0  ;;  %v15320_v56 = vld [vmem:[%s22015_s9 + $0xa8] sm:$0xff]   ;;  %v15322_v11 = vld [vmem:[%s22015_s9 + $0xb0] sm:$0xff]  }
 0x450   : > { %v13777_v40 = vpop.f32.mrb[41].mxu0  ;;  %13653 = vmatpush3.bf16.msra.mxu1 %v15320_v56 }
 0x451   : > { %22228 = vst [vmem:[#allocation42_spill] sm:$0xff] %v17542_v18  ;;  %v17547_v10 = vadd.f32 %v13777_v40, %v13776_v0  ;;  %v13779_v15 = vpop.f32.mrb[42].mxu0  ;;  %13654 = vmatprep.subr.bf16.mxu1 %v15321_v3  ;;  %v15324_v0 = vld [vmem:[%s22015_s9 + $0xb8] sm:$0xff]   ;;  %v15325_v40 = vld [vmem:[%s22015_s9 + $0x1c0] sm:$0xff]  }
 0x452   : > { %3934 = vmatmul.mubr.bf16.gmra.mrb[40].mxu1 %v17241_v29  ;;  %v13780_v16 = vpop.f32.mrb[43].mxu0 }
 0x453   : > { %22229 = vst [vmem:[#allocation43_spill] sm:$0xff] %v17547_v10  ;;  %v17549_v59 = vadd.f32 %v13780_v16, %v13779_v15 }
 0x454   : > { %13655 = vmatpush3.bf16.msra.mxu1 %v15322_v11 }
 0x455   : > { %22230 = vst [vmem:[#allocation44_spill] sm:$0xff] %v17549_v59  ;;  %13656 = vmatprep.subr.bf16.mxu1 %v15323_v53 }
 0x458   : > { %13657 = vmatpush3.bf16.msra.mxu1 %v15324_v0 }
 0x459   : > { %13866 = vmatprep.subr.bf16.mxu1 %v15325_v40 }
 0x463   : > { %v13782_v21 = vpop.f32.mrb[44].mxu0 }
 0x464   : > { %v13783_v17 = vpop.f32.mrb[45].mxu0 }
 0x465   : > { %v17551_v22 = vadd.f32 %v13783_v17, %v13782_v21  ;;  %v13785_v26 = vpop.f32.mrb[46].mxu0 }
 0x466   : > { %v13786_v54 = vpop.f32.mrb[47].mxu0 }
 0x467   : > { %22231 = vst [vmem:[#allocation45_spill] sm:$0xff] %v17551_v22  ;;  %v17553_v9 = vadd.f32 %v13786_v54, %v13785_v26 }
 0x469   : > { %22232 = vst [vmem:[#allocation46_spill] sm:$0xff] %v17553_v9 }
 0x46d   : > { %v13788_v37 = vpop.f32.mrb[48].mxu0 }
 0x46e   : > { %v13789_v47 = vpop.f32.mrb[49].mxu0 }
 0x46f   : > { %v17555_v62 = vadd.f32 %v13789_v47, %v13788_v37  ;;  %v13791_v7 = vpop.f32.mrb[50].mxu0 }
 0x470   : > { %v13792_v12 = vpop.f32.mrb[51].mxu0 }
 0x471   : > { %22233 = vst [vmem:[#allocation47_spill] sm:$0xff] %v17555_v62  ;;  %v17563_v32 = vadd.f32 %v13792_v12, %v13791_v7 }
 0x473   : > { %22234 = vst [vmem:[#allocation48_spill] sm:$0xff] %v17563_v32 }
 0x475   : > { %v13794_v23 = vpop.f32.mrb[52].mxu0 }
 0x476   : > { %v13795_v57 = vpop.f32.mrb[53].mxu0 }
 0x477   : > { %v17565_v19 = vadd.f32 %v13795_v57, %v13794_v23  ;;  %v13797_v48 = vpop.f32.mrb[54].mxu0 }
 0x478   : > { %v13798_v42 = vpop.f32.mrb[55].mxu0 }
 0x479   : > { %22235 = vst [vmem:[#allocation49_spill] sm:$0xff] %v17565_v19  ;;  %v17567_v8 = vadd.f32 %v13798_v42, %v13797_v48 }
 0x47b   : > { %22236 = vst [vmem:[#allocation50_spill] sm:$0xff] %v17567_v8 }
 0x4cd   : > { %v14276_v15 = vpop.f32.mrb[0].mxu1 }
 0x4ce   : > { %v1155_v16 = vmin.f32 %v14276_v15, 0.0  ;;  %v1134_v21 = vpop.f32.mrb[1].mxu1  ;;  %vm1151_vm0 = vcmp.gt.f32.partialorder %v14276_v15, 0.0 }
 0x4cf   : > { %v1153_v17 = vmin.f32 %v1134_v21, 0.0  ;;  %v14277_v26 = vpop.f32.mrb[2].mxu1  ;;  %vm1149_vm5 = vcmp.gt.f32.partialorder %v1134_v21, 0.0 }
 0x4d0   : > { %v1161_v54 = vmul.f32 1.442695, %v1155_v16  ;;  %v1156_v37 = vmin.f32 %v14277_v26, 0.0  ;;  %v1137_v47 = vpop.f32.mrb[3].mxu1  ;;  %vm1152_vm6 = vcmp.gt.f32.partialorder %v14277_v26, 0.0 }
 0x4d1   : > { %v1157_v7 = vmul.f32 1.442695, %v1153_v17  ;;  %v1154_v12 = vmin.f32 %v1137_v47, 0.0  ;;  %vm1150_vm7 = vcmp.gt.f32.partialorder %v1137_v47, 0.0 }
 0x4d2   : > { %16182 = vpow2.f32 %v1161_v54  ;;  %v1163_v2 = vmul.f32 1.442695, %v1156_v37 }
 0x4d3   : > { %16184 = vpow2.f32 %v1157_v7  ;;  %v1159_v13 = vmul.f32 1.442695, %v1154_v12 }
 0x4d4   : > { %16186 = vpow2.f32 %v1163_v2 }
 0x4d5   : > { %16188 = vpow2.f32 %v1159_v13 }
 0x4dc   : > { %v16183_v23 = vpop.eup %16182 }
 0x4dd   : > { %v16185_v57 = vpop.eup %16184  ;;  %v12646_v48 = vadd.f32 -1.0, %v16183_v23  ;;  %v14300_v42 = vpop.f32.mrb[4].mxu1 }
 0x4de   : > { %v16187_v27 = vpop.eup %16186  ;;  %v12644_v56 = vadd.f32 -1.0, %v16185_v57  ;;  %v14542_v3 = vadd.f32 %v17308_v5, %v14300_v42  ;;  %v1907_v11 = vpop.f32.mrb[5].mxu1 }
 0x4df   : > { %v16189_v53 = vpop.eup %16188  ;;  %v12647_v0 = vadd.f32 -1.0, %v16187_v27  ;;  %v14543_v40 = vadd.f32 %v17318_v4, %v1907_v11  ;;  %v14301_v16 = vpop.f32.mrb[6].mxu1  ;;  %v1171_v12 = vsel %vm1151_vm0, %v14276_v15, %v12646_v48 }
 0x4e0   : > { %v12645_v17 = vadd.f32 -1.0, %v16189_v53  ;;  %v2865_v54 = vadd.f32 %v14542_v3, %v17153_v49  ;;  %v14544_v37 = vadd.f32 %v17320_v34, %v14301_v16  ;;  %v1910_v7 = vpop.f32.mrb[7].mxu1  ;;  %v1169_v23 = vsel %vm1149_vm5, %v1134_v21, %v12644_v56 }
 0x4e1   : > { %v1172_v2 = vsel %vm1152_vm6, %v14277_v26, %v12647_v0  ;;  %v2863_v13 = vadd.f32 %v14543_v40, %v17153_v49  ;;  %v14545_v5 = vadd.f32 %v17322_v38, %v1910_v7 }
 0x4e2   : > { %v1181_v57 = vmax.f32 %v1171_v12, %v1172_v2  ;;  %v1170_v42 = vsel %vm1150_vm7, %v1137_v47, %v12645_v17  ;;  %v2866_v27 = vadd.f32 %v14544_v37, %v17153_v49  ;;  %v2897_v8 = vmax.f32 %v2865_v54, 0.0 }
 0x4e3   : > { %v1173_v4 = vmax.f32 %v1169_v23, %v1170_v42  ;;  %v2864_v11 = vadd.f32 %v14545_v5, %v17153_v49  ;;  %v2895_v34 = vmax.f32 %v2863_v13, 0.0 }
 0x4e4   : > { %v1182_v53 = vrot.slane %v1181_v57, 4  ;;  %v2898_v3 = vmax.f32 %v2866_v27, 0.0 }
 0x4e5   : > { %v1174_v19 = vrot.slane %v1173_v4, 4  ;;  %v2896_v16 = vmax.f32 %v2864_v11, 0.0  ;;  %v14304_v15 = vpop.f32.mrb[8].mxu1 }
 0x4e6   : > { %v1183_v26 = vmax.f32 %v1181_v57, %v1182_v53  ;;  %v17598_v48 = vpack.c.bf16 %v2898_v3, %v2897_v8  ;;  %v14546_v38 = vadd.f32 %v17324_v6, %v14304_v15  ;;  %v1923_v21 = vpop.f32.mrb[9].mxu1 }
 0x4e7   : > { %v1175_v56 = vmax.f32 %v1173_v4, %v1174_v19  ;;  %v17601_v47 = vpack.c.bf16 %v2896_v16, %v2895_v34  ;;  %v14547_v0 = vadd.f32 %v17326_v39, %v1923_v21  ;;  %v14305_v40 = vpop.f32.mrb[10].mxu1 }
 0x4e8   : > { %v1184_v17 = vrot.slane %v1183_v26, 2  ;;  %v2869_v54 = vadd.f32 %v14546_v38, %v17153_v49  ;;  %v14548_v37 = vadd.f32 %v17328_v45, %v14305_v40  ;;  %v1926_v7 = vpop.f32.mrb[11].mxu1  ;;  %v17607_v12 = vshll.u32 %v17598_v48, 16 }
 0x4e9   : > { %v1176_v8 = vrot.slane %v1175_v56, 2  ;;  %v2867_v2 = vadd.f32 %v14547_v0, %v17153_v49  ;;  %v14549_v6 = vadd.f32 %v17330_v41, %v1926_v7  ;;  %v17612_v19 = vshll.u32 %v17601_v47, 16 }
 0x4ea   : > { %v1185_v13 = vmax.f32 %v1183_v26, %v1184_v17  ;;  %v2901_v39 = vmax.f32 %v2869_v54, 0.0  ;;  %v2870_v5 = vadd.f32 %v14548_v37, %v17153_v49  ;;  %v17616_v23 = vshrl.u32 %v17601_v47, 16 }
 0x4eb   : > { %v1177_v45 = vmax.f32 %v1175_v56, %v1176_v8  ;;  %v2899_v57 = vmax.f32 %v2867_v2, 0.0  ;;  %v2868_v42 = vadd.f32 %v14549_v6, %v17153_v49  ;;  %v2982_v27 = vrot.slane %v17612_v19, 1 }
 0x4ec   : > { %v1186_v4 = vrot.slane %v1185_v13, 1  ;;  %v2902_v11 = vmax.f32 %v2870_v5, 0.0  ;;  %v2990_v41 = vrot.slane %v17607_v12, 1  ;;  %v3295_v53 = vrot.slane %v17616_v23, 2 }
 0x4ed   : > { %v1178_v3 = vrot.slane %v1177_v45, 1  ;;  %v2900_v34 = vmax.f32 %v2868_v42, 0.0  ;;  %v14308_v16 = vpop.f32.mrb[12].mxu1  ;;  %v2983_v15 = vsel %vm1624_vm1, %v17288_v33, %v2982_v27  ;;  %v2986_v26 = vor.u32 %v17616_v23, %v2982_v27 }
 0x4ee   : > { %v1187_v38 = vmax.f32 %v1185_v13, %v1186_v4  ;;  %v17625_v21 = vpack.c.bf16 %v2902_v11, %v2901_v39  ;;  %v14550_v56 = vadd.f32 %v17332_v14, %v14308_v16  ;;  %v1939_v0 = vpop.f32.mrb[13].mxu1  ;;  %3941 = vmatprep.mubr.bf16.mxu1 %v2983_v15  ;;  %v3296_v40 = vrot.slane %v17612_v19, 3 }
 0x4ef   : > { %v1179_v17 = vmax.f32 %v1177_v45, %v1178_v3  ;;  %v17629_v54 = vpack.c.bf16 %v2900_v34, %v2899_v57  ;;  %v14551_v37 = vadd.f32 %v17336_v43, %v1939_v0  ;;  %v14309_v7 = vpop.f32.mrb[14].mxu1  ;;  %3942 = vmatmul.mubr.bf16.gmra.mrb[44].mxu1 %v17238_v28  ;;  %v2991_v33 = vsel %vm1624_vm1, %v2986_v26, %v2990_v41 }
 0x4f0   : > { %1188 = vst [vmem:[#allocation2 + $0x9] sm:$0x1] %v1187_v38  ;;  %v2873_v8 = vadd.f32 %v14550_v56, %v17153_v49  ;;  %v14552_v2 = vadd.f32 %v17338_v61, %v14309_v7  ;;  %v1942_v14 = vpop.f32.mrb[15].mxu1  ;;  %3949 = vmatprep.mubr.bf16.mxu1 %v2991_v33  ;;  %v3297_v6 = vor.u32 %v3296_v40, %v3295_v53  ;;  %v3235_v13 = vrot.slane %v17601_v47, 2 }
 0x4f1   : > { %1180 = vst [vmem:[#allocation2 + $0x8] sm:$0x1] %v1179_v17  ;;  %v2871_v39 = vadd.f32 %v14551_v37, %v17153_v49  ;;  %v14553_v43 = vadd.f32 %v17342_v44, %v1942_v14  ;;  %v17640_v5 = vshrl.u32 %v17598_v48, 16  ;;  %v3300_v45 = vrot.slane %v17607_v12, 3  ;;  %v22238_v14 = vld [vmem:[#allocation35_spill] sm:$0xff] }
 0x4f2   : > { %v2905_v57 = vmax.f32 %v2873_v8, 0.0  ;;  %v2874_v42 = vadd.f32 %v14552_v2, %v17153_v49  ;;  %v3298_v61 = vsel %vm3271_vm13, %v17271_v58, %v3297_v6  ;;  %v22237_v27 = vrot.slane %v17238_v28, 2 }
 0x4f3   : > { %v2903_v11 = vmax.f32 %v2871_v39, 0.0  ;;  %v2872_v53 = vadd.f32 %v14553_v43, %v17153_v49  ;;  %4261 = vmatprep.mubr.bf16.mxu0 %v3298_v61  ;;  %v3299_v44 = vrot.slane %v17640_v5, 2  ;;  %v2994_v3 = vor.u32 %v17640_v5, %v2990_v41 }
 0x4f4   : > { %v3236_v4 = vsel %vm3223_vm14, %v22237_v27, %v3235_v13  ;;  %v2906_v34 = vmax.f32 %v2874_v42, 0.0  ;;  %v17653_v16 = vshll.u32 %v17629_v54, 16  ;;  %v3237_v15 = vrot.slane %v17598_v48, 2 }
 0x4f5   : > { %4262 = vmatmul.mubr.bf16.gmra.mrb[56].mxu0 %v3236_v4  ;;  %v17657_v58 = vshrl.u32 %v17629_v54, 16  ;;  %v2904_v26 = vmax.f32 %v2872_v53, 0.0  ;;  %v3301_v38 = vor.u32 %v3300_v45, %v3299_v44  ;;  %v14312_v56 = vpop.f32.mrb[16].mxu1  ;;  %v17660_v0 = vshll.u32 %v17625_v21, 16 }
 0x4f6   : > { %v3239_v40 = vrot.slane %v17629_v54, 2  ;;  %v17663_v17 = vpack.c.bf16 %v2906_v34, %v2905_v57  ;;  %v14554_v41 = vadd.f32 %v17344_v51, %v14312_v56  ;;  %v1955_v37 = vpop.f32.mrb[17].mxu1  ;;  %v2998_v7 = vrot.slane %v17653_v16, 1  ;;  %v22239_v51 = vld [vmem:[#allocation36_spill] sm:$0xff] }
 0x4f7   : > { %v3238_v33 = vsel %vm3223_vm14, %v3235_v13, %v3237_v15  ;;  %v17668_v8 = vpack.c.bf16 %v2904_v26, %v2903_v11  ;;  %v3302_v2 = vsel %vm3271_vm13, %v3297_v6, %v3301_v38  ;;  %v14555_v39 = vadd.f32 %v22238_v14, %v1955_v37  ;;  %v14313_v43 = vpop.f32.mrb[18].mxu1  ;;  %3950 = vmatmul.mubr.bf16.gmra.mrb[48].mxu1 %v17601_v47 }
 0x4f8   : > { %v3303_v45 = vrot.slane %v17657_v58, 2  ;;  %4269 = vmatprep.mubr.bf16.mxu0 %v3302_v2  ;;  %v2877_v57 = vadd.f32 %v14554_v41, %v17153_v49  ;;  %v14556_v42 = vadd.f32 %v22239_v51, %v14313_v43  ;;  %v1958_v61 = vpop.f32.mrb[19].mxu1  ;;  %v2999_v27 = vsel %vm1624_vm1, %v2994_v3, %v2998_v7  ;;  %v16194_v3 = vld [vmem:[%s22014_s8] ss:$0 sm:$0xff] }
 0x4f9   : > { %v3304_v13 = vrot.slane %v17653_v16, 3  ;;  %v2875_v4 = vadd.f32 %v14555_v39, %v17153_v49  ;;  %v14557_v6 = vadd.f32 %v17350_v30, %v1958_v61  ;;  %3957 = vmatprep.mubr.bf16.mxu1 %v2999_v27  ;;  %v3002_v11 = vor.u32 %v17657_v58, %v2998_v7 }
 0x4fa   : > { %v3006_v53 = vrot.slane %v17660_v0, 1  ;;  %v2909_v44 = vmax.f32 %v2877_v57, 0.0  ;;  %v2878_v34 = vadd.f32 %v14556_v42, %v17153_v49  ;;  %v3240_v56 = vsel %vm3223_vm14, %v3237_v15, %v3239_v40 }
 0x4fb   : > { %v3305_v26 = vor.u32 %v3304_v13, %v3303_v45  ;;  %v2907_v41 = vmax.f32 %v2875_v4, 0.0  ;;  %v2876_v37 = vadd.f32 %v16194_v3, %v14557_v6  ;;  %v17689_v30 = vshrl.u32 %v17625_v21, 16 }
 0x4fc   : > { %v3007_v2 = vsel %vm1624_vm1, %v3002_v11, %v3006_v53  ;;  %v2910_v7 = vmax.f32 %v2878_v34, 0.0  ;;  %v3308_v49 = vrot.slane %v17660_v0, 3  ;;  %v17694_v39 = vshll.u32 %v17668_v8, 16  ;;  %v22240_v34 = vld [vmem:[#allocation37_spill] sm:$0xff] }
 0x4fd   : > { %4270 = vmatmul.mubr.bf16.gmra.mrb[60].mxu0 %v3238_v33  ;;  %v3306_v14 = vsel %vm3271_vm13, %v3301_v38, %v3305_v26  ;;  %v2908_v15 = vmax.f32 %v2876_v37, 0.0  ;;  %v14316_v43 = vpop.f32.mrb[20].mxu1  ;;  %v3307_v45 = vrot.slane %v17689_v30, 2  ;;  %v3010_v57 = vor.u32 %v17689_v30, %v3006_v53 }
 0x4fe   : > { %4277 = vmatprep.mubr.bf16.mxu0 %v3306_v14  ;;  %v3241_v51 = vrot.slane %v17625_v21, 2  ;;  %v17699_v42 = vpack.c.bf16 %v2910_v7, %v2909_v44  ;;  %v14558_v33 = vadd.f32 %v17355_v1, %v14316_v43  ;;  %v1971_v61 = vpop.f32.mrb[21].mxu1  ;;  %v3014_v38 = vrot.slane %v17694_v39, 1 }
 0x4ff   : > { %v17704_v27 = vshrl.u32 %v17668_v8, 16  ;;  %v17706_v13 = vpack.c.bf16 %v2908_v15, %v2907_v41  ;;  %v14559_v4 = vadd.f32 %v17358_v55, %v1971_v61  ;;  %v14317_v6 = vpop.f32.mrb[22].mxu1  ;;  %3958 = vmatmul.mubr.bf16.gmra.mrb[52].mxu1 %v17598_v48  ;;  %v3309_v11 = vor.u32 %v3308_v49, %v3307_v45 }
 0x500   : > { %v3242_v53 = vsel %vm3223_vm14, %v3239_v40, %v3241_v51  ;;  %v2881_v44 = vadd.f32 %v16194_v3, %v14558_v33  ;;  %v14560_v37 = vadd.f32 %v22240_v34, %v14317_v6  ;;  %v1974_v1 = vpop.f32.mrb[23].mxu1  ;;  %3965 = vmatprep.mubr.bf16.mxu1 %v3007_v2  ;;  %v3015_v7 = vsel %vm1624_vm1, %v3010_v57, %v3014_v38 }
 0x501   : > { %v3311_v14 = vrot.slane %v17704_v27, 2  ;;  %v2879_v43 = vadd.f32 %v16194_v3, %v14559_v4  ;;  %v14561_v41 = vadd.f32 %v17362_v60, %v1974_v1  ;;  %v3310_v55 = vsel %vm3271_vm13, %v3305_v26, %v3309_v11 }
 0x502   : > { %v3312_v15 = vrot.slane %v17694_v39, 3  ;;  %v2913_v61 = vmax.f32 %v2881_v44, 0.0  ;;  %v2882_v49 = vadd.f32 %v16194_v3, %v14560_v37  ;;  %v3018_v40 = vor.u32 %v17704_v27, %v3014_v38 }
 0x503   : > { %v17719_v45 = vshll.u32 %v17663_v17, 16  ;;  %v2880_v33 = vadd.f32 %v16194_v3, %v14561_v41  ;;  %v3243_v57 = vrot.slane %v17668_v8, 2  ;;  %v2911_v6 = vmax.f32 %v2879_v43, 0.0 }
 0x504   : > { %v3313_v2 = vor.u32 %v3312_v15, %v3311_v14  ;;  %v2914_v34 = vmax.f32 %v2882_v49, 0.0  ;;  %v17724_v26 = vshrl.u32 %v17663_v17, 16  ;;  %v17731_v1 = vpack.c.bf16 %v2913_v61, %v2913_v61 }
 0x505   : > { %4278 = vmatmul.mubr.bf16.gmra.mrb[64].mxu0 %v3240_v56  ;;  %v3022_v60 = vrot.slane %v17719_v45, 1  ;;  %v2912_v4 = vmax.f32 %v2880_v33, 0.0  ;;  %v13546_v44 = vpop.f32.mrb[24].mxu1  ;;  %v17728_v37 = vsel %vm3223_vm14, %v3241_v51, %v3243_v57  ;;  %v3316_v3 = vrot.slane %v17719_v45, 3 }
 0x506   : > { %4285 = vmatprep.mubr.bf16.mxu0 %v3310_v55  ;;  %v3314_v38 = vsel %vm3271_vm13, %v3309_v11, %v3313_v2  ;;  %v17733_v14 = vpack.c.bf16 %v2914_v34, %v2913_v61  ;;  %v13547_v56 = vpop.f32.mrb[25].mxu1  ;;  %v3315_v41 = vrot.slane %v17724_v26, 2  ;;  %v17743_v51 = vshll.u32 %v17706_v13, 16 }
 0x507   : > { %v3023_v43 = vsel %vm1624_vm1, %v3018_v40, %v3022_v60  ;;  %v17737_v15 = vpack.c.bf16 %v2912_v4, %v2911_v6  ;;  %v17739_v55 = vadd.f32 %v13547_v56, %v13546_v44  ;;  %v13549_v49 = vpop.f32.mrb[26].mxu1  ;;  %3966 = vmatmul.mubr.bf16.gmra.mrb[56].mxu1 %v17629_v54  ;;  %v3245_v11 = vrot.slane %v17663_v17, 2 }
 0x508   : > { %v13550_v33 = vpop.f32.mrb[27].mxu1  ;;  %3973 = vmatprep.mubr.bf16.mxu1 %v3015_v7  ;;  %v3317_v61 = vor.u32 %v3316_v3, %v3315_v41  ;;  %v17747_v34 = vshrl.u32 %v17706_v13, 16  ;;  %v17750_v40 = vshll.u32 %v17699_v42, 16  ;;  %v3247_v6 = vrot.slane %v17706_v13, 2 }
 0x509   : > { %22241 = vst [vmem:[#allocation35_spill] sm:$0xff] %v17739_v55  ;;  %v17753_v4 = vadd.f32 %v13550_v33, %v13549_v49  ;;  %v3026_v44 = vor.u32 %v17724_v26, %v3022_v60  ;;  %v3030_v56 = vrot.slane %v17743_v51, 1  ;;  %v17758_v32 = vsel %vm3223_vm14, %v3243_v57, %v3245_v11 }
 0x50a   : > { %v3318_v7 = vsel %vm3271_vm13, %v3313_v2, %v3317_v61  ;;  %v3319_v3 = vrot.slane %v17747_v34, 2  ;;  %v3320_v41 = vrot.slane %v17743_v51, 3  ;;  %v3038_v62 = vrot.slane %v17750_v40, 1 }
 0x50b   : > { %22242 = vst [vmem:[#allocation36_spill] sm:$0xff] %v17753_v4  ;;  %v3031_v9 = vsel %vm1624_vm1, %v3026_v44, %v3030_v56  ;;  %v3034_v49 = vor.u32 %v17747_v34, %v3030_v56  ;;  %v17767_v33 = vsel %vm3223_vm14, %v3245_v11, %v3247_v6  ;;  %v17770_v57 = vshrl.u32 %v17699_v42, 16 }
 0x50c   : > { %v3321_v60 = vor.u32 %v3320_v41, %v3319_v3  ;;  %v3324_v2 = vrot.slane %v17750_v40, 3  ;;  %v17774_v22 = vshll.u32 %v17737_v15, 16  ;;  %v3249_v44 = vrot.slane %v17699_v42, 2 }
 0x50d   : > { %4286 = vmatmul.mubr.bf16.gmra.mrb[68].mxu0 %v3242_v53  ;;  %v13552_v59 = vpop.f32.mrb[28].mxu1  ;;  %v17777_v10 = vsel %vm1624_vm1, %v3034_v49, %v3038_v62  ;;  %v17781_v11 = vshrl.u32 %v17737_v15, 16  ;;  %v3052_v53 = vshll.u32 %v17731_v1, 16  ;;  %v3323_v41 = vrot.slane %v17770_v57, 2 }
 0x50e   : > { %4293 = vmatprep.mubr.bf16.mxu0 %v3314_v38  ;;  %v13553_v56 = vpop.f32.mrb[29].mxu1  ;;  %v17785_v3 = vsel %vm3271_vm13, %v3317_v61, %v3321_v60  ;;  %v3042_v18 = vor.u32 %v17770_v57, %v3038_v62  ;;  %v3046_v38 = vrot.slane %v17774_v22, 1  ;;  %v17794_v4 = vsel %vm3223_vm14, %v3247_v6, %v3249_v44 }
 0x50f   : > { %v17790_v20 = vadd.f32 %v13553_v56, %v13552_v59  ;;  %v13555_v49 = vpop.f32.mrb[30].mxu1  ;;  %3974 = vmatmul.mubr.bf16.gmra.mrb[60].mxu1 %v17625_v21  ;;  %v3327_v55 = vrot.slane %v17781_v11, 2  ;;  %v3328_v28 = vrot.slane %v17774_v22, 3  ;;  %v3325_v29 = vor.u32 %v3324_v2, %v3323_v41 }
 0x510   : > { %v13556_v61 = vpop.f32.mrb[31].mxu1  ;;  %3981 = vmatprep.mubr.bf16.mxu1 %v3023_v43  ;;  %v17799_v24 = vsel %vm1624_vm1, %v3042_v18, %v3046_v38  ;;  %v3050_v62 = vor.u32 %v17781_v11, %v3046_v38  ;;  %v17802_v59 = vrot.slane %v3052_v53, 1  ;;  %v3251_v6 = vrot.slane %v17737_v15, 2 }
 0x511   : > { %22243 = vst [vmem:[#allocation37_spill] sm:$0xff] %v17790_v20  ;;  %v17804_v56 = vadd.f32 %v13556_v61, %v13555_v49  ;;  %v3329_v20 = vor.u32 %v3328_v28, %v3327_v55  ;;  %v17808_v46 = vsel %vm3271_vm13, %v3321_v60, %v3325_v29  ;;  %v17815_v43 = vshrl.u32 %v17733_v14, 16 }
 0x512   : > { %v17812_v31 = vsel %vm1624_vm1, %v3050_v62, %v17802_v59  ;;  %v17818_v18 = vshll.u32 %v17733_v14, 16  ;;  %v17824_v28 = vsel %vm3223_vm14, %v3249_v44, %v3251_v6  ;;  %v22082_v53 = vrot.slane %v17733_v14, 2 }
 0x513   : > { %22244 = vst [vmem:[#allocation51_spill] sm:$0xff] %v17804_v56  ;;  %v17821_v2 = vsel %vm3271_vm13, %v3325_v29, %v3329_v20  ;;  %v3331_v55 = vrot.slane %v17815_v43, 2  ;;  %v3161_v41 = vrot.slane %v17616_v23, 1  ;;  %v3162_v49 = vrot.slane %v17612_v19, 2 }
 0x514   : > { %v3332_v60 = vrot.slane %v17818_v18, 3  ;;  %v3165_v61 = vrot.slane %v17640_v5, 1  ;;  %v3166_v56 = vrot.slane %v17607_v12, 2  ;;  %v3104_v36 = vrot.slane %v17598_v48, 1 }
 0x515   : > { %4294 = vmatmul.mubr.bf16.gmra.mrb[72].mxu0 %v17728_v37  ;;  %v13558_v38 = vpop.f32.mrb[32].mxu1  ;;  %v17839_v37 = vsel %vm3223_vm14, %v3251_v6, %v22082_v53  ;;  %v3163_v29 = vor.u32 %v3162_v49, %v3161_v41  ;;  %v3169_v63 = vrot.slane %v17657_v58, 1 }
 0x516   : > { %4301 = vmatprep.mubr.bf16.mxu0 %v3318_v7  ;;  %v13559_v44 = vpop.f32.mrb[33].mxu1  ;;  %v17834_v62 = vor.u32 %v3332_v60, %v3331_v55  ;;  %22246 = vst [vmem:[#allocation53_spill] sm:$0xff] %v17839_v37  ;;  %v3167_v6 = vor.u32 %v3166_v56, %v3165_v61  ;;  %v22248_v60 = vrot.slane %v17601_v47, 1  ;;  %v3173_v56 = vrot.slane %v17689_v30, 1 }
 0x517   : > { %v17843_v7 = vadd.f32 %v13559_v44, %v13558_v38  ;;  %v13561_v35 = vpop.f32.mrb[34].mxu1  ;;  %3982 = vmatmul.mubr.bf16.gmra.mrb[64].mxu1 %v17668_v8  ;;  %v3170_v38 = vrot.slane %v17653_v16, 2  ;;  %v3174_v61 = vrot.slane %v17660_v0, 2 }
 0x518   : > { %22245 = vst [vmem:[#allocation52_spill] sm:$0xff] %v17834_v62  ;;  %v13562_v50 = vpop.f32.mrb[35].mxu1  ;;  %3989 = vmatprep.mubr.bf16.mxu1 %v3031_v9  ;;  %v17849_v55 = vsel %vm3271_vm13, %v3329_v20, %v17834_v62  ;;  %v17854_v53 = vsel %vm2219_vm3, %v22248_v60, %v3104_v36  ;;  %v3106_v9 = vrot.slane %v17629_v54, 1  ;;  %v17865_v49 = vsel %vm2516_vm4, %v3163_v29, %v3167_v6 }
 0x519   : > { %22247 = vst [vmem:[#allocation54_spill] sm:$0xff] %v17843_v7  ;;  %22249 = vst [vmem:[#allocation55_spill] sm:$0xff] %v17854_v53  ;;  %v17857_v44 = vadd.f32 %v13562_v50, %v13561_v35  ;;  %v22251_v7 = vld [vmem:[#allocation32_spill] sm:$0xff]  ;;  %v3171_v20 = vor.u32 %v3170_v38, %v3169_v63  ;;  %v3108_v50 = vrot.slane %v17625_v21, 1  ;;  %v3177_v35 = vrot.slane %v17704_v27, 1 }
 0x51a   : > { %v17861_v41 = vsel %vm2516_vm4, %v22251_v7, %v3163_v29  ;;  %22253 = vst [vmem:[#allocation57_spill] sm:$0xff] %v17865_v49  ;;  %v17870_v60 = vsel %vm2219_vm3, %v3104_v36, %v3106_v9  ;;  %v3178_v29 = vrot.slane %v17694_v39, 2  ;;  %v3110_v63 = vrot.slane %v17668_v8, 1 }
 0x51b   : > { %22250 = vst [vmem:[#allocation56_spill] sm:$0xff] %v17857_v44  ;;  %22252 = vst [vmem:[#allocation32_spill] sm:$0xff] %v17861_v41  ;;  %v17876_v7 = vsel %vm2516_vm4, %v3167_v6, %v3171_v20  ;;  %v3175_v44 = vor.u32 %v3174_v61, %v3173_v56  ;;  %v17882_v36 = vsel %vm2219_vm3, %v3106_v9, %v3108_v50  ;;  %v3182_v53 = vrot.slane %v17719_v45, 2 }
 0x51c   : > { %22254 = vst [vmem:[#allocation58_spill] sm:$0xff] %v17870_v60  ;;  %22255 = vst [vmem:[#allocation59_spill] sm:$0xff] %v17876_v7  ;;  %v3181_v60 = vrot.slane %v17724_v26, 1  ;;  %v3179_v56 = vor.u32 %v3178_v29, %v3177_v35  ;;  %v17891_v61 = vsel %vm2219_vm3, %v3108_v50, %v3110_v63  ;;  %v3186_v62 = vrot.slane %v17743_v51, 2 }
 0x51d   : > { %4302 = vmatmul.mubr.bf16.gmra.mrb[76].mxu0 %v17758_v32  ;;  %v13564_v38 = vpop.f32.mrb[36].mxu1  ;;  %22256 = vst [vmem:[#allocation60_spill] sm:$0xff] %v17882_v36  ;;  %v3112_v32 = vrot.slane %v17663_v17, 1  ;;  %v17888_v6 = vsel %vm2516_vm4, %v3171_v20, %v3175_v44  ;;  %v3114_v50 = vrot.slane %v17706_v13, 1  ;;  %v3190_v35 = vrot.slane %v17750_v40, 2 }
 0x51e   : > { %4309 = vmatprep.mubr.bf16.mxu0 %v17785_v3  ;;  %v13565_v49 = vpop.f32.mrb[37].mxu1  ;;  %v3185_v3 = vrot.slane %v17747_v34, 1  ;;  %v3183_v36 = vor.u32 %v3182_v53, %v3181_v60  ;;  %v17903_v20 = vsel %vm2516_vm4, %v3175_v44, %v3179_v56  ;;  %v3193_v44 = vrot.slane %v17781_v11, 1 }
 0x51f   : > { %v17894_v7 = vadd.f32 %v13565_v49, %v13564_v38  ;;  %v13567_v9 = vpop.f32.mrb[38].mxu1  ;;  %3990 = vmatmul.mubr.bf16.gmra.mrb[68].mxu1 %v17663_v17  ;;  %v17898_v41 = vsel %vm2219_vm3, %v3110_v63, %v3112_v32  ;;  %v3189_v49 = vrot.slane %v17770_v57, 1  ;;  %v17914_v63 = vsel %vm2219_vm3, %v3112_v32, %v3114_v50 }
 0x520   : > { %22258 = vst [vmem:[#allocation62_spill] sm:$0xff] %v17898_v41  ;;  %v13568_v37 = vpop.f32.mrb[39].mxu1  ;;  %3997 = vmatprep.mubr.bf16.mxu1 %v17777_v10  ;;  %v17911_v53 = vsel %vm2516_vm4, %v3179_v56, %v3183_v36  ;;  %v3187_v60 = vor.u32 %v3186_v62, %v3185_v3  ;;  %22260 = vst [vmem:[#allocation64_spill] sm:$0xff] %v17914_v63  ;;  %v3116_v10 = vrot.slane %v17699_v42, 1  ;;  %v3194_v41 = vrot.slane %v17774_v22, 2 }
 0x521   : > { %22257 = vst [vmem:[#allocation61_spill] sm:$0xff] %v17894_v7  ;;  %v17908_v29 = vadd.f32 %v13568_v37, %v13567_v9  ;;  %v3191_v38 = vor.u32 %v3190_v35, %v3189_v49  ;;  %v3118_v37 = vrot.slane %v17737_v15, 1  ;;  %v3200_v32 = vrot.slane %v17815_v43, 1 }
 0x522   : > { %v17919_v7 = vsel %vm2516_vm4, %v3183_v36, %v3187_v60  ;;  %v17928_v62 = vsel %vm2219_vm3, %v3114_v50, %v3116_v10  ;;  %v3203_v3 = vrot.slane %v17818_v18, 2  ;;  %v3195_v9 = vor.u32 %v3194_v41, %v3193_v44 }
 0x523   : > { %22259 = vst [vmem:[#allocation63_spill] sm:$0xff] %v17908_v29  ;;  %v17925_v56 = vsel %vm2516_vm4, %v3187_v60, %v3191_v38  ;;  %22262 = vst [vmem:[#allocation66_spill] sm:$0xff] %v17928_v62  ;;  %v17934_v49 = vsel %vm2219_vm3, %v3116_v10, %v3118_v37  ;;  %v3120_v35 = vrot.slane %v17731_v1, 1  ;;  %v3424_v50 = vrot.slane %v17612_v19, 4 }
 0x524   : > { %22261 = vst [vmem:[#allocation65_spill] sm:$0xff] %v17925_v56  ;;  %v17938_v29 = vor.u32 %v3203_v3, %v3200_v32  ;;  %v3363_v62 = vrot.slane %v17601_v47, 3  ;;  %v3427_v56 = vrot.slane %v17640_v5, 3  ;;  %v17947_v41 = vsel %vm2516_vm4, %v3191_v38, %v3195_v9 }
 0x525   : > { %4310 = vmatmul.mubr.bf16.gmra.mrb[80].mxu0 %v17767_v33  ;;  %v13570_v36 = vpop.f32.mrb[40].mxu1  ;;  %v3423_v33 = vrot.slane %v17616_v23, 3  ;;  %v17952_v23 = vsel %vm2219_vm3, %v3118_v37, %v3120_v35  ;;  %v3428_v10 = vrot.slane %v17607_v12, 4  ;;  %v3365_v32 = vrot.slane %v17598_v48, 3 }
 0x526   : > { %4317 = vmatprep.mubr.bf16.mxu0 %v17808_v46  ;;  %v13571_v60 = vpop.f32.mrb[41].mxu1  ;;  %v17958_v5 = vsel %vm2516_vm4, %v3195_v9, %v17938_v29  ;;  %v3432_v12 = vrot.slane %v17653_v16, 4  ;;  %v3367_v9 = vrot.slane %v17629_v54, 3  ;;  %v3056_v48 = vshrl.u32 %v17731_v1, 16 }
 0x527   : > { %v17943_v63 = vadd.f32 %v13571_v60, %v13570_v36  ;;  %v13573_v46 = vpop.f32.mrb[42].mxu1  ;;  %3998 = vmatmul.mubr.bf16.gmra.mrb[72].mxu1 %v17706_v13  ;;  %v3425_v44 = vor.u32 %v3424_v50, %v3423_v33  ;;  %v3429_v38 = vor.u32 %v3428_v10, %v3427_v56  ;;  %v3431_v36 = vrot.slane %v17657_v58, 3 }
 0x528   : > { %v13574_v19 = vpop.f32.mrb[43].mxu1  ;;  %4005 = vmatprep.mubr.bf16.mxu1 %v17799_v24  ;;  %v17971_v24 = vsel %vm3351_vm8, %v3363_v62, %v3365_v32  ;;  %v3435_v58 = vrot.slane %v17689_v30, 3  ;;  %v3436_v56 = vrot.slane %v17660_v0, 4  ;;  %v17983_v60 = vsel %vm3351_vm8, %v3365_v32, %v3367_v9 }
 0x529   : > { %v17961_v3 = vadd.f32 %v13574_v19, %v13573_v46  ;;  %v17966_v37 = vsel %vm3399_vm15, %v17373_v25, %v3425_v44  ;;  %v17977_v33 = vsel %vm3399_vm15, %v3425_v44, %v3429_v38  ;;  %v3433_v25 = vor.u32 %v3432_v12, %v3431_v36 }
 0x52a   : > { %v3369_v50 = vrot.slane %v17625_v21, 3  ;;  %v3439_v16 = vrot.slane %v17704_v27, 3  ;;  %v3437_v54 = vor.u32 %v3436_v56, %v3435_v58  ;;  %v3440_v46 = vrot.slane %v17694_v39, 4 }
 0x52b   : > { %v3371_v10 = vrot.slane %v17668_v8, 3  ;;  %v3443_v30 = vrot.slane %v17724_v26, 3  ;;  %v17992_v0 = vsel %vm3399_vm15, %v3429_v38, %v3433_v25  ;;  %v3444_v19 = vrot.slane %v17719_v45, 4 }
 0x52c   : > { %v3373_v21 = vrot.slane %v17663_v17, 3  ;;  %v18001_v27 = vsel %vm3399_vm15, %v3433_v25, %v3437_v54  ;;  %v3441_v39 = vor.u32 %v3440_v46, %v3439_v16  ;;  %v3447_v26 = vrot.slane %v17747_v34, 3 }
 0x52d   : > { %4318 = vmatmul.mubr.bf16.gmra.mrb[84].mxu0 %v17794_v4  ;;  %v17995_v4 = vsel %vm3351_vm8, %v3367_v9, %v3369_v50  ;;  %v18004_v8 = vsel %vm3351_vm8, %v3369_v50, %v3371_v10  ;;  %v3448_v45 = vrot.slane %v17743_v51, 4  ;;  %v3375_v17 = vrot.slane %v17706_v13, 3 }
 0x52e   : > { %4325 = vmatprep.mubr.bf16.mxu0 %v17821_v2  ;;  %v3445_v2 = vor.u32 %v3444_v19, %v3443_v30  ;;  %v18009_v44 = vsel %vm3351_vm8, %v3371_v10, %v3373_v21  ;;  %v18014_v32 = vsel %vm3399_vm15, %v3437_v54, %v3441_v39  ;;  %v3451_v38 = vrot.slane %v17770_v57, 3  ;;  %v22264_v10 = vld [vmem:[#allocation24_spill] sm:$0xff]  ;;  %v22265_v19 = vld [vmem:[#allocation23_spill] sm:$0xff] }
 0x52f   : > { %4006 = vmatmul.mubr.bf16.gmra.mrb[76].mxu1 %v17699_v42  ;;  %v3452_v36 = vrot.slane %v17750_v40, 4  ;;  %v3377_v12 = vrot.slane %v17699_v42, 3  ;;  %v18023_v9 = vsel %vm3351_vm8, %v3373_v21, %v3375_v17  ;;  %v3455_v51 = vrot.slane %v17781_v11, 3 }
 0x530   : > { %4013 = vmatprep.mubr.bf16.mxu1 %v17812_v31  ;;  %v18020_v34 = vsel %vm3399_vm15, %v3441_v39, %v3445_v2  ;;  %v3449_v31 = vor.u32 %v3448_v45, %v3447_v26  ;;  %v3456_v56 = vrot.slane %v17774_v22, 4  ;;  %v3379_v57 = vrot.slane %v17737_v15, 3  ;;  %v22267_v45 = vld [vmem:[#allocation52_spill] sm:$0xff] }
 0x531   : > { %v3453_v58 = vor.u32 %v3452_v36, %v3451_v38  ;;  %v18027_v13 = vsel %vm3351_vm8, %v3375_v17, %v3377_v12  ;;  %v3459_v40 = vrot.slane %v17815_v43, 3  ;;  %v3460_v25 = vrot.slane %v17818_v18, 4  ;;  %v22263_v18 = vld [vmem:[#allocation22_spill] sm:$0xff]  ;;  %v22268_v17 = vld [vmem:[#allocation21_spill] sm:$0xff]  ;;  %v22269_v36 = vld [vmem:[#allocation20_spill] sm:$0xff] }
 0x532   : > { %v18033_v42 = vsel %vm3399_vm15, %v3445_v2, %v3449_v31  ;;  %v22084_v50 = vrot.slane %v17733_v14, 3  ;;  %v3457_v16 = vor.u32 %v3456_v56, %v3455_v51  ;;  %v18043_v22 = vsel %vm3351_vm8, %v3377_v12, %v3379_v57  ;;  %v22266_v2 = vld [vmem:[#allocation53_spill] sm:$0xff]  ;;  %v15326_v51 = vld [vmem:[%s22015_s9 + $0x180] sm:$0xff]  }
 0x533   : > { %v18040_v11 = vsel %vm3399_vm15, %v3449_v31, %v3453_v58  ;;  %v3138_v54 = vrot.slane %v17187_v52, 1  ;;  %v18047_v46 = vor.u32 %v3460_v25, %v3459_v40  ;;  %v3141_v30 = vrot.slane %v22264_v10, 1  ;;  %v15328_v25 = vld [vmem:[%s22015_s9 + $0x188] sm:$0xff]  }
 0x534   : > { %v18052_v43 = vsel %vm3351_vm8, %v3379_v57, %v22084_v50  ;;  %v3142_v21 = vrot.slane %v22265_v19, 2  ;;  %v18059_v39 = vsel %vm3399_vm15, %v3453_v58, %v3457_v16  ;;  %v3091_v38 = vrot.slane %v22268_v17, 1  ;;  %v15327_v58 = vld [vmem:[%s22015_s9 + $0x1c8] sm:$0xff]  }
 0x535   : > { %4326 = vmatmul.mubr.bf16.gmra.mrb[88].mxu0 %v17824_v28  ;;  %v3058_v28 = vor.u32 %v3056_v48, %v17802_v59  ;;  %v18063_v59 = vsel %vm3399_vm15, %v3457_v16, %v18047_v46  ;;  %v3092_v12 = vrot.slane %v22269_v36, 1  ;;  %v22270_v31 = vrot.slane %v17733_v14, 2  ;;  %v22271_v57 = vld [vmem:[#allocation29_spill] sm:$0xff] }
 0x536   : > { %4333 = vmatprep.mubr.bf16.mxu0 %v17849_v55  ;;  %v3139_v55 = vrot.slane %v22263_v18, 2  ;;  %v3143_v26 = vor.u32 %v3142_v21, %v3141_v30  ;;  %v15329_v16 = vld [vmem:[%s22015_s9 + $0x1d0] sm:$0xff]   ;;  %v15331_v30 = vld [vmem:[%s22015_s9 + $0x1d8] sm:$0xff]  }
 0x537   : > { %4014 = vmatmul.mubr.bf16.gmra.mrb[80].mxu1 %v17737_v15  ;;  %v3093_v56 = vsel %vm2219_vm3, %v3091_v38, %v3092_v12  ;;  %v15334_v38 = vld [vmem:[%s22015_s9 + $0x1a0] sm:$0xff]  }
 0x538   : > { %4021 = vmatprep.mubr.bf16.mxu1 %v3058_v28  ;;  %v3140_v48 = vor.u32 %v3139_v55, %v3138_v54  ;;  %v3148_v40 = vsel %vm2516_vm4, %v3143_v26, %v22271_v57  ;;  %v22272_v28 = vld [vmem:[#allocation26_spill] sm:$0xff]  ;;  %v22276_v57 = vld [vmem:[#allocation28_spill] sm:$0xff] }
 0x539   : > { %v3094_v54 = vrot.slane %v22272_v28, 1  ;;  %v15330_v55 = vld [vmem:[%s22015_s9 + $0x190] sm:$0xff]  }
 0x53a   : > { %v3144_v15 = vsel %vm2516_vm4, %v3140_v48, %v3143_v26  ;;  %v22273_v48 = vld [vmem:[#allocation30_spill] sm:$0xff] }
 0x53b   : > { %v3095_v21 = vsel %vm2219_vm3, %v3092_v12, %v3094_v54  ;;  %v15332_v26 = vld [vmem:[%s22015_s9 + $0x198] sm:$0xff]   ;;  %v15335_v12 = vld [vmem:[%s22015_s9 + $0x1e8] sm:$0xff]  }
 0x53d   : > { %4334 = vmatmul.mubr.bf16.gmra.mrb[92].mxu0 %v22266_v2  ;;  %v15333_v2 = vld [vmem:[%s22015_s9 + $0x1e0] sm:$0xff]  }
 0x53e   : > { %4341 = vmatprep.mubr.bf16.mxu0 %v22267_v45  ;;  %v22274_v45 = vld [vmem:[#allocation25_spill] sm:$0xff] }
 0x53f   : > { %4022 = vmatmul.mubr.bf16.gmra.mrb[84].mxu1 %v17731_v1 }
 0x540   : > { %4061 = vmatprep.mubr.bf16.mxu1 %v3144_v15  ;;  %v3096_v15 = vrot.slane %v22274_v45, 1 }
 0x545   : > { %4342 = vmatmul.mubr.bf16.gmra.mrb[96].mxu0 %v22270_v31  ;;  %v3097_v31 = vsel %vm2219_vm3, %v3094_v54, %v3096_v15 }
 0x547   : > { %4062 = vmatmul.mubr.bf16.vlgmr.msra.gmra.mrb[88].mxu1 %v3093_v56  ;;  %v15337_v56 = vld [vmem:[%s22015_s9 + $0x1f0] sm:$0xff]  }
 0x548   : > { %13867 = vmatpush3.bf16.msra.mxu1 %v15326_v51  ;;  %4069 = vmatprep.mubr.bf16.mxu1 %v3148_v40  ;;  %v22275_v51 = vld [vmem:[#allocation31_spill] sm:$0xff]  ;;  %v3098_v40 = vrot.slane %v22276_v57, 1 }
 0x549   : > { %13868 = vmatprep.subr.bf16.mxu1 %v15327_v58  ;;  %v15336_v58 = vld [vmem:[%s22015_s9 + $0x1a8] sm:$0xff]  }
 0x54a   : > { %v3099_v54 = vsel %vm2219_vm3, %v3096_v15, %v3098_v40  ;;  %v22279_v15 = vld [vmem:[#allocation32_spill] sm:$0xff] }
 0x54c   : > { %13869 = vmatpush3.bf16.msra.mxu1 %v15328_v25  ;;  %v15338_v25 = vld [vmem:[%s22015_s9 + $0x1b0] sm:$0xff]  }
 0x54d   : > { %13870 = vmatprep.subr.bf16.mxu1 %v15329_v16  ;;  %v15339_v16 = vld [vmem:[%s22015_s9 + $0x1f8] sm:$0xff]  }
 0x54f   : > { %4070 = vmatmul.mubr.bf16.gmra.mrb[92].mxu1 %v3095_v21  ;;  %v15341_v21 = vld [vmem:[%s22019_s13 + $0x20] sm:$0xff]  }
 0x550   : > { %4077 = vmatprep.mubr.bf16.mxu1 %v22273_v48  ;;  %13871 = vmatpush3.bf16.msra.mxu1 %v15330_v55  ;;  %v22277_v55 = vld [vmem:[#allocation33_spill] sm:$0xff]  ;;  %v22278_v48 = vld [vmem:[#allocation27_spill] sm:$0xff] }
 0x551   : > { %13872 = vmatprep.subr.bf16.mxu1 %v15331_v30  ;;  %v15340_v30 = vld [vmem:[%s22015_s9 + $0x1b8] sm:$0xff]  }
 0x554   : > { %13873 = vmatpush3.bf16.msra.mxu1 %v15332_v26  ;;  %v3100_v26 = vrot.slane %v22278_v48, 1 }
 0x555   : > { %13874 = vmatprep.subr.bf16.mxu1 %v15333_v2 }
 0x556   : > { %v3101_v2 = vsel %vm2219_vm3, %v3098_v40, %v3100_v26  ;;  %v22286_v40 = vld [vmem:[#allocation62_spill] sm:$0xff] }
 0x557   : > { %4078 = vmatmul.mubr.bf16.gmra.mrb[96].mxu1 %v3097_v31  ;;  %v22281_v31 = vld [vmem:[#allocation57_spill] sm:$0xff] }
 0x558   : > { %4085 = vmatprep.mubr.bf16.mxu1 %v22275_v51  ;;  %13875 = vmatpush3.bf16.msra.mxu1 %v15334_v38  ;;  %v22280_v38 = vrot.slane %v17601_v47, 1  ;;  %v22282_v51 = vld [vmem:[#allocation55_spill] sm:$0xff] }
 0x559   : > { %13876 = vmatprep.subr.bf16.mxu1 %v15335_v12 }
 0x55a   : > { %v3103_v12 = vsel %vm2219_vm3, %v3100_v26, %v22280_v38 }
 0x55c   : > { %13877 = vmatpush3.bf16.msra.mxu1 %v15336_v58  ;;  %v22283_v58 = vld [vmem:[#allocation59_spill] sm:$0xff] }
 0x55d   : > { %13878 = vmatprep.subr.bf16.mxu1 %v15337_v56  ;;  %v22284_v56 = vld [vmem:[#allocation58_spill] sm:$0xff] }
 0x55f   : > { %4086 = vmatmul.mubr.bf16.gmra.mrb[100].mxu1 %v3099_v54  ;;  %v22288_v54 = vld [vmem:[#allocation65_spill] sm:$0xff] }
 0x560   : > { %4093 = vmatprep.mubr.bf16.mxu1 %v22277_v55  ;;  %13879 = vmatpush3.bf16.msra.mxu1 %v15338_v25  ;;  %v22285_v25 = vld [vmem:[#allocation60_spill] sm:$0xff]  ;;  %v22289_v55 = vld [vmem:[#allocation66_spill] sm:$0xff] }
 0x561   : > { %13880 = vmatprep.subr.bf16.mxu1 %v15339_v16  ;;  %v22287_v16 = vld [vmem:[#allocation64_spill] sm:$0xff] }
 0x564   : > { %13881 = vmatpush3.bf16.msra.mxu1 %v15340_v30 }
 0x565   : > { %14438 = vmatprep.subr.bf16.mxu1 %v15341_v21 }
 0x567   : > { %4094 = vmatmul.mubr.bf16.gmra.mrb[104].mxu1 %v3101_v2  ;;  %v22290_v2 = vld [vmem:[#allocation34_spill] sm:$0xff] }
 0x568   : > { %4101 = vmatprep.mubr.bf16.mxu1 %v22279_v15 }
 0x56f   : > { %4102 = vmatmul.mubr.bf16.gmra.mrb[108].mxu1 %v3103_v12  ;;  %v15343_v12 = vld [vmem:[%s22019_s13 + $0x30] sm:$0xff]  }
 0x570   : > { %4109 = vmatprep.mubr.bf16.mxu1 %v22281_v31 }
 0x577   : > { %4110 = vmatmul.mubr.bf16.gmra.mrb[112].mxu1 %v22282_v51 }
 0x578   : > { %4117 = vmatprep.mubr.bf16.mxu1 %v22283_v58  ;;  %v3355_v58 = vrot.slane %v22272_v28, 3 }
 0x57f   : > { %4118 = vmatmul.mubr.bf16.gmra.mrb[116].mxu1 %v22284_v56 }
 0x580   : > { %4125 = vmatprep.mubr.bf16.mxu1 %v17888_v6  ;;  %v3400_v6 = vrot.slane %v17187_v52, 3  ;;  %v3352_v52 = vrot.slane %v22268_v17, 3 }
 0x587   : > { %4126 = vmatmul.mubr.bf16.gmra.mrb[120].mxu1 %v22285_v25 }
 0x588   : > { %4133 = vmatprep.mubr.bf16.mxu1 %v17903_v20  ;;  %v3404_v20 = vrot.slane %v22265_v19, 4 }
 0x58f   : > { %4134 = vmatmul.mubr.bf16.gmra.mrb[124].mxu1 %v17891_v61  ;;  %v3401_v61 = vrot.slane %v22263_v18, 4 }
 0x590   : > { %4141 = vmatprep.mubr.bf16.mxu1 %v17911_v53 }
 0x591   : > { %v3402_v53 = vor.u32 %v3401_v61, %v3400_v6 }
 0x597   : > { %4142 = vmatmul.mubr.bf16.gmra.mrb[128].mxu1 %v22286_v40 }
 0x598   : > { %4149 = vmatprep.mubr.bf16.mxu1 %v17919_v7  ;;  %v3403_v7 = vrot.slane %v22264_v10, 3 }
 0x59a   : > { %v3405_v30 = vor.u32 %v3404_v20, %v3403_v7  ;;  %v22292_v7 = vld [vmem:[#allocation38_spill] sm:$0xff] }
 0x59c   : > { %v3410_v17 = vsel %vm3399_vm15, %v3405_v30, %v22290_v2 }
 0x59f   : > { %4150 = vmatmul.mubr.bf16.gmra.mrb[132].mxu1 %v22287_v16 }
 0x5a0   : > { %4157 = vmatprep.mubr.bf16.mxu1 %v22288_v54  ;;  %v15344_v54 = vld [vmem:[%s22019_s13 + $0x38] sm:$0xff]  }
 0x5a7   : > { %4158 = vmatmul.mubr.bf16.gmra.mrb[136].mxu1 %v22289_v55 }
 0x5a8   : > { %4165 = vmatprep.mubr.bf16.mxu1 %v17947_v41 }
 0x5af   : > { %4166 = vmatmul.mubr.bf16.gmra.mrb[140].mxu1 %v17934_v49  ;;  %v3406_v49 = vsel %vm3399_vm15, %v3402_v53, %v3405_v30  ;;  %v18205_v30 = vld [vmem:[%s22019_s13] sm:$0xff]  }
 0x5b0   : > { %4173 = vmatprep.mubr.bf16.mxu1 %v17958_v5 }
 0x5b7   : > { %4174 = vmatmul.mubr.bf16.gmra.mrb[144].mxu1 %v17952_v23  ;;  %v3353_v23 = vrot.slane %v22269_v36, 3 }
 0x5b8   : > { %4181 = vmatprep.mubr.bf16.mxu1 %v17938_v29  ;;  %v15342_v29 = vld [vmem:[%s22019_s13 + $0x28] sm:$0xff]  }
 0x5b9   : > { %v3356_v6 = vsel %vm3351_vm8, %v3353_v23, %v3355_v58 }
 0x5bf   : > { %4182 = vmatmul.mubr.bf16.gmra.mrb[148].mxu1 %v3120_v35  ;;  %v3354_v35 = vsel %vm3351_vm8, %v3352_v52, %v3353_v23  ;;  %v3357_v52 = vrot.slane %v22274_v45, 3 }
 0x5c0   : > { %4381 = vmatprep.mubr.bf16.mxu1 %v3406_v49 }
 0x5c2   : > { %v13576_v41 = vpop.f32.mrb[44].mxu1 }
 0x5c3   : > { %v13577_v5 = vpop.f32.mrb[45].mxu1 }
 0x5c4   : > { %v18167_v18 = vadd.f32 %v13577_v5, %v13576_v41  ;;  %v13579_v10 = vpop.f32.mrb[46].mxu1 }
 0x5c5   : > { %v13580_v19 = vpop.f32.mrb[47].mxu1 }
 0x5c6   : > { %v18172_v1 = vadd.f32 %v13580_v19, %v13579_v10 }
 0x5c7   : > { %4382 = vmatmul.mubr.bf16.vlgmr.msra.gmra.mrb[152].mxu1 %v3354_v35 }
 0x5c8   : > { %v13800_v26 = vpop.f32.mrb[56].mxu0  ;;  %14439 = vmatpush3.bf16.msra.mxu1 %v15341_v21  ;;  %4389 = vmatprep.mubr.bf16.mxu1 %v3410_v17 }
 0x5c9   : > { %v13801_v15 = vpop.f32.mrb[57].mxu0  ;;  %14440 = vmatprep.subr.bf16.mxu1 %v15342_v29 }
 0x5ca   : > { %v18178_v36 = vadd.f32 %v13801_v15, %v13800_v26  ;;  %v13803_v38 = vpop.f32.mrb[58].mxu0  ;;  %v13582_v51 = vpop.f32.mrb[48].mxu1  ;;  %v3358_v26 = vsel %vm3351_vm8, %v3355_v58, %v3357_v52  ;;  %v22293_v15 = vld [vmem:[#allocation39_spill] sm:$0xff] }
 0x5cb   : > { %v13804_v31 = vpop.f32.mrb[59].mxu0  ;;  %v13583_v25 = vpop.f32.mrb[49].mxu1 }
 0x5cc   : > { %v18184_v56 = vadd.f32 %v13804_v31, %v13803_v38  ;;  %v18186_v21 = vadd.f32 %v13583_v25, %v13582_v51  ;;  %v13585_v40 = vpop.f32.mrb[50].mxu1  ;;  %14441 = vmatpush3.bf16.msra.mxu1 %v15342_v29  ;;  %v3359_v51 = vrot.slane %v22276_v57, 3 }
 0x5cd   : > { %v13586_v16 = vpop.f32.mrb[51].mxu1  ;;  %14442 = vmatprep.subr.bf16.mxu1 %v15343_v12 }
 0x5ce   : > { %v18191_v55 = vadd.f32 %v13586_v16, %v13585_v40 }
 0x5cf   : > { %4390 = vmatmul.mubr.bf16.gmra.mrb[156].mxu1 %v3356_v6 }
 0x5d0   : > { %v13806_v28 = vpop.f32.mrb[60].mxu0  ;;  %4397 = vmatprep.mubr.bf16.mxu1 %v22292_v7  ;;  %14443 = vmatpush3.bf16.msra.mxu1 %v15343_v12 }
 0x5d1   : > { %v13807_v61 = vpop.f32.mrb[61].mxu0  ;;  %14444 = vmatprep.subr.bf16.mxu1 %v15344_v54 }
 0x5d2   : > { %v18200_v20 = vadd.f32 %v13807_v61, %v13806_v28  ;;  %v13809_v53 = vpop.f32.mrb[62].mxu0  ;;  %v13588_v41 = vpop.f32.mrb[52].mxu1  ;;  %v3360_v28 = vsel %vm3351_vm8, %v3357_v52, %v3359_v51 }
 0x5d3   : > { %v13810_v49 = vpop.f32.mrb[63].mxu0  ;;  %v13589_v5 = vpop.f32.mrb[53].mxu1 }
 0x5d4   : > { %v18208_v23 = vadd.f32 %v13810_v49, %v13809_v53  ;;  %v18210_v10 = vadd.f32 %v13589_v5, %v13588_v41  ;;  %v13591_v19 = vpop.f32.mrb[54].mxu1  ;;  %14445 = vmatpush3.bf16.msra.mxu1 %v15344_v54  ;;  %v22294_v53 = vld [vmem:[#allocation40_spill] sm:$0xff] }
 0x5d5   : > { %v13592_v29 = vpop.f32.mrb[55].mxu1  ;;  %14462 = vmatprep.subr.bf16.mxu1 %v18205_v30 }
 0x5d6   : > { %v18213_v35 = vadd.f32 %v13592_v29, %v13591_v19  ;;  %v3361_v19 = vrot.slane %v22278_v48, 3 }
 0x5d7   : > { %4398 = vmatmul.mubr.bf16.gmra.mrb[160].mxu1 %v3358_v26 }
 0x5d8   : > { %v13812_v2 = vpop.f32.mrb[64].mxu0  ;;  %4405 = vmatprep.mubr.bf16.mxu1 %v22293_v15 }
 0x5d9   : > { %v13813_v17 = vpop.f32.mrb[65].mxu0 }
 0x5da   : > { %v18217_v45 = vadd.f32 %v13813_v17, %v13812_v2  ;;  %v13815_v38 = vpop.f32.mrb[66].mxu0  ;;  %v13594_v31 = vpop.f32.mrb[56].mxu1 }
 0x5db   : > { %v13816_v12 = vpop.f32.mrb[67].mxu0  ;;  %v13595_v40 = vpop.f32.mrb[57].mxu1 }
 0x5dc   : > { %v18220_v25 = vadd.f32 %v13816_v12, %v13815_v38  ;;  %v18222_v16 = vadd.f32 %v13595_v40, %v13594_v31  ;;  %v13597_v54 = vpop.f32.mrb[58].mxu1  ;;  %v3362_v38 = vsel %vm3351_vm8, %v3359_v51, %v3361_v19  ;;  %v3364_v51 = vsel %vm3351_vm8, %v3361_v19, %v3363_v62  ;;  %v15359_v62 = vld [vmem:[%s22017_s11] ss:$8 sps:$4 sm:$0xff]  }
 0x5dd   : > { %v13598_v6 = vpop.f32.mrb[59].mxu1 }
 0x5de   : > { %v18224_v58 = vadd.f32 %v13598_v6, %v13597_v54 }
 0x5df   : > { %4406 = vmatmul.mubr.bf16.gmra.mrb[164].mxu1 %v3360_v28 }
 0x5e0   : > { %v13818_v61 = vpop.f32.mrb[68].mxu0  ;;  %4413 = vmatprep.mubr.bf16.mxu1 %v22294_v53 }
 0x5e1   : > { %v13819_v7 = vpop.f32.mrb[69].mxu0 }
 0x5e2   : > { %v18228_v49 = vadd.f32 %v13819_v7, %v13818_v61  ;;  %v13821_v41 = vpop.f32.mrb[70].mxu0  ;;  %v13600_v5 = vpop.f32.mrb[60].mxu1 }
 0x5e3   : > { %v13822_v57 = vpop.f32.mrb[71].mxu0  ;;  %v13601_v26 = vpop.f32.mrb[61].mxu1 }
 0x5e4   : > { %v18231_v29 = vadd.f32 %v13822_v57, %v13821_v41  ;;  %v18233_v2 = vadd.f32 %v13601_v26, %v13600_v5  ;;  %v13603_v17 = vpop.f32.mrb[62].mxu1 }
 0x5e5   : > { %v13604_v15 = vpop.f32.mrb[63].mxu1 }
 0x5e6   : > { %v18235_v52 = vadd.f32 %v13604_v15, %v13603_v17 }
 0x5e7   : > { %4414 = vmatmul.mubr.bf16.gmra.mrb[168].mxu1 %v3362_v38 }
 0x5e8   : > { %v13824_v12 = vpop.f32.mrb[72].mxu0  ;;  %4421 = vmatprep.mubr.bf16.mxu1 %v17966_v37 }
 0x5e9   : > { %v13825_v31 = vpop.f32.mrb[73].mxu0 }
 0x5ea   : > { %v18239_v40 = vadd.f32 %v13825_v31, %v13824_v12  ;;  %v13827_v54 = vpop.f32.mrb[74].mxu0  ;;  %v13606_v6 = vpop.f32.mrb[64].mxu1 }
 0x5eb   : > { %v13828_v48 = vpop.f32.mrb[75].mxu0  ;;  %v13607_v61 = vpop.f32.mrb[65].mxu1 }
 0x5ec   : > { %v18241_v28 = vadd.f32 %v13828_v48, %v13827_v54  ;;  %v18243_v7 = vadd.f32 %v13607_v61, %v13606_v6  ;;  %v13609_v53 = vpop.f32.mrb[66].mxu1 }
 0x5ed   : > { %v13610_v41 = vpop.f32.mrb[67].mxu1 }
 0x5ee   : > { %v18245_v57 = vadd.f32 %v13610_v41, %v13609_v53  ;;  %v15365_v53 = vld [vmem:[%s22017_s11 + $0x14] ss:$8 sps:$4 sm:$0xff]  }
 0x5ef   : > { %4422 = vmatmul.mubr.bf16.gmra.mrb[172].mxu1 %v3364_v51 }
 0x5f0   : > { %v13830_v5 = vpop.f32.mrb[76].mxu0  ;;  %4429 = vmatprep.mubr.bf16.mxu1 %v17977_v33  ;;  %v15361_v33 = vld [vmem:[%s22017_s11 + $0x4] ss:$8 sps:$4 sm:$0xff]  }
 0x5f1   : > { %v13831_v37 = vpop.f32.mrb[77].mxu0  ;;  %6324 = vmatprep.subr.bf16.mxu0 %v15361_v33 }
 0x5f2   : > { %v18251_v26 = vadd.f32 %v13831_v37, %v13830_v5  ;;  %v13833_v17 = vpop.f32.mrb[78].mxu0  ;;  %v13612_v38 = vpop.f32.mrb[68].mxu1  ;;  %6325 = vmatpush1.bf16.msra.mxu0 %v15359_v62  ;;  %v15363_v5 = vld [vmem:[%s22017_s11 + $0x10] ss:$8 sps:$4 sm:$0xff]  }
 0x5f3   : > { %v13834_v15 = vpop.f32.mrb[79].mxu0  ;;  %v13613_v31 = vpop.f32.mrb[69].mxu1  ;;  %6326 = vmatprep.subr.bf16.mxu0 %v15365_v53 }
 0x5f4   : > { %v18253_v12 = vadd.f32 %v13834_v15, %v13833_v17  ;;  %v18255_v54 = vadd.f32 %v13613_v31, %v13612_v38  ;;  %v13615_v48 = vpop.f32.mrb[70].mxu1 }
 0x5f5   : > { %v13616_v6 = vpop.f32.mrb[71].mxu1 }
 0x5f6   : > { %v18257_v47 = vadd.f32 %v13616_v6, %v13615_v48  ;;  %6327 = vmatpush1.bf16.msra.mxu0 %v15363_v5  ;;  %v15366_v48 = vld [vmem:[%s22017_s11 + $0x20] ss:$8 sps:$4 sm:$0xff]   ;;  %v15368_v6 = vld [vmem:[%s22017_s11 + $0x24] ss:$8 sps:$4 sm:$0xff]   ;;  %v15370_v5 = vld [vmem:[%s22017_s11 + $0x30] ss:$8 sps:$4 sm:$0xff]  }
 0x5f7   : > { %4430 = vmatmul.mubr.bf16.gmra.mrb[176].mxu1 %v17971_v24  ;;  %6328 = vmatprep.subr.bf16.mxu0 %v15368_v6  ;;  %v15373_v6 = vld [vmem:[%s22017_s11 + $0x40] ss:$8 sps:$4 sm:$0xff]  }
 0x5f8   : > { %v13836_v19 = vpop.f32.mrb[80].mxu0  ;;  %4437 = vmatprep.mubr.bf16.mxu1 %v17992_v0 }
 0x5f9   : > { %v13837_v61 = vpop.f32.mrb[81].mxu0 }
 0x5fa   : > { %v18270_v41 = vadd.f32 %v13837_v61, %v13836_v19  ;;  %v13839_v51 = vpop.f32.mrb[82].mxu0  ;;  %v13618_v17 = vpop.f32.mrb[72].mxu1  ;;  %v15372_v61 = vld [vmem:[%s22017_s11 + $0x34] ss:$8 sps:$4 sm:$0xff]   ;;  %6329 = vmatpush1.bf16.msra.mxu0 %v15366_v48  ;;  %v15375_v48 = vld [vmem:[%s22017_s11 + $0x44] ss:$8 sps:$4 sm:$0xff]  }
 0x5fb   : > { %v13840_v37 = vpop.f32.mrb[83].mxu0  ;;  %v13619_v15 = vpop.f32.mrb[73].mxu1  ;;  %6330 = vmatprep.subr.bf16.mxu0 %v15372_v61 }
 0x5fc   : > { %v18275_v24 = vadd.f32 %v13840_v37, %v13839_v51  ;;  %v13621_v0 = vpop.f32.mrb[74].mxu1  ;;  %v18277_v38 = vadd.f32 %v13619_v15, %v13618_v17 }
 0x5fd   : > { %v13622_v31 = vpop.f32.mrb[75].mxu1 }
 0x5fe   : > { %v18285_v62 = vadd.f32 %v13622_v31, %v13621_v0  ;;  %6331 = vmatpush1.bf16.msra.mxu0 %v15370_v5 }
 0x5ff   : > { %4438 = vmatmul.mubr.bf16.gmra.mrb[180].mxu1 %v17983_v60  ;;  %6332 = vmatprep.subr.bf16.mxu0 %v15375_v48 }
 0x600   : > { %v13842_v33 = vpop.f32.mrb[84].mxu0  ;;  %4445 = vmatprep.mubr.bf16.mxu1 %v18001_v27 }
 0x601   : > { %v13843_v19 = vpop.f32.mrb[85].mxu0 }
 0x602   : > { %v18292_v53 = vadd.f32 %v13843_v19, %v13842_v33  ;;  %v13845_v51 = vpop.f32.mrb[86].mxu0  ;;  %v13624_v17 = vpop.f32.mrb[76].mxu1  ;;  %6333 = vmatpush1.bf16.msra.mxu0 %v15373_v6  ;;  %v15380_v6 = vld [vmem:[%s22017_s11 + $0x60] ss:$8 sps:$4 sm:$0xff]  }
 0x603   : > { %v13846_v37 = vpop.f32.mrb[87].mxu0  ;;  %v13625_v15 = vpop.f32.mrb[77].mxu1 }
 0x604   : > { %v18297_v60 = vadd.f32 %v13846_v37, %v13845_v51  ;;  %v13627_v27 = vpop.f32.mrb[78].mxu1  ;;  %v18299_v0 = vadd.f32 %v13625_v15, %v13624_v17  ;;  %v15377_v37 = vld [vmem:[%s22017_s11 + $0x50] ss:$8 sps:$4 sm:$0xff]   ;;  %v15379_v17 = vld [vmem:[%s22017_s11 + $0x54] ss:$8 sps:$4 sm:$0xff]  }
 0x605   : > { %v13628_v31 = vpop.f32.mrb[79].mxu1  ;;  %6334 = vmatprep.subr.bf16.mxu0 %v15379_v17 }
 0x606   : > { %v18307_v33 = vadd.f32 %v13628_v31, %v13627_v27  ;;  %6335 = vmatpush1.bf16.msra.mxu0 %v15377_v37 }
 0x607   : > { %4446 = vmatmul.mubr.bf16.gmra.mrb[184].mxu1 %v17995_v4 }
 0x608   : > { %v13848_v19 = vpop.f32.mrb[88].mxu0  ;;  %4453 = vmatprep.mubr.bf16.mxu1 %v18014_v32 }
 0x609   : > { %v13849_v61 = vpop.f32.mrb[89].mxu0 }
 0x60a   : > { %v18311_v51 = vadd.f32 %v13849_v61, %v13848_v19  ;;  %v13851_v5 = vpop.f32.mrb[90].mxu0  ;;  %v13630_v27 = vpop.f32.mrb[80].mxu1  ;;  %v15382_v61 = vld [vmem:[%s22017_s11 + $0x64] ss:$8 sps:$4 sm:$0xff]  }
 0x60b   : > { %v13852_v15 = vpop.f32.mrb[91].mxu0  ;;  %v13631_v4 = vpop.f32.mrb[81].mxu1  ;;  %6336 = vmatprep.subr.bf16.mxu0 %v15382_v61 }
 0x60c   : > { %22295 = vst [vmem:[#allocation22_spill] sm:$0xff] %v18311_v51  ;;  %v18319_v31 = vadd.f32 %v13852_v15, %v13851_v5  ;;  %v13633_v32 = vpop.f32.mrb[82].mxu1  ;;  %v18321_v48 = vadd.f32 %v13631_v4, %v13630_v27  ;;  %6337 = vmatpush1.bf16.msra.mxu0 %v15380_v6  ;;  %v15384_v15 = vld [vmem:[%s22017_s11 + $0x70] ss:$8 sps:$4 sm:$0xff]   ;;  %v15386_v27 = vld [vmem:[%s22017_s11 + $0x74] ss:$8 sps:$4 sm:$0xff]  }
 0x60d   : > { %v13634_v19 = vpop.f32.mrb[83].mxu1  ;;  %6338 = vmatprep.subr.bf16.mxu0 %v15386_v27  ;;  %v15387_v6 = vld [vmem:[%s22017_s11 + $0x80] ss:$8 sps:$4 sm:$0xff]  }
 0x60e   : > { %v18329_v50 = vadd.f32 %v13634_v19, %v13633_v32 }
 0x60f   : > { %4454 = vmatmul.mubr.bf16.gmra.mrb[188].mxu1 %v18004_v8 }
 0x610   : > { %22296 = vst [vmem:[#allocation24_spill] sm:$0xff] %v18329_v50  ;;  %v13854_v51 = vpop.f32.mrb[92].mxu0  ;;  %4461 = vmatprep.mubr.bf16.mxu1 %v18020_v34  ;;  %6339 = vmatpush1.bf16.msra.mxu0 %v15384_v15  ;;  %v18356_v15 = vld [vmem:[#allocation3] ss:$0 sm:$0xff] }
 0x611   : > { %v13855_v5 = vpop.f32.mrb[93].mxu0 }
 0x612   : > { %v18333_v17 = vadd.f32 %v13855_v5, %v13854_v51  ;;  %v13857_v37 = vpop.f32.mrb[94].mxu0  ;;  %v13636_v32 = vpop.f32.mrb[84].mxu1  ;;  %v15389_v5 = vld [vmem:[%s22017_s11 + $0x84] ss:$8 sps:$4 sm:$0xff]  }
 0x613   : > { %v13858_v4 = vpop.f32.mrb[95].mxu0  ;;  %v13637_v8 = vpop.f32.mrb[85].mxu1  ;;  %6340 = vmatprep.subr.bf16.mxu0 %v15389_v5 }
 0x614   : > { %22297 = vst [vmem:[#allocation23_spill] sm:$0xff] %v18333_v17  ;;  %v18341_v19 = vadd.f32 %v13858_v4, %v13857_v37  ;;  %v13639_v34 = vpop.f32.mrb[86].mxu1  ;;  %v18343_v61 = vadd.f32 %v13637_v8, %v13636_v32  ;;  %v15393_v37 = vld [vmem:[%s22017_s11 + $0x94] ss:$8 sps:$4 sm:$0xff]   ;;  %6341 = vmatpush1.bf16.msra.mxu0 %v15387_v6  ;;  %v15391_v8 = vld [vmem:[%s22017_s11 + $0x90] ss:$8 sps:$4 sm:$0xff]  }
 0x615   : > { %v13640_v51 = vpop.f32.mrb[87].mxu1  ;;  %6342 = vmatprep.subr.bf16.mxu0 %v15393_v37  ;;  %v15396_v37 = vld [vmem:[%s22017_s11 + $0xa4] ss:$8 sps:$4 sm:$0xff]  }
 0x616   : > { %22298 = vst [vmem:[#allocation53_spill] sm:$0xff] %v18341_v19  ;;  %22299 = vst [vmem:[#allocation52_spill] sm:$0xff] %v18343_v61  ;;  %v22301_v61 = vld [vmem:[#allocation35_spill] sm:$0xff] }
 0x617   : > { %4462 = vmatmul.mubr.bf16.gmra.mrb[192].mxu1 %v18009_v44  ;;  %v3904_v19 = vadd.f32 %v22301_v61, %v18356_v15  ;;  %v15394_v61 = vld [vmem:[%s22017_s11 + $0xa0] ss:$8 sps:$4 sm:$0xff]  }
 0x618   : > { %v13860_v17 = vpop.f32.mrb[96].mxu0  ;;  %4469 = vmatprep.mubr.bf16.mxu1 %v18033_v42  ;;  %6343 = vmatpush1.bf16.msra.mxu0 %v15391_v8 }
 0x619   : > { %v13861_v27 = vpop.f32.mrb[97].mxu0  ;;  %6344 = vmatprep.subr.bf16.mxu0 %v15396_v37 }
 0x61a   : > { %v18358_v4 = vadd.f32 %v13861_v27, %v13860_v17  ;;  %v13863_v32 = vpop.f32.mrb[98].mxu0  ;;  %v13658_v44 = vpop.f32.mrb[88].mxu1  ;;  %v22302_v17 = vld [vmem:[#allocation36_spill] sm:$0xff] }
 0x61b   : > { %v13864_v34 = vpop.f32.mrb[99].mxu0  ;;  %v13659_v51 = vpop.f32.mrb[89].mxu1  ;;  %v3907_v27 = vadd.f32 %v22302_v17, %v18356_v15 }
 0x61c   : > { %22300 = vst [vmem:[#allocation21_spill] sm:$0xff] %v18358_v4  ;;  %v13661_v50 = vpop.f32.mrb[90].mxu1  ;;  %v13660_v42 = vadd.f32 %v13659_v51, %v13658_v44  ;;  %v22303_v34 = vld [vmem:[#allocation41_spill] sm:$0xff]  ;;  %6345 = vmatpush1.bf16.msra.mxu0 %v15394_v61  ;;  %v22309_v61 = vld [vmem:[#allocation43_spill] sm:$0xff] }
 0x61d   : > { %v13662_v5 = vpop.f32.mrb[91].mxu1 }
 0x61e   : > { %v4064_v32 = vadd.f32 %v13660_v42, %v3904_v19  ;;  %v13663_v6 = vadd.f32 %v13662_v5, %v13661_v50  ;;  %v22305_v19 = vld [vmem:[#allocation42_spill] sm:$0xff] }
 0x61f   : > { %4470 = vmatmul.mubr.bf16.gmra.mrb[196].mxu1 %v18023_v9  ;;  %v15398_v5 = vld [vmem:[%s22017_s11 + $0xb0] ss:$8 sps:$4 sm:$0xff]  }
 0x620   : > { %4477 = vmatprep.mubr.bf16.mxu1 %v18040_v11  ;;  %v18370_v4 = vadd.f32 %v22303_v34, %v4064_v32  ;;  %v4067_v8 = vadd.f32 %v13663_v6, %v3907_v27  ;;  %v22307_v11 = vld [vmem:[#allocation37_spill] sm:$0xff]  ;;  %v15400_v27 = vld [vmem:[%s22017_s11 + $0xb4] ss:$8 sps:$4 sm:$0xff]  }
 0x621   : > { %v3912_v51 = vadd.f32 %v22307_v11, %v18356_v15  ;;  %v22308_v6 = vld [vmem:[#allocation51_spill] sm:$0xff]  ;;  %6346 = vmatprep.subr.bf16.mxu0 %v15400_v27 }
 0x622   : > { %22304 = vst [vmem:[#allocation20_spill] sm:$0xff] %v18370_v4  ;;  %v13664_v44 = vpop.f32.mrb[92].mxu1  ;;  %v18379_v50 = vadd.f32 %v22305_v19, %v4067_v8  ;;  %v3915_v34 = vadd.f32 %v22308_v6, %v18356_v15  ;;  %6347 = vmatpush1.bf16.msra.mxu0 %v15398_v5  ;;  %v15401_v11 = vld [vmem:[%s22017_s11 + $0xc0] ss:$8 sps:$4 sm:$0xff]   ;;  %v22313_v5 = vld [vmem:[#allocation54_spill] sm:$0xff] }
 0x623   : > { %v13665_v9 = vpop.f32.mrb[93].mxu1  ;;  %v18408_v6 = vld [vmem:[%s18197_s3] sm:$0xff]  }
 0x624   : > { %22306 = vst [vmem:[#allocation29_spill] sm:$0xff] %v18379_v50  ;;  %v13667_v42 = vpop.f32.mrb[94].mxu1  ;;  %v13666_v17 = vadd.f32 %v13665_v9, %v13664_v44 }
 0x625   : > { %v13668_v32 = vpop.f32.mrb[95].mxu1 }
 0x626   : > { %v4072_v37 = vadd.f32 %v13666_v17, %v3912_v51  ;;  %v13669_v8 = vadd.f32 %v13668_v32, %v13667_v42  ;;  %v15403_v51 = vld [vmem:[%s22017_s11 + $0xc4] ss:$8 sps:$4 sm:$0xff]   ;;  %v3920_v32 = vadd.f32 %v22313_v5, %v18356_v15 }
 0x627   : > { %4478 = vmatmul.mubr.bf16.gmra.mrb[200].mxu1 %v18027_v13  ;;  %v22311_v42 = vld [vmem:[#allocation44_spill] sm:$0xff]  ;;  %6348 = vmatprep.subr.bf16.mxu0 %v15403_v51 }
 0x628   : > { %4485 = vmatprep.mubr.bf16.mxu1 %v18059_v39  ;;  %v18394_v19 = vadd.f32 %v22309_v61, %v4072_v37  ;;  %v4075_v44 = vadd.f32 %v13669_v8, %v3915_v34  ;;  %6349 = vmatpush1.bf16.msra.mxu0 %v15401_v11  ;;  %v15404_v34 = vld [vmem:[%s22017_s11 + $0xd0] ss:$8 sps:$4 sm:$0xff]   ;;  %v15406_v37 = vld [vmem:[%s22017_s11 + $0xd4] ss:$8 sps:$4 sm:$0xff]   ;;  %v22314_v61 = vld [vmem:[#allocation56_spill] sm:$0xff] }
 0x629   : > { %6350 = vmatprep.subr.bf16.mxu0 %v15406_v37  ;;  %v18421_v11 = vld [vmem:[%s18197_s3 + $0x8] sm:$0xff]  }
 0x62a   : > { %22310 = vst [vmem:[#allocation26_spill] sm:$0xff] %v18394_v19  ;;  %v13670_v9 = vpop.f32.mrb[96].mxu1  ;;  %v18403_v17 = vadd.f32 %v22311_v42, %v4075_v44  ;;  %v3923_v44 = vadd.f32 %v22314_v61, %v18356_v15  ;;  %v22315_v19 = vld [vmem:[#allocation45_spill] sm:$0xff] }
 0x62b   : > { %v13671_v13 = vpop.f32.mrb[97].mxu1  ;;  %v22319_v37 = vld [vmem:[#allocation61_spill] sm:$0xff] }
 0x62c   : > { %22312 = vst [vmem:[#allocation30_spill] sm:$0xff] %v18403_v17  ;;  %v13673_v39 = vpop.f32.mrb[98].mxu1  ;;  %v13672_v8 = vadd.f32 %v13671_v13, %v13670_v9  ;;  %v22085_v17 = vshll.u32 %v18408_v6, 16  ;;  %6351 = vmatpush1.bf16.msra.mxu0 %v15404_v34  ;;  %v15407_v13 = vld [vmem:[%s22017_s11 + $0xe0] ss:$8 sps:$4 sm:$0xff]   ;;  %v22086_v34 = vshrl.u32 %v18408_v6, 16 }
 0x62d   : > { %v13674_v27 = vpop.f32.mrb[99].mxu1 }
 0x62e   : > { %v13675_v51 = vadd.f32 %v13674_v27, %v13673_v39  ;;  %v4080_v42 = vadd.f32 %v13672_v8, %v3920_v32  ;;  %v22317_v39 = vld [vmem:[#allocation46_spill] sm:$0xff]  ;;  %v3928_v8 = vadd.f32 %v22319_v37, %v18356_v15 }
 0x62f   : > { %4486 = vmatmul.mubr.bf16.gmra.mrb[204].mxu1 %v18043_v22  ;;  %v15409_v22 = vld [vmem:[%s22017_s11 + $0xe4] ss:$8 sps:$4 sm:$0xff]   ;;  %v18452_v37 = vld [vmem:[%s18197_s3 + $0x10] sm:$0xff]  }
 0x630   : > { %4493 = vmatprep.mubr.bf16.mxu1 %v18063_v59  ;;  %v4083_v5 = vadd.f32 %v13675_v51, %v3923_v44  ;;  %v18425_v50 = vadd.f32 %v22315_v19, %v4080_v42  ;;  %6352 = vmatprep.subr.bf16.mxu0 %v15409_v22  ;;  %v7826_v44 = vrot.slane %v22085_v17, 1  ;;  %v15410_v51 = vld [vmem:[%s22017_s11 + $0xf0] ss:$8 sps:$4 sm:$0xff]   ;;  %v15412_v42 = vld [vmem:[%s22017_s11 + $0xf4] ss:$8 sps:$4 sm:$0xff]  }
 0x631   : > { %6353 = vmatpush1.bf16.msra.mxu0 %v15407_v13  ;;  %v22320_v22 = vld [vmem:[#allocation63_spill] sm:$0xff] }
 0x632   : > { %22316 = vst [vmem:[#allocation25_spill] sm:$0xff] %v18425_v50  ;;  %v13676_v9 = vpop.f32.mrb[100].mxu1  ;;  %v18434_v59 = vadd.f32 %v22317_v39, %v4083_v5  ;;  %v3931_v39 = vadd.f32 %v22320_v22, %v18356_v15  ;;  %6354 = vmatprep.subr.bf16.mxu0 %v15412_v42  ;;  %v22321_v50 = vshll.u32 %v18421_v11, 16 }
 0x633   : > { %v13677_v32 = vpop.f32.mrb[101].mxu1 }
 0x634   : > { %22318 = vst [vmem:[#allocation31_spill] sm:$0xff] %v18434_v59  ;;  %v13679_v27 = vpop.f32.mrb[102].mxu1  ;;  %v13678_v5 = vadd.f32 %v13677_v32, %v13676_v9  ;;  %v7827_v59 = vor.u32 %v7826_v44, %v22086_v34  ;;  %v7831_v4 = vrot.slane %v22321_v50, 1  ;;  %v18460_v9 = vld [vmem:[%s18197_s3 + $0x18] sm:$0xff]   ;;  %v18482_v34 = vld [vmem:[%s18197_s3 + $0x20] sm:$0xff]  }
 0x635   : > { %v13680_v61 = vpop.f32.mrb[103].mxu1  ;;  %6355 = vmatpush1.bf16.msra.mxu0 %v15410_v51  ;;  %v22322_v32 = vld [vmem:[#allocation47_spill] sm:$0xff] }
 0x636   : > { %v13681_v19 = vadd.f32 %v13680_v61, %v13679_v27  ;;  %v4088_v17 = vadd.f32 %v13678_v5, %v3928_v8  ;;  %v22323_v61 = vld [vmem:[#allocation48_spill] sm:$0xff]  ;;  %v7832_v51 = vsel %vm1624_vm1, %v7827_v59, %v7831_v4  ;;  %v22326_v59 = vshrl.u32 %v18421_v11, 16 }
 0x637   : > { %4494 = vmatmul.mubr.bf16.gmra.mrb[208].mxu1 %v18052_v43 }
 0x638   : > { %4501 = vmatprep.mubr.bf16.mxu1 %v18047_v46  ;;  %v4091_v13 = vadd.f32 %v13681_v19, %v3931_v39  ;;  %v18463_v27 = vadd.f32 %v22322_v32, %v4088_v17  ;;  %v22087_v46 = vshll.u32 %v18452_v37, 16  ;;  %v3936_v19 = vadd.f32 %v17943_v63, %v18356_v15 }
 0x639   : > { %v22088_v17 = vshrl.u32 %v18452_v37, 16 }
 0x63a   : > { %v13682_v43 = vpop.f32.mrb[104].mxu1  ;;  %v18466_v42 = vadd.f32 %v22323_v61, %v4091_v13  ;;  %v3939_v13 = vadd.f32 %v17961_v3, %v18356_v15  ;;  %v22325_v61 = vrot.slane %v17733_v14, 3  ;;  %v7839_v63 = vrot.slane %v22087_v46, 1  ;;  %v18492_v14 = vld [vmem:[%s18197_s3 + $0x28] sm:$0xff]   ;;  %v22329_v46 = vld [vmem:[#allocation50_spill] sm:$0xff] }
 0x63b   : > { %v13683_v8 = vpop.f32.mrb[105].mxu1  ;;  %v22327_v3 = vshll.u32 %v18460_v9, 16 }
 0x63c   : > { %22324 = vst [vmem:[#allocation28_spill] sm:$0xff] %v18466_v42  ;;  %v13685_v44 = vpop.f32.mrb[106].mxu1  ;;  %v13684_v39 = vadd.f32 %v13683_v8, %v13682_v43  ;;  %v7835_v42 = vor.u32 %v22326_v59, %v7831_v4  ;;  %v7843_v43 = vor.u32 %v22088_v17, %v7839_v63  ;;  %v22089_v4 = vshll.u32 %v18482_v34, 16 }
 0x63d   : > { %v13686_v5 = vpop.f32.mrb[107].mxu1  ;;  %v7847_v8 = vrot.slane %v22327_v3, 1  ;;  %v22090_v3 = vshrl.u32 %v18460_v9, 16 }
 0x63e   : > { %v13687_v32 = vadd.f32 %v13686_v5, %v13685_v44  ;;  %v4096_v50 = vadd.f32 %v13684_v39, %v3936_v19  ;;  %v22328_v44 = vld [vmem:[#allocation49_spill] sm:$0xff]  ;;  %v7840_v59 = vsel %vm1624_vm1, %v7835_v42, %v7839_v63  ;;  %v7855_v42 = vrot.slane %v22089_v4, 1 }
 0x63f   : > { %4502 = vmatmul.mubr.bf16.gmra.mrb[212].mxu1 %v22325_v61  ;;  %v18517_v63 = vld [vmem:[%s18197_s3 + $0x30] sm:$0xff]  }
 0x640   : > { %14446 = vmatprep.mubr.msk.bf16.mxu1 %vm1776_vm2, %v7832_v51  ;;  %v4099_v22 = vadd.f32 %v13687_v32, %v3939_v13  ;;  %v18495_v5 = vadd.f32 %v22328_v44, %v4096_v50  ;;  %v3944_v51 = vadd.f32 %v18167_v18, %v18356_v15  ;;  %v7848_v50 = vsel %vm1624_vm1, %v7843_v43, %v7847_v8 }
 0x641   : > { %v3947_v18 = vadd.f32 %v18172_v1, %v18356_v15  ;;  %v7851_v44 = vor.u32 %v22090_v3, %v7847_v8  ;;  %v22330_v1 = vshrl.u32 %v18482_v34, 16 }
 0x642   : > { %v13688_v61 = vpop.f32.mrb[108].mxu1  ;;  %v18498_v19 = vadd.f32 %v22329_v46, %v4099_v22  ;;  %v15350_v46 = vld [vmem:[%s22019_s13 + $0x8] sm:$0xff]  }
 0x643   : > { %v13689_v39 = vpop.f32.mrb[109].mxu1 }
 0x644   : > { %v13690_v13 = vadd.f32 %v13689_v39, %v13688_v61  ;;  %v13691_v32 = vpop.f32.mrb[110].mxu1 }
 0x645   : > { %v13692_v17 = vpop.f32.mrb[111].mxu1 }
 0x646   : > { %v4104_v61 = vadd.f32 %v13690_v13, %v3944_v51  ;;  %v13693_v39 = vadd.f32 %v13692_v17, %v13691_v32  ;;  %v7859_v17 = vor.u32 %v22330_v1, %v7855_v42  ;;  %v22331_v51 = vshll.u32 %v18492_v14, 16  ;;  %v15353_v32 = vld [vmem:[%s22019_s13 + $0x10] sm:$0xff]  }
 0x647   : > { %14447 = vmatmul.mubr.msk.bf16.vlgmr.msra.gmra.mrb[216].mxu1 %vm1776_vm2, %v7840_v59  ;;  %v7856_v1 = vsel %vm1624_vm1, %v7851_v44, %v7855_v42 }
 0x648   : > { %v4107_v43 = vadd.f32 %v13693_v39, %v3947_v18  ;;  %14463 = vmatpush3.bf16.msra.mxu1 %v18205_v30  ;;  %14450 = vmatprep.mubr.msk.bf16.mxu1 %vm1776_vm2, %v7848_v50  ;;  %v18524_v22 = vadd.f32 %v18178_v36, %v4104_v61  ;;  %v7863_v13 = vrot.slane %v22331_v51, 1  ;;  %v18534_v30 = vld [vmem:[%s18197_s3 + $0x38] sm:$0xff]   ;;  %v3952_v18 = vadd.f32 %v18186_v21, %v18356_v15 }
 0x649   : > { %14464 = vmatprep.subr.bf16.mxu1 %v15350_v46  ;;  %v7865_v51 = vshrl.u32 %v18492_v14, 16  ;;  %v15356_v36 = vld [vmem:[%s22019_s13 + $0x18] sm:$0xff]   ;;  %v3955_v21 = vadd.f32 %v18191_v55, %v18356_v15 }
 0x64a   : > { %v13694_v59 = vpop.f32.mrb[112].mxu1  ;;  %v18537_v50 = vadd.f32 %v18184_v56, %v4107_v43  ;;  %v7864_v3 = vsel %vm1624_vm1, %v7859_v17, %v7863_v13  ;;  %v22091_v56 = vshrl.u32 %v18517_v63, 16 }
 0x64b   : > { %v13695_v8 = vpop.f32.mrb[113].mxu1 }
 0x64c   : > { %v13696_v61 = vadd.f32 %v13695_v8, %v13694_v59  ;;  %v13697_v39 = vpop.f32.mrb[114].mxu1  ;;  %14465 = vmatpush3.bf16.msra.mxu1 %v15350_v46  ;;  %v22332_v46 = vshll.u32 %v18517_v63, 16  ;;  %v7867_v8 = vor.u32 %v7865_v51, %v7863_v13 }
 0x64d   : > { %v13698_v4 = vpop.f32.mrb[115].mxu1  ;;  %14466 = vmatprep.subr.bf16.mxu1 %v15353_v32 }
 0x64e   : > { %v4112_v59 = vadd.f32 %v13696_v61, %v3952_v18  ;;  %v13699_v44 = vadd.f32 %v13698_v4, %v13697_v39  ;;  %v7871_v42 = vrot.slane %v22332_v46, 1  ;;  %v22333_v4 = vshll.u32 %v18534_v30, 16  ;;  %v15357_v61 = vld [vmem:[%s22019_s13 + $0x40] sm:$0xff]  }
 0x64f   : > { %14451 = vmatmul.mubr.msk.bf16.gmra.mrb[220].mxu1 %vm1776_vm2, %v7856_v1 }
 0x650   : > { %v4115_v17 = vadd.f32 %v13699_v44, %v3955_v21  ;;  %14454 = vmatprep.mubr.msk.bf16.mxu1 %vm1776_vm2, %v7864_v3  ;;  %14467 = vmatpush3.bf16.msra.mxu1 %v15353_v32  ;;  %v18559_v43 = vadd.f32 %v18200_v20, %v4112_v59  ;;  %v7875_v55 = vor.u32 %v22091_v56, %v7871_v42  ;;  %v7879_v18 = vrot.slane %v22333_v4, 1 }
 0x651   : > { %14468 = vmatprep.subr.bf16.mxu1 %v15356_v36  ;;  %v3960_v20 = vadd.f32 %v18210_v10, %v18356_v15  ;;  %v7872_v21 = vsel %vm1624_vm1, %v7867_v8, %v7871_v42  ;;  %v3963_v4 = vadd.f32 %v18213_v35, %v18356_v15  ;;  %v3968_v35 = vadd.f32 %v18222_v16, %v18356_v15 }
 0x652   : > { %v13700_v39 = vpop.f32.mrb[116].mxu1  ;;  %v18569_v3 = vadd.f32 %v18208_v23, %v4115_v17  ;;  %v7880_v44 = vsel %vm1624_vm1, %v7875_v55, %v7879_v18  ;;  %v7881_v23 = vshrl.u32 %v18534_v30, 16 }
 0x653   : > { %v13701_v13 = vpop.f32.mrb[117].mxu1 }
 0x654   : > { %v13702_v32 = vadd.f32 %v13701_v13, %v13700_v39  ;;  %v13703_v1 = vpop.f32.mrb[118].mxu1  ;;  %14469 = vmatpush3.bf16.msra.mxu1 %v15356_v36  ;;  %v7883_v55 = vor.u32 %v7881_v23, %v7879_v18 }
 0x655   : > { %v13704_v59 = vpop.f32.mrb[119].mxu1  ;;  %14486 = vmatprep.subr.bf16.mxu1 %v15357_v61 }
 0x656   : > { %v4120_v46 = vadd.f32 %v13702_v32, %v3960_v20  ;;  %v13705_v56 = vadd.f32 %v13704_v59, %v13703_v1  ;;  %v3971_v32 = vadd.f32 %v18224_v58, %v18356_v15  ;;  %v3976_v59 = vadd.f32 %v18233_v2, %v18356_v15 }
 0x657   : > { %14455 = vmatmul.mubr.msk.bf16.gmra.mrb[224].mxu1 %vm1776_vm2, %v7872_v21 }
 0x658   : > { %v4123_v17 = vadd.f32 %v13705_v56, %v3963_v4  ;;  %14458 = vmatprep.mubr.msk.bf16.mxu1 %vm1776_vm2, %v7880_v44  ;;  %v18581_v10 = vadd.f32 %v18217_v45, %v4120_v46  ;;  %v15358_v4 = vld [vmem:[%s22019_s13 + $0x48] sm:$0xff]  }
 0x65a   : > { %v13706_v36 = vpop.f32.mrb[120].mxu1  ;;  %v18584_v42 = vadd.f32 %v18220_v25, %v4123_v17 }
 0x65b   : > { %v13707_v8 = vpop.f32.mrb[121].mxu1 }
 0x65c   : > { %v13708_v39 = vadd.f32 %v13707_v8, %v13706_v36  ;;  %v13709_v13 = vpop.f32.mrb[122].mxu1  ;;  %v15362_v8 = vld [vmem:[%s22019_s13 + $0x50] sm:$0xff]  }
 0x65d   : > { %v13710_v20 = vpop.f32.mrb[123].mxu1 }
 0x65e   : > { %v4128_v56 = vadd.f32 %v13708_v39, %v3968_v35  ;;  %v13711_v45 = vadd.f32 %v13710_v20, %v13709_v13  ;;  %v3984_v39 = vadd.f32 %v18243_v7, %v18356_v15 }
 0x65f   : > { %14459 = vmatmul.mubr.msk.bf16.gmra.mrb[228].mxu1 %vm1776_vm2, %v7883_v55 }
 0x660   : > { %v4131_v1 = vadd.f32 %v13711_v45, %v3971_v32  ;;  %14470 = vmatprep.mubr.msk.bf16.mxu1 %vm1776_vm2, %v18408_v6  ;;  %v18596_v25 = vadd.f32 %v18228_v49, %v4128_v56  ;;  %v3979_v49 = vadd.f32 %v18235_v52, %v18356_v15  ;;  %v3987_v32 = vadd.f32 %v18245_v57, %v18356_v15  ;;  %v15415_v57 = vld [vmem:[%s22017_s11 + $0x104] ss:$8 sps:$4 sm:$0xff]  }
 0x661   : > { %6503 = vmatprep.subr.bf16.mxu0 %v15415_v57 }
 0x662   : > { %v13712_v18 = vpop.f32.mrb[124].mxu1  ;;  %v18599_v16 = vadd.f32 %v18231_v29, %v4131_v1  ;;  %v15376_v1 = vld [vmem:[%s22019_s13 + $0x60] sm:$0xff]  }
 0x663   : > { %v13713_v21 = vpop.f32.mrb[125].mxu1 }
 0x664   : > { %v13714_v44 = vadd.f32 %v13713_v21, %v13712_v18  ;;  %v13715_v58 = vpop.f32.mrb[126].mxu1 }
 0x665   : > { %v13716_v46 = vpop.f32.mrb[127].mxu1 }
 0x666   : > { %v4136_v17 = vadd.f32 %v13714_v44, %v3976_v59  ;;  %v13717_v36 = vadd.f32 %v13716_v46, %v13715_v58  ;;  %v3992_v44 = vadd.f32 %v18255_v54, %v18356_v15 }
 0x667   : > { %14471 = vmatmul.mubr.msk.bf16.vlgmr.msra.gmra.mrb[216].mxu1 %vm1776_vm2, %v18421_v11 }
 0x668   : > { %v4139_v29 = vadd.f32 %v13717_v36, %v3979_v49  ;;  %14487 = vmatpush3.bf16.msra.mxu1 %v15357_v61  ;;  %14474 = vmatprep.mubr.msk.bf16.mxu1 %vm1776_vm2, %v18452_v37  ;;  %v18613_v2 = vadd.f32 %v18239_v40, %v4136_v17  ;;  %v15369_v40 = vld [vmem:[%s22019_s13 + $0x58] sm:$0xff]   ;;  %v3995_v17 = vadd.f32 %v18257_v47, %v18356_v15  ;;  %v8174_v36 = vrot.slane %v18408_v6, 1 }
 0x669   : > { %14488 = vmatprep.subr.bf16.mxu1 %v15358_v4 }
 0x66a   : > { %v13718_v55 = vpop.f32.mrb[128].mxu1  ;;  %v18619_v52 = vadd.f32 %v18241_v28, %v4139_v29  ;;  %v8175_v29 = vrot.slane %v18421_v11, 1 }
 0x66b   : > { %v13719_v35 = vpop.f32.mrb[129].mxu1 }
 0x66c   : > { %v13720_v61 = vadd.f32 %v13719_v35, %v13718_v55  ;;  %v13721_v13 = vpop.f32.mrb[130].mxu1  ;;  %14489 = vmatpush3.bf16.msra.mxu1 %v15358_v4  ;;  %v4000_v35 = vadd.f32 %v18277_v38, %v18356_v15 }
 0x66d   : > { %v13722_v20 = vpop.f32.mrb[131].mxu1  ;;  %14490 = vmatprep.subr.bf16.mxu1 %v15362_v8 }
 0x66e   : > { %v4144_v56 = vadd.f32 %v13720_v61, %v3984_v39  ;;  %v13723_v45 = vadd.f32 %v13722_v20, %v13721_v13  ;;  %v8176_v20 = vsel %vm2219_vm3, %v8174_v36, %v8175_v29 }
 0x66f   : > { %14475 = vmatmul.mubr.msk.bf16.gmra.mrb[220].mxu1 %vm1776_vm2, %v18460_v9 }
 0x670   : > { %v4147_v28 = vadd.f32 %v13723_v45, %v3987_v32  ;;  %14478 = vmatprep.mubr.msk.bf16.mxu1 %vm1776_vm2, %v18482_v34  ;;  %14491 = vmatpush3.bf16.msra.mxu1 %v15362_v8  ;;  %v18633_v7 = vadd.f32 %v18251_v26, %v4144_v56  ;;  %v8179_v45 = vrot.slane %v18460_v9, 1 }
 0x671   : > { %14492 = vmatprep.subr.bf16.mxu1 %v15369_v40 }
 0x672   : > { %v13724_v18 = vpop.f32.mrb[132].mxu1  ;;  %v18642_v21 = vadd.f32 %v18253_v12, %v4147_v28 }
 0x673   : > { %v13725_v59 = vpop.f32.mrb[133].mxu1 }
 0x674   : > { %v13726_v58 = vadd.f32 %v13725_v59, %v13724_v18  ;;  %v13727_v26 = vpop.f32.mrb[134].mxu1  ;;  %14493 = vmatpush3.bf16.msra.mxu1 %v15369_v40 }
 0x675   : > { %v13728_v46 = vpop.f32.mrb[135].mxu1  ;;  %14510 = vmatprep.subr.bf16.mxu1 %v15376_v1 }
 0x676   : > { %v4152_v4 = vadd.f32 %v13726_v58, %v3992_v44  ;;  %v13729_v49 = vadd.f32 %v13728_v46, %v13727_v26 }
 0x677   : > { %14479 = vmatmul.mubr.msk.bf16.gmra.mrb[224].mxu1 %vm1776_vm2, %v18492_v14 }
 0x678   : > { %v4155_v12 = vadd.f32 %v13729_v49, %v3995_v17  ;;  %14482 = vmatprep.mubr.msk.bf16.mxu1 %vm1776_vm2, %v18517_v63  ;;  %v18653_v54 = vadd.f32 %v18270_v41, %v4152_v4  ;;  %v4003_v41 = vadd.f32 %v18285_v62, %v18356_v15  ;;  %v4008_v62 = vadd.f32 %v18299_v0, %v18356_v15 }
 0x679   : > { %v8181_v0 = vrot.slane %v18482_v34, 1 }
 0x67a   : > { %v13730_v8 = vpop.f32.mrb[136].mxu1  ;;  %v18658_v55 = vadd.f32 %v18275_v24, %v4155_v12  ;;  %v8177_v24 = vrot.slane %v18452_v37, 1  ;;  %v22334_v12 = vld [vmem:[#allocation22_spill] sm:$0xff] }
 0x67b   : > { %v13731_v47 = vpop.f32.mrb[137].mxu1 }
 0x67c   : > { %v13732_v39 = vadd.f32 %v13731_v47, %v13730_v8  ;;  %v13733_v61 = vpop.f32.mrb[138].mxu1  ;;  %v8178_v58 = vsel %vm2219_vm3, %v8175_v29, %v8177_v24  ;;  %v8180_v46 = vsel %vm2219_vm3, %v8177_v24, %v8179_v45  ;;  %v8183_v29 = vrot.slane %v18492_v14, 1  ;;  %v15390_v8 = vld [vmem:[%s22019_s13 + $0x70] sm:$0xff]  }
 0x67d   : > { %v13734_v13 = vpop.f32.mrb[139].mxu1 }
 0x67e   : > { %v4160_v40 = vadd.f32 %v13732_v39, %v4000_v35  ;;  %v13735_v56 = vadd.f32 %v13734_v13, %v13733_v61  ;;  %v8182_v13 = vsel %vm2219_vm3, %v8179_v45, %v8181_v0  ;;  %v8185_v45 = vrot.slane %v18517_v63, 1 }
 0x67f   : > { %14483 = vmatmul.mubr.msk.bf16.gmra.mrb[228].mxu1 %vm1776_vm2, %v18534_v30 }
 0x680   : > { %v4163_v32 = vadd.f32 %v13735_v56, %v4003_v41  ;;  %14494 = vmatprep.mubr.msk.bf16.mxu1 %vm1776_vm2, %v8176_v20  ;;  %v18670_v38 = vadd.f32 %v18292_v53, %v4160_v40  ;;  %v15383_v53 = vld [vmem:[%s22019_s13 + $0x68] sm:$0xff]   ;;  %v8184_v40 = vsel %vm2219_vm3, %v8181_v0, %v8183_v29  ;;  %v15397_v41 = vld [vmem:[%s22019_s13 + $0x78] sm:$0xff]  }
 0x682   : > { %v13736_v28 = vpop.f32.mrb[140].mxu1  ;;  %v18674_v18 = vadd.f32 %v18297_v60, %v4163_v32  ;;  %v4011_v60 = vadd.f32 %v18307_v33, %v18356_v15 }
 0x683   : > { %v13737_v57 = vpop.f32.mrb[141].mxu1 }
 0x684   : > { %v13738_v59 = vadd.f32 %v13737_v57, %v13736_v28  ;;  %v13739_v44 = vpop.f32.mrb[142].mxu1  ;;  %v8187_v28 = vrot.slane %v18534_v30, 1  ;;  %v22336_v57 = vld [vmem:[#allocation23_spill] sm:$0xff] }
 0x685   : > { %v13740_v26 = vpop.f32.mrb[143].mxu1 }
 0x686   : > { %v4168_v4 = vadd.f32 %v13738_v59, %v4008_v62  ;;  %v13741_v17 = vadd.f32 %v13740_v26, %v13739_v44  ;;  %v22337_v44 = vld [vmem:[#allocation53_spill] sm:$0xff] }
 0x687   : > { %14495 = vmatmul.mubr.msk.bf16.vlgmr.msra.gmra.mrb[216].mxu1 %vm1776_vm2, %v8178_v58 }
 0x688   : > { %v4171_v49 = vadd.f32 %v13741_v17, %v4011_v60  ;;  %14511 = vmatpush3.bf16.msra.mxu1 %v15376_v1  ;;  %14498 = vmatprep.mubr.msk.bf16.mxu1 %vm1776_vm2, %v8180_v46  ;;  %v18689_v36 = vadd.f32 %v22334_v12, %v4168_v4  ;;  %v4016_v1 = vadd.f32 %v18321_v48, %v18356_v15  ;;  %v22338_v46 = vld [vmem:[#allocation52_spill] sm:$0xff]  ;;  %v22339_v12 = vshrl.u32 %v18408_v6, 16 }
 0x689   : > { %14512 = vmatprep.subr.bf16.mxu1 %v15383_v53  ;;  %v8186_v17 = vsel %vm2219_vm3, %v8183_v29, %v8185_v45  ;;  %v22343_v29 = vld [vmem:[#allocation21_spill] sm:$0xff] }
 0x68a   : > { %v13742_v33 = vpop.f32.mrb[144].mxu1  ;;  %v18696_v47 = vadd.f32 %v18319_v31, %v4171_v49  ;;  %v22335_v31 = vld [vmem:[#allocation24_spill] sm:$0xff]  ;;  %v8188_v49 = vsel %vm2219_vm3, %v8185_v45, %v8187_v28 }
 0x68b   : > { %v13743_v35 = vpop.f32.mrb[145].mxu1  ;;  %v4019_v32 = vadd.f32 %v22335_v31, %v18356_v15 }
 0x68c   : > { %v13744_v39 = vadd.f32 %v13743_v35, %v13742_v33  ;;  %v13745_v61 = vpop.f32.mrb[146].mxu1  ;;  %14513 = vmatpush3.bf16.msra.mxu1 %v15383_v53  ;;  %v4024_v53 = vadd.f32 %v22338_v46, %v18356_v15  ;;  %v22340_v33 = vshll.u32 %v18408_v6, 16  ;;  %v22344_v6 = vshrl.u32 %v18452_v37, 16 }
 0x68d   : > { %v13746_v20 = vpop.f32.mrb[147].mxu1  ;;  %14514 = vmatprep.subr.bf16.mxu1 %v15390_v8  ;;  %v22347_v46 = vshll.u32 %v18460_v9, 16 }
 0x68e   : > { %v4176_v56 = vadd.f32 %v13744_v39, %v4016_v1  ;;  %v13747_v24 = vadd.f32 %v13746_v20, %v13745_v61  ;;  %v8351_v35 = vrot.slane %v22340_v33, 2  ;;  %v22341_v1 = vshrl.u32 %v18421_v11, 16 }
 0x68f   : > { %14499 = vmatmul.mubr.msk.bf16.gmra.mrb[220].mxu1 %vm1776_vm2, %v8182_v13  ;;  %v22342_v61 = vshll.u32 %v18421_v11, 16  ;;  %v22345_v11 = vshll.u32 %v18452_v37, 16 }
 0x690   : > { %v4179_v48 = vadd.f32 %v13747_v24, %v4019_v32  ;;  %14502 = vmatprep.mubr.msk.bf16.mxu1 %vm1776_vm2, %v8184_v40  ;;  %14515 = vmatpush3.bf16.msra.mxu1 %v15390_v8  ;;  %v18712_v62 = vadd.f32 %v22336_v57, %v4176_v56  ;;  %v8350_v8 = vrot.slane %v22339_v12, 1  ;;  %v8353_v39 = vrot.slane %v22341_v1, 1 }
 0x691   : > { %14516 = vmatprep.subr.bf16.mxu1 %v15397_v41  ;;  %v8354_v15 = vrot.slane %v22342_v61, 2  ;;  %v8357_v32 = vrot.slane %v22344_v6, 1  ;;  %v8358_v45 = vrot.slane %v22345_v11, 2  ;;  %v22350_v1 = vshrl.u32 %v18482_v34, 16 }
 0x692   : > { %v13748_v59 = vpop.f32.mrb[148].mxu1  ;;  %v18715_v58 = vadd.f32 %v22337_v44, %v4179_v48  ;;  %v8352_v40 = vor.u32 %v8351_v35, %v8350_v8  ;;  %v22346_v44 = vshrl.u32 %v18460_v9, 16  ;;  %v22351_v9 = vshll.u32 %v18482_v34, 16 }
 0x693   : > { %v13749_v26 = vpop.f32.mrb[149].mxu1  ;;  %v8359_v37 = vor.u32 %v8358_v45, %v8357_v32 }
 0x694   : > { %v13750_v4 = vadd.f32 %v13749_v26, %v13748_v59  ;;  %v13751_v60 = vpop.f32.mrb[150].mxu1  ;;  %14517 = vmatpush3.bf16.msra.mxu1 %v15397_v41  ;;  %v8355_v41 = vor.u32 %v8354_v15, %v8353_v39  ;;  %v8361_v26 = vrot.slane %v22346_v44, 1  ;;  %v8365_v39 = vrot.slane %v22350_v1, 1 }
 0x695   : > { %v13752_v0 = vpop.f32.mrb[151].mxu1  ;;  %v8366_v61 = vrot.slane %v22351_v9, 2 }
 0x696   : > { %v4184_v13 = vadd.f32 %v13750_v4, %v4024_v53  ;;  %v8356_v59 = vsel %vm2516_vm4, %v8352_v40, %v8355_v41  ;;  %v8362_v53 = vrot.slane %v22347_v46, 2  ;;  %v22348_v4 = vld [vmem:[#allocation20_spill] sm:$0xff]  ;;  %v22353_v40 = vshrl.u32 %v18517_v63, 16 }
 0x697   : > { %14503 = vmatmul.mubr.msk.bf16.gmra.mrb[224].mxu1 %vm1776_vm2, %v8186_v17  ;;  %v8360_v34 = vsel %vm2516_vm4, %v8355_v41, %v8359_v37 }
 0x698   : > { %14506 = vmatprep.mubr.msk.bf16.mxu1 %vm1776_vm2, %v8188_v49  ;;  %v18732_v20 = vadd.f32 %v22343_v29, %v4184_v13  ;;  %v22349_v49 = vld [vmem:[#allocation29_spill] sm:$0xff]  ;;  %v8363_v12 = vor.u32 %v8362_v53, %v8361_v26  ;;  %v8369_v13 = vrot.slane %v7865_v51, 1  ;;  %v8377_v53 = vrot.slane %v7881_v23, 1 }
 0x69a   : > { %v13882_v56 = vpop.f32.mrb[152].mxu1  ;;  %v8364_v45 = vsel %vm2516_vm4, %v8359_v37, %v8363_v12 }
 0x69b   : > { %v13883_v31 = vpop.f32.mrb[153].mxu1 }
 0x69c   : > { %v13884_v24 = vadd.f32 %v13883_v31, %v13882_v56  ;;  %v13885_v48 = vpop.f32.mrb[154].mxu1  ;;  %v8373_v56 = vrot.slane %v22353_v40, 1  ;;  %v22354_v31 = vshll.u32 %v18517_v63, 16  ;;  %v8367_v63 = vor.u32 %v8366_v61, %v8365_v39 }
 0x69d   : > { %v13886_v57 = vpop.f32.mrb[155].mxu1 }
 0x69e   : > { %v4384_v60 = vadd.f32 %v13884_v24, %v22348_v4  ;;  %v13887_v17 = vadd.f32 %v13886_v57, %v13885_v48  ;;  %v8374_v6 = vrot.slane %v22354_v31, 2  ;;  %v22355_v57 = vld [vmem:[#allocation26_spill] sm:$0xff]  ;;  %v8368_v23 = vsel %vm2516_vm4, %v8363_v12, %v8367_v63 }
 0x69f   : > { %14507 = vmatmul.mubr.msk.bf16.gmra.mrb[228].mxu1 %vm1776_vm2, %v8187_v28  ;;  %v22352_v28 = vshll.u32 %v18492_v14, 16  ;;  %v22356_v4 = vld [vmem:[#allocation30_spill] sm:$0xff] }
 0x6a0   : > { %v4387_v0 = vadd.f32 %v13887_v17, %v22349_v49  ;;  %14518 = vmatprep.mubr.msk.bf16.mxu1 %vm1776_vm2, %v8356_v59  ;;  %v4509_v8 = vmax.f32 %v4384_v60, 0.0  ;;  %v18767_v46 = vor.u32 %v8374_v6, %v8373_v56  ;;  %v22357_v17 = vshll.u32 %v18534_v30, 16 }
 0x6a1   : > { %v8370_v29 = vrot.slane %v22352_v28, 2 }
 0x6a2   : > { %v4510_v33 = vmax.f32 %v4387_v0, 0.0  ;;  %v13888_v35 = vpop.f32.mrb[156].mxu1  ;;  %v8378_v49 = vrot.slane %v22357_v17, 2 }
 0x6a3   : > { %v13889_v15 = vpop.f32.mrb[157].mxu1  ;;  %v8371_v26 = vor.u32 %v8370_v29, %v8369_v13 }
 0x6a4   : > { %v18759_v32 = vpack.c.bf16 %v4510_v33, %v4509_v8  ;;  %v13890_v24 = vadd.f32 %v13889_v15, %v13888_v35  ;;  %v13891_v48 = vpop.f32.mrb[158].mxu1 }
 0x6a5   : > { %v13892_v11 = vpop.f32.mrb[159].mxu1  ;;  %v8372_v6 = vsel %vm2516_vm4, %v8367_v63, %v8371_v26 }
 0x6a6   : > { %v4392_v51 = vadd.f32 %v13890_v24, %v22355_v57  ;;  %v13893_v59 = vadd.f32 %v13892_v11, %v13891_v48  ;;  %v4572_v14 = vshrl.u32 %v18759_v32, 16  ;;  %v4574_v44 = vshll.u32 %v18759_v32, 16 }
 0x6a7   : > { %14519 = vmatmul.mubr.msk.bf16.vlgmr.msra.gmra.mrb[216].mxu1 %vm1776_vm2, %v8360_v34  ;;  %v18785_v34 = vor.u32 %v8378_v49, %v8377_v53  ;;  %v4720_v11 = vrot.slane %v18759_v32, 1  ;;  %v4838_v12 = vrot.slane %v18759_v32, 2 }
 0x6a8   : > { %v4511_v41 = vmax.f32 %v4392_v51, 0.0  ;;  %v4395_v60 = vadd.f32 %v13893_v59, %v22356_v4  ;;  %14522 = vmatprep.mubr.msk.bf16.mxu1 %vm1776_vm2, %v8364_v45  ;;  %v4764_v0 = vrot.slane %v4572_v14, 1  ;;  %v4765_v37 = vrot.slane %v4574_v44, 2  ;;  %v22359_v45 = vld [vmem:[#allocation25_spill] sm:$0xff] }
 0x6a9   : > { %v4882_v8 = vrot.slane %v4572_v14, 2  ;;  %v4883_v35 = vrot.slane %v4574_v44, 3  ;;  %v5003_v1 = vrot.slane %v4572_v14, 3  ;;  %v5004_v15 = vrot.slane %v4574_v44, 4 }
 0x6aa   : > { %v18775_v39 = vpack.c.bf16 %v4511_v41, %v4510_v33  ;;  %v4512_v9 = vmax.f32 %v4395_v60, 0.0  ;;  %v13894_v61 = vpop.f32.mrb[160].mxu1  ;;  %v4576_v28 = vrot.slane %v4574_v44, 1  ;;  %v4766_v29 = vor.u32 %v4765_v37, %v4764_v0  ;;  %v22360_v60 = vld [vmem:[#allocation31_spill] sm:$0xff] }
 0x6ab   : > { %v13895_v13 = vpop.f32.mrb[161].mxu1  ;;  %v4884_v40 = vor.u32 %v4883_v35, %v4882_v8  ;;  %v18781_v24 = vor.u32 %v5004_v15, %v5003_v1  ;;  %v8376_v33 = vsel %vm2516_vm4, %v8371_v26, %v18767_v46  ;;  %v15413_v37 = vld [vmem:[%s22017_s11 + $0x100] ss:$8 sps:$4 sm:$0xff]  }
 0x6ac   : > { %22358 = vst [vmem:[#allocation33_spill] sm:$0xff] %v18775_v39  ;;  %v18778_v56 = vpack.c.bf16 %v4512_v9, %v4511_v41  ;;  %v13896_v30 = vadd.f32 %v13895_v13, %v13894_v61  ;;  %v13897_v31 = vpop.f32.mrb[162].mxu1  ;;  %v4577_v63 = vor.u32 %v4576_v28, %v4572_v14  ;;  %v15418_v28 = vld [vmem:[%s22017_s11 + $0x114] ss:$8 sps:$4 sm:$0xff]  }
 0x6ad   : > { %v13898_v48 = vpop.f32.mrb[163].mxu1 }
 0x6ae   : > { %v4400_v57 = vadd.f32 %v13896_v30, %v22359_v45  ;;  %v13899_v51 = vadd.f32 %v13898_v48, %v13897_v31  ;;  %v4579_v59 = vshll.u32 %v18778_v56, 16  ;;  %v4583_v44 = vshrl.u32 %v18778_v56, 16 }
 0x6af   : > { %14523 = vmatmul.mubr.msk.bf16.gmra.mrb[220].mxu1 %vm1776_vm2, %v8368_v23  ;;  %v4721_v41 = vrot.slane %v18778_v56, 1  ;;  %v4839_v26 = vrot.slane %v18778_v56, 2  ;;  %v22092_v53 = vrot.slane %v18778_v56, 3  ;;  %v4957_v30 = vrot.slane %v18759_v32, 3 }
 0x6b0   : > { %v4513_v4 = vmax.f32 %v4400_v57, 0.0  ;;  %v4403_v17 = vadd.f32 %v13899_v51, %v22360_v60  ;;  %v4581_v49 = vrot.slane %v4579_v59, 1  ;;  %14526 = vmatprep.mubr.msk.bf16.mxu1 %vm1776_vm2, %v8372_v6  ;;  %v4767_v0 = vrot.slane %v4583_v44, 1 }
 0x6b1   : > { %v4768_v8 = vrot.slane %v4579_v59, 2  ;;  %v18802_v14 = vsel %vm2219_vm3, %v4720_v11, %v4721_v41  ;;  %v4885_v35 = vrot.slane %v4583_v44, 2  ;;  %v4886_v1 = vrot.slane %v4579_v59, 3 }
 0x6b2   : > { %v18804_v61 = vpack.c.bf16 %v4513_v4, %v4512_v9  ;;  %v4514_v15 = vmax.f32 %v4403_v17, 0.0  ;;  %v13900_v13 = vpop.f32.mrb[164].mxu1  ;;  %v4582_v23 = vsel %vm1624_vm1, %v4577_v63, %v4581_v49  ;;  %v18814_v11 = vsel %vm3223_vm14, %v4838_v12, %v4839_v26 }
 0x6b3   : > { %v13901_v31 = vpop.f32.mrb[165].mxu1  ;;  %6356 = vmatprep.mubr.bf16.mxu0 %v4582_v23  ;;  %v4769_v6 = vor.u32 %v4768_v8, %v4767_v0  ;;  %v4887_v48 = vor.u32 %v4886_v1, %v4885_v35  ;;  %22362 = vst [vmem:[#allocation32_spill] sm:$0xff] %v18814_v11  ;;  %v5006_v9 = vrot.slane %v4583_v44, 3  ;;  %v5007_v63 = vrot.slane %v4579_v59, 4 }
 0x6b4   : > { %22361 = vst [vmem:[#allocation27_spill] sm:$0xff] %v18804_v61  ;;  %v18816_v45 = vpack.c.bf16 %v4514_v15, %v4513_v4  ;;  %v13902_v57 = vadd.f32 %v13901_v31, %v13900_v13  ;;  %v13903_v51 = vpop.f32.mrb[166].mxu1  ;;  %6357 = vmatmul.mubr.bf16.vlgmr.msra.gmra.mrb[100].mxu0 %v18759_v32  ;;  %v18822_v60 = vsel %vm3351_vm8, %v4957_v30, %v22092_v53  ;;  %v15416_v4 = vld [vmem:[%s22017_s11 + $0x110] ss:$8 sps:$4 sm:$0xff]   ;;  %v22365_v13 = vld [vmem:[#allocation28_spill] sm:$0xff] }
 0x6b5   : > { %22363 = vst [vmem:[#allocation57_spill] sm:$0xff] %v18822_v60  ;;  %v13904_v17 = vpop.f32.mrb[167].mxu1  ;;  %v4585_v0 = vor.u32 %v4583_v44, %v4581_v49  ;;  %v8380_v12 = vsel %vm2516_vm4, %v18767_v46, %v18785_v34  ;;  %6504 = vmatpush1.bf16.msra.mxu0 %v15413_v37  ;;  %v18831_v8 = vsel %vm2516_vm4, %v4766_v29, %v4769_v6  ;;  %v15421_v46 = vld [vmem:[%s22017_s11 + $0x124] ss:$8 sps:$4 sm:$0xff]  }
 0x6b6   : > { %v18834_v32 = vsel %vm3271_vm13, %v4884_v40, %v4887_v48  ;;  %v4408_v59 = vadd.f32 %v13902_v57, %v18463_v27  ;;  %v13905_v35 = vadd.f32 %v13904_v17, %v13903_v51  ;;  %v4587_v44 = vshll.u32 %v18816_v45, 16  ;;  %6505 = vmatprep.subr.bf16.mxu0 %v15418_v28 }
 0x6b7   : > { %22364 = vst [vmem:[#allocation55_spill] sm:$0xff] %v18834_v32  ;;  %v4591_v49 = vshrl.u32 %v18816_v45, 16  ;;  %14527 = vmatmul.mubr.msk.bf16.gmra.mrb[224].mxu1 %vm1776_vm2, %v8376_v33  ;;  %v4723_v29 = vrot.slane %v18816_v45, 1  ;;  %v22094_v37 = vrot.slane %v18816_v45, 2  ;;  %v18845_v40 = vor.u32 %v5007_v63, %v5006_v9  ;;  %v15419_v33 = vld [vmem:[%s22017_s11 + $0x120] ss:$8 sps:$4 sm:$0xff]  }
 0x6b8   : > { %v22093_v27 = vrot.slane %v18816_v45, 3  ;;  %v4515_v1 = vmax.f32 %v4408_v59, 0.0  ;;  %v4411_v23 = vadd.f32 %v13905_v35, %v22365_v13  ;;  %v4589_v30 = vrot.slane %v4587_v44, 1  ;;  %14530 = vmatprep.mubr.msk.bf16.mxu1 %vm1776_vm2, %v8380_v12  ;;  %v15424_v12 = vld [vmem:[%s22017_s11 + $0x134] ss:$8 sps:$4 sm:$0xff]  }
 0x6b9   : > { %v4771_v28 = vrot.slane %v4591_v49, 1  ;;  %6506 = vmatpush1.bf16.msra.mxu0 %v15416_v4  ;;  %v4772_v31 = vrot.slane %v4587_v44, 2  ;;  %v18854_v57 = vsel %vm2219_vm3, %v4721_v41, %v4723_v29  ;;  %v4889_v9 = vrot.slane %v4591_v49, 2 }
 0x6ba   : > { %v4890_v51 = vrot.slane %v4587_v44, 3  ;;  %v18856_v63 = vpack.c.bf16 %v4515_v1, %v4514_v15  ;;  %v4516_v17 = vmax.f32 %v4411_v23, 0.0  ;;  %v13906_v59 = vpop.f32.mrb[168].mxu1  ;;  %v4590_v35 = vsel %vm1624_vm1, %v4585_v0, %v4589_v30  ;;  %6507 = vmatprep.subr.bf16.mxu0 %v15421_v46 }
 0x6bb   : > { %v13907_v4 = vpop.f32.mrb[169].mxu1  ;;  %6366 = vmatprep.mubr.bf16.mxu0 %v4590_v35  ;;  %v4773_v13 = vor.u32 %v4772_v31, %v4771_v28  ;;  %v18867_v41 = vsel %vm3223_vm14, %v4839_v26, %v22094_v37  ;;  %v18872_v15 = vsel %vm3399_vm15, %v18781_v24, %v18845_v40  ;;  %v5010_v28 = vrot.slane %v4591_v49, 3  ;;  %v15422_v26 = vld [vmem:[%s22017_s11 + $0x130] ss:$8 sps:$4 sm:$0xff]  }
 0x6bc   : > { %22366 = vst [vmem:[#allocation59_spill] sm:$0xff] %v18856_v63  ;;  %v4891_v53 = vor.u32 %v4890_v51, %v4889_v9  ;;  %22367 = vst [vmem:[#allocation58_spill] sm:$0xff] %v18867_v41  ;;  %v18874_v0 = vpack.c.bf16 %v4516_v17, %v4515_v1  ;;  %v13908_v46 = vadd.f32 %v13907_v4, %v13906_v59  ;;  %v13909_v23 = vpop.f32.mrb[170].mxu1  ;;  %6367 = vmatmul.mubr.bf16.gmra.mrb[104].mxu0 %v18778_v56 }
 0x6bd   : > { %22368 = vst [vmem:[#allocation60_spill] sm:$0xff] %v18872_v15  ;;  %v5011_v31 = vrot.slane %v4587_v44, 4  ;;  %v13910_v9 = vpop.f32.mrb[171].mxu1  ;;  %v4593_v51 = vor.u32 %v4591_v49, %v4589_v30  ;;  %6508 = vmatpush1.bf16.msra.mxu0 %v15419_v33  ;;  %v18881_v35 = vsel %vm2516_vm4, %v4769_v6, %v4773_v13  ;;  %v22370_v1 = vrot.slane %v18778_v56, 3  ;;  %v15427_v6 = vld [vmem:[%s22017_s11 + $0x144] ss:$8 sps:$4 sm:$0xff]  }
 0x6be   : > { %v18884_v24 = vsel %vm3271_vm13, %v4887_v48, %v4891_v53  ;;  %v4416_v44 = vadd.f32 %v13908_v46, %v18495_v5  ;;  %v13911_v49 = vadd.f32 %v13910_v9, %v13909_v23  ;;  %v4595_v30 = vshll.u32 %v18874_v0, 16  ;;  %6509 = vmatprep.subr.bf16.mxu0 %v15424_v12 }
 0x6bf   : > { %22369 = vst [vmem:[#allocation62_spill] sm:$0xff] %v18884_v24  ;;  %v18891_v59 = vsel %vm3351_vm8, %v22370_v1, %v22093_v27  ;;  %v4599_v33 = vshrl.u32 %v18874_v0, 16  ;;  %14531 = vmatmul.mubr.msk.bf16.gmra.mrb[228].mxu1 %vm1776_vm2, %v18785_v34  ;;  %v4725_v56 = vrot.slane %v18874_v0, 1  ;;  %v18903_v4 = vor.u32 %v5011_v31, %v5010_v28  ;;  %v15425_v1 = vld [vmem:[%s22017_s11 + $0x140] ss:$8 sps:$4 sm:$0xff]  }
 0x6c0   : > { %22371 = vst [vmem:[#allocation64_spill] sm:$0xff] %v18891_v59  ;;  %v4517_v46 = vmax.f32 %v4416_v44, 0.0  ;;  %v4419_v23 = vadd.f32 %v13911_v49, %v18498_v19  ;;  %v4597_v9 = vrot.slane %v4595_v30, 1  ;;  %v4776_v27 = vrot.slane %v4595_v30, 2  ;;  %v15430_v19 = vld [vmem:[%s22017_s11 + $0x154] ss:$8 sps:$4 sm:$0xff]  }
 0x6c1   : > { %v4775_v12 = vrot.slane %v4599_v33, 1  ;;  %6510 = vmatpush1.bf16.msra.mxu0 %v15422_v26  ;;  %v18911_v34 = vsel %vm2219_vm3, %v4723_v29, %v4725_v56  ;;  %v4893_v37 = vrot.slane %v4599_v33, 2  ;;  %v4894_v48 = vrot.slane %v4595_v30, 3 }
 0x6c2   : > { %v18913_v28 = vpack.c.bf16 %v4517_v46, %v4516_v17  ;;  %v4518_v31 = vmax.f32 %v4419_v23, 0.0  ;;  %v13912_v5 = vpop.f32.mrb[172].mxu1  ;;  %v4598_v44 = vsel %vm1624_vm1, %v4593_v51, %v4597_v9  ;;  %6511 = vmatprep.subr.bf16.mxu0 %v15427_v6  ;;  %v22373_v29 = vrot.slane %v18874_v0, 2 }
 0x6c3   : > { %v13913_v26 = vpop.f32.mrb[173].mxu1  ;;  %6376 = vmatprep.mubr.bf16.mxu0 %v4598_v44  ;;  %v4777_v49 = vor.u32 %v4776_v27, %v4775_v12  ;;  %v4895_v61 = vor.u32 %v4894_v48, %v4893_v37  ;;  %v22374_v39 = vrot.slane %v18816_v45, 2  ;;  %v18929_v51 = vsel %vm3399_vm15, %v18845_v40, %v18903_v4 }
 0x6c4   : > { %22372 = vst [vmem:[#allocation65_spill] sm:$0xff] %v18913_v28  ;;  %22376 = vst [vmem:[#allocation34_spill] sm:$0xff] %v18929_v51  ;;  %v18931_v6 = vpack.c.bf16 %v4518_v31, %v4517_v46  ;;  %v13914_v23 = vadd.f32 %v13913_v26, %v13912_v5  ;;  %v13915_v59 = vpop.f32.mrb[174].mxu1  ;;  %6377 = vmatmul.mubr.bf16.gmra.mrb[108].mxu0 %v18816_v45  ;;  %v5014_v27 = vrot.slane %v4599_v33, 3  ;;  %v5015_v37 = vrot.slane %v4595_v30, 4 }
 0x6c5   : > { %v18924_v17 = vsel %vm3223_vm14, %v22374_v39, %v22373_v29  ;;  %v13916_v48 = vpop.f32.mrb[175].mxu1  ;;  %v4601_v12 = vor.u32 %v4599_v33, %v4597_v9  ;;  %6512 = vmatpush1.bf16.msra.mxu0 %v15425_v1  ;;  %v15428_v39 = vld [vmem:[%s22017_s11 + $0x150] ss:$8 sps:$4 sm:$0xff]   ;;  %v18938_v44 = vsel %vm2516_vm4, %v4773_v13, %v4777_v49  ;;  %v18941_v40 = vsel %vm3271_vm13, %v4891_v53, %v4895_v61  ;;  %v15433_v53 = vld [vmem:[%s22017_s11 + $0x164] ss:$8 sps:$4 sm:$0xff]  }
 0x6c6   : > { %22375 = vst [vmem:[#allocation66_spill] sm:$0xff] %v18924_v17  ;;  %22377 = vst [vmem:[#allocation38_spill] sm:$0xff] %v18941_v40  ;;  %v22378_v5 = vrot.slane %v18874_v0, 3  ;;  %v22379_v46 = vrot.slane %v18816_v45, 3  ;;  %v4424_v30 = vadd.f32 %v13914_v23, %v18524_v22  ;;  %v13917_v33 = vadd.f32 %v13916_v48, %v13915_v59  ;;  %6513 = vmatprep.subr.bf16.mxu0 %v15430_v19  ;;  %v15431_v19 = vld [vmem:[%s22017_s11 + $0x160] ss:$8 sps:$4 sm:$0xff]  }
 0x6c7   : > { %v4603_v9 = vshll.u32 %v18931_v6, 16  ;;  %v4607_v1 = vshrl.u32 %v18931_v6, 16  ;;  %v4727_v13 = vrot.slane %v18931_v6, 1  ;;  %v18958_v45 = vor.u32 %v5015_v37, %v5014_v27 }
 0x6c8   : > { %v18948_v26 = vsel %vm3351_vm8, %v22379_v46, %v22378_v5  ;;  %v4519_v46 = vmax.f32 %v4424_v30, 0.0  ;;  %v4427_v22 = vadd.f32 %v13917_v33, %v18537_v50  ;;  %v15436_v50 = vld [vmem:[%s22017_s11 + $0x174] ss:$8 sps:$4 sm:$0xff]   ;;  %v22383_v15 = vrot.slane %v18874_v0, 2 }
 0x6c9   : > { %22380 = vst [vmem:[#allocation39_spill] sm:$0xff] %v18948_v26  ;;  %v4605_v59 = vrot.slane %v4603_v9, 1  ;;  %v4779_v23 = vrot.slane %v4607_v1, 1  ;;  %6514 = vmatpush1.bf16.msra.mxu0 %v15428_v39  ;;  %v4780_v48 = vrot.slane %v4603_v9, 2  ;;  %v18966_v26 = vsel %vm2219_vm3, %v4725_v56, %v4727_v13 }
 0x6ca   : > { %v4897_v51 = vrot.slane %v4607_v1, 2  ;;  %v4898_v29 = vrot.slane %v4603_v9, 3  ;;  %v18968_v27 = vpack.c.bf16 %v4519_v46, %v4518_v31  ;;  %v4520_v37 = vmax.f32 %v4427_v22, 0.0  ;;  %v13918_v5 = vpop.f32.mrb[176].mxu1  ;;  %6515 = vmatprep.subr.bf16.mxu0 %v15433_v53 }
 0x6cb   : > { %v4606_v30 = vsel %vm1624_vm1, %v4601_v12, %v4605_v59  ;;  %v13919_v39 = vpop.f32.mrb[177].mxu1  ;;  %v4781_v33 = vor.u32 %v4780_v48, %v4779_v23  ;;  %v22382_v56 = vrot.slane %v18931_v6, 2  ;;  %v18984_v12 = vsel %vm3399_vm15, %v18903_v4, %v18958_v45 }
 0x6cc   : > { %22381 = vst [vmem:[#allocation40_spill] sm:$0xff] %v18968_v27  ;;  %6386 = vmatprep.mubr.bf16.mxu0 %v4606_v30  ;;  %v4899_v60 = vor.u32 %v4898_v29, %v4897_v51  ;;  %22385 = vst [vmem:[#allocation36_spill] sm:$0xff] %v18984_v12  ;;  %v18986_v53 = vpack.c.bf16 %v4520_v37, %v4519_v46  ;;  %v13920_v22 = vadd.f32 %v13919_v39, %v13918_v5  ;;  %v13921_v17 = vpop.f32.mrb[178].mxu1 }
 0x6cd   : > { %v18979_v31 = vsel %vm3223_vm14, %v22383_v15, %v22382_v56  ;;  %6387 = vmatmul.mubr.bf16.gmra.mrb[112].mxu0 %v18874_v0  ;;  %v5018_v23 = vrot.slane %v4607_v1, 3  ;;  %v5019_v51 = vrot.slane %v4603_v9, 4  ;;  %v13922_v29 = vpop.f32.mrb[179].mxu1  ;;  %v4609_v48 = vor.u32 %v4607_v1, %v4605_v59  ;;  %v15434_v15 = vld [vmem:[%s22017_s11 + $0x170] ss:$8 sps:$4 sm:$0xff]  }
 0x6ce   : > { %22384 = vst [vmem:[#allocation35_spill] sm:$0xff] %v18979_v31  ;;  %6516 = vmatpush1.bf16.msra.mxu0 %v15431_v19  ;;  %v18993_v30 = vsel %vm2516_vm4, %v4777_v49, %v4781_v33  ;;  %v18996_v4 = vsel %vm3271_vm13, %v4895_v61, %v4899_v60  ;;  %v22387_v5 = vrot.slane %v18931_v6, 3  ;;  %v22388_v46 = vrot.slane %v18874_v0, 3  ;;  %v15439_v61 = vld [vmem:[%s22017_s11 + $0x184] ss:$8 sps:$4 sm:$0xff]  }
 0x6cf   : > { %22386 = vst [vmem:[#allocation41_spill] sm:$0xff] %v18996_v4  ;;  %v4432_v9 = vadd.f32 %v13920_v22, %v18559_v43  ;;  %v13923_v1 = vadd.f32 %v13922_v29, %v13921_v17  ;;  %v4611_v59 = vshll.u32 %v18986_v53, 16  ;;  %v4615_v19 = vshrl.u32 %v18986_v53, 16  ;;  %6517 = vmatprep.subr.bf16.mxu0 %v15436_v50  ;;  %v15437_v50 = vld [vmem:[%s22017_s11 + $0x180] ss:$8 sps:$4 sm:$0xff]  }
 0x6d0   : > { %v19003_v39 = vsel %vm3351_vm8, %v22388_v46, %v22387_v5  ;;  %v4729_v49 = vrot.slane %v18986_v53, 1  ;;  %v19013_v0 = vor.u32 %v5019_v51, %v5018_v23  ;;  %v22392_v4 = vrot.slane %v18931_v6, 2 }
 0x6d1   : > { %22389 = vst [vmem:[#allocation42_spill] sm:$0xff] %v19003_v39  ;;  %v4521_v46 = vmax.f32 %v4432_v9, 0.0  ;;  %v4435_v43 = vadd.f32 %v13923_v1, %v18569_v3  ;;  %v4613_v17 = vrot.slane %v4611_v59, 1  ;;  %v4783_v22 = vrot.slane %v4615_v19, 1  ;;  %v15442_v3 = vld [vmem:[%s22017_s11 + $0x194] ss:$8 sps:$4 sm:$0xff]  }
 0x6d2   : > { %6518 = vmatpush1.bf16.msra.mxu0 %v15434_v15  ;;  %v4784_v29 = vrot.slane %v4611_v59, 2  ;;  %v19021_v39 = vsel %vm2219_vm3, %v4727_v13, %v4729_v49  ;;  %v4901_v12 = vrot.slane %v4615_v19, 2  ;;  %v4902_v56 = vrot.slane %v4611_v59, 3  ;;  %v13924_v5 = vpop.f32.mrb[180].mxu1 }
 0x6d3   : > { %v19023_v23 = vpack.c.bf16 %v4521_v46, %v4520_v37  ;;  %v4522_v51 = vmax.f32 %v4435_v43, 0.0  ;;  %v4614_v9 = vsel %vm1624_vm1, %v4609_v48, %v4613_v17  ;;  %6519 = vmatprep.subr.bf16.mxu0 %v15439_v61  ;;  %v13925_v15 = vpop.f32.mrb[181].mxu1  ;;  %v22391_v13 = vrot.slane %v18986_v53, 2 }
 0x6d4   : > { %6396 = vmatprep.mubr.bf16.mxu0 %v4614_v9  ;;  %v4785_v1 = vor.u32 %v4784_v29, %v4783_v22  ;;  %v4903_v31 = vor.u32 %v4902_v56, %v4901_v12  ;;  %v19039_v48 = vsel %vm3399_vm15, %v18958_v45, %v19013_v0  ;;  %v13926_v43 = vadd.f32 %v13925_v15, %v13924_v5  ;;  %v13927_v40 = vpop.f32.mrb[182].mxu1 }
 0x6d5   : > { %22390 = vst [vmem:[#allocation37_spill] sm:$0xff] %v19023_v23  ;;  %v19034_v37 = vsel %vm3223_vm14, %v22392_v4, %v22391_v13  ;;  %22394 = vst [vmem:[#allocation43_spill] sm:$0xff] %v19039_v48  ;;  %v19041_v61 = vpack.c.bf16 %v4522_v51, %v4521_v46  ;;  %6397 = vmatmul.mubr.bf16.gmra.mrb[116].mxu0 %v18931_v6  ;;  %v5022_v22 = vrot.slane %v4615_v19, 3  ;;  %v5023_v12 = vrot.slane %v4611_v59, 4  ;;  %v13928_v56 = vpop.f32.mrb[183].mxu1 }
 0x6d6   : > { %22393 = vst [vmem:[#allocation51_spill] sm:$0xff] %v19034_v37  ;;  %v4617_v29 = vor.u32 %v4615_v19, %v4613_v17  ;;  %6520 = vmatpush1.bf16.msra.mxu0 %v15437_v50  ;;  %v15440_v4 = vld [vmem:[%s22017_s11 + $0x190] ss:$8 sps:$4 sm:$0xff]   ;;  %v19048_v9 = vsel %vm2516_vm4, %v4781_v33, %v4785_v1  ;;  %v19051_v45 = vsel %vm3271_vm13, %v4899_v60, %v4903_v31  ;;  %v22396_v5 = vrot.slane %v18986_v53, 3  ;;  %v15445_v60 = vld [vmem:[%s22017_s11 + $0x1a4] ss:$8 sps:$4 sm:$0xff]  }
 0x6d7   : > { %22395 = vst [vmem:[#allocation44_spill] sm:$0xff] %v19051_v45  ;;  %v22397_v46 = vrot.slane %v18931_v6, 3  ;;  %v4440_v59 = vadd.f32 %v13926_v43, %v18581_v10  ;;  %v13929_v19 = vadd.f32 %v13928_v56, %v13927_v40  ;;  %v4619_v17 = vshll.u32 %v19041_v61, 16  ;;  %6521 = vmatprep.subr.bf16.mxu0 %v15442_v3  ;;  %v15443_v3 = vld [vmem:[%s22017_s11 + $0x1a0] ss:$8 sps:$4 sm:$0xff]  }
 0x6d8   : > { %v4623_v50 = vshrl.u32 %v19041_v61, 16  ;;  %v4731_v33 = vrot.slane %v19041_v61, 1  ;;  %v19068_v6 = vor.u32 %v5023_v12, %v5022_v22  ;;  %v22401_v45 = vrot.slane %v18986_v53, 2 }
 0x6d9   : > { %v19058_v15 = vsel %vm3351_vm8, %v22397_v46, %v22396_v5  ;;  %v4523_v46 = vmax.f32 %v4440_v59, 0.0  ;;  %v4443_v10 = vadd.f32 %v13929_v19, %v18584_v42  ;;  %v4621_v40 = vrot.slane %v4619_v17, 1  ;;  %v15448_v42 = vld [vmem:[%s22017_s11 + $0x1b4] ss:$8 sps:$4 sm:$0xff]  }
 0x6da   : > { %22398 = vst [vmem:[#allocation54_spill] sm:$0xff] %v19058_v15  ;;  %v4787_v43 = vrot.slane %v4623_v50, 1  ;;  %6522 = vmatpush1.bf16.msra.mxu0 %v15440_v4  ;;  %v4788_v56 = vrot.slane %v4619_v17, 2  ;;  %v19076_v15 = vsel %vm2219_vm3, %v4729_v49, %v4731_v33  ;;  %v4905_v48 = vrot.slane %v4623_v50, 2  ;;  %v13930_v5 = vpop.f32.mrb[184].mxu1 }
 0x6db   : > { %v4906_v13 = vrot.slane %v4619_v17, 3  ;;  %v19078_v22 = vpack.c.bf16 %v4523_v46, %v4522_v51  ;;  %v4524_v12 = vmax.f32 %v4443_v10, 0.0  ;;  %v4622_v59 = vsel %vm1624_vm1, %v4617_v29, %v4621_v40  ;;  %6523 = vmatprep.subr.bf16.mxu0 %v15445_v60  ;;  %v13931_v4 = vpop.f32.mrb[185].mxu1 }
 0x6dc   : > { %6406 = vmatprep.mubr.bf16.mxu0 %v4622_v59  ;;  %v4789_v19 = vor.u32 %v4788_v56, %v4787_v43  ;;  %v22400_v49 = vrot.slane %v19041_v61, 2  ;;  %v19094_v29 = vsel %vm3399_vm15, %v19013_v0, %v19068_v6  ;;  %v13932_v10 = vadd.f32 %v13931_v4, %v13930_v5  ;;  %v13933_v41 = vpop.f32.mrb[186].mxu1 }
 0x6dd   : > { %22399 = vst [vmem:[#allocation56_spill] sm:$0xff] %v19078_v22  ;;  %v4907_v37 = vor.u32 %v4906_v13, %v4905_v48  ;;  %22403 = vst [vmem:[#allocation46_spill] sm:$0xff] %v19094_v29  ;;  %v19096_v60 = vpack.c.bf16 %v4524_v12, %v4523_v46  ;;  %6407 = vmatmul.mubr.bf16.gmra.mrb[120].mxu0 %v18986_v53  ;;  %v5026_v43 = vrot.slane %v4623_v50, 3  ;;  %v5027_v48 = vrot.slane %v4619_v17, 4  ;;  %v13934_v13 = vpop.f32.mrb[187].mxu1 }
 0x6de   : > { %v19089_v51 = vsel %vm3223_vm14, %v22401_v45, %v22400_v49  ;;  %v4625_v56 = vor.u32 %v4623_v50, %v4621_v40  ;;  %6524 = vmatpush1.bf16.msra.mxu0 %v15443_v3  ;;  %v15446_v45 = vld [vmem:[%s22017_s11 + $0x1b0] ss:$8 sps:$4 sm:$0xff]   ;;  %v19103_v59 = vsel %vm2516_vm4, %v4785_v1, %v4789_v19  ;;  %v22405_v5 = vrot.slane %v19041_v61, 3 }
 0x6df   : > { %22402 = vst [vmem:[#allocation45_spill] sm:$0xff] %v19089_v51  ;;  %v19106_v0 = vsel %vm3271_vm13, %v4903_v31, %v4907_v37  ;;  %v22406_v46 = vrot.slane %v18986_v53, 3  ;;  %v4448_v17 = vadd.f32 %v13932_v10, %v18596_v25  ;;  %v13935_v50 = vadd.f32 %v13934_v13, %v13933_v41  ;;  %6525 = vmatprep.subr.bf16.mxu0 %v15448_v42  ;;  %v15451_v31 = vld [vmem:[%s22017_s11 + $0x1c4] ss:$8 sps:$4 sm:$0xff]   ;;  %v15449_v42 = vld [vmem:[%s22017_s11 + $0x1c0] ss:$8 sps:$4 sm:$0xff]  }
 0x6e0   : > { %22404 = vst [vmem:[#allocation61_spill] sm:$0xff] %v19106_v0  ;;  %v19117_v40 = vshll.u32 %v19096_v60, 16  ;;  %v19120_v3 = vshrl.u32 %v19096_v60, 16  ;;  %v4733_v1 = vrot.slane %v19096_v60, 1  ;;  %v19127_v49 = vor.u32 %v5027_v48, %v5026_v43 }
 0x6e1   : > { %v19113_v4 = vsel %vm3351_vm8, %v22406_v46, %v22405_v5  ;;  %v4525_v41 = vmax.f32 %v4448_v17, 0.0  ;;  %v4451_v10 = vadd.f32 %v13935_v50, %v18599_v16  ;;  %v22409_v51 = vrot.slane %v19096_v60, 2 }
 0x6e2   : > { %22407 = vst [vmem:[#allocation63_spill] sm:$0xff] %v19113_v4  ;;  %v4629_v13 = vrot.slane %v19117_v40, 1  ;;  %v4791_v5 = vrot.slane %v19120_v3, 1  ;;  %6526 = vmatpush1.bf16.msra.mxu0 %v15446_v45  ;;  %v4792_v46 = vrot.slane %v19117_v40, 2  ;;  %v19138_v53 = vsel %vm2219_vm3, %v4731_v33, %v4733_v1  ;;  %v13936_v50 = vpop.f32.mrb[188].mxu1 }
 0x6e3   : > { %v4909_v43 = vrot.slane %v19120_v3, 2  ;;  %v4910_v48 = vrot.slane %v19117_v40, 3  ;;  %v19142_v17 = vpack.c.bf16 %v4525_v41, %v4524_v12  ;;  %v4526_v16 = vmax.f32 %v4451_v10, 0.0  ;;  %6527 = vmatprep.subr.bf16.mxu0 %v15451_v31  ;;  %v15454_v45 = vld [vmem:[%s22017_s11 + $0x1d4] ss:$8 sps:$4 sm:$0xff]   ;;  %v13937_v4 = vpop.f32.mrb[189].mxu1 }
 0x6e4   : > { %v4630_v25 = vsel %vm1624_vm1, %v4625_v56, %v4629_v13  ;;  %v4793_v29 = vor.u32 %v4792_v46, %v4791_v5  ;;  %v22410_v0 = vrot.slane %v19041_v61, 2  ;;  %v19158_v56 = vsel %vm3399_vm15, %v19068_v6, %v19127_v49  ;;  %v13939_v24 = vpop.f32.mrb[190].mxu1  ;;  %v15452_v6 = vld [vmem:[%s22017_s11 + $0x1d0] ss:$8 sps:$4 sm:$0xff]  }
 0x6e5   : > { %22408 = vst [vmem:[#allocation47_spill] sm:$0xff] %v19142_v17  ;;  %6416 = vmatprep.mubr.bf16.mxu0 %v4630_v25  ;;  %v4911_v33 = vor.u32 %v4910_v48, %v4909_v43  ;;  %22412 = vst [vmem:[#allocation49_spill] sm:$0xff] %v19158_v56  ;;  %v19160_v31 = vpack.c.bf16 %v4526_v16, %v4525_v41  ;;  %v13938_v10 = vadd.f32 %v13937_v4, %v13936_v50  ;;  %v15467_v41 = vld [vmem:[%s22021_s15 + $0x40] sm:$0xff]  }
 0x6e6   : > { %v19153_v12 = vsel %vm3223_vm14, %v22410_v0, %v22409_v51  ;;  %6417 = vmatmul.mubr.bf16.gmra.mrb[124].mxu0 %v19041_v61  ;;  %v22413_v25 = vrot.slane %v19096_v60, 3  ;;  %v22414_v5 = vrot.slane %v19041_v61, 3  ;;  %v13940_v51 = vpop.f32.mrb[191].mxu1  ;;  %v4633_v0 = vor.u32 %v19120_v3, %v4629_v13  ;;  %14026 = vmatprep.subr.bf16.mxu1 %v15467_v41 }
 0x6e7   : > { %22411 = vst [vmem:[#allocation48_spill] sm:$0xff] %v19153_v12  ;;  %6528 = vmatpush1.bf16.msra.mxu0 %v15449_v42  ;;  %v19175_v4 = vsel %vm2516_vm4, %v4789_v19, %v4793_v29  ;;  %v19181_v61 = vsel %vm3271_vm13, %v4907_v37, %v4911_v33  ;;  %v5030_v43 = vrot.slane %v19120_v3, 3  ;;  %v4456_v48 = vadd.f32 %v13938_v10, %v18613_v2  ;;  %v15457_v19 = vld [vmem:[%s22017_s11 + $0x1e4] ss:$8 sps:$4 sm:$0xff]  }
 0x6e8   : > { %v19168_v46 = vsel %vm3351_vm8, %v22414_v5, %v22413_v25  ;;  %22416 = vst [vmem:[#allocation22_spill] sm:$0xff] %v19181_v61  ;;  %v13941_v13 = vadd.f32 %v13940_v51, %v13939_v24  ;;  %v19186_v42 = vshll.u32 %v19160_v31, 16  ;;  %v19189_v50 = vshrl.u32 %v19160_v31, 16  ;;  %6529 = vmatprep.subr.bf16.mxu0 %v15454_v45  ;;  %v15455_v51 = vld [vmem:[%s22017_s11 + $0x1e0] ss:$8 sps:$4 sm:$0xff]  }
 0x6e9   : > { %22415 = vst [vmem:[#allocation50_spill] sm:$0xff] %v19168_v46  ;;  %v4735_v25 = vrot.slane %v19160_v31, 1  ;;  %v5031_v3 = vrot.slane %v19117_v40, 4  ;;  %v4527_v24 = vmax.f32 %v4456_v48, 0.0  ;;  %v22419_v61 = vrot.slane %v19160_v31, 2 }
 0x6ea   : > { %v4459_v10 = vadd.f32 %v13941_v13, %v18619_v52  ;;  %v4637_v5 = vrot.slane %v19186_v42, 1  ;;  %v4795_v45 = vrot.slane %v19189_v50, 1  ;;  %v4796_v41 = vrot.slane %v19186_v42, 2  ;;  %v13942_v13 = vpop.f32.mrb[192].mxu1 }
 0x6eb   : > { %6530 = vmatpush1.bf16.msra.mxu0 %v15452_v6  ;;  %v19206_v37 = vsel %vm2219_vm3, %v4733_v1, %v4735_v25  ;;  %v4913_v40 = vrot.slane %v19189_v50, 2  ;;  %v4914_v48 = vrot.slane %v19186_v42, 3  ;;  %v19210_v2 = vpack.c.bf16 %v4527_v24, %v4526_v16  ;;  %v15460_v6 = vld [vmem:[%s22017_s11 + $0x1f4] ss:$8 sps:$4 sm:$0xff]   ;;  %v13943_v56 = vpop.f32.mrb[193].mxu1 }
 0x6ec   : > { %22417 = vst [vmem:[#allocation24_spill] sm:$0xff] %v19206_v37  ;;  %v4528_v52 = vmax.f32 %v4459_v10, 0.0  ;;  %v4638_v46 = vsel %vm1624_vm1, %v4633_v0, %v4637_v5  ;;  %6531 = vmatprep.subr.bf16.mxu0 %v15457_v19  ;;  %v4797_v12 = vor.u32 %v4796_v41, %v4795_v45  ;;  %v22420_v11 = vrot.slane %v19096_v60, 2  ;;  %v13945_v32 = vpop.f32.mrb[194].mxu1 }
 0x6ed   : > { %22418 = vst [vmem:[#allocation23_spill] sm:$0xff] %v19210_v2  ;;  %6426 = vmatprep.mubr.bf16.mxu0 %v4638_v46  ;;  %v19216_v1 = vor.u32 %v4914_v48, %v4913_v40  ;;  %v19225_v10 = vor.u32 %v5031_v3, %v5030_v43  ;;  %v13944_v19 = vadd.f32 %v13943_v56, %v13942_v13  ;;  %v15471_v46 = vld [vmem:[%s22021_s15] sm:$0xff]   ;;  %v22422_v45 = vrot.slane %v19160_v31, 3  ;;  %v15458_v56 = vld [vmem:[%s22017_s11 + $0x1f0] ss:$8 sps:$4 sm:$0xff]   ;;  %v15472_v3 = vld [vmem:[%s22021_s15 + $0x48] sm:$0xff]  }
 0x6ee   : > { %v19223_v16 = vsel %vm3223_vm14, %v22420_v11, %v22419_v61  ;;  %v19227_v0 = vpack.c.bf16 %v4528_v52, %v4527_v24  ;;  %6427 = vmatmul.mubr.bf16.gmra.mrb[128].mxu0 %v19096_v60  ;;  %v22423_v41 = vrot.slane %v19096_v60, 3  ;;  %v13946_v11 = vpop.f32.mrb[195].mxu1  ;;  %v4641_v61 = vor.u32 %v19189_v50, %v4637_v5  ;;  %14027 = vmatpush3.bf16.msra.mxu1 %v15471_v46 }
 0x6ef   : > { %22421 = vst [vmem:[#allocation53_spill] sm:$0xff] %v19223_v16  ;;  %6532 = vmatpush1.bf16.msra.mxu0 %v15455_v51  ;;  %v19245_v43 = vsel %vm2516_vm4, %v4793_v29, %v4797_v12  ;;  %v19252_v60 = vsel %vm3271_vm13, %v4911_v33, %v19216_v1  ;;  %v19257_v24 = vsel %vm3399_vm15, %v19127_v49, %v19225_v10  ;;  %v15463_v33 = vld [vmem:[%s22017_s11 + $0x204] ss:$8 sps:$4 sm:$0xff]  }
 0x6f0   : > { %v19238_v40 = vsel %vm3351_vm8, %v22423_v41, %v22422_v45  ;;  %22425 = vst [vmem:[#allocation21_spill] sm:$0xff] %v19245_v43  ;;  %22426 = vst [vmem:[#allocation20_spill] sm:$0xff] %v19252_v60  ;;  %v4464_v5 = vadd.f32 %v13944_v19, %v18633_v7  ;;  %v13947_v51 = vadd.f32 %v13946_v11, %v13945_v32  ;;  %v19261_v48 = vshll.u32 %v19227_v0, 16  ;;  %v15476_v49 = vld [vmem:[%s22021_s15 + $0x8] sm:$0xff]   ;;  %v15477_v7 = vld [vmem:[%s22021_s15 + $0x50] sm:$0xff]  }
 0x6f1   : > { %22424 = vst [vmem:[#allocation52_spill] sm:$0xff] %v19238_v40  ;;  %22427 = vst [vmem:[#allocation29_spill] sm:$0xff] %v19257_v24  ;;  %v19264_v29 = vshrl.u32 %v19227_v0, 16  ;;  %6533 = vmatprep.subr.bf16.mxu0 %v15460_v6  ;;  %v4737_v13 = vrot.slane %v19227_v0, 1  ;;  %14028 = vmatprep.subr.bf16.mxu1 %v15472_v3  ;;  %v5034_v6 = vrot.slane %v19189_v50, 3  ;;  %v5035_v19 = vrot.slane %v19186_v42, 4 }
 0x6f2   : > { %v4529_v45 = vmax.f32 %v4464_v5, 0.0  ;;  %v4467_v46 = vadd.f32 %v13947_v51, %v18642_v21  ;;  %v4645_v41 = vrot.slane %v19261_v48, 1  ;;  %v4800_v3 = vrot.slane %v19261_v48, 2  ;;  %v13948_v5 = vpop.f32.mrb[196].mxu1  ;;  %14029 = vmatpush3.bf16.msra.mxu1 %v15476_v49 }
 0x6f3   : > { %v4799_v11 = vrot.slane %v19264_v29, 1  ;;  %6534 = vmatpush1.bf16.msra.mxu0 %v15458_v56  ;;  %v19284_v40 = vsel %vm2219_vm3, %v4735_v25, %v4737_v13  ;;  %v4917_v24 = vrot.slane %v19264_v29, 2  ;;  %v4918_v32 = vrot.slane %v19261_v48, 3  ;;  %v13949_v51 = vpop.f32.mrb[197].mxu1  ;;  %14030 = vmatprep.subr.bf16.mxu1 %v15477_v7 }
 0x6f4   : > { %22428 = vst [vmem:[#allocation26_spill] sm:$0xff] %v19284_v40  ;;  %v19288_v50 = vpack.c.bf16 %v4529_v45, %v4528_v52  ;;  %v4530_v42 = vmax.f32 %v4467_v46, 0.0  ;;  %v4646_v21 = vsel %vm1624_vm1, %v4641_v61, %v4645_v41  ;;  %6682 = vmatprep.subr.bf16.mxu0 %v15463_v33  ;;  %v22430_v25 = vrot.slane %v19227_v0, 2  ;;  %v13951_v37 = vpop.f32.mrb[198].mxu1  ;;  %v15481_v61 = vld [vmem:[%s22021_s15 + $0x10] sm:$0xff]  }
 0x6f5   : > { %6432 = vmatprep.mubr.bf16.mxu0 %v4646_v21  ;;  %v4801_v56 = vor.u32 %v4800_v3, %v4799_v11  ;;  %v4919_v16 = vor.u32 %v4918_v32, %v4917_v24  ;;  %v22431_v60 = vrot.slane %v19160_v31, 2  ;;  %v13950_v46 = vadd.f32 %v13949_v51, %v13948_v5  ;;  %v13952_v49 = vpop.f32.mrb[199].mxu1 }
 0x6f6   : > { %22429 = vst [vmem:[#allocation30_spill] sm:$0xff] %v19288_v50  ;;  %v19298_v52 = vpack.c.bf16 %v4530_v42, %v4529_v45  ;;  %6433 = vmatmul.mubr.bf16.gmra.mrb[132].mxu0 %v19160_v31  ;;  %v5036_v33 = vor.u32 %v5035_v19, %v5034_v6  ;;  %v4649_v24 = vor.u32 %v19264_v29, %v4645_v41  ;;  %v5038_v45 = vrot.slane %v19264_v29, 3 }
 0x6f7   : > { %v19296_v40 = vsel %vm3223_vm14, %v22431_v60, %v22430_v25  ;;  %v19306_v7 = vsel %vm2516_vm4, %v4797_v12, %v4801_v56  ;;  %v15482_v60 = vld [vmem:[%s22021_s15 + $0x58] sm:$0xff]   ;;  %v19313_v32 = vsel %vm3271_vm13, %v19216_v1, %v4919_v16  ;;  %v4472_v11 = vadd.f32 %v13950_v46, %v18653_v54  ;;  %14031 = vmatpush3.bf16.msra.mxu1 %v15481_v61 }
 0x6f8   : > { %22432 = vst [vmem:[#allocation25_spill] sm:$0xff] %v19296_v40  ;;  %22433 = vst [vmem:[#allocation31_spill] sm:$0xff] %v19306_v7  ;;  %v13953_v3 = vadd.f32 %v13952_v49, %v13951_v37  ;;  %v4651_v6 = vshll.u32 %v19298_v52, 16  ;;  %v4655_v19 = vshrl.u32 %v19298_v52, 16  ;;  %v15486_v12 = vld [vmem:[%s22021_s15 + $0x18] sm:$0xff]   ;;  %v4739_v41 = vrot.slane %v19298_v52, 1  ;;  %14032 = vmatprep.subr.bf16.mxu1 %v15482_v60 }
 0x6f9   : > { %22434 = vst [vmem:[#allocation28_spill] sm:$0xff] %v19313_v32  ;;  %v4857_v1 = vrot.slane %v19298_v52, 2  ;;  %v19326_v29 = vsel %vm3399_vm15, %v19225_v10, %v5036_v33  ;;  %v5039_v54 = vrot.slane %v19261_v48, 4  ;;  %v4531_v37 = vmax.f32 %v4472_v11, 0.0 }
 0x6fa   : > { %22435 = vst [vmem:[#allocation67_spill] sm:$0xff] %v19326_v29  ;;  %v4475_v5 = vadd.f32 %v13953_v3, %v18658_v55  ;;  %v4653_v21 = vrot.slane %v4651_v6, 1  ;;  %v4803_v51 = vrot.slane %v4655_v19, 1  ;;  %v4804_v25 = vrot.slane %v4651_v6, 2  ;;  %v13954_v32 = vpop.f32.mrb[200].mxu1 }
 0x6fb   : > { %v19331_v46 = vsel %vm2219_vm3, %v4737_v13, %v4739_v41  ;;  %v4921_v61 = vrot.slane %v4655_v19, 2  ;;  %v4922_v49 = vrot.slane %v4651_v6, 3  ;;  %v19333_v60 = vpack.c.bf16 %v4531_v37, %v4530_v42  ;;  %14033 = vmatpush3.bf16.msra.mxu1 %v15486_v12  ;;  %v13955_v48 = vpop.f32.mrb[201].mxu1 }
 0x6fc   : > { %22436 = vst [vmem:[#allocation68_spill] sm:$0xff] %v19331_v46  ;;  %v4532_v40 = vmax.f32 %v4475_v5, 0.0  ;;  %v4654_v10 = vsel %vm1624_vm1, %v4649_v24, %v4653_v21  ;;  %v4657_v29 = vor.u32 %v4655_v19, %v4653_v21  ;;  %v4805_v11 = vor.u32 %v4804_v25, %v4803_v51  ;;  %v13957_v43 = vpop.f32.mrb[202].mxu1 }
 0x6fd   : > { %22437 = vst [vmem:[#allocation69_spill] sm:$0xff] %v19333_v60  ;;  %6442 = vmatprep.mubr.bf16.mxu0 %v4654_v10  ;;  %v4923_v55 = vor.u32 %v4922_v49, %v4921_v61  ;;  %v22438_v3 = vrot.slane %v19227_v0, 2  ;;  %v5040_v13 = vor.u32 %v5039_v54, %v5038_v45  ;;  %v13956_v42 = vadd.f32 %v13955_v48, %v13954_v32  ;;  %v13958_v12 = vpop.f32.mrb[203].mxu1 }
 0x6fe   : > { %v19341_v46 = vpack.c.bf16 %v4532_v40, %v4531_v37  ;;  %6443 = vmatmul.mubr.bf16.gmra.mrb[136].mxu0 %v19227_v0  ;;  %v4974_v24 = vrot.slane %v19227_v0, 3  ;;  %v5042_v5 = vrot.slane %v4655_v19, 3  ;;  %v19346_v21 = vsel %vm2516_vm4, %v4801_v56, %v4805_v11  ;;  %v15487_v56 = vld [vmem:[%s22021_s15 + $0x60] sm:$0xff]  }
 0x6ff   : > { %v19339_v7 = vsel %vm3223_vm14, %v22438_v3, %v4857_v1  ;;  %v19349_v51 = vsel %vm3271_vm13, %v4919_v16, %v4923_v55  ;;  %v19352_v25 = vsel %vm3399_vm15, %v5036_v33, %v5040_v13  ;;  %v5043_v45 = vrot.slane %v4651_v6, 4  ;;  %14034 = vmatprep.subr.bf16.mxu1 %v15487_v56  ;;  %v15491_v56 = vld [vmem:[%s22021_s15 + $0x20] sm:$0xff]  }
 0x700   : > { %22439 = vst [vmem:[#allocation70_spill] sm:$0xff] %v19339_v7  ;;  %22440 = vst [vmem:[#allocation71_spill] sm:$0xff] %v19349_v51  ;;  %v4480_v54 = vadd.f32 %v13956_v42, %v18670_v38  ;;  %v13959_v32 = vadd.f32 %v13958_v12, %v13957_v43  ;;  %v19356_v37 = vshll.u32 %v19341_v46, 16  ;;  %v19359_v0 = vshrl.u32 %v19341_v46, 16  ;;  %14035 = vmatpush3.bf16.msra.mxu1 %v15491_v56  ;;  %v15497_v56 = vld [vmem:[%s22021_s15 + $0x70] sm:$0xff]  }
 0x701   : > { %22441 = vst [vmem:[#allocation72_spill] sm:$0xff] %v19352_v25  ;;  %v4741_v16 = vrot.slane %v19341_v46, 1  ;;  %v22097_v19 = vrot.slane %v19341_v46, 2  ;;  %v22442_v33 = vrot.slane %v19160_v31, 3  ;;  %v19371_v38 = vor.u32 %v5043_v45, %v5042_v5 }
 0x702   : > { %v4533_v43 = vmax.f32 %v4480_v54, 0.0  ;;  %v4483_v61 = vadd.f32 %v13959_v32, %v18674_v18  ;;  %v4661_v49 = vrot.slane %v19356_v37, 1  ;;  %v4807_v10 = vrot.slane %v19359_v0, 1  ;;  %v13960_v45 = vpop.f32.mrb[204].mxu1 }
 0x703   : > { %v19369_v6 = vsel %vm3351_vm8, %v22442_v33, %v4974_v24  ;;  %v4808_v48 = vrot.slane %v19356_v37, 2  ;;  %v19378_v3 = vsel %vm2219_vm3, %v4739_v41, %v4741_v16  ;;  %v4925_v31 = vrot.slane %v19359_v0, 2  ;;  %v13961_v54 = vpop.f32.mrb[205].mxu1 }
 0x704   : > { %22443 = vst [vmem:[#allocation73_spill] sm:$0xff] %v19369_v6  ;;  %v4926_v42 = vrot.slane %v19356_v37, 3  ;;  %v19382_v12 = vpack.c.bf16 %v4533_v43, %v4532_v40  ;;  %v4534_v5 = vmax.f32 %v4483_v61, 0.0  ;;  %v4662_v18 = vsel %vm1624_vm1, %v4657_v29, %v4661_v49  ;;  %v13963_v6 = vpop.f32.mrb[206].mxu1 }
 0x705   : > { %6452 = vmatprep.mubr.bf16.mxu0 %v4662_v18  ;;  %v4809_v32 = vor.u32 %v4808_v48, %v4807_v10  ;;  %v19391_v41 = vsel %vm3223_vm14, %v4857_v1, %v22097_v19  ;;  %v19395_v40 = vsel %vm3399_vm15, %v5040_v13, %v19371_v38  ;;  %v13962_v29 = vadd.f32 %v13961_v54, %v13960_v45  ;;  %v15492_v48 = vld [vmem:[%s22021_s15 + $0x68] sm:$0xff]  }
 0x706   : > { %22444 = vst [vmem:[#allocation74_spill] sm:$0xff] %v19382_v12  ;;  %v4927_v33 = vor.u32 %v4926_v42, %v4925_v31  ;;  %22445 = vst [vmem:[#allocation75_spill] sm:$0xff] %v19391_v41  ;;  %v19397_v61 = vpack.c.bf16 %v4534_v5, %v4533_v43  ;;  %6453 = vmatmul.mubr.bf16.gmra.mrb[140].mxu0 %v19298_v52  ;;  %v4665_v10 = vor.u32 %v19359_v0, %v4661_v49  ;;  %v13964_v31 = vpop.f32.mrb[207].mxu1  ;;  %v15496_v13 = vld [vmem:[%s22021_s15 + $0x28] sm:$0xff]  }
 0x707   : > { %22446 = vst [vmem:[#allocation76_spill] sm:$0xff] %v19395_v40  ;;  %v19405_v1 = vsel %vm2516_vm4, %v4805_v11, %v4809_v32  ;;  %v4976_v42 = vrot.slane %v19298_v52, 3  ;;  %v5046_v49 = vrot.slane %v19359_v0, 3  ;;  %v4488_v45 = vadd.f32 %v13962_v29, %v18689_v36  ;;  %14036 = vmatprep.subr.bf16.mxu1 %v15492_v48 }
 0x708   : > { %v19411_v43 = vsel %vm3271_vm13, %v4923_v55, %v4927_v33  ;;  %v13965_v18 = vadd.f32 %v13964_v31, %v13963_v6  ;;  %v19417_v54 = vshll.u32 %v19397_v61, 16  ;;  %v19420_v11 = vshrl.u32 %v19397_v61, 16  ;;  %14037 = vmatpush3.bf16.msra.mxu1 %v15496_v13  ;;  %v15501_v13 = vld [vmem:[%s22021_s15 + $0x30] sm:$0xff]  }
 0x709   : > { %22447 = vst [vmem:[#allocation77_spill] sm:$0xff] %v19411_v43  ;;  %v4743_v55 = vrot.slane %v19397_v61, 1  ;;  %v19428_v0 = vsel %vm3351_vm8, %v4974_v24, %v4976_v42  ;;  %v5047_v36 = vrot.slane %v19356_v37, 4  ;;  %v4535_v6 = vmax.f32 %v4488_v45, 0.0  ;;  %14038 = vmatprep.subr.bf16.mxu1 %v15497_v56 }
 0x70a   : > { %22448 = vst [vmem:[#allocation78_spill] sm:$0xff] %v19428_v0  ;;  %v4491_v29 = vadd.f32 %v13965_v18, %v18696_v47  ;;  %v4669_v31 = vrot.slane %v19417_v54, 1  ;;  %v4811_v48 = vrot.slane %v19420_v11, 1  ;;  %v4812_v19 = vrot.slane %v19417_v54, 2  ;;  %v13966_v45 = vpop.f32.mrb[208].mxu1 }
 0x70b   : > { %v19436_v40 = vsel %vm2219_vm3, %v4741_v16, %v4743_v55  ;;  %v4929_v52 = vrot.slane %v19420_v11, 2  ;;  %v4930_v24 = vrot.slane %v19417_v54, 3  ;;  %v19440_v0 = vpack.c.bf16 %v4535_v6, %v4534_v5  ;;  %v13967_v18 = vpop.f32.mrb[209].mxu1 }
 0x70c   : > { %22449 = vst [vmem:[#allocation79_spill] sm:$0xff] %v19436_v40  ;;  %v4536_v37 = vmax.f32 %v4491_v29, 0.0  ;;  %v4670_v47 = vsel %vm1624_vm1, %v4665_v10, %v4669_v31  ;;  %v4813_v25 = vor.u32 %v4812_v19, %v4811_v48  ;;  %v22451_v41 = vrot.slane %v19397_v61, 2  ;;  %v13969_v56 = vpop.f32.mrb[210].mxu1  ;;  %14039 = vmatpush3.bf16.msra.mxu1 %v15501_v13 }
 0x70d   : > { %22450 = vst [vmem:[#allocation80_spill] sm:$0xff] %v19440_v0  ;;  %6462 = vmatprep.mubr.bf16.mxu0 %v4670_v47  ;;  %v4931_v16 = vor.u32 %v4930_v24, %v4929_v52  ;;  %v22452_v43 = vrot.slane %v19341_v46, 2  ;;  %v5048_v29 = vor.u32 %v5047_v36, %v5046_v49  ;;  %v13968_v10 = vadd.f32 %v13967_v18, %v13966_v45  ;;  %v15502_v52 = vld [vmem:[%s22021_s15 + $0x78] sm:$0xff]   ;;  %v13970_v48 = vpop.f32.mrb[211].mxu1 }
 0x70e   : > { %v19453_v7 = vpack.c.bf16 %v4536_v37, %v4535_v6  ;;  %6463 = vmatmul.mubr.bf16.gmra.mrb[144].mxu0 %v19341_v46  ;;  %v4673_v19 = vor.u32 %v19420_v11, %v4669_v31  ;;  %v19461_v24 = vsel %vm2516_vm4, %v4809_v32, %v4813_v25  ;;  %v4978_v36 = vrot.slane %v19341_v46, 3  ;;  %14040 = vmatprep.subr.bf16.mxu1 %v15502_v52 }
 0x70f   : > { %v19451_v5 = vsel %vm3223_vm14, %v22452_v43, %v22451_v41  ;;  %v15506_v41 = vld [vmem:[%s22021_s15 + $0x38] sm:$0xff]   ;;  %v19467_v43 = vsel %vm3271_vm13, %v4927_v33, %v4931_v16  ;;  %v19471_v49 = vsel %vm3399_vm15, %v19371_v38, %v5048_v29  ;;  %v4496_v6 = vadd.f32 %v13968_v10, %v18712_v62  ;;  %v15507_v33 = vld [vmem:[%s22021_s15 + $0xc0] sm:$0xff]  }
 0x710   : > { %22453 = vst [vmem:[#allocation81_spill] sm:$0xff] %v19451_v5  ;;  %22454 = vst [vmem:[#allocation82_spill] sm:$0xff] %v19467_v43  ;;  %v13971_v31 = vadd.f32 %v13970_v48, %v13969_v56  ;;  %v19476_v32 = vshll.u32 %v19453_v7, 16  ;;  %v19479_v45 = vshrl.u32 %v19453_v7, 16  ;;  %v4745_v47 = vrot.slane %v19453_v7, 1  ;;  %14041 = vmatpush3.bf16.msra.mxu1 %v15506_v41 }
 0x711   : > { %22455 = vst [vmem:[#allocation83_spill] sm:$0xff] %v19471_v49  ;;  %v4863_v38 = vrot.slane %v19453_v7, 2  ;;  %v19487_v46 = vsel %vm3351_vm8, %v4976_v42, %v4978_v36  ;;  %v5050_v62 = vrot.slane %v19420_v11, 3  ;;  %v4537_v18 = vmax.f32 %v4496_v6, 0.0  ;;  %14090 = vmatprep.subr.bf16.mxu1 %v15507_v33 }
 0x712   : > { %22456 = vst [vmem:[#allocation84_spill] sm:$0xff] %v19487_v46  ;;  %v4499_v13 = vadd.f32 %v13971_v31, %v18715_v58  ;;  %v4677_v10 = vrot.slane %v19476_v32, 1  ;;  %v4815_v56 = vrot.slane %v19479_v45, 1  ;;  %v4816_v52 = vrot.slane %v19476_v32, 2  ;;  %v13972_v6 = vpop.f32.mrb[212].mxu1 }
 0x713   : > { %v19495_v48 = vsel %vm2219_vm3, %v4743_v55, %v4745_v47  ;;  %v4933_v49 = vrot.slane %v19479_v45, 2  ;;  %v4934_v42 = vrot.slane %v19476_v32, 3  ;;  %v19499_v46 = vpack.c.bf16 %v4537_v18, %v4536_v37  ;;  %v13973_v31 = vpop.f32.mrb[213].mxu1 }
 0x714   : > { %22457 = vst [vmem:[#allocation85_spill] sm:$0xff] %v19495_v48  ;;  %v4538_v11 = vmax.f32 %v4499_v13, 0.0  ;;  %v4678_v58 = vsel %vm1624_vm1, %v4673_v19, %v4677_v10  ;;  %v4817_v5 = vor.u32 %v4816_v52, %v4815_v56  ;;  %v22459_v41 = vrot.slane %v19397_v61, 2  ;;  %v13975_v40 = vpop.f32.mrb[214].mxu1 }
 0x715   : > { %22458 = vst [vmem:[#allocation86_spill] sm:$0xff] %v19499_v46  ;;  %6472 = vmatprep.mubr.bf16.mxu0 %v4678_v58  ;;  %v4935_v43 = vor.u32 %v4934_v42, %v4933_v49  ;;  %v5051_v51 = vrot.slane %v19417_v54, 4  ;;  %v13974_v37 = vadd.f32 %v13973_v31, %v13972_v6  ;;  %v4980_v19 = vrot.slane %v19397_v61, 3  ;;  %v13976_v33 = vpop.f32.mrb[215].mxu1 }
 0x716   : > { %v19505_v55 = vsel %vm3223_vm14, %v22459_v41, %v4863_v38  ;;  %v19508_v48 = vpack.c.bf16 %v4538_v11, %v4537_v18  ;;  %6473 = vmatmul.mubr.bf16.gmra.mrb[148].mxu0 %v19397_v61  ;;  %v4681_v13 = vor.u32 %v19479_v45, %v4677_v10  ;;  %v19514_v49 = vsel %vm2516_vm4, %v4813_v25, %v4817_v5 }
 0x717   : > { %v19517_v56 = vsel %vm3271_vm13, %v4931_v16, %v4935_v43  ;;  %v5052_v52 = vor.u32 %v5051_v51, %v5050_v62  ;;  %v4504_v54 = vadd.f32 %v13974_v37, %v18732_v20  ;;  %v19528_v25 = vsel %vm3351_vm8, %v4978_v36, %v4980_v19 }
 0x718   : > { %v4683_v18 = vshll.u32 %v19508_v48, 16  ;;  %v4687_v40 = vshrl.u32 %v19508_v48, 16  ;;  %v22098_v42 = vrot.slane %v19508_v48, 1  ;;  %v22107_v61 = vrot.slane %v19508_v48, 2  ;;  %22461 = vst [vmem:[#allocation88_spill] sm:$0xff] %v19528_v25 }
 0x719   : > { %v19525_v6 = vsel %vm3399_vm15, %v5048_v29, %v5052_v52  ;;  %v5054_v16 = vrot.slane %v19479_v45, 3  ;;  %v4539_v10 = vmax.f32 %v4504_v54, 0.0 }
 0x71a   : > { %22460 = vst [vmem:[#allocation87_spill] sm:$0xff] %v19525_v6  ;;  %v4685_v51 = vrot.slane %v4683_v18, 1  ;;  %v4819_v62 = vrot.slane %v4687_v40, 1  ;;  %v4820_v20 = vrot.slane %v4683_v18, 2  ;;  %v19534_v58 = vsel %vm2219_vm3, %v4745_v47, %v22098_v42 }
 0x71b   : > { %v4937_v31 = vrot.slane %v4687_v40, 2  ;;  %v4938_v41 = vrot.slane %v4683_v18, 3  ;;  %v19539_v29 = vsel %vm3223_vm14, %v4863_v38, %v22107_v61  ;;  %v4555_v36 = vpack.c.bf16 %v4539_v10, %v4539_v10 }
 0x71c   : > { %v19541_v37 = vpack.c.bf16 %v4539_v10, %v4538_v11  ;;  %v4686_v45 = vsel %vm1624_vm1, %v4681_v13, %v4685_v51  ;;  %v4689_v33 = vor.u32 %v4687_v40, %v4685_v51  ;;  %v19544_v54 = vor.u32 %v4820_v20, %v4819_v62 }
 0x71d   : > { %6482 = vmatprep.mubr.bf16.mxu0 %v4686_v45  ;;  %v19546_v25 = vor.u32 %v4938_v41, %v4937_v31  ;;  %v5055_v47 = vrot.slane %v19476_v32, 4  ;;  %v4982_v42 = vrot.slane %v19453_v7, 3  ;;  %v5058_v6 = vrot.slane %v4687_v40, 3 }
 0x71e   : > { %22462 = vst [vmem:[#allocation89_spill] sm:$0xff] %v19541_v37  ;;  %6483 = vmatmul.mubr.bf16.gmra.mrb[152].mxu0 %v19453_v7  ;;  %v19553_v38 = vsel %vm2516_vm4, %v4817_v5, %v19544_v54  ;;  %v5059_v51 = vrot.slane %v4683_v18, 4  ;;  %v4984_v7 = vrot.slane %v19508_v48, 3  ;;  %v5063_v40 = vshrl.u32 %v4555_v36, 16 }
 0x71f   : > { %6492 = vmatprep.mubr.bf16.mxu0 %v4689_v33  ;;  %v19557_v11 = vsel %vm3271_vm13, %v4935_v43, %v19546_v25  ;;  %v5056_v13 = vor.u32 %v5055_v47, %v5054_v16  ;;  %v19560_v10 = vsel %vm3351_vm8, %v4980_v19, %v4982_v42  ;;  %v5066_v62 = vshll.u32 %v4555_v36, 16 }
 0x720   : > { %v5060_v20 = vor.u32 %v5059_v51, %v5058_v6  ;;  %v4986_v31 = vrot.slane %v4555_v36, 3  ;;  %v19567_v5 = vsel %vm3351_vm8, %v4982_v42, %v4984_v7  ;;  %v5065_v41 = vrot.slane %v5063_v40, 3  ;;  %v15461_v42 = vld [vmem:[%s22017_s11 + $0x200] ss:$8 sps:$4 sm:$0xff]   ;;  %v15466_v6 = vld [vmem:[%s22017_s11 + $0x214] ss:$8 sps:$4 sm:$0xff]  }
 0x721   : > { %v19563_v32 = vsel %vm3399_vm15, %v5052_v52, %v5056_v13  ;;  %22463 = vst [vmem:[#allocation90_spill] sm:$0xff] %v19567_v5  ;;  %v5068_v43 = vrot.slane %v5066_v62, 4  ;;  %v15470_v36 = vld [vmem:[%s22017_s11 + $0x224] ss:$8 sps:$4 sm:$0xff]   ;;  %v22102_v45 = vshll.u32 %v18856_v63, 16  ;;  %v22100_v33 = vshrl.u32 %v18856_v63, 16 }
 0x722   : > { %v19570_v16 = vsel %vm3399_vm15, %v5056_v13, %v5060_v20  ;;  %v19573_v19 = vsel %vm3351_vm8, %v4984_v7, %v4986_v31  ;;  %v22099_v47 = vshrl.u32 %v18913_v28, 16  ;;  %v15475_v13 = vld [vmem:[%s22017_s11 + $0x234] ss:$8 sps:$4 sm:$0xff]   ;;  %v22103_v51 = vshrl.u32 %v18968_v27, 16 }
 0x723   : > { %22464 = vst [vmem:[#allocation91_spill] sm:$0xff] %v19573_v19  ;;  %v5069_v18 = vor.u32 %v5068_v43, %v5065_v41  ;;  %v22104_v7 = vshll.u32 %v18968_v27, 16  ;;  %v22106_v40 = vshll.u32 %v19023_v23, 16  ;;  %v22105_v62 = vshrl.u32 %v19023_v23, 16  ;;  %v15473_v41 = vld [vmem:[%s22017_s11 + $0x230] ss:$8 sps:$4 sm:$0xff]  }
 0x724   : > { %v5287_v31 = vrot.slane %v22102_v45, 2  ;;  %v15536_v23 = vld [vmem:[%s22021_s15 + $0xa8] sm:$0xff]  }
 0x725   : > { %v19578_v52 = vsel %vm3399_vm15, %v5060_v20, %v5069_v18  ;;  %v5286_v20 = vrot.slane %v22100_v33, 1  ;;  %v15480_v18 = vld [vmem:[%s22017_s11 + $0x244] ss:$8 sps:$4 sm:$0xff]   ;;  %v5298_v45 = vrot.slane %v22105_v62, 1  ;;  %v15485_v62 = vld [vmem:[%s22017_s11 + $0x254] ss:$8 sps:$4 sm:$0xff]  }
 0x726   : > { %6493 = vmatmul.mubr.bf16.gmra.mrb[156].mxu0 %v19508_v48  ;;  %22465 = vst [vmem:[#allocation92_spill] sm:$0xff] %v19578_v52 }
 0x727   : > { %6535 = vmatprep.mubr.bf16.mxu0 %v18831_v8  ;;  %v15464_v8 = vld [vmem:[%s22017_s11 + $0x210] ss:$8 sps:$4 sm:$0xff]  }
 0x72e   : > { %6536 = vmatmul.mubr.bf16.vlgmr.msra.gmra.mrb[100].mxu0 %v18802_v14  ;;  %v15468_v14 = vld [vmem:[%s22017_s11 + $0x220] ss:$8 sps:$4 sm:$0xff]  }
 0x72f   : > { %6545 = vmatprep.mubr.bf16.mxu0 %v18881_v35  ;;  %6683 = vmatpush1.bf16.msra.mxu0 %v15461_v42  ;;  %v22101_v35 = vshll.u32 %v18913_v28, 16  ;;  %v22111_v42 = vshll.u32 %v19078_v22, 16 }
 0x730   : > { %6684 = vmatprep.subr.bf16.mxu0 %v15466_v6  ;;  %v19626_v6 = vor.u32 %v5287_v31, %v5286_v20  ;;  %v5299_v20 = vrot.slane %v22106_v40, 2  ;;  %v15478_v31 = vld [vmem:[%s22017_s11 + $0x240] ss:$8 sps:$4 sm:$0xff]  }
 0x731   : > { %v5291_v43 = vrot.slane %v22101_v35, 2  ;;  %v22112_v35 = vshrl.u32 %v19210_v2, 16 }
 0x732   : > { %22466 = vst [vmem:[#allocation93_spill] sm:$0xff] %v19626_v6  ;;  %v5300_v40 = vor.u32 %v5299_v20, %v5298_v45 }
 0x733   : > { %6685 = vmatpush1.bf16.msra.mxu0 %v15464_v8  ;;  %v5294_v8 = vrot.slane %v22103_v51, 1 }
 0x734   : > { %6686 = vmatprep.subr.bf16.mxu0 %v15470_v36  ;;  %v22110_v36 = vshll.u32 %v19142_v17, 16 }
 0x736   : > { %6546 = vmatmul.mubr.bf16.gmra.mrb[104].mxu0 %v18854_v57  ;;  %v5290_v57 = vrot.slane %v22099_v47, 1 }
 0x737   : > { %6555 = vmatprep.mubr.bf16.mxu0 %v18938_v44  ;;  %6687 = vmatpush1.bf16.msra.mxu0 %v15468_v14  ;;  %v22108_v44 = vshrl.u32 %v19078_v22, 16  ;;  %v22109_v14 = vshrl.u32 %v19142_v17, 16 }
 0x738   : > { %6688 = vmatprep.subr.bf16.mxu0 %v15475_v13  ;;  %v5292_v47 = vor.u32 %v5291_v43, %v5290_v57  ;;  %v5295_v13 = vrot.slane %v22104_v7, 2  ;;  %v5303_v57 = vrot.slane %v22111_v42, 2  ;;  %v22113_v43 = vshrl.u32 %v19333_v60, 16 }
 0x739   : > { %v5302_v61 = vrot.slane %v22108_v44, 1  ;;  %v22470_v42 = vshll.u32 %v19210_v2, 16 }
 0x73a   : > { %v19647_v51 = vsel %vm2516_vm4, %v19626_v6, %v5292_v47  ;;  %v5296_v7 = vor.u32 %v5295_v13, %v5294_v8  ;;  %v5307_v8 = vrot.slane %v22110_v36, 2 }
 0x73b   : > { %6689 = vmatpush1.bf16.msra.mxu0 %v15473_v41  ;;  %22467 = vst [vmem:[#allocation94_spill] sm:$0xff] %v19647_v51  ;;  %v22114_v41 = vshll.u32 %v19333_v60, 16  ;;  %v5304_v44 = vor.u32 %v5303_v57, %v5302_v61  ;;  %v5311_v45 = vrot.slane %v22470_v42, 2  ;;  %v15490_v61 = vld [vmem:[%s22017_s11 + $0x264] ss:$8 sps:$4 sm:$0xff]  }
 0x73c   : > { %6690 = vmatprep.subr.bf16.mxu0 %v15480_v18  ;;  %v19659_v33 = vsel %vm2516_vm4, %v5292_v47, %v5296_v7  ;;  %v5306_v18 = vrot.slane %v22109_v14, 1  ;;  %v19669_v20 = vsel %vm2516_vm4, %v5296_v7, %v5300_v40  ;;  %v15483_v47 = vld [vmem:[%s22017_s11 + $0x250] ss:$8 sps:$4 sm:$0xff]  }
 0x73d   : > { %22468 = vst [vmem:[#allocation95_spill] sm:$0xff] %v19659_v33  ;;  %22469 = vst [vmem:[#allocation96_spill] sm:$0xff] %v19669_v20  ;;  %v19685_v7 = vsel %vm2516_vm4, %v5300_v40, %v5304_v44  ;;  %v5318_v40 = vrot.slane %v22113_v43, 1 }
 0x73e   : > { %6556 = vmatmul.mubr.bf16.gmra.mrb[108].mxu0 %v18911_v34  ;;  %v5308_v36 = vor.u32 %v5307_v8, %v5306_v18  ;;  %v5310_v34 = vrot.slane %v22112_v35, 1  ;;  %22471 = vst [vmem:[#allocation97_spill] sm:$0xff] %v19685_v7  ;;  %v22473_v18 = vshll.u32 %v19288_v50, 16 }
 0x73f   : > { %6565 = vmatprep.mubr.bf16.mxu0 %v18993_v30  ;;  %6691 = vmatpush1.bf16.msra.mxu0 %v15478_v31  ;;  %v22472_v31 = vshrl.u32 %v19288_v50, 16  ;;  %v22503_v50 = vrot.slane %v19508_v48, 1 }
 0x740   : > { %6692 = vmatprep.subr.bf16.mxu0 %v15485_v62  ;;  %v5315_v8 = vrot.slane %v22473_v18, 2  ;;  %v19694_v62 = vsel %vm2516_vm4, %v5304_v44, %v5308_v36  ;;  %v5312_v14 = vor.u32 %v5311_v45, %v5310_v34  ;;  %v15488_v18 = vld [vmem:[%s22017_s11 + $0x260] ss:$8 sps:$4 sm:$0xff]   ;;  %v22476_v44 = vshrl.u32 %v19382_v12, 16 }
 0x741   : > { %v5314_v57 = vrot.slane %v22472_v31, 1  ;;  %22474 = vst [vmem:[#allocation98_spill] sm:$0xff] %v19694_v62  ;;  %v5319_v31 = vrot.slane %v22114_v41, 2  ;;  %v22477_v34 = vshll.u32 %v19382_v12, 16 }
 0x742   : > { %v19705_v35 = vsel %vm2516_vm4, %v5308_v36, %v5312_v14  ;;  %v5322_v45 = vrot.slane %v22476_v44, 1  ;;  %v22479_v36 = vshrl.u32 %v19440_v0, 16  ;;  %v22480_v44 = vshll.u32 %v19440_v0, 16 }
 0x743   : > { %v5316_v30 = vor.u32 %v5315_v8, %v5314_v57  ;;  %6693 = vmatpush1.bf16.msra.mxu0 %v15483_v47  ;;  %22475 = vst [vmem:[#allocation99_spill] sm:$0xff] %v19705_v35  ;;  %v5323_v57 = vrot.slane %v22477_v34, 2  ;;  %v15495_v8 = vld [vmem:[%s22017_s11 + $0x274] ss:$8 sps:$4 sm:$0xff]   ;;  %v5320_v41 = vor.u32 %v5319_v31, %v5318_v40  ;;  %v22483_v47 = vshrl.u32 %v19499_v46, 16 }
 0x744   : > { %6694 = vmatprep.subr.bf16.mxu0 %v15490_v61  ;;  %v5326_v13 = vrot.slane %v22479_v36, 1  ;;  %v5327_v35 = vrot.slane %v22480_v44, 2  ;;  %v22481_v61 = vshrl.u32 %v19541_v37, 16  ;;  %v22484_v40 = vshll.u32 %v19499_v46, 16 }
 0x745   : > { %v19716_v43 = vsel %vm2516_vm4, %v5312_v14, %v5316_v30  ;;  %v5324_v42 = vor.u32 %v5323_v57, %v5322_v45  ;;  %v19726_v62 = vsel %vm2516_vm4, %v5316_v30, %v5320_v41  ;;  %v5330_v14 = vrot.slane %v22483_v47, 1  ;;  %v15493_v45 = vld [vmem:[%s22017_s11 + $0x270] ss:$8 sps:$4 sm:$0xff]   ;;  %v15500_v30 = vld [vmem:[%s22017_s11 + $0x284] ss:$8 sps:$4 sm:$0xff]  }
 0x746   : > { %22478 = vst [vmem:[#allocation100_spill] sm:$0xff] %v19716_v43  ;;  %6566 = vmatmul.mubr.bf16.gmra.mrb[112].mxu0 %v18966_v26  ;;  %v5334_v34 = vrot.slane %v22481_v61, 1  ;;  %22482 = vst [vmem:[#allocation101_spill] sm:$0xff] %v19726_v62  ;;  %v5331_v31 = vrot.slane %v22484_v40, 2  ;;  %v5328_v57 = vor.u32 %v5327_v35, %v5326_v13  ;;  %v22486_v36 = vshll.u32 %v19541_v37, 16 }
 0x747   : > { %6575 = vmatprep.mubr.bf16.mxu0 %v19048_v9  ;;  %6695 = vmatpush1.bf16.msra.mxu0 %v15488_v18  ;;  %v19737_v26 = vsel %vm2516_vm4, %v5320_v41, %v5324_v42  ;;  %v15498_v35 = vld [vmem:[%s22017_s11 + $0x280] ss:$8 sps:$4 sm:$0xff]   ;;  %v15505_v41 = vld [vmem:[%s22017_s11 + $0x294] ss:$8 sps:$4 sm:$0xff]  }
 0x748   : > { %22485 = vst [vmem:[#allocation102_spill] sm:$0xff] %v19737_v26  ;;  %6696 = vmatprep.subr.bf16.mxu0 %v15495_v8  ;;  %v5332_v47 = vor.u32 %v5331_v31, %v5330_v14  ;;  %v5335_v44 = vrot.slane %v22486_v36, 2  ;;  %v19745_v9 = vsel %vm2516_vm4, %v5324_v42, %v5328_v57  ;;  %v15503_v42 = vld [vmem:[%s22017_s11 + $0x290] ss:$8 sps:$4 sm:$0xff]   ;;  %v15510_v8 = vld [vmem:[%s22017_s11 + $0x2a4] ss:$8 sps:$4 sm:$0xff]  }
 0x749   : > { %22487 = vst [vmem:[#allocation103_spill] sm:$0xff] %v19745_v9  ;;  %v15518_v14 = vld [vmem:[%s22017_s11 + $0x2c4] ss:$8 sps:$4 sm:$0xff]   ;;  %v15516_v40 = vld [vmem:[%s22017_s11 + $0x2c0] ss:$8 sps:$4 sm:$0xff]  }
 0x74a   : > { %v19748_v18 = vsel %vm2516_vm4, %v5328_v57, %v5332_v47  ;;  %v19750_v61 = vor.u32 %v5335_v44, %v5334_v34  ;;  %v15508_v34 = vld [vmem:[%s22017_s11 + $0x2a0] ss:$8 sps:$4 sm:$0xff]   ;;  %v15520_v31 = vld [vmem:[%s22017_s11 + $0x2d0] ss:$8 sps:$4 sm:$0xff]   ;;  %v15548_v44 = vld [vmem:[%s22017_s11 + $0x304] ss:$8 sps:$4 sm:$0xff]  }
 0x74b   : > { %22488 = vst [vmem:[#allocation104_spill] sm:$0xff] %v19748_v18  ;;  %6697 = vmatpush1.bf16.msra.mxu0 %v15493_v45  ;;  %v15526_v45 = vld [vmem:[%s22017_s11 + $0x2e4] ss:$8 sps:$4 sm:$0xff]   ;;  %v15524_v57 = vld [vmem:[%s22017_s11 + $0x2e0] ss:$8 sps:$4 sm:$0xff]  }
 0x74c   : > { %22489 = vst [vmem:[#allocation105_spill] sm:$0xff] %v19750_v61  ;;  %6698 = vmatprep.subr.bf16.mxu0 %v15500_v30  ;;  %v19760_v13 = vsel %vm2516_vm4, %v5332_v47, %v19750_v61  ;;  %v22492_v30 = vld [vmem:[#allocation24_spill] sm:$0xff]  ;;  %v22493_v47 = vld [vmem:[#allocation31_spill] sm:$0xff]  ;;  %v15528_v36 = vld [vmem:[%s22017_s11 + $0x2f0] ss:$8 sps:$4 sm:$0xff]  }
 0x74d   : > { %22490 = vst [vmem:[#allocation106_spill] sm:$0xff] %v19760_v13 }
 0x74e   : > { %6576 = vmatmul.mubr.bf16.gmra.mrb[116].mxu0 %v19021_v39  ;;  %v15514_v39 = vld [vmem:[%s22017_s11 + $0x2b4] ss:$8 sps:$4 sm:$0xff]  }
 0x74f   : > { %6585 = vmatprep.mubr.bf16.mxu0 %v19103_v59  ;;  %6699 = vmatpush1.bf16.msra.mxu0 %v15498_v35  ;;  %v15512_v59 = vld [vmem:[%s22017_s11 + $0x2b0] ss:$8 sps:$4 sm:$0xff]  }
 0x750   : > { %6700 = vmatprep.subr.bf16.mxu0 %v15505_v41  ;;  %v22494_v35 = vld [vmem:[#allocation26_spill] sm:$0xff]  ;;  %v22495_v41 = vld [vmem:[#allocation68_spill] sm:$0xff] }
 0x753   : > { %6701 = vmatpush1.bf16.msra.mxu0 %v15503_v42  ;;  %v19816_v42 = vld [vmem:[#allocation7] ss:$0 sm:$0xff] }
 0x754   : > { %6702 = vmatprep.subr.bf16.mxu0 %v15510_v8 }
 0x756   : > { %6586 = vmatmul.mubr.bf16.gmra.mrb[120].mxu0 %v19076_v15  ;;  %v15522_v15 = vld [vmem:[%s22017_s11 + $0x2d4] ss:$8 sps:$4 sm:$0xff]  }
 0x757   : > { %6595 = vmatprep.mubr.bf16.mxu0 %v19175_v4  ;;  %6703 = vmatpush1.bf16.msra.mxu0 %v15508_v34  ;;  %v22491_v4 = vld [vmem:[#allocation21_spill] sm:$0xff] }
 0x758   : > { %6704 = vmatprep.subr.bf16.mxu0 %v15514_v39 }
 0x75b   : > { %6705 = vmatpush1.bf16.msra.mxu0 %v15512_v59 }
 0x75c   : > { %6706 = vmatprep.subr.bf16.mxu0 %v15518_v14 }
 0x75e   : > { %6596 = vmatmul.mubr.bf16.gmra.mrb[124].mxu0 %v19138_v53  ;;  %v15530_v53 = vld [vmem:[%s22017_s11 + $0x2f4] ss:$8 sps:$4 sm:$0xff]  }
 0x75f   : > { %6605 = vmatprep.mubr.bf16.mxu0 %v22491_v4  ;;  %6707 = vmatpush1.bf16.msra.mxu0 %v15516_v40 }
 0x760   : > { %6708 = vmatprep.subr.bf16.mxu0 %v15522_v15 }
 0x763   : > { %6709 = vmatpush1.bf16.msra.mxu0 %v15520_v31 }
 0x764   : > { %6710 = vmatprep.subr.bf16.mxu0 %v15526_v45 }
 0x766   : > { %6606 = vmatmul.mubr.bf16.gmra.mrb[160].mxu0 %v22492_v30 }
 0x767   : > { %6611 = vmatprep.mubr.bf16.mxu0 %v22493_v47  ;;  %6711 = vmatpush1.bf16.msra.mxu0 %v15524_v57 }
 0x768   : > { %6712 = vmatprep.subr.bf16.mxu0 %v15530_v53 }
 0x76b   : > { %6713 = vmatpush1.bf16.msra.mxu0 %v15528_v36 }
 0x76c   : > { %6861 = vmatprep.subr.bf16.mxu0 %v15548_v44 }
 0x76e   : > { %6612 = vmatmul.mubr.bf16.gmra.mrb[132].mxu0 %v22494_v35 }
 0x76f   : > { %6621 = vmatprep.mubr.bf16.mxu0 %v19346_v21 }
 0x776   : > { %6622 = vmatmul.mubr.bf16.gmra.mrb[136].mxu0 %v22495_v41  ;;  %v22496_v41 = vld [vmem:[#allocation79_spill] sm:$0xff] }
 0x777   : > { %6631 = vmatprep.mubr.bf16.mxu0 %v19405_v1 }
 0x77a   : > { %v14520_v8 = vpop.f32.mrb[216].mxu1 }
 0x77b   : > { %v8550_v34 = vadd.f32 %v14520_v8, %v19816_v42  ;;  %v8463_v39 = vpop.f32.mrb[217].mxu1 }
 0x77c   : > { %v8548_v59 = vadd.f32 %v19816_v42, %v8463_v39  ;;  %v14521_v14 = vpop.f32.mrb[218].mxu1 }
 0x77d   : > { %v8551_v40 = vadd.f32 %v14521_v14, %v19816_v42  ;;  %v8466_v21 = vpop.f32.mrb[219].mxu1  ;;  %v8566_v4 = vmax.f32 %v8550_v34, 0.0 }
 0x77e   : > { %6632 = vmatmul.mubr.bf16.gmra.mrb[140].mxu0 %v19378_v3  ;;  %v8549_v15 = vadd.f32 %v19816_v42, %v8466_v21  ;;  %v8564_v31 = vmax.f32 %v8548_v59, 0.0 }
 0x77f   : > { %6641 = vmatprep.mubr.bf16.mxu0 %v19461_v24  ;;  %v8567_v1 = vmax.f32 %v8551_v40, 0.0 }
 0x780   : > { %v8565_v45 = vmax.f32 %v8549_v15, 0.0 }
 0x781   : > { %v19824_v57 = vpack.c.bf16 %v8567_v1, %v8566_v4 }
 0x782   : > { %v19826_v53 = vpack.c.bf16 %v8565_v45, %v8564_v31  ;;  %v14524_v30 = vpop.f32.mrb[220].mxu1 }
 0x783   : > { %v8554_v47 = vadd.f32 %v14524_v30, %v19816_v42  ;;  %v8479_v3 = vpop.f32.mrb[221].mxu1  ;;  %v19830_v36 = vshll.u32 %v19824_v57, 16  ;;  %v22116_v24 = vrot.slane %v19824_v57, 1  ;;  %v19848_v1 = vshrl.u32 %v19824_v57, 16 }
 0x784   : > { %v8668_v44 = vrot.slane %v19826_v53, 1  ;;  %v8552_v35 = vadd.f32 %v19816_v42, %v8479_v3  ;;  %v14525_v8 = vpop.f32.mrb[222].mxu1  ;;  %v19837_v34 = vshrl.u32 %v19826_v53, 16  ;;  %v19843_v40 = vshll.u32 %v19826_v53, 16 }
 0x785   : > { %v8555_v59 = vadd.f32 %v14525_v8, %v19816_v42  ;;  %v8482_v14 = vpop.f32.mrb[223].mxu1  ;;  %v8599_v21 = vrot.slane %v19830_v36, 1  ;;  %v8570_v15 = vmax.f32 %v8554_v47, 0.0  ;;  %v8694_v39 = vrot.slane %v19848_v1, 1 }
 0x786   : > { %6642 = vmatmul.mubr.bf16.gmra.mrb[144].mxu0 %v22496_v41  ;;  %v8553_v4 = vadd.f32 %v19816_v42, %v8482_v14  ;;  %v8691_v31 = vrot.slane %v19837_v34, 1  ;;  %v8594_v30 = vrot.slane %v19843_v40, 1  ;;  %v8692_v3 = vrot.slane %v19843_v40, 2 }
 0x787   : > { %6651 = vmatprep.mubr.bf16.mxu0 %v19514_v49  ;;  %v8571_v45 = vmax.f32 %v8555_v59, 0.0  ;;  %v8695_v49 = vrot.slane %v19830_v36, 2  ;;  %v8568_v41 = vmax.f32 %v8552_v35, 0.0  ;;  %v19858_v47 = vsel %vm2219_vm3, %v8668_v44, %v22116_v24  ;;  %v15511_v35 = vld [vmem:[%s22021_s15 + $0x80] sm:$0xff]  }
 0x788   : > { %v8569_v8 = vmax.f32 %v8553_v4, 0.0  ;;  %v8595_v59 = vor.u32 %v8594_v30, %v19837_v34  ;;  %v8603_v13 = vor.u32 %v19848_v1, %v8599_v21  ;;  %v8693_v4 = vor.u32 %v8692_v3, %v8691_v31  ;;  %v15515_v30 = vld [vmem:[%s22021_s15 + $0xc8] sm:$0xff]  }
 0x789   : > { %v19861_v61 = vpack.c.bf16 %v8571_v45, %v8570_v15  ;;  %v19870_v26 = vor.u32 %v8695_v49, %v8694_v39  ;;  %v22497_v3 = vld [vmem:[#allocation85_spill] sm:$0xff] }
 0x78a   : > { %v19865_v18 = vpack.c.bf16 %v8569_v8, %v8568_v41  ;;  %v14528_v9 = vpop.f32.mrb[224].mxu1  ;;  %v8600_v45 = vsel %vm1624_vm1, %v8595_v59, %v8599_v21 }
 0x78b   : > { %v8558_v14 = vadd.f32 %v14528_v9, %v19816_v42  ;;  %v8495_v15 = vpop.f32.mrb[225].mxu1  ;;  %9118 = vmatprep.mubr.bf16.mxu1 %v8600_v45 }
 0x78c   : > { %v8556_v31 = vadd.f32 %v19816_v42, %v8495_v15  ;;  %v14529_v9 = vpop.f32.mrb[226].mxu1  ;;  %v19885_v21 = vshll.u32 %v19865_v18, 16  ;;  %9119 = vmatmul.mubr.bf16.vlgmr.msra.gmra.mrb[232].mxu1 %v19826_v53  ;;  %v19891_v41 = vshrl.u32 %v19865_v18, 16  ;;  %v19894_v15 = vshll.u32 %v19861_v61, 16 }
 0x78d   : > { %v8574_v49 = vmax.f32 %v8558_v14, 0.0  ;;  %v8559_v59 = vadd.f32 %v14529_v9, %v19816_v42  ;;  %v8498_v8 = vpop.f32.mrb[227].mxu1  ;;  %14091 = vmatpush3.bf16.msra.mxu1 %v15511_v35  ;;  %v15519_v14 = vld [vmem:[%s22021_s15 + $0x88] sm:$0xff]   ;;  %v19902_v9 = vshrl.u32 %v19861_v61, 16  ;;  %v19910_v35 = vsel %vm2516_vm4, %v8693_v4, %v19870_v26 }
 0x78e   : > { %6652 = vmatmul.mubr.bf16.gmra.mrb[148].mxu0 %v22497_v3  ;;  %v8572_v45 = vmax.f32 %v8556_v31, 0.0  ;;  %v8557_v3 = vadd.f32 %v19816_v42, %v8498_v8  ;;  %v8607_v44 = vrot.slane %v19885_v21, 1  ;;  %14092 = vmatprep.subr.bf16.mxu1 %v15515_v30  ;;  %v8615_v24 = vrot.slane %v19894_v15, 1  ;;  %v15523_v31 = vld [vmem:[%s22021_s15 + $0xd0] sm:$0xff]  }
 0x78f   : > { %6661 = vmatprep.mubr.bf16.mxu0 %v19553_v38  ;;  %v8575_v38 = vmax.f32 %v8559_v59, 0.0  ;;  %v8698_v8 = vrot.slane %v19891_v41, 1  ;;  %v8699_v59 = vrot.slane %v19885_v21, 2  ;;  %v22498_v33 = vrot.slane %v19865_v18, 1  ;;  %v15527_v30 = vld [vmem:[%s22021_s15 + $0x90] sm:$0xff]  }
 0x790   : > { %v8573_v39 = vmax.f32 %v8557_v3, 0.0  ;;  %v8608_v62 = vsel %vm1624_vm1, %v8603_v13, %v8607_v44  ;;  %v8611_v43 = vor.u32 %v19891_v41, %v8607_v44  ;;  %v22499_v4 = vrot.slane %v19824_v57, 1 }
 0x791   : > { %v19918_v20 = vpack.c.bf16 %v8575_v38, %v8574_v49  ;;  %9126 = vmatprep.mubr.bf16.mxu1 %v8608_v62  ;;  %14093 = vmatpush3.bf16.msra.mxu1 %v15519_v14  ;;  %v8619_v49 = vor.u32 %v19902_v9, %v8615_v24  ;;  %v8702_v62 = vrot.slane %v19902_v9, 1 }
 0x792   : > { %v19925_v51 = vsel %vm2219_vm3, %v22499_v4, %v22498_v33  ;;  %v19927_v3 = vpack.c.bf16 %v8573_v39, %v8572_v45  ;;  %v14532_v13 = vpop.f32.mrb[228].mxu1  ;;  %v8616_v44 = vsel %vm1624_vm1, %v8611_v43, %v8615_v24  ;;  %14094 = vmatprep.subr.bf16.mxu1 %v15523_v31  ;;  %v15531_v33 = vld [vmem:[%s22021_s15 + $0xd8] sm:$0xff]   ;;  %v8700_v43 = vor.u32 %v8699_v59, %v8698_v8 }
 0x793   : > { %v8562_v38 = vadd.f32 %v14532_v13, %v19816_v42  ;;  %v8511_v7 = vpop.f32.mrb[229].mxu1  ;;  %v19940_v39 = vshll.u32 %v19918_v20, 16  ;;  %v8703_v45 = vrot.slane %v19894_v15, 2  ;;  %v19976_v12 = vshrl.u32 %v19918_v20, 16 }
 0x794   : > { %v8560_v4 = vadd.f32 %v19816_v42, %v8511_v7  ;;  %v14533_v13 = vpop.f32.mrb[230].mxu1  ;;  %v19948_v31 = vshll.u32 %v19927_v3, 16  ;;  %v8675_v6 = vrot.slane %v19927_v3, 1  ;;  %9127 = vmatmul.mubr.bf16.gmra.mrb[236].mxu1 %v19824_v57  ;;  %v19956_v24 = vshrl.u32 %v19927_v3, 16 }
 0x795   : > { %v8563_v8 = vadd.f32 %v14533_v13, %v19816_v42  ;;  %v8514_v59 = vpop.f32.mrb[231].mxu1  ;;  %v19958_v7 = vmax.f32 %v8562_v38, 0.0  ;;  %9134 = vmatprep.mubr.bf16.mxu1 %v8616_v44  ;;  %14095 = vmatpush3.bf16.msra.mxu1 %v15527_v30  ;;  %v15532_v13 = vld [vmem:[%s22021_s15 + $0x98] sm:$0xff]   ;;  %v8631_v37 = vrot.slane %v19940_v39, 1  ;;  %v15533_v38 = vld [vmem:[%s22021_s15 + $0xe0] sm:$0xff]   ;;  %v8704_v30 = vor.u32 %v8703_v45, %v8702_v62 }
 0x796   : > { %6662 = vmatmul.mubr.bf16.gmra.mrb[152].mxu0 %v19534_v58  ;;  %v8561_v58 = vadd.f32 %v19816_v42, %v8514_v59  ;;  %v8623_v14 = vrot.slane %v19948_v31, 1  ;;  %v8576_v46 = vmax.f32 %v8560_v4, 0.0  ;;  %14096 = vmatprep.subr.bf16.mxu1 %v15531_v33  ;;  %v19971_v42 = vsel %vm2516_vm4, %v19870_v26, %v8700_v43 }
 0x797   : > { %6671 = vmatprep.mubr.bf16.mxu0 %v19544_v54  ;;  %v8579_v54 = vmax.f32 %v8563_v8, 0.0  ;;  %v19982_v33 = vsel %vm2516_vm4, %v8700_v43, %v8704_v30  ;;  %v22500_v8 = vrot.slane %v19861_v61, 1  ;;  %v22501_v26 = vrot.slane %v19865_v18, 1  ;;  %v15534_v43 = vld [vmem:[%s22021_s15 + $0xa0] sm:$0xff]  }
 0x798   : > { %v8577_v44 = vmax.f32 %v8561_v58, 0.0  ;;  %v8624_v59 = vsel %vm1624_vm1, %v8619_v49, %v8623_v14  ;;  %v8627_v0 = vor.u32 %v19956_v24, %v8623_v14  ;;  %v8706_v49 = vrot.slane %v19956_v24, 1 }
 0x799   : > { %v19979_v4 = vpack.c.bf16 %v8579_v54, %v19958_v7  ;;  %v19989_v62 = vsel %vm2219_vm3, %v22501_v26, %v22500_v8  ;;  %14097 = vmatpush3.bf16.msra.mxu1 %v15532_v13  ;;  %v8707_v58 = vrot.slane %v19948_v31, 2  ;;  %v22502_v54 = vmov %v22500_v8  ;;  %v22504_v8 = vld [vmem:[#allocation55_spill] sm:$0xff] }
 0x79a   : > { %v19992_v45 = vpack.c.bf16 %v8577_v44, %v8576_v46  ;;  %v19995_v14 = vsel %vm1624_vm1, %v8627_v0, %v8631_v37  ;;  %v20004_v60 = vsel %vm2219_vm3, %v22502_v54, %v8675_v6  ;;  %14098 = vmatprep.subr.bf16.mxu1 %v15533_v38  ;;  %v8635_v13 = vor.u32 %v19976_v12, %v8631_v37  ;;  %v15535_v0 = vld [vmem:[%s22021_s15 + $0xe8] sm:$0xff]  }
 0x79b   : > { %v20013_v44 = vshll.u32 %v19979_v4, 16  ;;  %v20025_v37 = vshrl.u32 %v19979_v4, 16  ;;  %v8708_v2 = vor.u32 %v8707_v58, %v8706_v49  ;;  %v8710_v17 = vrot.slane %v19976_v12, 1 }
 0x79c   : > { %v8679_v26 = vrot.slane %v19992_v45, 1  ;;  %v20019_v54 = vshll.u32 %v19992_v45, 16  ;;  %v20022_v46 = vshrl.u32 %v19992_v45, 16  ;;  %9135 = vmatmul.mubr.bf16.gmra.mrb[240].mxu1 %v19865_v18  ;;  %v22505_v27 = vrot.slane %v19918_v20, 1 }
 0x79d   : > { %9142 = vmatprep.mubr.bf16.mxu1 %v8624_v59  ;;  %14099 = vmatpush3.bf16.msra.mxu1 %v15534_v43  ;;  %v15537_v59 = vld [vmem:[%s22021_s15 + $0xf0] sm:$0xff]   ;;  %v20048_v43 = vsel %vm2516_vm4, %v8704_v30, %v8708_v2  ;;  %v8718_v58 = vrot.slane %v20025_v37, 1  ;;  %v8719_v30 = vrot.slane %v20013_v44, 2 }
 0x79e   : > { %6672 = vmatmul.mubr.bf16.gmra.mrb[156].mxu0 %v22503_v50  ;;  %v8711_v50 = vrot.slane %v19940_v39, 2  ;;  %v8639_v22 = vrot.slane %v20019_v54, 1  ;;  %v20039_v38 = vsel %vm2219_vm3, %v8675_v6, %v22505_v27  ;;  %v8715_v49 = vrot.slane %v20019_v54, 2  ;;  %14100 = vmatprep.subr.bf16.mxu1 %v15535_v0 }
 0x79f   : > { %6714 = vmatprep.mubr.bf16.mxu0 %v22504_v8  ;;  %v8714_v8 = vrot.slane %v20022_v46, 1  ;;  %v22506_v63 = vmov %v22505_v27 }
 0x7a0   : > { %v8712_v28 = vor.u32 %v8711_v50, %v8710_v17  ;;  %v20053_v27 = vsel %vm2219_vm3, %v22506_v63, %v8679_v26  ;;  %v20056_v6 = vsel %vm1624_vm1, %v8635_v13, %v8639_v22  ;;  %v8643_v0 = vor.u32 %v20022_v46, %v8639_v22 }
 0x7a1   : > { %v8716_v19 = vor.u32 %v8715_v49, %v8714_v8  ;;  %v22507_v17 = vrot.slane %v19979_v4, 1  ;;  %v22508_v63 = vrot.slane %v19837_v34, 2  ;;  %v22509_v13 = vrot.slane %v19843_v40, 3  ;;  %14101 = vmatpush3.bf16.msra.mxu1 %v15536_v23 }
 0x7a2   : > { %v20061_v52 = vsel %vm2516_vm4, %v8708_v2, %v8712_v28  ;;  %v22510_v22 = vrot.slane %v20013_v44, 1  ;;  %v15538_v2 = vld [vmem:[%s22021_s15 + $0xb0] sm:$0xff]   ;;  %v22511_v34 = vrot.slane %v19824_v57, 2  ;;  %v22512_v40 = vrot.slane %v19826_v53, 2  ;;  %14102 = vmatprep.subr.bf16.mxu1 %v15537_v59 }
 0x7a3   : > { %v20067_v50 = vsel %vm2219_vm3, %v8679_v26, %v22507_v17  ;;  %v8755_v5 = vor.u32 %v22509_v13, %v22508_v63  ;;  %v20082_v49 = vsel %vm2516_vm4, %v8712_v28, %v8716_v19  ;;  %v8757_v26 = vrot.slane %v19830_v36, 3  ;;  %v15546_v17 = vld [vmem:[%s22017_s11 + $0x300] ss:$8 sps:$4 sm:$0xff]  }
 0x7a4   : > { %v20076_v8 = vsel %vm1624_vm1, %v8643_v0, %v22510_v22  ;;  %v20090_v23 = vsel %vm3223_vm14, %v22512_v40, %v22511_v34  ;;  %v15539_v0 = vld [vmem:[%s22021_s15 + $0xf8] sm:$0xff]   ;;  %v20098_v28 = vor.u32 %v8719_v30, %v8718_v58  ;;  %v8760_v36 = vrot.slane %v19891_v41, 2  ;;  %v22515_v22 = vld [vmem:[#allocation32_spill] sm:$0xff]  ;;  %9143 = vmatmul.mubr.bf16.gmra.mrb[244].mxu1 %v19861_v61 }
 0x7a5   : > { %v8761_v63 = vrot.slane %v19885_v21, 3  ;;  %v22513_v53 = vrot.slane %v19865_v18, 2  ;;  %v22514_v13 = vmov %v22511_v34  ;;  %v15552_v34 = vld [vmem:[%s22017_s11 + $0x314] ss:$8 sps:$4 sm:$0xff]   ;;  %v22516_v58 = vrot.slane %v19848_v1, 2  ;;  %9150 = vmatprep.mubr.bf16.mxu1 %v19995_v14  ;;  %14103 = vmatpush3.bf16.msra.mxu1 %v15538_v2 }
 0x7a6   : > { %6715 = vmatmul.mubr.bf16.vlgmr.msra.gmra.mrb[100].mxu0 %v22515_v22  ;;  %v8764_v41 = vrot.slane %v19902_v9, 2  ;;  %v8765_v21 = vrot.slane %v19894_v15, 3  ;;  %v22517_v40 = vrot.slane %v19861_v61, 2  ;;  %v20128_v22 = vsel %vm2516_vm4, %v8716_v19, %v20098_v28  ;;  %v15540_v18 = vld [vmem:[%s22021_s15 + $0xb8] sm:$0xff]   ;;  %14104 = vmatprep.subr.bf16.mxu1 %v15539_v0 }
 0x7a7   : > { %v20107_v59 = vsel %vm3223_vm14, %v22514_v13, %v22513_v53  ;;  %v8758_v30 = vor.u32 %v8757_v26, %v22516_v58  ;;  %v22518_v57 = vmov %v22513_v53  ;;  %v22519_v13 = vld [vmem:[#allocation62_spill] sm:$0xff]  ;;  %v8762_v1 = vor.u32 %v8761_v63, %v8760_v36  ;;  %6862 = vmatpush1.bf16.msra.mxu0 %v15546_v17  ;;  %v15556_v17 = vld [vmem:[%s22017_s11 + $0x324] ss:$8 sps:$4 sm:$0xff]  }
 0x7a8   : > { %v20122_v53 = vsel %vm3223_vm14, %v22518_v57, %v22517_v40  ;;  %6724 = vmatprep.mubr.bf16.mxu0 %v22519_v13  ;;  %v8768_v9 = vrot.slane %v19956_v24, 2  ;;  %v8769_v15 = vrot.slane %v19948_v31, 3  ;;  %v8766_v58 = vor.u32 %v8765_v21, %v8764_v41  ;;  %v15541_v31 = vld [vmem:[%s22021_s15 + $0x140] sm:$0xff]   ;;  %6863 = vmatprep.subr.bf16.mxu0 %v15552_v34 }
 0x7a9   : > { %v20137_v26 = vsel %vm3271_vm13, %v8755_v5, %v8758_v30  ;;  %v22520_v40 = vrot.slane %v19927_v3, 2  ;;  %v22521_v19 = vrot.slane %v19861_v61, 2  ;;  %v8772_v24 = vrot.slane %v19976_v12, 2  ;;  %v15550_v5 = vld [vmem:[%s22017_s11 + $0x310] ss:$8 sps:$4 sm:$0xff]   ;;  %14105 = vmatpush3.bf16.msra.mxu1 %v15540_v18 }
 0x7aa   : > { %v20154_v14 = vsel %vm3271_vm13, %v8758_v30, %v8762_v1  ;;  %v8770_v2 = vor.u32 %v8769_v15, %v8768_v9  ;;  %v8773_v61 = vrot.slane %v19940_v39, 3  ;;  %v22522_v63 = vrot.slane %v19918_v20, 2  ;;  %14154 = vmatprep.subr.bf16.mxu1 %v15541_v31  ;;  %v22528_v18 = vld [vmem:[#allocation58_spill] sm:$0xff] }
 0x7ab   : > { %v20144_v36 = vsel %vm3223_vm14, %v22521_v19, %v22520_v40  ;;  %v22523_v12 = vmov %v22520_v40  ;;  %v20168_v41 = vsel %vm3271_vm13, %v8762_v1, %v8766_v58  ;;  %v8776_v30 = vrot.slane %v20022_v46, 2  ;;  %6864 = vmatpush1.bf16.msra.mxu0 %v15550_v5  ;;  %v22529_v31 = vld [vmem:[#allocation38_spill] sm:$0xff] }
 0x7ac   : > { %v20162_v0 = vsel %vm3223_vm14, %v22523_v12, %v22522_v63  ;;  %v8777_v21 = vrot.slane %v20019_v54, 3  ;;  %v22524_v39 = vrot.slane %v19992_v45, 2  ;;  %v22525_v57 = vmov %v22522_v63  ;;  %6865 = vmatprep.subr.bf16.mxu0 %v15556_v17  ;;  %v15560_v63 = vld [vmem:[%s22017_s11 + $0x334] ss:$8 sps:$4 sm:$0xff]   ;;  %9151 = vmatmul.mubr.bf16.gmra.mrb[248].mxu1 %v19927_v3  ;;  %v15564_v17 = vld [vmem:[%s22017_s11 + $0x344] ss:$8 sps:$4 sm:$0xff]  }
 0x7ad   : > { %v20180_v34 = vsel %vm3271_vm13, %v8766_v58, %v8770_v2  ;;  %v8774_v9 = vor.u32 %v8773_v61, %v8772_v24  ;;  %v8780_v15 = vrot.slane %v20025_v37, 2  ;;  %v8781_v1 = vrot.slane %v20013_v44, 3  ;;  %v15554_v58 = vld [vmem:[%s22017_s11 + $0x320] ss:$8 sps:$4 sm:$0xff]   ;;  %9158 = vmatprep.mubr.bf16.mxu1 %v20056_v6  ;;  %v15568_v6 = vld [vmem:[%s22017_s11 + $0x354] ss:$8 sps:$4 sm:$0xff]  }
 0x7ae   : > { %v20177_v13 = vsel %vm3223_vm14, %v22525_v57, %v22524_v39  ;;  %v8778_v40 = vor.u32 %v8777_v21, %v8776_v30  ;;  %v22526_v46 = vrot.slane %v19979_v4, 2  ;;  %v22527_v54 = vmov %v22524_v39  ;;  %6725 = vmatmul.mubr.bf16.gmra.mrb[104].mxu0 %v22528_v18  ;;  %v15562_v3 = vld [vmem:[%s22017_s11 + $0x340] ss:$8 sps:$4 sm:$0xff]   ;;  %v22530_v30 = vld [vmem:[#allocation66_spill] sm:$0xff]  ;;  %v22531_v21 = vld [vmem:[#allocation41_spill] sm:$0xff] }
 0x7af   : > { %v20195_v24 = vsel %vm3271_vm13, %v8770_v2, %v8774_v9  ;;  %v20197_v61 = vor.u32 %v8781_v1, %v8780_v15  ;;  %6734 = vmatprep.mubr.bf16.mxu0 %v22529_v31  ;;  %6866 = vmatpush1.bf16.msra.mxu0 %v15554_v58  ;;  %v15558_v2 = vld [vmem:[%s22017_s11 + $0x330] ss:$8 sps:$4 sm:$0xff]   ;;  %v15572_v57 = vld [vmem:[%s22017_s11 + $0x364] ss:$8 sps:$4 sm:$0xff]   ;;  %v22533_v15 = vrot.slane %v20013_v44, 1  ;;  %v22535_v31 = vld [vmem:[#allocation51_spill] sm:$0xff] }
 0x7b0   : > { %v20189_v19 = vsel %vm3223_vm14, %v22527_v54, %v22526_v46  ;;  %v20204_v12 = vsel %vm3271_vm13, %v8774_v9, %v8778_v40  ;;  %6867 = vmatprep.subr.bf16.mxu0 %v15560_v63  ;;  %v15566_v39 = vld [vmem:[%s22017_s11 + $0x350] ss:$8 sps:$4 sm:$0xff]   ;;  %v15570_v9 = vld [vmem:[%s22017_s11 + $0x360] ss:$8 sps:$4 sm:$0xff]   ;;  %v15576_v1 = vld [vmem:[%s22017_s11 + $0x374] ss:$8 sps:$4 sm:$0xff]  }
 0x7b1   : > { %v20210_v5 = vsel %vm3271_vm13, %v8778_v40, %v20197_v61  ;;  %v22534_v40 = vld [vmem:[#allocation44_spill] sm:$0xff]  ;;  %v15574_v54 = vld [vmem:[%s22017_s11 + $0x370] ss:$8 sps:$4 sm:$0xff]  }
 0x7b2   : > { %v15580_v44 = vld [vmem:[%s22017_s11 + $0x384] ss:$8 sps:$4 sm:$0xff]   ;;  %v15578_v63 = vld [vmem:[%s22017_s11 + $0x380] ss:$8 sps:$4 sm:$0xff]  }
 0x7b3   : > { %6868 = vmatpush1.bf16.msra.mxu0 %v15558_v2  ;;  %v15584_v2 = vld [vmem:[%s22017_s11 + $0x394] ss:$8 sps:$4 sm:$0xff]  }
 0x7b4   : > { %6869 = vmatprep.subr.bf16.mxu0 %v15564_v17  ;;  %9159 = vmatmul.mubr.bf16.gmra.mrb[252].mxu1 %v19918_v20  ;;  %v22532_v20 = vld [vmem:[#allocation35_spill] sm:$0xff]  ;;  %v22536_v17 = vld [vmem:[#allocation61_spill] sm:$0xff] }
 0x7b5   : > { %9166 = vmatprep.mubr.bf16.mxu1 %v20076_v8  ;;  %v8651_v8 = vor.u32 %v20025_v37, %v22533_v15  ;;  %v15590_v15 = vld [vmem:[%s22017_s11 + $0x3b0] ss:$8 sps:$4 sm:$0xff]  }
 0x7b6   : > { %6735 = vmatmul.mubr.bf16.gmra.mrb[108].mxu0 %v22530_v30  ;;  %v15542_v30 = vld [vmem:[%s22021_s15 + $0x100] sm:$0xff]  }
 0x7b7   : > { %6744 = vmatprep.mubr.bf16.mxu0 %v22531_v21  ;;  %6870 = vmatpush1.bf16.msra.mxu0 %v15562_v3  ;;  %v15588_v3 = vld [vmem:[%s22017_s11 + $0x3a4] ss:$8 sps:$4 sm:$0xff]  }
 0x7b8   : > { %6871 = vmatprep.subr.bf16.mxu0 %v15568_v6  ;;  %v15543_v6 = vld [vmem:[%s22021_s15 + $0x148] sm:$0xff]  }
 0x7b9   : > { %v22537_v21 = vld [vmem:[#allocation45_spill] sm:$0xff] }
 0x7bb   : > { %6872 = vmatpush1.bf16.msra.mxu0 %v15566_v39  ;;  %v15592_v39 = vld [vmem:[%s22017_s11 + $0x3b4] ss:$8 sps:$4 sm:$0xff]  }
 0x7bc   : > { %6873 = vmatprep.subr.bf16.mxu0 %v15572_v57  ;;  %9167 = vmatmul.mubr.bf16.gmra.mrb[0].mxu1 %v19992_v45  ;;  %v8587_v45 = vpack.c.bf16 %v19958_v7, %v19958_v7  ;;  %v15582_v7 = vld [vmem:[%s22017_s11 + $0x390] ss:$8 sps:$4 sm:$0xff]  }
 0x7bd   : > { %9174 = vmatprep.mubr.bf16.mxu1 %v8651_v8  ;;  %v22538_v57 = vld [vmem:[#allocation22_spill] sm:$0xff] }
 0x7be   : > { %6745 = vmatmul.mubr.bf16.gmra.mrb[112].mxu0 %v22532_v20  ;;  %v15545_v20 = vld [vmem:[%s22021_s15 + $0x150] sm:$0xff]   ;;  %v15553_v8 = vld [vmem:[%s22021_s15 + $0x158] sm:$0xff]  }
 0x7bf   : > { %6754 = vmatprep.mubr.bf16.mxu0 %v22534_v40  ;;  %6874 = vmatpush1.bf16.msra.mxu0 %v15570_v9  ;;  %v15544_v9 = vld [vmem:[%s22021_s15 + $0x108] sm:$0xff]  }
 0x7c0   : > { %6875 = vmatprep.subr.bf16.mxu0 %v15576_v1  ;;  %v15593_v1 = vld [vmem:[%s22017_s11 + $0x3c0] ss:$8 sps:$4 sm:$0xff]  }
 0x7c1   : > { %v6428_v46 = vpop.f32.mrb[128].mxu0  ;;  %v22539_v40 = vld [vmem:[#allocation48_spill] sm:$0xff] }
 0x7c2   : > { %v6429_v58 = vpop.f32.mrb[129].mxu0  ;;  %v15598_v46 = vld [vmem:[%s22017_s11 + $0x3d4] ss:$8 sps:$4 sm:$0xff]  }
 0x7c3   : > { %v6430_v37 = vpop.f32.mrb[130].mxu0  ;;  %6876 = vmatpush1.bf16.msra.mxu0 %v15574_v54  ;;  %v22540_v54 = vld [vmem:[#allocation20_spill] sm:$0xff]  ;;  %v15557_v58 = vld [vmem:[%s22021_s15 + $0x118] sm:$0xff]  }
 0x7c4   : > { %v6431_v18 = vpop.f32.mrb[131].mxu0  ;;  %6877 = vmatprep.subr.bf16.mxu0 %v15580_v44  ;;  %9175 = vmatmul.mubr.bf16.gmra.mrb[4].mxu1 %v8587_v45  ;;  %v15561_v44 = vld [vmem:[%s22021_s15 + $0x160] sm:$0xff]   ;;  %v15596_v37 = vld [vmem:[%s22017_s11 + $0x3d0] ss:$8 sps:$4 sm:$0xff]  }
 0x7c5   : > { %9214 = vmatprep.mubr.bf16.mxu1 %v19910_v35  ;;  %v15586_v35 = vld [vmem:[%s22017_s11 + $0x3a0] ss:$8 sps:$4 sm:$0xff]  }
 0x7c6   : > { %6755 = vmatmul.mubr.bf16.gmra.mrb[116].mxu0 %v22535_v31  ;;  %v15569_v18 = vld [vmem:[%s22021_s15 + $0x168] sm:$0xff]   ;;  %v15604_v31 = vld [vmem:[%s22017_s11 + $0x3f4] ss:$8 sps:$4 sm:$0xff]  }
 0x7c7   : > { %6764 = vmatprep.mubr.bf16.mxu0 %v22536_v17  ;;  %6878 = vmatpush1.bf16.msra.mxu0 %v15578_v63  ;;  %v15599_v45 = vld [vmem:[%s22017_s11 + $0x3e0] ss:$8 sps:$4 sm:$0xff]   ;;  %v22541_v63 = vld [vmem:[#allocation53_spill] sm:$0xff] }
 0x7c8   : > { %6879 = vmatprep.subr.bf16.mxu0 %v15584_v2  ;;  %v22542_v2 = vld [vmem:[#allocation28_spill] sm:$0xff] }
 0x7c9   : > { %v15573_v17 = vld [vmem:[%s22021_s15 + $0x128] sm:$0xff]  }
 0x7cb   : > { %6880 = vmatpush1.bf16.msra.mxu0 %v15582_v7  ;;  %v15577_v7 = vld [vmem:[%s22021_s15 + $0x170] sm:$0xff]  }
 0x7cc   : > { %6881 = vmatprep.subr.bf16.mxu0 %v15588_v3  ;;  %9215 = vmatmul.mubr.bf16.vlgmr.msra.gmra.mrb[8].mxu1 %v19858_v47  ;;  %v15595_v47 = vld [vmem:[%s22017_s11 + $0x3c4] ss:$8 sps:$4 sm:$0xff]   ;;  %v15602_v3 = vld [vmem:[%s22017_s11 + $0x3f0] ss:$8 sps:$4 sm:$0xff]  }
 0x7cd   : > { %14155 = vmatpush3.bf16.msra.mxu1 %v15542_v30  ;;  %9222 = vmatprep.mubr.bf16.mxu1 %v19971_v42  ;;  %v15549_v42 = vld [vmem:[%s22021_s15 + $0x110] sm:$0xff]   ;;  %v15585_v30 = vld [vmem:[%s22021_s15 + $0x178] sm:$0xff]  }
 0x7ce   : > { %6765 = vmatmul.mubr.bf16.gmra.mrb[120].mxu0 %v22537_v21  ;;  %14156 = vmatprep.subr.bf16.mxu1 %v15543_v6  ;;  %v22543_v6 = vld [vmem:[#allocation25_spill] sm:$0xff]  ;;  %v15589_v21 = vld [vmem:[%s22021_s15 + $0x138] sm:$0xff]  }
 0x7cf   : > { %6774 = vmatprep.mubr.bf16.mxu0 %v22538_v57  ;;  %6882 = vmatpush1.bf16.msra.mxu0 %v15586_v35  ;;  %v22544_v35 = vld [vmem:[#allocation71_spill] sm:$0xff]  ;;  %v22546_v57 = vld [vmem:[#allocation77_spill] sm:$0xff] }
 0x7d0   : > { %6883 = vmatprep.subr.bf16.mxu0 %v15592_v39  ;;  %v22545_v39 = vld [vmem:[#allocation70_spill] sm:$0xff] }
 0x7d1   : > { %14157 = vmatpush3.bf16.msra.mxu1 %v15544_v9  ;;  %v22549_v9 = vld [vmem:[#allocation81_spill] sm:$0xff] }
 0x7d2   : > { %14158 = vmatprep.subr.bf16.mxu1 %v15545_v20  ;;  %v15623_v20 = vld [vmem:[%s22017_s11 + $0x460] ss:$8 sps:$4 sm:$0xff]  }
 0x7d3   : > { %6884 = vmatpush1.bf16.msra.mxu0 %v15590_v15  ;;  %v22560_v15 = vld [vmem:[#allocation46_spill] sm:$0xff] }
 0x7d4   : > { %6885 = vmatprep.subr.bf16.mxu0 %v15595_v47  ;;  %9223 = vmatmul.mubr.bf16.gmra.mrb[12].mxu1 %v19925_v51  ;;  %v15601_v51 = vld [vmem:[%s22017_s11 + $0x3e4] ss:$8 sps:$4 sm:$0xff]   ;;  %v15626_v47 = vld [vmem:[%s22017_s11 + $0x470] ss:$8 sps:$4 sm:$0xff]  }
 0x7d5   : > { %9230 = vmatprep.mubr.bf16.mxu1 %v19982_v33  ;;  %14159 = vmatpush3.bf16.msra.mxu1 %v15549_v42  ;;  %v15565_v33 = vld [vmem:[%s22021_s15 + $0x120] sm:$0xff]  }
 0x7d6   : > { %6775 = vmatmul.mubr.bf16.gmra.mrb[124].mxu0 %v22539_v40  ;;  %14160 = vmatprep.subr.bf16.mxu1 %v15553_v8  ;;  %v15631_v8 = vld [vmem:[%s22017_s11 + $0x484] ss:$8 sps:$4 sm:$0xff]  }
 0x7d7   : > { %6784 = vmatprep.mubr.bf16.mxu0 %v22540_v54  ;;  %6886 = vmatpush1.bf16.msra.mxu0 %v15593_v1  ;;  %v22561_v54 = vld [vmem:[#allocation54_spill] sm:$0xff] }
 0x7d8   : > { %6887 = vmatprep.subr.bf16.mxu0 %v15598_v46 }
 0x7d9   : > { %14161 = vmatpush3.bf16.msra.mxu1 %v15557_v58  ;;  %v15653_v58 = vld [vmem:[#allocation10] ss:$8 sps:$4 sm:$0xff]  }
 0x7da   : > { %14162 = vmatprep.subr.bf16.mxu1 %v15561_v44  ;;  %v15655_v44 = vld [vmem:[#allocation10 + $0x4] ss:$8 sps:$4 sm:$0xff]  }
 0x7db   : > { %6888 = vmatpush1.bf16.msra.mxu0 %v15596_v37  ;;  %v22562_v37 = vld [vmem:[#allocation49_spill] sm:$0xff] }
 0x7dc   : > { %6889 = vmatprep.subr.bf16.mxu0 %v15601_v51  ;;  %9231 = vmatmul.mubr.bf16.gmra.mrb[16].mxu1 %v19989_v62  ;;  %v15607_v62 = vld [vmem:[%s22017_s11 + $0x404] ss:$8 sps:$4 sm:$0xff]   ;;  %v15632_v51 = vld [vmem:[%s22017_s11 + $0x490] ss:$8 sps:$4 sm:$0xff]  }
 0x7dd   : > { %9238 = vmatprep.mubr.bf16.mxu1 %v20048_v43  ;;  %14163 = vmatpush3.bf16.msra.mxu1 %v15565_v33  ;;  %v15581_v43 = vld [vmem:[%s22021_s15 + $0x130] sm:$0xff]  }
 0x7de   : > { %6785 = vmatmul.mubr.bf16.gmra.mrb[164].mxu0 %v22541_v63  ;;  %14164 = vmatprep.subr.bf16.mxu1 %v15569_v18  ;;  %v15658_v33 = vld [vmem:[#allocation10 + $0x14] ss:$8 sps:$4 sm:$0xff]   ;;  %v22563_v63 = vld [vmem:[#allocation63_spill] sm:$0xff] }
 0x7df   : > { %6790 = vmatprep.mubr.bf16.mxu0 %v22542_v2  ;;  %6890 = vmatpush1.bf16.msra.mxu0 %v15599_v45  ;;  %v15637_v18 = vld [vmem:[%s22017_s11 + $0x4a4] ss:$8 sps:$4 sm:$0xff]   ;;  %v15661_v2 = vld [vmem:[#allocation10 + $0x24] ss:$8 sps:$4 sm:$0xff]  }
 0x7e0   : > { %6891 = vmatprep.subr.bf16.mxu0 %v15604_v31  ;;  %v15656_v45 = vld [vmem:[#allocation10 + $0x10] ss:$8 sps:$4 sm:$0xff]   ;;  %v15659_v31 = vld [vmem:[#allocation10 + $0x20] ss:$8 sps:$4 sm:$0xff]  }
 0x7e1   : > { %14165 = vmatpush3.bf16.msra.mxu1 %v15573_v17  ;;  %v22564_v17 = vrot.slane %v19979_v4, 2 }
 0x7e2   : > { %14166 = vmatprep.subr.bf16.mxu1 %v15577_v7  ;;  %v22565_v7 = vld [vmem:[#allocation29_spill] sm:$0xff] }
 0x7e3   : > { %6892 = vmatpush1.bf16.msra.mxu0 %v15602_v3  ;;  %v15638_v3 = vld [vmem:[%s22017_s11 + $0x4b0] ss:$8 sps:$4 sm:$0xff]  }
 0x7e4   : > { %7040 = vmatprep.subr.bf16.mxu0 %v15607_v62  ;;  %9239 = vmatmul.mubr.bf16.gmra.mrb[20].mxu1 %v20004_v60  ;;  %v22547_v60 = vld [vmem:[#allocation75_spill] sm:$0xff]  ;;  %v15664_v62 = vld [vmem:[#allocation10 + $0x34] ss:$8 sps:$4 sm:$0xff]  }
 0x7e5   : > { %9246 = vmatprep.mubr.bf16.mxu1 %v20061_v52  ;;  %14167 = vmatpush3.bf16.msra.mxu1 %v15581_v43  ;;  %v22548_v52 = vld [vmem:[#allocation82_spill] sm:$0xff]  ;;  %v15643_v43 = vld [vmem:[%s22017_s11 + $0x4c4] ss:$8 sps:$4 sm:$0xff]  }
 0x7e6   : > { %6791 = vmatmul.mubr.bf16.gmra.mrb[132].mxu0 %v22543_v6  ;;  %14168 = vmatprep.subr.bf16.mxu1 %v15585_v30  ;;  %v15662_v30 = vld [vmem:[#allocation10 + $0x30] ss:$8 sps:$4 sm:$0xff]   ;;  %v15646_v6 = vld [vmem:[%s22017_s11 + $0x4d4] ss:$8 sps:$4 sm:$0xff]  }
 0x7e7   : > { %6800 = vmatprep.mubr.bf16.mxu0 %v22544_v35  ;;  %v22566_v35 = vld [vmem:[#allocation50_spill] sm:$0xff] }
 0x7e9   : > { %14169 = vmatpush3.bf16.msra.mxu1 %v15589_v21  ;;  %v15665_v21 = vld [vmem:[#allocation10 + $0x40] ss:$8 sps:$4 sm:$0xff]  }
 0x7ea   : > { %10312 = vmatprep.subr.bf16.mxu1 %v15655_v44  ;;  %v22575_v44 = vld [vmem:[#allocation87_spill] sm:$0xff] }
 0x7ec   : > { %9247 = vmatmul.mubr.bf16.gmra.mrb[24].mxu1 %v20039_v38  ;;  %v22550_v38 = vrot.slane %v19979_v4, 1  ;;  %v15641_v4 = vld [vmem:[%s22017_s11 + $0x4c0] ss:$8 sps:$4 sm:$0xff]  }
 0x7ed   : > { %9254 = vmatprep.mubr.bf16.mxu1 %v20082_v49  ;;  %v15611_v49 = vld [vmem:[%s22017_s11 + $0x420] ss:$8 sps:$4 sm:$0xff]  }
 0x7ee   : > { %6801 = vmatmul.mubr.bf16.gmra.mrb[136].mxu0 %v22545_v39  ;;  %v15667_v39 = vld [vmem:[#allocation10 + $0x44] ss:$8 sps:$4 sm:$0xff]  }
 0x7ef   : > { %6810 = vmatprep.mubr.bf16.mxu0 %v22546_v57  ;;  %v22567_v57 = vld [vmem:[#allocation67_spill] sm:$0xff] }
 0x7f4   : > { %9255 = vmatmul.mubr.bf16.gmra.mrb[28].mxu1 %v20053_v27  ;;  %v15608_v27 = vld [vmem:[%s22017_s11 + $0x410] ss:$8 sps:$4 sm:$0xff]  }
 0x7f5   : > { %9262 = vmatprep.mubr.bf16.mxu1 %v20128_v22  ;;  %v15619_v22 = vld [vmem:[%s22017_s11 + $0x444] ss:$8 sps:$4 sm:$0xff]  }
 0x7f6   : > { %6811 = vmatmul.mubr.bf16.gmra.mrb[140].mxu0 %v22547_v60  ;;  %v15644_v60 = vld [vmem:[%s22017_s11 + $0x4d0] ss:$8 sps:$4 sm:$0xff]  }
 0x7f7   : > { %6820 = vmatprep.mubr.bf16.mxu0 %v22548_v52  ;;  %v15649_v52 = vld [vmem:[%s22017_s11 + $0x4e4] ss:$8 sps:$4 sm:$0xff]  }
 0x7fc   : > { %9263 = vmatmul.mubr.bf16.gmra.mrb[32].mxu1 %v20067_v50  ;;  %v15613_v50 = vld [vmem:[%s22017_s11 + $0x424] ss:$8 sps:$4 sm:$0xff]  }
 0x7fd   : > { %9270 = vmatprep.mubr.bf16.mxu1 %v20098_v28  ;;  %v22555_v28 = vld [vmem:[#allocation64_spill] sm:$0xff] }
 0x7fe   : > { %6821 = vmatmul.mubr.bf16.gmra.mrb[144].mxu0 %v22549_v9  ;;  %v15673_v9 = vld [vmem:[#allocation10 + $0x54] ss:$8 sps:$4 sm:$0xff]  }
 0x7ff   : > { %6830 = vmatprep.mubr.bf16.mxu0 %v19517_v56  ;;  %v22551_v56 = vrot.slane %v19508_v48, 2  ;;  %v22554_v48 = vld [vmem:[#allocation34_spill] sm:$0xff] }
 0x804   : > { %9271 = vmatmul.mubr.bf16.gmra.mrb[36].mxu1 %v22550_v38  ;;  %v15671_v38 = vld [vmem:[#allocation10 + $0x50] ss:$8 sps:$4 sm:$0xff]  }
 0x805   : > { %9310 = vmatprep.mubr.bf16.mxu1 %v20137_v26  ;;  %v15617_v26 = vld [vmem:[%s22017_s11 + $0x440] ss:$8 sps:$4 sm:$0xff]  }
 0x806   : > { %6831 = vmatmul.mubr.bf16.gmra.mrb[148].mxu0 %v19505_v55  ;;  %v22552_v55 = vld [vmem:[#allocation60_spill] sm:$0xff] }
 0x807   : > { %6840 = vmatprep.mubr.bf16.mxu0 %v19557_v11  ;;  %v15605_v11 = vld [vmem:[%s22017_s11 + $0x400] ss:$8 sps:$4 sm:$0xff]  }
 0x80c   : > { %9311 = vmatmul.mubr.bf16.vlgmr.msra.gmra.mrb[40].mxu1 %v20090_v23  ;;  %v15616_v23 = vld [vmem:[%s22017_s11 + $0x434] ss:$8 sps:$4 sm:$0xff]  }
 0x80d   : > { %9318 = vmatprep.mubr.bf16.mxu1 %v20154_v14  ;;  %v22557_v14 = vld [vmem:[#allocation39_spill] sm:$0xff]  ;;  %10313 = vmatpush1.bf16.msra.mxu1 %v15653_v58 }
 0x80e   : > { %6841 = vmatmul.mubr.bf16.gmra.mrb[152].mxu0 %v19539_v29  ;;  %v15610_v29 = vld [vmem:[%s22017_s11 + $0x414] ss:$8 sps:$4 sm:$0xff]   ;;  %10314 = vmatprep.subr.bf16.mxu1 %v15658_v33  ;;  %v15707_v58 = vld [vmem:[#allocation10 + $0xb0] ss:$8 sps:$4 sm:$0xff]  }
 0x80f   : > { %6850 = vmatprep.mubr.bf16.mxu0 %v19546_v25  ;;  %v22553_v25 = vld [vmem:[#allocation57_spill] sm:$0xff] }
 0x811   : > { %10315 = vmatpush1.bf16.msra.mxu1 %v15656_v45 }
 0x812   : > { %10316 = vmatprep.subr.bf16.mxu1 %v15661_v2  ;;  %v22576_v2 = vld [vmem:[#allocation88_spill] sm:$0xff] }
 0x814   : > { %9319 = vmatmul.mubr.bf16.gmra.mrb[44].mxu1 %v20107_v59  ;;  %v22556_v59 = vld [vmem:[#allocation36_spill] sm:$0xff] }
 0x815   : > { %9326 = vmatprep.mubr.bf16.mxu1 %v20168_v41  ;;  %v22558_v41 = vld [vmem:[#allocation43_spill] sm:$0xff]  ;;  %10317 = vmatpush1.bf16.msra.mxu1 %v15659_v31 }
 0x816   : > { %6851 = vmatmul.mubr.bf16.gmra.mrb[156].mxu0 %v22551_v56  ;;  %10318 = vmatprep.subr.bf16.mxu1 %v15664_v62  ;;  %v15647_v56 = vld [vmem:[%s22017_s11 + $0x4e0] ss:$8 sps:$4 sm:$0xff]  }
 0x817   : > { %6893 = vmatprep.mubr.bf16.mxu0 %v22552_v55  ;;  %v15652_v55 = vld [vmem:[%s22017_s11 + $0x4f4] ss:$8 sps:$4 sm:$0xff]  }
 0x819   : > { %10319 = vmatpush1.bf16.msra.mxu1 %v15662_v30  ;;  %v15725_v30 = vld [vmem:[#allocation10 + $0xe0] ss:$8 sps:$4 sm:$0xff]  }
 0x81a   : > { %10320 = vmatprep.subr.bf16.mxu1 %v15667_v39 }
 0x81c   : > { %9327 = vmatmul.mubr.bf16.gmra.mrb[48].mxu1 %v20122_v53  ;;  %v15614_v53 = vld [vmem:[%s22017_s11 + $0x430] ss:$8 sps:$4 sm:$0xff]  }
 0x81d   : > { %9334 = vmatprep.mubr.bf16.mxu1 %v20180_v34  ;;  %v15620_v34 = vld [vmem:[%s22017_s11 + $0x450] ss:$8 sps:$4 sm:$0xff]   ;;  %10321 = vmatpush1.bf16.msra.mxu1 %v15665_v21 }
 0x81e   : > { %6894 = vmatmul.mubr.bf16.vlgmr.msra.gmra.mrb[100].mxu0 %v22553_v25  ;;  %10322 = vmatprep.subr.bf16.mxu1 %v15673_v9  ;;  %v15679_v25 = vld [vmem:[#allocation10 + $0x64] ss:$8 sps:$4 sm:$0xff]   ;;  %v15733_v21 = vld [vmem:[#allocation10 + $0xf4] ss:$8 sps:$4 sm:$0xff]  }
 0x81f   : > { %6903 = vmatprep.mubr.bf16.mxu0 %v22554_v48  ;;  %7041 = vmatpush1.bf16.msra.mxu0 %v15605_v11  ;;  %v22568_v11 = vld [vmem:[#allocation52_spill] sm:$0xff] }
 0x820   : > { %7042 = vmatprep.subr.bf16.mxu0 %v15610_v29  ;;  %v15677_v29 = vld [vmem:[#allocation10 + $0x60] ss:$8 sps:$4 sm:$0xff]   ;;  %v22569_v48 = vld [vmem:[#allocation72_spill] sm:$0xff] }
 0x821   : > { %10323 = vmatpush1.bf16.msra.mxu1 %v15671_v38 }
 0x822   : > { %10324 = vmatprep.subr.bf16.mxu1 %v15679_v25  ;;  %v22578_v25 = vld [vmem:[#allocation90_spill] sm:$0xff] }
 0x823   : > { %7043 = vmatpush1.bf16.msra.mxu0 %v15608_v27  ;;  %v15650_v27 = vld [vmem:[%s22017_s11 + $0x4f0] ss:$8 sps:$4 sm:$0xff]  }
 0x824   : > { %7044 = vmatprep.subr.bf16.mxu0 %v15613_v50  ;;  %9335 = vmatmul.mubr.bf16.gmra.mrb[52].mxu1 %v20144_v36  ;;  %v15622_v36 = vld [vmem:[%s22017_s11 + $0x454] ss:$8 sps:$4 sm:$0xff]   ;;  %v15670_v50 = vld [vmem:[%s22017_s11 + $0x504] ss:$8 sps:$4 sm:$0xff]  }
 0x825   : > { %9342 = vmatprep.mubr.bf16.mxu1 %v20195_v24  ;;  %v15625_v24 = vld [vmem:[%s22017_s11 + $0x464] ss:$8 sps:$4 sm:$0xff]   ;;  %10325 = vmatpush1.bf16.msra.mxu1 %v15677_v29 }
 0x826   : > { %6904 = vmatmul.mubr.bf16.gmra.mrb[104].mxu0 %v22555_v28  ;;  %v22570_v28 = vld [vmem:[#allocation73_spill] sm:$0xff] }
 0x827   : > { %6913 = vmatprep.mubr.bf16.mxu0 %v22556_v59  ;;  %7045 = vmatpush1.bf16.msra.mxu0 %v15611_v49  ;;  %v15685_v49 = vld [vmem:[#allocation10 + $0x74] ss:$8 sps:$4 sm:$0xff]   ;;  %v15689_v59 = vld [vmem:[#allocation10 + $0x80] ss:$8 sps:$4 sm:$0xff]  }
 0x828   : > { %7046 = vmatprep.subr.bf16.mxu0 %v15616_v23  ;;  %v15683_v23 = vld [vmem:[#allocation10 + $0x70] ss:$8 sps:$4 sm:$0xff]   ;;  %10326 = vmatprep.subr.bf16.mxu1 %v15685_v49 }
 0x829   : > { %10327 = vmatpush1.bf16.msra.mxu1 %v15683_v23 }
 0x82b   : > { %7047 = vmatpush1.bf16.msra.mxu0 %v15614_v53  ;;  %v15691_v53 = vld [vmem:[#allocation10 + $0x84] ss:$8 sps:$4 sm:$0xff]  }
 0x82c   : > { %7048 = vmatprep.subr.bf16.mxu0 %v15619_v22  ;;  %9343 = vmatmul.mubr.bf16.gmra.mrb[56].mxu1 %v20162_v0  ;;  %v15628_v0 = vld [vmem:[%s22017_s11 + $0x474] ss:$8 sps:$4 sm:$0xff]   ;;  %v22571_v22 = vld [vmem:[#allocation76_spill] sm:$0xff] }
 0x82d   : > { %9350 = vmatprep.mubr.bf16.mxu1 %v20204_v12  ;;  %v22559_v12 = vld [vmem:[#allocation42_spill] sm:$0xff]  ;;  %10328 = vmatprep.subr.bf16.mxu1 %v15691_v53 }
 0x82e   : > { %6914 = vmatmul.mubr.bf16.gmra.mrb[108].mxu0 %v22557_v14  ;;  %10329 = vmatpush1.bf16.msra.mxu1 %v15689_v59  ;;  %v15695_v14 = vld [vmem:[#allocation10 + $0x90] ss:$8 sps:$4 sm:$0xff]  }
 0x82f   : > { %6923 = vmatprep.mubr.bf16.mxu0 %v22558_v41  ;;  %7049 = vmatpush1.bf16.msra.mxu0 %v15617_v26  ;;  %v15697_v26 = vld [vmem:[#allocation10 + $0x94] ss:$8 sps:$4 sm:$0xff]  }
 0x830   : > { %7050 = vmatprep.subr.bf16.mxu0 %v15622_v36  ;;  %10330 = vmatprep.subr.bf16.mxu1 %v15697_v26 }
 0x832   : > { %10331 = vmatpush1.bf16.msra.mxu1 %v15695_v14  ;;  %v22581_v14 = vld [vmem:[#allocation91_spill] sm:$0xff] }
 0x833   : > { %7051 = vmatpush1.bf16.msra.mxu0 %v15620_v34 }
 0x834   : > { %7052 = vmatprep.subr.bf16.mxu0 %v15625_v24  ;;  %9351 = vmatmul.mubr.bf16.gmra.mrb[60].mxu1 %v20177_v13  ;;  %v15629_v13 = vld [vmem:[%s22017_s11 + $0x480] ss:$8 sps:$4 sm:$0xff]  }
 0x835   : > { %9358 = vmatprep.mubr.bf16.mxu1 %v20210_v5  ;;  %v15634_v5 = vld [vmem:[%s22017_s11 + $0x494] ss:$8 sps:$4 sm:$0xff]  }
 0x836   : > { %6924 = vmatmul.mubr.bf16.gmra.mrb[112].mxu0 %v22559_v12  ;;  %v22572_v12 = vld [vmem:[#allocation78_spill] sm:$0xff] }
 0x837   : > { %6933 = vmatprep.mubr.bf16.mxu0 %v22560_v15  ;;  %7053 = vmatpush1.bf16.msra.mxu0 %v15623_v20  ;;  %v22573_v15 = vld [vmem:[#allocation83_spill] sm:$0xff] }
 0x838   : > { %7054 = vmatprep.subr.bf16.mxu0 %v15628_v0 }
 0x839   : > { %v6607_v42 = vpop.f32.mrb[160].mxu0 }
 0x83a   : > { %v6608_v1 = vpop.f32.mrb[161].mxu0  ;;  %v15703_v42 = vld [vmem:[#allocation10 + $0xa4] ss:$8 sps:$4 sm:$0xff]  }
 0x83b   : > { %v6609_v40 = vpop.f32.mrb[162].mxu0  ;;  %7055 = vmatpush1.bf16.msra.mxu0 %v15626_v47  ;;  %v15701_v47 = vld [vmem:[#allocation10 + $0xa0] ss:$8 sps:$4 sm:$0xff]   ;;  %10332 = vmatprep.subr.bf16.mxu1 %v15703_v42 }
 0x83c   : > { %v6610_v46 = vpop.f32.mrb[163].mxu0  ;;  %7056 = vmatprep.subr.bf16.mxu0 %v15631_v8  ;;  %9359 = vmatmul.mubr.bf16.gmra.mrb[64].mxu1 %v20189_v19  ;;  %v15635_v19 = vld [vmem:[%s22017_s11 + $0x4a0] ss:$8 sps:$4 sm:$0xff]  }
 0x83d   : > { %9366 = vmatprep.mubr.bf16.mxu1 %v20197_v61  ;;  %v15640_v61 = vld [vmem:[%s22017_s11 + $0x4b4] ss:$8 sps:$4 sm:$0xff]   ;;  %10333 = vmatpush1.bf16.msra.mxu1 %v15701_v47 }
 0x83e   : > { %6934 = vmatmul.mubr.bf16.gmra.mrb[116].mxu0 %v22561_v54  ;;  %v22574_v54 = vld [vmem:[#allocation84_spill] sm:$0xff] }
 0x83f   : > { %6943 = vmatprep.mubr.bf16.mxu0 %v22562_v37  ;;  %7057 = vmatpush1.bf16.msra.mxu0 %v15629_v13  ;;  %v15709_v37 = vld [vmem:[#allocation10 + $0xb4] ss:$8 sps:$4 sm:$0xff]  }
 0x840   : > { %7058 = vmatprep.subr.bf16.mxu0 %v15634_v5  ;;  %10334 = vmatprep.subr.bf16.mxu1 %v15709_v37 }
 0x841   : > { %10335 = vmatpush1.bf16.msra.mxu1 %v15707_v58 }
 0x843   : > { %7059 = vmatpush1.bf16.msra.mxu0 %v15632_v51  ;;  %v15715_v51 = vld [vmem:[#allocation10 + $0xc4] ss:$8 sps:$4 sm:$0xff]  }
 0x844   : > { %7060 = vmatprep.subr.bf16.mxu0 %v15637_v18  ;;  %9367 = vmatmul.mubr.bf16.gmra.mrb[68].mxu1 %v22564_v17  ;;  %v15713_v18 = vld [vmem:[#allocation10 + $0xc0] ss:$8 sps:$4 sm:$0xff]   ;;  %v15719_v17 = vld [vmem:[#allocation10 + $0xd0] ss:$8 sps:$4 sm:$0xff]  }
 0x845   : > { %10336 = vmatprep.subr.bf16.mxu1 %v15715_v51  ;;  %v15674_v51 = vld [vmem:[%s22017_s11 + $0x510] ss:$8 sps:$4 sm:$0xff]  }
 0x846   : > { %6944 = vmatmul.mubr.bf16.gmra.mrb[120].mxu0 %v22563_v63  ;;  %10337 = vmatpush1.bf16.msra.mxu1 %v15713_v18 }
 0x847   : > { %6953 = vmatprep.mubr.bf16.mxu0 %v22565_v7  ;;  %7061 = vmatpush1.bf16.msra.mxu0 %v15635_v19  ;;  %v15721_v7 = vld [vmem:[#allocation10 + $0xd4] ss:$8 sps:$4 sm:$0xff]  }
 0x848   : > { %7062 = vmatprep.subr.bf16.mxu0 %v15640_v61  ;;  %10338 = vmatprep.subr.bf16.mxu1 %v15721_v7 }
 0x84a   : > { %10339 = vmatpush1.bf16.msra.mxu1 %v15719_v17  ;;  %v15680_v17 = vld [vmem:[%s22017_s11 + $0x520] ss:$8 sps:$4 sm:$0xff]  }
 0x84b   : > { %7063 = vmatpush1.bf16.msra.mxu0 %v15638_v3  ;;  %v15727_v3 = vld [vmem:[#allocation10 + $0xe4] ss:$8 sps:$4 sm:$0xff]  }
 0x84c   : > { %7064 = vmatprep.subr.bf16.mxu0 %v15643_v43  ;;  %10340 = vmatprep.subr.bf16.mxu1 %v15727_v3 }
 0x84e   : > { %6954 = vmatmul.mubr.bf16.gmra.mrb[124].mxu0 %v22566_v35  ;;  %10341 = vmatpush1.bf16.msra.mxu1 %v15725_v30  ;;  %v15688_v30 = vld [vmem:[%s22017_s11 + $0x534] ss:$8 sps:$4 sm:$0xff]  }
 0x84f   : > { %6963 = vmatprep.mubr.bf16.mxu0 %v22567_v57  ;;  %7065 = vmatpush1.bf16.msra.mxu0 %v15641_v4  ;;  %v15739_v57 = vld [vmem:[#allocation10 + $0x104] ss:$8 sps:$4 sm:$0xff]  }
 0x850   : > { %7066 = vmatprep.subr.bf16.mxu0 %v15646_v6  ;;  %10342 = vmatprep.subr.bf16.mxu1 %v15733_v21  ;;  %v15686_v21 = vld [vmem:[%s22017_s11 + $0x530] ss:$8 sps:$4 sm:$0xff]  }
 0x853   : > { %7067 = vmatpush1.bf16.msra.mxu0 %v15644_v60 }
 0x854   : > { %7068 = vmatprep.subr.bf16.mxu0 %v15649_v52 }
 0x856   : > { %6964 = vmatmul.mubr.bf16.gmra.mrb[168].mxu0 %v22568_v11 }
 0x857   : > { %6969 = vmatprep.mubr.bf16.mxu0 %v22569_v48  ;;  %7069 = vmatpush1.bf16.msra.mxu0 %v15647_v56  ;;  %v22577_v56 = vld [vmem:[#allocation33_spill] sm:$0xff]  ;;  %v22580_v48 = vld [vmem:[#allocation92_spill] sm:$0xff] }
 0x858   : > { %7070 = vmatprep.subr.bf16.mxu0 %v15652_v55  ;;  %v5089_v55 = vshll.u32 %v22577_v56, 16  ;;  %v5087_v49 = vshrl.u32 %v22577_v56, 16 }
 0x85b   : > { %7071 = vmatpush1.bf16.msra.mxu0 %v15650_v27  ;;  %v5091_v27 = vrot.slane %v5089_v55, 1 }
 0x85c   : > { %7219 = vmatprep.subr.bf16.mxu0 %v15670_v50 }
 0x85e   : > { %6970 = vmatmul.mubr.bf16.gmra.mrb[132].mxu0 %v22570_v28 }
 0x85f   : > { %6979 = vmatprep.mubr.bf16.mxu0 %v22571_v22  ;;  %v14042_v36 = vpop.f32.mrb[232].mxu1  ;;  %v5092_v22 = vor.u32 %v5091_v27, %v5087_v49 }
 0x860   : > { %v14043_v41 = vpop.f32.mrb[233].mxu1 }
 0x861   : > { %v20519_v34 = vadd.f32 %v14043_v41, %v14042_v36  ;;  %v14045_v24 = vpop.f32.mrb[234].mxu1 }
 0x862   : > { %v14046_v20 = vpop.f32.mrb[235].mxu1 }
 0x863   : > { %v20521_v0 = vadd.f32 %v14046_v20, %v14045_v24 }
 0x866   : > { %6980 = vmatmul.mubr.bf16.gmra.mrb[136].mxu0 %v22572_v12  ;;  %v22582_v12 = vld [vmem:[#allocation59_spill] sm:$0xff] }
 0x867   : > { %6989 = vmatprep.mubr.bf16.mxu0 %v22573_v15  ;;  %v14048_v8 = vpop.f32.mrb[236].mxu1  ;;  %v22583_v15 = vshll.u32 %v22582_v12, 16 }
 0x868   : > { %v14049_v1 = vpop.f32.mrb[237].mxu1 }
 0x869   : > { %v20525_v40 = vadd.f32 %v14049_v1, %v14048_v8  ;;  %v14051_v46 = vpop.f32.mrb[238].mxu1  ;;  %v5104_v47 = vrot.slane %v22583_v15, 1  ;;  %v15668_v8 = vld [vmem:[%s22017_s11 + $0x500] ss:$8 sps:$4 sm:$0xff]   ;;  %v15698_v15 = vld [vmem:[%s22017_s11 + $0x550] ss:$8 sps:$4 sm:$0xff]  }
 0x86a   : > { %v14052_v13 = vpop.f32.mrb[239].mxu1 }
 0x86b   : > { %v20527_v5 = vadd.f32 %v14052_v13, %v14051_v46 }
 0x86e   : > { %6990 = vmatmul.mubr.bf16.gmra.mrb[140].mxu0 %v22574_v54  ;;  %v15676_v54 = vld [vmem:[%s22017_s11 + $0x514] ss:$8 sps:$4 sm:$0xff]  }
 0x86f   : > { %6999 = vmatprep.mubr.bf16.mxu0 %v22575_v44  ;;  %v14054_v33 = vpop.f32.mrb[240].mxu1 }
 0x870   : > { %v14055_v45 = vpop.f32.mrb[241].mxu1 }
 0x871   : > { %v20531_v19 = vadd.f32 %v14055_v45, %v14054_v33  ;;  %v14057_v61 = vpop.f32.mrb[242].mxu1  ;;  %v15682_v33 = vld [vmem:[%s22017_s11 + $0x524] ss:$8 sps:$4 sm:$0xff]  }
 0x872   : > { %v14058_v63 = vpop.f32.mrb[243].mxu1  ;;  %v22584_v45 = vld [vmem:[#allocation65_spill] sm:$0xff] }
 0x873   : > { %v20533_v31 = vadd.f32 %v14058_v63, %v14057_v61  ;;  %v22585_v61 = vshll.u32 %v22584_v45, 16 }
 0x875   : > { %v5112_v63 = vrot.slane %v22585_v61, 1 }
 0x876   : > { %7000 = vmatmul.mubr.bf16.gmra.mrb[144].mxu0 %v22576_v2 }
 0x877   : > { %7009 = vmatprep.mubr.bf16.mxu0 %v19563_v32  ;;  %v14060_v62 = vpop.f32.mrb[244].mxu1  ;;  %v15731_v32 = vld [vmem:[#allocation10 + $0xf0] ss:$8 sps:$4 sm:$0xff]  }
 0x878   : > { %v14061_v43 = vpop.f32.mrb[245].mxu1  ;;  %10343 = vmatpush1.bf16.msra.mxu1 %v15731_v32  ;;  %v15694_v32 = vld [vmem:[%s22017_s11 + $0x544] ss:$8 sps:$4 sm:$0xff]  }
 0x879   : > { %v20537_v4 = vadd.f32 %v14061_v43, %v14060_v62  ;;  %v14063_v6 = vpop.f32.mrb[246].mxu1  ;;  %10421 = vmatprep.subr.bf16.mxu1 %v15739_v57  ;;  %v22586_v62 = vshrl.u32 %v22582_v12, 16  ;;  %v20607_v57 = vld [vmem:[#allocation8] ss:$0 sm:$0xff] }
 0x87a   : > { %v14064_v35 = vpop.f32.mrb[247].mxu1  ;;  %v9121_v27 = vadd.f32 %v20519_v34, %v20607_v57 }
 0x87b   : > { %v20539_v39 = vadd.f32 %v14064_v35, %v14063_v6  ;;  %v5108_v43 = vor.u32 %v22586_v62, %v5104_v47 }
 0x87d   : > { %v5113_v35 = vsel %vm1624_vm1, %v5108_v43, %v5112_v63  ;;  %v15710_v43 = vld [vmem:[%s22017_s11 + $0x570] ss:$8 sps:$4 sm:$0xff]  }
 0x87e   : > { %7010 = vmatmul.mubr.bf16.gmra.mrb[148].mxu0 %v19560_v10  ;;  %v22579_v10 = vld [vmem:[#allocation27_spill] sm:$0xff] }
 0x87f   : > { %7019 = vmatprep.mubr.bf16.mxu0 %v19570_v16  ;;  %v14066_v60 = vpop.f32.mrb[248].mxu1  ;;  %v5094_v16 = vshll.u32 %v22579_v10, 16  ;;  %v5098_v20 = vshrl.u32 %v22579_v10, 16 }
 0x880   : > { %v14067_v52 = vpop.f32.mrb[249].mxu1 }
 0x881   : > { %v20543_v9 = vadd.f32 %v14067_v52, %v14066_v60  ;;  %v14069_v38 = vpop.f32.mrb[250].mxu1  ;;  %v5096_v23 = vrot.slane %v5094_v16, 1  ;;  %v22587_v52 = vld [vmem:[#allocation40_spill] sm:$0xff] }
 0x882   : > { %v14070_v11 = vpop.f32.mrb[251].mxu1 }
 0x883   : > { %v20546_v29 = vadd.f32 %v14070_v11, %v14069_v38  ;;  %v5097_v41 = vsel %vm1624_vm1, %v5092_v22, %v5096_v23  ;;  %v5100_v13 = vor.u32 %v5098_v20, %v5096_v23  ;;  %v22588_v38 = vshll.u32 %v22587_v52, 16  ;;  %v15700_v22 = vld [vmem:[%s22017_s11 + $0x554] ss:$8 sps:$4 sm:$0xff]  }
 0x885   : > { %v5105_v37 = vsel %vm1624_vm1, %v5100_v13, %v5104_v47  ;;  %v5120_v11 = vrot.slane %v22588_v38, 1 }
 0x886   : > { %7020 = vmatmul.mubr.bf16.gmra.mrb[152].mxu0 %v22578_v25 }
 0x887   : > { %7029 = vmatprep.mubr.bf16.mxu0 %v22580_v48  ;;  %v14072_v50 = vpop.f32.mrb[252].mxu1  ;;  %v15692_v48 = vld [vmem:[%s22017_s11 + $0x540] ss:$8 sps:$4 sm:$0xff]  }
 0x888   : > { %v14073_v28 = vpop.f32.mrb[253].mxu1 }
 0x889   : > { %v20556_v59 = vadd.f32 %v14073_v28, %v14072_v50  ;;  %v14075_v53 = vpop.f32.mrb[254].mxu1  ;;  %v22589_v28 = vshrl.u32 %v22584_v45, 16 }
 0x88a   : > { %v14076_v26 = vpop.f32.mrb[255].mxu1 }
 0x88b   : > { %v20560_v36 = vadd.f32 %v14076_v26, %v14075_v53  ;;  %v5116_v53 = vor.u32 %v22589_v28, %v5112_v63  ;;  %v15712_v63 = vld [vmem:[%s22017_s11 + $0x574] ss:$8 sps:$4 sm:$0xff]  }
 0x88d   : > { %v5121_v34 = vsel %vm1624_vm1, %v5116_v53, %v5120_v11 }
 0x88e   : > { %7030 = vmatmul.mubr.bf16.gmra.mrb[156].mxu0 %v22581_v14  ;;  %v9124_v14 = vadd.f32 %v20521_v0, %v20607_v57  ;;  %v15706_v0 = vld [vmem:[%s22017_s11 + $0x564] ss:$8 sps:$4 sm:$0xff]  }
 0x88f   : > { %7072 = vmatprep.mubr.bf16.mxu0 %v5097_v41  ;;  %v14078_v24 = vpop.f32.mrb[0].mxu1 }
 0x890   : > { %v14079_v42 = vpop.f32.mrb[1].mxu1 }
 0x891   : > { %v20570_v1 = vadd.f32 %v14079_v42, %v14078_v24  ;;  %v14081_v46 = vpop.f32.mrb[2].mxu1 }
 0x892   : > { %v14082_v58 = vpop.f32.mrb[3].mxu1 }
 0x893   : > { %v20577_v44 = vadd.f32 %v14082_v58, %v14081_v46  ;;  %v15704_v58 = vld [vmem:[%s22017_s11 + $0x560] ss:$8 sps:$4 sm:$0xff]  }
 0x896   : > { %7073 = vmatmul.mubr.bf16.vlgmr.msra.gmra.mrb[100].mxu0 %v22577_v56 }
 0x897   : > { %7082 = vmatprep.mubr.bf16.mxu0 %v5105_v37  ;;  %7220 = vmatpush1.bf16.msra.mxu0 %v15668_v8  ;;  %v14084_v18 = vpop.f32.mrb[4].mxu1  ;;  %v22590_v8 = vld [vmem:[#allocation37_spill] sm:$0xff]  ;;  %v9129_v37 = vadd.f32 %v20525_v40, %v20607_v57 }
 0x898   : > { %7221 = vmatprep.subr.bf16.mxu0 %v15676_v54  ;;  %v14085_v2 = vpop.f32.mrb[5].mxu1  ;;  %v22591_v46 = vshll.u32 %v22590_v8, 16  ;;  %v22595_v53 = vshrl.u32 %v22590_v8, 16 }
 0x899   : > { %v20592_v7 = vadd.f32 %v14085_v2, %v14084_v18  ;;  %v14087_v3 = vpop.f32.mrb[6].mxu1  ;;  %v22592_v18 = vshrl.u32 %v22587_v52, 16 }
 0x89a   : > { %v14088_v6 = vpop.f32.mrb[7].mxu1  ;;  %v5128_v13 = vrot.slane %v22591_v46, 1 }
 0x89b   : > { %7222 = vmatpush1.bf16.msra.mxu0 %v15674_v51  ;;  %v5124_v61 = vor.u32 %v22592_v18, %v5120_v11 }
 0x89c   : > { %7223 = vmatprep.subr.bf16.mxu0 %v15682_v33 }
 0x89d   : > { %v5129_v40 = vsel %vm1624_vm1, %v5124_v61, %v5128_v13 }
 0x89e   : > { %7083 = vmatmul.mubr.bf16.gmra.mrb[104].mxu0 %v22579_v10 }
 0x89f   : > { %7092 = vmatprep.mubr.bf16.mxu0 %v5113_v35  ;;  %7224 = vmatpush1.bf16.msra.mxu0 %v15680_v17  ;;  %v14106_v60 = vpop.f32.mrb[8].mxu1  ;;  %v9132_v17 = vadd.f32 %v20527_v5, %v20607_v57  ;;  %v15718_v5 = vld [vmem:[%s22017_s11 + $0x584] ss:$8 sps:$4 sm:$0xff]  }
 0x8a0   : > { %7225 = vmatprep.subr.bf16.mxu0 %v15688_v30  ;;  %v14107_v25 = vpop.f32.mrb[9].mxu1 }
 0x8a1   : > { %v14108_v50 = vadd.f32 %v14107_v25, %v14106_v60  ;;  %v14109_v23 = vpop.f32.mrb[10].mxu1 }
 0x8a2   : > { %v14110_v26 = vpop.f32.mrb[11].mxu1 }
 0x8a3   : > { %7226 = vmatpush1.bf16.msra.mxu0 %v15686_v21  ;;  %v20623_v41 = vadd.f32 %v14108_v50, %v9121_v27  ;;  %v14111_v24 = vadd.f32 %v14110_v26, %v14109_v23  ;;  %v9137_v27 = vadd.f32 %v20531_v19, %v20607_v57  ;;  %v15724_v26 = vld [vmem:[%s22017_s11 + $0x594] ss:$8 sps:$4 sm:$0xff]  }
 0x8a4   : > { %7227 = vmatprep.subr.bf16.mxu0 %v15694_v32  ;;  %v22593_v32 = vld [vmem:[#allocation56_spill] sm:$0xff] }
 0x8a5   : > { %v20630_v47 = vadd.f32 %v14111_v24, %v9124_v14  ;;  %v22594_v60 = vshll.u32 %v22593_v32, 16  ;;  %v9140_v24 = vadd.f32 %v20533_v31, %v20607_v57  ;;  %v15730_v31 = vld [vmem:[%s22017_s11 + $0x5a4] ss:$8 sps:$4 sm:$0xff]  }
 0x8a6   : > { %7093 = vmatmul.mubr.bf16.gmra.mrb[108].mxu0 %v22582_v12 }
 0x8a7   : > { %7102 = vmatprep.mubr.bf16.mxu0 %v5121_v34  ;;  %7228 = vmatpush1.bf16.msra.mxu0 %v15692_v48  ;;  %v14112_v42 = vpop.f32.mrb[12].mxu1  ;;  %v5136_v38 = vrot.slane %v22594_v60, 1  ;;  %v15716_v48 = vld [vmem:[%s22017_s11 + $0x580] ss:$8 sps:$4 sm:$0xff]  }
 0x8a8   : > { %7229 = vmatprep.subr.bf16.mxu0 %v15700_v22  ;;  %v14113_v54 = vpop.f32.mrb[13].mxu1  ;;  %v5132_v22 = vor.u32 %v22595_v53, %v5128_v13  ;;  %v22596_v13 = vld [vmem:[#allocation47_spill] sm:$0xff] }
 0x8a9   : > { %v14114_v51 = vadd.f32 %v14113_v54, %v14112_v42  ;;  %v14115_v33 = vpop.f32.mrb[14].mxu1  ;;  %v22597_v54 = vshll.u32 %v22596_v13, 16  ;;  %v22599_v60 = vld [vmem:[#allocation23_spill] sm:$0xff] }
 0x8aa   : > { %v14116_v2 = vpop.f32.mrb[15].mxu1  ;;  %v5137_v19 = vsel %vm1624_vm1, %v5132_v22, %v5136_v38  ;;  %v15748_v22 = vld [vmem:[%s22017_s11 + $0x5d4] ss:$8 sps:$4 sm:$0xff]  }
 0x8ab   : > { %7230 = vmatpush1.bf16.msra.mxu0 %v15698_v15  ;;  %v20649_v3 = vadd.f32 %v14114_v51, %v9129_v37  ;;  %v14117_v62 = vadd.f32 %v14116_v2, %v14115_v33  ;;  %v15728_v51 = vld [vmem:[%s22017_s11 + $0x5a0] ss:$8 sps:$4 sm:$0xff]   ;;  %v9145_v33 = vadd.f32 %v20537_v4, %v20607_v57 }
 0x8ac   : > { %7231 = vmatprep.subr.bf16.mxu0 %v15706_v0  ;;  %v15722_v0 = vld [vmem:[%s22017_s11 + $0x590] ss:$8 sps:$4 sm:$0xff]  }
 0x8ad   : > { %v20656_v30 = vadd.f32 %v14117_v62, %v9132_v17  ;;  %v15736_v17 = vld [vmem:[%s22017_s11 + $0x5b4] ss:$8 sps:$4 sm:$0xff]  }
 0x8ae   : > { %7103 = vmatmul.mubr.bf16.gmra.mrb[112].mxu0 %v22584_v45 }
 0x8af   : > { %7112 = vmatprep.mubr.bf16.mxu0 %v5129_v40  ;;  %7232 = vmatpush1.bf16.msra.mxu0 %v15704_v58  ;;  %v14118_v35 = vpop.f32.mrb[16].mxu1  ;;  %v5144_v58 = vrot.slane %v22597_v54, 1  ;;  %v9148_v40 = vadd.f32 %v20539_v39, %v20607_v57  ;;  %v15742_v39 = vld [vmem:[%s22017_s11 + $0x5c4] ss:$8 sps:$4 sm:$0xff]  }
 0x8b0   : > { %7233 = vmatprep.subr.bf16.mxu0 %v15712_v63  ;;  %v14119_v11 = vpop.f32.mrb[17].mxu1  ;;  %v22598_v63 = vshrl.u32 %v22593_v32, 16 }
 0x8b1   : > { %v6786_v6 = vpop.f32.mrb[164].mxu0  ;;  %v14120_v50 = vadd.f32 %v14119_v11, %v14118_v35  ;;  %v14121_v23 = vpop.f32.mrb[18].mxu1 }
 0x8b2   : > { %v6787_v21 = vpop.f32.mrb[165].mxu0  ;;  %v14122_v14 = vpop.f32.mrb[19].mxu1  ;;  %v5140_v2 = vor.u32 %v22598_v63, %v5136_v38  ;;  %v15734_v6 = vld [vmem:[%s22017_s11 + $0x5b0] ss:$8 sps:$4 sm:$0xff]   ;;  %v22600_v38 = vshll.u32 %v22599_v60, 16  ;;  %v22604_v63 = vshrl.u32 %v22599_v60, 16 }
 0x8b3   : > { %v6788_v25 = vpop.f32.mrb[166].mxu0  ;;  %7234 = vmatpush1.bf16.msra.mxu0 %v15710_v43  ;;  %v20675_v34 = vadd.f32 %v14120_v50, %v9137_v27  ;;  %v14123_v15 = vadd.f32 %v14122_v14, %v14121_v23  ;;  %v9153_v27 = vadd.f32 %v20543_v9, %v20607_v57  ;;  %v9156_v14 = vadd.f32 %v20546_v29, %v20607_v57  ;;  %v15754_v29 = vld [vmem:[%s22017_s11 + $0x5e4] ss:$8 sps:$4 sm:$0xff]  }
 0x8b4   : > { %v6789_v28 = vpop.f32.mrb[167].mxu0  ;;  %7235 = vmatprep.subr.bf16.mxu0 %v15718_v5  ;;  %v5145_v4 = vsel %vm1624_vm1, %v5140_v2, %v5144_v58  ;;  %v5152_v11 = vrot.slane %v22600_v38, 1  ;;  %v22605_v38 = vld [vmem:[#allocation69_spill] sm:$0xff] }
 0x8b5   : > { %v20682_v42 = vadd.f32 %v14123_v15, %v9140_v24  ;;  %v22601_v28 = vshrl.u32 %v22596_v13, 16 }
 0x8b6   : > { %7113 = vmatmul.mubr.bf16.gmra.mrb[116].mxu0 %v22587_v52  ;;  %v5156_v2 = vor.u32 %v22604_v63, %v5152_v11 }
 0x8b7   : > { %7122 = vmatprep.mubr.bf16.mxu0 %v5137_v19  ;;  %7236 = vmatpush1.bf16.msra.mxu0 %v15716_v48  ;;  %v14124_v46 = vpop.f32.mrb[20].mxu1  ;;  %v15740_v48 = vld [vmem:[%s22017_s11 + $0x5c0] ss:$8 sps:$4 sm:$0xff]   ;;  %v5148_v53 = vor.u32 %v22601_v28, %v5144_v58  ;;  %v15746_v19 = vld [vmem:[%s22017_s11 + $0x5d0] ss:$8 sps:$4 sm:$0xff]  }
 0x8b8   : > { %7237 = vmatprep.subr.bf16.mxu0 %v15724_v26  ;;  %v14125_v37 = vpop.f32.mrb[21].mxu1 }
 0x8b9   : > { %v14126_v18 = vadd.f32 %v14125_v37, %v14124_v46  ;;  %v14127_v61 = vpop.f32.mrb[22].mxu1  ;;  %v5153_v9 = vsel %vm1624_vm1, %v5148_v53, %v5152_v11  ;;  %v22602_v46 = vld [vmem:[#allocation30_spill] sm:$0xff]  ;;  %v22606_v11 = vshll.u32 %v22605_v38, 16 }
 0x8ba   : > { %v14128_v62 = vpop.f32.mrb[23].mxu1  ;;  %v22603_v54 = vshll.u32 %v22602_v46, 16 }
 0x8bb   : > { %7238 = vmatpush1.bf16.msra.mxu0 %v15722_v0  ;;  %v20701_v43 = vadd.f32 %v14126_v18, %v9145_v33  ;;  %v14129_v5 = vadd.f32 %v14128_v62, %v14127_v61  ;;  %v9161_v33 = vadd.f32 %v20556_v59, %v20607_v57 }
 0x8bc   : > { %7239 = vmatprep.subr.bf16.mxu0 %v15730_v31  ;;  %v5160_v58 = vrot.slane %v22603_v54, 1 }
 0x8bd   : > { %v20708_v35 = vadd.f32 %v14129_v5, %v9148_v40  ;;  %v9164_v40 = vadd.f32 %v20560_v36, %v20607_v57  ;;  %v5168_v36 = vrot.slane %v22606_v11, 1 }
 0x8be   : > { %7123 = vmatmul.mubr.bf16.gmra.mrb[120].mxu0 %v22590_v8  ;;  %v5161_v59 = vsel %vm1624_vm1, %v5156_v2, %v5160_v58 }
 0x8bf   : > { %7132 = vmatprep.mubr.bf16.mxu0 %v5145_v4  ;;  %7240 = vmatpush1.bf16.msra.mxu0 %v15728_v51  ;;  %v14130_v21 = vpop.f32.mrb[24].mxu1  ;;  %v15752_v51 = vld [vmem:[%s22017_s11 + $0x5e0] ss:$8 sps:$4 sm:$0xff]  }
 0x8c0   : > { %7241 = vmatprep.subr.bf16.mxu0 %v15736_v17  ;;  %v14131_v25 = vpop.f32.mrb[25].mxu1  ;;  %v15760_v17 = vld [vmem:[%s22017_s11 + $0x5f4] ss:$8 sps:$4 sm:$0xff]  }
 0x8c1   : > { %v14132_v50 = vadd.f32 %v14131_v25, %v14130_v21  ;;  %v14133_v23 = vpop.f32.mrb[26].mxu1 }
 0x8c2   : > { %v14134_v26 = vpop.f32.mrb[27].mxu1 }
 0x8c3   : > { %7242 = vmatpush1.bf16.msra.mxu0 %v15734_v6  ;;  %v20727_v24 = vadd.f32 %v14132_v50, %v9153_v27  ;;  %v14135_v15 = vadd.f32 %v14134_v26, %v14133_v23  ;;  %v15758_v6 = vld [vmem:[%s22017_s11 + $0x5f0] ss:$8 sps:$4 sm:$0xff]   ;;  %v22607_v23 = vshrl.u32 %v22602_v46, 16 }
 0x8c4   : > { %7243 = vmatprep.subr.bf16.mxu0 %v15742_v39 }
 0x8c5   : > { %v20734_v0 = vadd.f32 %v14135_v15, %v9156_v14  ;;  %v5164_v28 = vor.u32 %v22607_v23, %v5160_v58  ;;  %v9177_v58 = vadd.f32 %v20592_v7, %v20607_v57 }
 0x8c6   : > { %7133 = vmatmul.mubr.bf16.gmra.mrb[124].mxu0 %v22593_v32 }
 0x8c7   : > { %7142 = vmatprep.mubr.bf16.mxu0 %v5153_v9  ;;  %7244 = vmatpush1.bf16.msra.mxu0 %v15740_v48  ;;  %v14136_v31 = vpop.f32.mrb[28].mxu1  ;;  %v9169_v48 = vadd.f32 %v20570_v1, %v20607_v57  ;;  %v5169_v15 = vsel %vm1624_vm1, %v5164_v28, %v5168_v36  ;;  %v22614_v28 = vld [vmem:[#allocation86_spill] sm:$0xff] }
 0x8c8   : > { %7245 = vmatprep.subr.bf16.mxu0 %v15748_v22  ;;  %v14137_v37 = vpop.f32.mrb[29].mxu1  ;;  %v9172_v22 = vadd.f32 %v20577_v44, %v20607_v57 }
 0x8c9   : > { %v14138_v18 = vadd.f32 %v14137_v37, %v14136_v31  ;;  %v14139_v61 = vpop.f32.mrb[30].mxu1 }
 0x8ca   : > { %v14140_v62 = vpop.f32.mrb[31].mxu1 }
 0x8cb   : > { %7246 = vmatpush1.bf16.msra.mxu0 %v15746_v19  ;;  %v20753_v5 = vadd.f32 %v14138_v18, %v9161_v33  ;;  %v14141_v4 = vadd.f32 %v14140_v62, %v14139_v61  ;;  %v22608_v19 = vld [vmem:[#allocation74_spill] sm:$0xff] }
 0x8cc   : > { %7247 = vmatprep.subr.bf16.mxu0 %v15754_v29  ;;  %v22609_v29 = vshll.u32 %v22608_v19, 16  ;;  %v22613_v57 = vshrl.u32 %v22608_v19, 16 }
 0x8cd   : > { %v20760_v39 = vadd.f32 %v14141_v4, %v9164_v40 }
 0x8ce   : > { %7143 = vmatmul.mubr.bf16.gmra.mrb[172].mxu0 %v22596_v13  ;;  %v5176_v31 = vrot.slane %v22609_v29, 1 }
 0x8cf   : > { %7148 = vmatprep.mubr.bf16.mxu0 %v5161_v59  ;;  %7248 = vmatpush1.bf16.msra.mxu0 %v15752_v51  ;;  %v14142_v21 = vpop.f32.mrb[32].mxu1  ;;  %v22610_v51 = vshrl.u32 %v22605_v38, 16 }
 0x8d0   : > { %7249 = vmatprep.subr.bf16.mxu0 %v15760_v17  ;;  %v14143_v25 = vpop.f32.mrb[33].mxu1  ;;  %v22611_v17 = vld [vmem:[#allocation80_spill] sm:$0xff] }
 0x8d1   : > { %v14144_v27 = vadd.f32 %v14143_v25, %v14142_v21  ;;  %v14145_v50 = vpop.f32.mrb[34].mxu1  ;;  %v5172_v33 = vor.u32 %v22610_v51, %v5168_v36  ;;  %v22612_v62 = vshll.u32 %v22611_v17, 16 }
 0x8d2   : > { %v14146_v53 = vpop.f32.mrb[35].mxu1 }
 0x8d3   : > { %7250 = vmatpush1.bf16.msra.mxu0 %v15758_v6  ;;  %v20770_v26 = vadd.f32 %v14144_v27, %v9169_v48  ;;  %v14147_v14 = vadd.f32 %v14146_v53, %v14145_v50  ;;  %v5177_v63 = vsel %vm1624_vm1, %v5172_v33, %v5176_v31  ;;  %v5184_v40 = vrot.slane %v22612_v62, 1 }
 0x8d4   : > { %v5180_v6 = vor.u32 %v22613_v57, %v5176_v31  ;;  %v22615_v53 = vshll.u32 %v22614_v28, 16  ;;  %v22144_v62 = vrot.slane %v22579_v10, 1 }
 0x8d5   : > { %v20774_v9 = vadd.f32 %v14147_v14, %v9172_v22 }
 0x8d6   : > { %7149 = vmatmul.mubr.bf16.gmra.mrb[132].mxu0 %v22599_v60  ;;  %v5185_v25 = vsel %vm1624_vm1, %v5180_v6, %v5184_v40  ;;  %v5192_v22 = vrot.slane %v22615_v53, 1  ;;  %v5235_v6 = vrot.slane %v22577_v56, 1 }
 0x8d7   : > { %7158 = vmatprep.mubr.bf16.mxu0 %v5169_v15  ;;  %v14148_v1 = vpop.f32.mrb[36].mxu1 }
 0x8d8   : > { %v14149_v54 = vpop.f32.mrb[37].mxu1 }
 0x8d9   : > { %v14150_v37 = vadd.f32 %v14149_v54, %v14148_v1  ;;  %v14151_v44 = vpop.f32.mrb[38].mxu1 }
 0x8da   : > { %v14152_v18 = vpop.f32.mrb[39].mxu1  ;;  %v22617_v44 = vld [vmem:[#allocation89_spill] sm:$0xff] }
 0x8db   : > { %v20782_v61 = vadd.f32 %v14150_v37, %v9177_v58  ;;  %v20802_v58 = vrot.slane %v5087_v49, 1  ;;  %v22618_v51 = vshll.u32 %v22617_v44, 16  ;;  %v5280_v18 = vrot.slane %v5089_v55, 2 }
 0x8dc   : > { %v5283_v49 = vrot.slane %v5094_v16, 2  ;;  %v22620_v57 = vshrl.u32 %v22617_v44, 16 }
 0x8dd   : > { %v5200_v33 = vrot.slane %v22618_v51, 1  ;;  %v5281_v16 = vor.u32 %v5280_v18, %v20802_v58 }
 0x8de   : > { %7159 = vmatmul.mubr.bf16.gmra.mrb[136].mxu0 %v22602_v46 }
 0x8df   : > { %7168 = vmatprep.mubr.bf16.mxu0 %v5177_v63  ;;  %v14170_v2 = vpop.f32.mrb[40].mxu1 }
 0x8e0   : > { %v14171_v4 = vpop.f32.mrb[41].mxu1 }
 0x8e1   : > { %v14172_v59 = vadd.f32 %v14171_v4, %v14170_v2  ;;  %v14173_v7 = vpop.f32.mrb[42].mxu1  ;;  %v5282_v2 = vrot.slane %v5098_v20, 1  ;;  %v22619_v4 = vshrl.u32 %v22614_v28, 16  ;;  %v20827_v20 = vor.u32 %v22620_v57, %v5200_v33 }
 0x8e2   : > { %v14174_v21 = vpop.f32.mrb[43].mxu1 }
 0x8e3   : > { %v9313_v11 = vadd.f32 %v14172_v59, %v20623_v41  ;;  %v14175_v36 = vadd.f32 %v14174_v21, %v14173_v7  ;;  %v22616_v41 = vshrl.u32 %v22611_v17, 16  ;;  %v5196_v59 = vor.u32 %v22619_v4, %v5192_v22 }
 0x8e5   : > { %v9316_v48 = vadd.f32 %v14175_v36, %v20630_v47  ;;  %v9374_v27 = vmax.f32 %v9313_v11, 0.0  ;;  %v5188_v31 = vor.u32 %v22616_v41, %v5184_v40 }
 0x8e6   : > { %7169 = vmatmul.mubr.bf16.gmra.mrb[140].mxu0 %v22605_v38 }
 0x8e7   : > { %7178 = vmatprep.mubr.bf16.mxu0 %v5185_v25  ;;  %v9375_v50 = vmax.f32 %v9316_v48, 0.0  ;;  %v14176_v23 = vpop.f32.mrb[44].mxu1  ;;  %v5193_v37 = vsel %vm1624_vm1, %v5188_v31, %v5192_v22  ;;  %v20832_v25 = vor.u32 %v5283_v49, %v5282_v2 }
 0x8e8   : > { %v14177_v14 = vpop.f32.mrb[45].mxu1 }
 0x8e9   : > { %v20796_v15 = vpack.c.bf16 %v9375_v50, %v9374_v27  ;;  %v14178_v1 = vadd.f32 %v14177_v14, %v14176_v23  ;;  %v14179_v29 = vpop.f32.mrb[46].mxu1  ;;  %v20838_v23 = vsel %vm2219_vm3, %v5235_v6, %v22144_v62 }
 0x8ea   : > { %v14180_v54 = vpop.f32.mrb[47].mxu1 }
 0x8eb   : > { %v9321_v47 = vadd.f32 %v14178_v1, %v20649_v3  ;;  %v14181_v63 = vadd.f32 %v14180_v54, %v14179_v29  ;;  %v20816_v3 = vshll.u32 %v20796_v15, 16  ;;  %v20823_v55 = vshrl.u32 %v20796_v15, 16 }
 0x8ec   : > { %v9475_v56 = vrot.slane %v20796_v15, 1  ;;  %v9537_v22 = vrot.slane %v20796_v15, 2 }
 0x8ed   : > { %v9324_v40 = vadd.f32 %v14181_v63, %v20656_v30  ;;  %v9376_v21 = vmax.f32 %v9321_v47, 0.0  ;;  %v5201_v30 = vsel %vm1624_vm1, %v5196_v59, %v5200_v33  ;;  %v9402_v50 = vrot.slane %v20816_v3, 1 }
 0x8ee   : > { %7179 = vmatmul.mubr.bf16.gmra.mrb[144].mxu0 %v22608_v19  ;;  %v9498_v29 = vrot.slane %v20823_v55, 1  ;;  %v9560_v54 = vrot.slane %v20823_v55, 2  ;;  %v9561_v58 = vrot.slane %v20816_v3, 3  ;;  %v9499_v33 = vrot.slane %v20816_v3, 2 }
 0x8ef   : > { %7188 = vmatprep.mubr.bf16.mxu0 %v5193_v37  ;;  %v14182_v7 = vpop.f32.mrb[48].mxu1  ;;  %v9377_v11 = vmax.f32 %v9324_v40, 0.0  ;;  %v15737_v40 = vld [vmem:[#allocation10 + $0x100] ss:$8 sps:$4 sm:$0xff]  }
 0x8f0   : > { %v14183_v36 = vpop.f32.mrb[49].mxu1  ;;  %v9562_v2 = vor.u32 %v9561_v58, %v9560_v54  ;;  %v9500_v62 = vor.u32 %v9499_v33, %v9498_v29 }
 0x8f1   : > { %v14184_v48 = vadd.f32 %v14183_v36, %v14182_v7  ;;  %v14185_v27 = vpop.f32.mrb[50].mxu1  ;;  %v20843_v14 = vpack.c.bf16 %v9377_v11, %v9376_v21 }
 0x8f2   : > { %v14186_v1 = vpop.f32.mrb[51].mxu1 }
 0x8f3   : > { %v9329_v41 = vadd.f32 %v14184_v48, %v20675_v34  ;;  %v14187_v31 = vadd.f32 %v14186_v1, %v14185_v27  ;;  %v9476_v47 = vrot.slane %v20843_v14, 1  ;;  %v22145_v37 = vrot.slane %v20843_v14, 2  ;;  %v15745_v48 = vld [vmem:[#allocation10 + $0x114] ss:$8 sps:$4 sm:$0xff]  }
 0x8f4   : > { %v20853_v51 = vshll.u32 %v20843_v14, 16  ;;  %v9403_v34 = vor.u32 %v9402_v50, %v20823_v55  ;;  %v20859_v63 = vshrl.u32 %v20843_v14, 16  ;;  %v20872_v27 = vsel %vm2516_vm4, %v5281_v16, %v20832_v25 }
 0x8f5   : > { %v9332_v18 = vadd.f32 %v14187_v31, %v20682_v42  ;;  %v20864_v59 = vsel %vm2219_vm3, %v9475_v56, %v9476_v47  ;;  %v9378_v57 = vmax.f32 %v9329_v41, 0.0  ;;  %v20877_v50 = vsel %vm3223_vm14, %v9537_v22, %v22145_v37 }
 0x8f6   : > { %7189 = vmatmul.mubr.bf16.gmra.mrb[148].mxu0 %v22611_v17  ;;  %v9407_v49 = vrot.slane %v20853_v51, 1  ;;  %v9502_v4 = vrot.slane %v20853_v51, 2  ;;  %v9564_v7 = vrot.slane %v20853_v51, 3  ;;  %v9501_v42 = vrot.slane %v20859_v63, 1  ;;  %22621 = vst [vmem:[#allocation21_spill] sm:$0xff] %v20877_v50 }
 0x8f7   : > { %7198 = vmatprep.mubr.bf16.mxu0 %v5201_v30  ;;  %v9379_v6 = vmax.f32 %v9332_v18, 0.0  ;;  %v14188_v21 = vpop.f32.mrb[52].mxu1  ;;  %v9563_v11 = vrot.slane %v20859_v63, 2  ;;  %v9622_v56 = vrot.slane %v20823_v55, 3  ;;  %v9599_v18 = vrot.slane %v20796_v15, 3 }
 0x8f8   : > { %v14189_v36 = vpop.f32.mrb[53].mxu1  ;;  %v9408_v30 = vsel %vm1624_vm1, %v9403_v34, %v9407_v49  ;;  %v9503_v54 = vor.u32 %v9502_v4, %v9501_v42  ;;  %v22146_v34 = vrot.slane %v20843_v14, 3  ;;  %v9623_v22 = vrot.slane %v20816_v3, 4 }
 0x8f9   : > { %v20880_v1 = vpack.c.bf16 %v9379_v6, %v9378_v57  ;;  %v14190_v41 = vadd.f32 %v14189_v36, %v14188_v21  ;;  %10344 = vmatprep.mubr.bf16.mxu1 %v9408_v30  ;;  %v14191_v31 = vpop.f32.mrb[54].mxu1  ;;  %v9565_v58 = vor.u32 %v9564_v7, %v9563_v11  ;;  %v15743_v57 = vld [vmem:[#allocation10 + $0x110] ss:$8 sps:$4 sm:$0xff]   ;;  %v9411_v6 = vor.u32 %v20859_v63, %v9407_v49  ;;  %v15749_v49 = vld [vmem:[#allocation10 + $0x120] ss:$8 sps:$4 sm:$0xff]  }
 0x8fa   : > { %10345 = vmatmul.mubr.bf16.vlgmr.msra.gmra.mrb[72].mxu1 %v20796_v15  ;;  %v14192_v16 = vpop.f32.mrb[55].mxu1  ;;  %v15751_v15 = vld [vmem:[#allocation10 + $0x124] ss:$8 sps:$4 sm:$0xff]   ;;  %v20896_v29 = vsel %vm2516_vm4, %v9500_v62, %v9503_v54  ;;  %v20902_v33 = vor.u32 %v9623_v22, %v9622_v56  ;;  %v20918_v56 = vsel %vm3351_vm8, %v9599_v18, %v22146_v34  ;;  %v9626_v18 = vrot.slane %v20853_v51, 4 }
 0x8fb   : > { %v9337_v53 = vadd.f32 %v14190_v41, %v20701_v43  ;;  %10422 = vmatpush1.bf16.msra.mxu1 %v15737_v40  ;;  %v14193_v55 = vadd.f32 %v14192_v16, %v14191_v31  ;;  %v20889_v4 = vshll.u32 %v20880_v1, 16  ;;  %v20892_v7 = vshrl.u32 %v20880_v1, 16  ;;  %22622 = vst [vmem:[#allocation24_spill] sm:$0xff] %v20918_v56 }
 0x8fc   : > { %10423 = vmatprep.subr.bf16.mxu1 %v15745_v48  ;;  %v9478_v43 = vrot.slane %v20880_v1, 1  ;;  %v20900_v3 = vsel %vm3271_vm13, %v9562_v2, %v9565_v58  ;;  %v9540_v22 = vrot.slane %v20880_v1, 2 }
 0x8fd   : > { %v9340_v40 = vadd.f32 %v14193_v55, %v20708_v35  ;;  %v9415_v21 = vrot.slane %v20889_v4, 1  ;;  %v9505_v42 = vrot.slane %v20892_v7, 1  ;;  %v9567_v11 = vrot.slane %v20892_v7, 2 }
 0x8fe   : > { %7199 = vmatmul.mubr.bf16.gmra.mrb[152].mxu0 %v22614_v28  ;;  %v20910_v62 = vsel %vm2219_vm3, %v9476_v47, %v9478_v43  ;;  %v9568_v2 = vrot.slane %v20889_v4, 3  ;;  %v9380_v36 = vmax.f32 %v9337_v53, 0.0  ;;  %v15757_v47 = vld [vmem:[#allocation10 + $0x134] ss:$8 sps:$4 sm:$0xff]   ;;  %v9625_v53 = vrot.slane %v20859_v63, 3 }
 0x8ff   : > { %7208 = vmatprep.mubr.bf16.mxu0 %v20827_v20  ;;  %v9506_v20 = vrot.slane %v20889_v4, 2  ;;  %v9381_v30 = vmax.f32 %v9340_v40, 0.0  ;;  %10424 = vmatpush1.bf16.msra.mxu1 %v15743_v57  ;;  %v14194_v48 = vpop.f32.mrb[56].mxu1  ;;  %v9416_v35 = vsel %vm1624_vm1, %v9411_v6, %v9415_v21  ;;  %v22623_v6 = vld [vmem:[#allocation93_spill] sm:$0xff] }
 0x900   : > { %v14195_v41 = vpop.f32.mrb[57].mxu1  ;;  %10354 = vmatprep.mubr.bf16.mxu1 %v9416_v35  ;;  %10425 = vmatprep.subr.bf16.mxu1 %v15751_v15  ;;  %v9569_v16 = vor.u32 %v9568_v2, %v9567_v11  ;;  %v20927_v37 = vsel %vm2516_vm4, %v20832_v25, %v22623_v6  ;;  %v22625_v11 = vrot.slane %v20843_v14, 2  ;;  %v9630_v35 = vrot.slane %v20889_v4, 4 }
 0x901   : > { %v9507_v31 = vor.u32 %v9506_v20, %v9505_v42  ;;  %v20922_v55 = vpack.c.bf16 %v9381_v30, %v9380_v36  ;;  %v14196_v57 = vadd.f32 %v14195_v41, %v14194_v48  ;;  %v14197_v40 = vpop.f32.mrb[58].mxu1  ;;  %v9419_v42 = vor.u32 %v20892_v7, %v9415_v21  ;;  %v15755_v36 = vld [vmem:[#allocation10 + $0x130] ss:$8 sps:$4 sm:$0xff]  }
 0x902   : > { %10355 = vmatmul.mubr.bf16.gmra.mrb[76].mxu1 %v20843_v14  ;;  %v14198_v15 = vpop.f32.mrb[59].mxu1  ;;  %v20936_v63 = vsel %vm3271_vm13, %v9565_v58, %v9569_v16  ;;  %v20941_v2 = vsel %vm3223_vm14, %v22625_v11, %v9540_v22  ;;  %v15763_v58 = vld [vmem:[#allocation10 + $0x144] ss:$8 sps:$4 sm:$0xff]   ;;  %v9627_v48 = vor.u32 %v9626_v18, %v9625_v53 }
 0x903   : > { %v20933_v20 = vsel %vm2516_vm4, %v9503_v54, %v9507_v31  ;;  %22624 = vst [vmem:[#allocation31_spill] sm:$0xff] %v20936_v63  ;;  %22626 = vst [vmem:[#allocation26_spill] sm:$0xff] %v20941_v2  ;;  %v9345_v25 = vadd.f32 %v14196_v57, %v20727_v24  ;;  %10426 = vmatpush1.bf16.msra.mxu1 %v15749_v49  ;;  %v14199_v51 = vadd.f32 %v14198_v15, %v14197_v40  ;;  %v15761_v15 = vld [vmem:[#allocation10 + $0x140] ss:$8 sps:$4 sm:$0xff]  }
 0x904   : > { %v20946_v21 = vshll.u32 %v20922_v55, 16  ;;  %v20949_v54 = vshrl.u32 %v20922_v55, 16  ;;  %10427 = vmatprep.subr.bf16.mxu1 %v15757_v47  ;;  %v9480_v30 = vrot.slane %v20922_v55, 1  ;;  %v9629_v24 = vrot.slane %v20892_v7, 3 }
 0x905   : > { %v9348_v49 = vadd.f32 %v14199_v51, %v20734_v0  ;;  %v9602_v40 = vrot.slane %v20880_v1, 3  ;;  %v9382_v7 = vmax.f32 %v9345_v25, 0.0  ;;  %v20968_v11 = vsel %vm3399_vm15, %v20902_v33, %v9627_v48 }
 0x906   : > { %7209 = vmatmul.mubr.bf16.gmra.mrb[156].mxu0 %v22617_v44  ;;  %v9423_v41 = vrot.slane %v20946_v21, 1  ;;  %v9509_v57 = vrot.slane %v20949_v54, 1  ;;  %v9510_v47 = vrot.slane %v20946_v21, 2  ;;  %v9571_v6 = vrot.slane %v20949_v54, 2 }
 0x907   : > { %7251 = vmatprep.mubr.bf16.mxu0 %v20872_v27  ;;  %v20961_v27 = vsel %vm2219_vm3, %v9478_v43, %v9480_v30  ;;  %v9572_v53 = vrot.slane %v20946_v21, 3  ;;  %v9383_v18 = vmax.f32 %v9348_v49, 0.0  ;;  %10428 = vmatpush1.bf16.msra.mxu1 %v15755_v36  ;;  %v14200_v4 = vpop.f32.mrb[60].mxu1  ;;  %v15766_v43 = vld [vmem:[#allocation10 + $0x154] ss:$8 sps:$4 sm:$0xff]   ;;  %v9542_v2 = vrot.slane %v20922_v55, 2 }
 0x908   : > { %v9424_v0 = vsel %vm1624_vm1, %v9419_v42, %v9423_v41  ;;  %v14201_v51 = vpop.f32.mrb[61].mxu1  ;;  %10429 = vmatprep.subr.bf16.mxu1 %v15763_v58  ;;  %v9511_v34 = vor.u32 %v9510_v47, %v9509_v57  ;;  %v9631_v63 = vor.u32 %v9630_v35, %v9629_v24  ;;  %v22627_v42 = vrot.slane %v20843_v14, 3 }
 0x909   : > { %10364 = vmatprep.mubr.bf16.mxu1 %v9424_v0  ;;  %v9573_v56 = vor.u32 %v9572_v53, %v9571_v6  ;;  %v20971_v25 = vpack.c.bf16 %v9383_v18, %v9382_v7  ;;  %v14202_v36 = vadd.f32 %v14201_v51, %v14200_v4  ;;  %v14203_v49 = vpop.f32.mrb[62].mxu1  ;;  %v22147_v33 = vrot.slane %v20922_v55, 3 }
 0x90a   : > { %v20976_v50 = vsel %vm3351_vm8, %v22627_v42, %v9602_v40  ;;  %10365 = vmatmul.mubr.bf16.gmra.mrb[80].mxu1 %v20880_v1  ;;  %v14204_v58 = vpop.f32.mrb[63].mxu1  ;;  %v20981_v57 = vsel %vm2516_vm4, %v9507_v31, %v9511_v34  ;;  %v20987_v24 = vsel %vm3223_vm14, %v9540_v22, %v9542_v2  ;;  %v20990_v35 = vsel %vm3399_vm15, %v9627_v48, %v9631_v63  ;;  %v15764_v1 = vld [vmem:[#allocation10 + $0x150] ss:$8 sps:$4 sm:$0xff]   ;;  %v15772_v42 = vld [vmem:[#allocation10 + $0x174] ss:$8 sps:$4 sm:$0xff]  }
 0x90b   : > { %22628 = vst [vmem:[#allocation68_spill] sm:$0xff] %v20976_v50  ;;  %v20984_v47 = vsel %vm3271_vm13, %v9569_v16, %v9573_v56  ;;  %22629 = vst [vmem:[#allocation79_spill] sm:$0xff] %v20990_v35  ;;  %v9353_v14 = vadd.f32 %v14202_v36, %v20753_v5  ;;  %10430 = vmatpush1.bf16.msra.mxu1 %v15761_v15  ;;  %v14205_v6 = vadd.f32 %v14204_v58, %v14203_v49  ;;  %v15769_v16 = vld [vmem:[#allocation10 + $0x164] ss:$8 sps:$4 sm:$0xff]  }
 0x90c   : > { %v20995_v53 = vshll.u32 %v20971_v25, 16  ;;  %v20998_v31 = vshrl.u32 %v20971_v25, 16  ;;  %10431 = vmatprep.subr.bf16.mxu1 %v15766_v43  ;;  %v9482_v22 = vrot.slane %v20971_v25, 1  ;;  %v9633_v48 = vrot.slane %v20949_v54, 3 }
 0x90d   : > { %v9634_v5 = vrot.slane %v20946_v21, 4  ;;  %v9356_v7 = vadd.f32 %v14205_v6, %v20760_v39  ;;  %v9427_v18 = vor.u32 %v20949_v54, %v9423_v41  ;;  %v9384_v43 = vmax.f32 %v9353_v14, 0.0  ;;  %v15767_v54 = vld [vmem:[#allocation10 + $0x160] ss:$8 sps:$4 sm:$0xff]  }
 0x90e   : > { %7252 = vmatmul.mubr.bf16.vlgmr.msra.gmra.mrb[100].mxu0 %v20838_v23  ;;  %v21007_v23 = vsel %vm3351_vm8, %v9602_v40, %v22147_v33  ;;  %v9431_v4 = vrot.slane %v20995_v53, 1  ;;  %v9514_v0 = vrot.slane %v20995_v53, 2  ;;  %v21015_v15 = vsel %vm2219_vm3, %v9480_v30, %v9482_v22 }
 0x90f   : > { %7261 = vmatprep.mubr.bf16.mxu0 %v20927_v37  ;;  %22630 = vst [vmem:[#allocation85_spill] sm:$0xff] %v21007_v23  ;;  %v9513_v37 = vrot.slane %v20998_v31, 1  ;;  %v9575_v21 = vrot.slane %v20998_v31, 2  ;;  %v9576_v51 = vrot.slane %v20995_v53, 3  ;;  %v9385_v40 = vmax.f32 %v9356_v7, 0.0  ;;  %10432 = vmatpush1.bf16.msra.mxu1 %v15764_v1  ;;  %v14206_v36 = vpop.f32.mrb[64].mxu1 }
 0x910   : > { %v9432_v39 = vsel %vm1624_vm1, %v9427_v18, %v9431_v4  ;;  %v9635_v41 = vor.u32 %v9634_v5, %v9633_v48  ;;  %v14207_v49 = vpop.f32.mrb[65].mxu1  ;;  %10433 = vmatprep.subr.bf16.mxu1 %v15769_v16  ;;  %v9544_v33 = vrot.slane %v20971_v25, 2  ;;  %v22148_v18 = vrot.slane %v20971_v25, 3 }
 0x911   : > { %10374 = vmatprep.mubr.bf16.mxu1 %v9432_v39  ;;  %v9515_v30 = vor.u32 %v9514_v0, %v9513_v37  ;;  %v9577_v6 = vor.u32 %v9576_v51, %v9575_v21  ;;  %v21022_v23 = vpack.c.bf16 %v9385_v40, %v9384_v43  ;;  %v14208_v14 = vadd.f32 %v14207_v49, %v14206_v36  ;;  %v14209_v7 = vpop.f32.mrb[66].mxu1  ;;  %v15770_v40 = vld [vmem:[#allocation10 + $0x170] ss:$8 sps:$4 sm:$0xff]  }
 0x912   : > { %v21025_v1 = vsel %vm3399_vm15, %v9631_v63, %v9635_v41  ;;  %10375 = vmatmul.mubr.bf16.gmra.mrb[84].mxu1 %v20922_v55  ;;  %v14210_v48 = vpop.f32.mrb[67].mxu1  ;;  %v22632_v16 = vrot.slane %v22582_v12, 1  ;;  %v22633_v5 = vrot.slane %v22579_v10, 1  ;;  %v21041_v63 = vsel %vm3223_vm14, %v9542_v2, %v9544_v33 }
 0x913   : > { %22631 = vst [vmem:[#allocation55_spill] sm:$0xff] %v21025_v1  ;;  %v21035_v0 = vsel %vm2516_vm4, %v9511_v34, %v9515_v30  ;;  %v21038_v21 = vsel %vm3271_vm13, %v9573_v56, %v9577_v6  ;;  %v9361_v51 = vadd.f32 %v14208_v14, %v20770_v26  ;;  %10434 = vmatpush1.bf16.msra.mxu1 %v15767_v54  ;;  %v21045_v36 = vshll.u32 %v21022_v23, 16  ;;  %v22634_v34 = vld [vmem:[#allocation94_spill] sm:$0xff] }
 0x914   : > { %v5239_v37 = vsel %vm2219_vm3, %v22633_v5, %v22632_v16  ;;  %v14211_v43 = vadd.f32 %v14210_v48, %v14209_v7  ;;  %v21048_v10 = vshrl.u32 %v21022_v23, 16  ;;  %10435 = vmatprep.subr.bf16.mxu1 %v15772_v42  ;;  %v15775_v56 = vld [vmem:[#allocation10 + $0x184] ss:$8 sps:$4 sm:$0xff]   ;;  %v9484_v39 = vrot.slane %v21022_v23, 1 }
 0x915   : > { %v9637_v2 = vrot.slane %v20998_v31, 3  ;;  %v9638_v26 = vrot.slane %v20995_v53, 4  ;;  %v22635_v54 = vrot.slane %v20922_v55, 3  ;;  %v9435_v42 = vor.u32 %v20998_v31, %v9431_v4  ;;  %v15773_v31 = vld [vmem:[#allocation10 + $0x180] ss:$8 sps:$4 sm:$0xff]  }
 0x916   : > { %7262 = vmatmul.mubr.bf16.gmra.mrb[104].mxu0 %v5239_v37  ;;  %v9364_v14 = vadd.f32 %v14211_v43, %v20774_v9  ;;  %v9439_v7 = vrot.slane %v21045_v36, 1  ;;  %v9517_v48 = vrot.slane %v21048_v10, 1  ;;  %v9518_v16 = vrot.slane %v21045_v36, 2 }
 0x917   : > { %7271 = vmatprep.mubr.bf16.mxu0 %v22634_v34  ;;  %v21059_v49 = vsel %vm3351_vm8, %v22635_v54, %v22148_v18  ;;  %v21067_v5 = vsel %vm2219_vm3, %v9482_v22, %v9484_v39  ;;  %v9579_v53 = vrot.slane %v21048_v10, 2  ;;  %v9580_v55 = vrot.slane %v21045_v36, 3  ;;  %10436 = vmatpush1.bf16.msra.mxu1 %v15770_v40  ;;  %v14212_v54 = vpop.f32.mrb[68].mxu1  ;;  %v15778_v18 = vld [vmem:[#allocation10 + $0x194] ss:$8 sps:$4 sm:$0xff]  }
 0x918   : > { %22636 = vst [vmem:[#allocation32_spill] sm:$0xff] %v21059_v49  ;;  %v9386_v37 = vmax.f32 %v9361_v51, 0.0  ;;  %v9387_v34 = vmax.f32 %v9364_v14, 0.0  ;;  %v9440_v9 = vsel %vm1624_vm1, %v9435_v42, %v9439_v7  ;;  %v9639_v4 = vor.u32 %v9638_v26, %v9637_v2  ;;  %v14213_v43 = vpop.f32.mrb[69].mxu1  ;;  %10437 = vmatprep.subr.bf16.mxu1 %v15775_v56 }
 0x919   : > { %10382 = vmatprep.mubr.bf16.mxu1 %v9440_v9  ;;  %v22150_v58 = vrot.slane %v22587_v52, 1  ;;  %v9519_v22 = vor.u32 %v9518_v16, %v9517_v48  ;;  %v9581_v49 = vor.u32 %v9580_v55, %v9579_v53  ;;  %v9546_v1 = vrot.slane %v21022_v23, 2  ;;  %v14215_v14 = vpop.f32.mrb[70].mxu1  ;;  %v15781_v9 = vld [vmem:[#allocation10 + $0x1a4] ss:$8 sps:$4 sm:$0xff]  }
 0x91a   : > { %v21074_v50 = vpack.c.bf16 %v9387_v34, %v9386_v37  ;;  %v14214_v51 = vadd.f32 %v14213_v43, %v14212_v54  ;;  %v21077_v40 = vsel %vm3399_vm15, %v9635_v41, %v9639_v4  ;;  %v22149_v42 = vrot.slane %v21022_v23, 3  ;;  %10383 = vmatmul.mubr.bf16.gmra.mrb[88].mxu1 %v20971_v25  ;;  %v14216_v2 = vpop.f32.mrb[71].mxu1  ;;  %v15776_v37 = vld [vmem:[#allocation10 + $0x190] ss:$8 sps:$4 sm:$0xff]  }
 0x91b   : > { %22637 = vst [vmem:[#allocation62_spill] sm:$0xff] %v21077_v40  ;;  %v22638_v56 = vrot.slane %v22584_v45, 1  ;;  %v22639_v26 = vrot.slane %v22582_v12, 1  ;;  %v21087_v16 = vsel %vm2516_vm4, %v9515_v30, %v9519_v22  ;;  %v21090_v53 = vsel %vm3271_vm13, %v9577_v6, %v9581_v49  ;;  %10438 = vmatpush1.bf16.msra.mxu1 %v15773_v31  ;;  %v22640_v30 = vld [vmem:[#allocation95_spill] sm:$0xff] }
 0x91c   : > { %v21093_v41 = vsel %vm3223_vm14, %v9544_v33, %v9546_v1  ;;  %v9369_v55 = vadd.f32 %v14214_v51, %v20782_v61  ;;  %v9445_v34 = vshll.u32 %v21074_v50, 16  ;;  %v9449_v12 = vshrl.u32 %v21074_v50, 16  ;;  %10439 = vmatprep.subr.bf16.mxu1 %v15778_v18 }
 0x91d   : > { %v5241_v48 = vsel %vm2219_vm3, %v22639_v26, %v22638_v56  ;;  %v9486_v54 = vrot.slane %v21074_v50, 1  ;;  %v9443_v6 = vor.u32 %v21048_v10, %v9439_v7  ;;  %v9641_v33 = vrot.slane %v21048_v10, 3 }
 0x91e   : > { %7272 = vmatmul.mubr.bf16.gmra.mrb[108].mxu0 %v5241_v48  ;;  %v9642_v43 = vrot.slane %v21045_v36, 4  ;;  %v22641_v61 = vrot.slane %v20971_v25, 3  ;;  %v9388_v51 = vmax.f32 %v9369_v55, 0.0  ;;  %v9447_v14 = vrot.slane %v9445_v34, 1 }
 0x91f   : > { %7281 = vmatprep.mubr.bf16.mxu0 %v22640_v30  ;;  %v9521_v2 = vrot.slane %v9449_v12, 1  ;;  %v9522_v18 = vrot.slane %v9445_v34, 2  ;;  %v21111_v56 = vsel %vm2219_vm3, %v9484_v39, %v9486_v54  ;;  %v9583_v7 = vrot.slane %v9449_v12, 2  ;;  %10440 = vmatpush1.bf16.msra.mxu1 %v15776_v37  ;;  %v15779_v30 = vld [vmem:[#allocation10 + $0x1a0] ss:$8 sps:$4 sm:$0xff]  }
 0x920   : > { %v21108_v31 = vsel %vm3351_vm8, %v22641_v61, %v22149_v42  ;;  %v9584_v26 = vrot.slane %v9445_v34, 3  ;;  %v9643_v48 = vor.u32 %v9642_v43, %v9641_v33  ;;  %v21113_v10 = vpack.c.bf16 %v9388_v51, %v9388_v51  ;;  %10441 = vmatprep.subr.bf16.mxu1 %v15781_v9  ;;  %v15784_v39 = vld [vmem:[#allocation10 + $0x1b4] ss:$8 sps:$4 sm:$0xff]  }
 0x921   : > { %22642 = vst [vmem:[#allocation58_spill] sm:$0xff] %v21108_v31  ;;  %v9448_v36 = vsel %vm1624_vm1, %v9443_v6, %v9447_v14  ;;  %v9523_v25 = vor.u32 %v9522_v18, %v9521_v2  ;;  %v22643_v55 = vrot.slane %v22584_v45, 1  ;;  %v9548_v31 = vrot.slane %v21074_v50, 2  ;;  %v15782_v18 = vld [vmem:[#allocation10 + $0x1b0] ss:$8 sps:$4 sm:$0xff]  }
 0x922   : > { %10392 = vmatprep.mubr.bf16.mxu1 %v9448_v36  ;;  %v9585_v42 = vor.u32 %v9584_v26, %v9583_v7  ;;  %v21123_v33 = vsel %vm3399_vm15, %v9639_v4, %v9643_v48  ;;  %v9453_v37 = vshll.u32 %v21113_v10, 16  ;;  %v21127_v6 = vshrl.u32 %v21113_v10, 16 }
 0x923   : > { %v5243_v61 = vsel %vm2219_vm3, %v22643_v55, %v22150_v58  ;;  %22644 = vst [vmem:[#allocation38_spill] sm:$0xff] %v21123_v33  ;;  %v21130_v9 = vsel %vm2516_vm4, %v9519_v22, %v9523_v25  ;;  %v22151_v43 = vrot.slane %v21113_v10, 1  ;;  %10393 = vmatmul.mubr.bf16.gmra.mrb[92].mxu1 %v21022_v23  ;;  %v9451_v45 = vor.u32 %v9449_v12, %v9447_v14  ;;  %v15787_v14 = vld [vmem:[#allocation10 + $0x1c4] ss:$8 sps:$4 sm:$0xff]  }
 0x924   : > { %v21135_v51 = vsel %vm3271_vm13, %v9581_v49, %v9585_v42  ;;  %v21138_v2 = vsel %vm3223_vm14, %v9546_v1, %v9548_v31  ;;  %v9610_v4 = vrot.slane %v21074_v50, 3  ;;  %10442 = vmatpush1.bf16.msra.mxu1 %v15779_v30  ;;  %v9455_v7 = vrot.slane %v9453_v37, 1  ;;  %v22645_v49 = vld [vmem:[#allocation96_spill] sm:$0xff] }
 0x925   : > { %v9525_v22 = vrot.slane %v21127_v6, 1  ;;  %v9526_v26 = vrot.slane %v9453_v37, 2  ;;  %v21145_v36 = vsel %vm2219_vm3, %v9486_v54, %v22151_v43  ;;  %10443 = vmatprep.subr.bf16.mxu1 %v15784_v39  ;;  %v9587_v1 = vrot.slane %v21127_v6, 2 }
 0x926   : > { %7282 = vmatmul.mubr.bf16.gmra.mrb[112].mxu0 %v5243_v61  ;;  %v9588_v55 = vrot.slane %v9453_v37, 3  ;;  %v9645_v58 = vrot.slane %v9449_v12, 3  ;;  %v9646_v30 = vrot.slane %v9445_v34, 4  ;;  %v9456_v61 = vsel %vm1624_vm1, %v9451_v45, %v9455_v7  ;;  %v15785_v12 = vld [vmem:[#allocation10 + $0x1c0] ss:$8 sps:$4 sm:$0xff]  }
 0x927   : > { %7291 = vmatprep.mubr.bf16.mxu0 %v22645_v49  ;;  %v9527_v33 = vor.u32 %v9526_v26, %v9525_v22  ;;  %v22646_v40 = vrot.slane %v21022_v23, 3  ;;  %10402 = vmatprep.mubr.bf16.mxu1 %v9456_v61  ;;  %v5244_v34 = vrot.slane %v22590_v8, 1  ;;  %v9550_v7 = vrot.slane %v21113_v10, 2 }
 0x928   : > { %v9589_v39 = vor.u32 %v9588_v55, %v9587_v1  ;;  %v9647_v49 = vor.u32 %v9646_v30, %v9645_v58  ;;  %10444 = vmatpush1.bf16.msra.mxu1 %v15782_v18  ;;  %v9612_v58 = vrot.slane %v21113_v10, 3  ;;  %v5246_v30 = vrot.slane %v22593_v32, 1  ;;  %v15802_v32 = vld [vmem:[#allocation10 + $0x214] ss:$8 sps:$4 sm:$0xff]  }
 0x929   : > { %v21155_v35 = vsel %vm3351_vm8, %v22646_v40, %v9610_v4  ;;  %v6965_v54 = vpop.f32.mrb[168].mxu0  ;;  %v21161_v45 = vsel %vm2516_vm4, %v9523_v25, %v9527_v33  ;;  %10445 = vmatprep.subr.bf16.mxu1 %v15787_v14  ;;  %v15790_v40 = vld [vmem:[#allocation10 + $0x1d4] ss:$8 sps:$4 sm:$0xff]   ;;  %v21174_v8 = vsel %vm3223_vm14, %v9548_v31, %v9550_v7  ;;  %v9649_v25 = vrot.slane %v21127_v6, 3  ;;  %v15788_v14 = vld [vmem:[#allocation10 + $0x1d0] ss:$8 sps:$4 sm:$0xff]  }
 0x92a   : > { %v6966_v43 = vpop.f32.mrb[169].mxu0  ;;  %v21165_v26 = vsel %vm3271_vm13, %v9585_v42, %v9589_v39  ;;  %v21168_v61 = vsel %vm3399_vm15, %v9643_v48, %v9647_v49  ;;  %v9650_v33 = vrot.slane %v9453_v37, 4  ;;  %v21181_v42 = vsel %vm3351_vm8, %v9610_v4, %v9612_v58  ;;  %v15793_v37 = vld [vmem:[#allocation10 + $0x1e4] ss:$8 sps:$4 sm:$0xff]   ;;  %v15791_v4 = vld [vmem:[#allocation10 + $0x1e0] ss:$8 sps:$4 sm:$0xff]  }
 0x92b   : > { %v6967_v23 = vpop.f32.mrb[170].mxu0  ;;  %10403 = vmatmul.mubr.bf16.gmra.mrb[96].mxu1 %v21074_v50  ;;  %v22647_v48 = vrot.slane %v22587_v52, 1  ;;  %v22648_v50 = vld [vmem:[#allocation97_spill] sm:$0xff]  ;;  %v5247_v54 = vsel %vm2219_vm3, %v5244_v34, %v5246_v30  ;;  %vm7409_vm1 = vcmask 1042432  }
 0x92c   : > { %v6968_v43 = vpop.f32.mrb[171].mxu0  ;;  %10446 = vmatpush1.bf16.msra.mxu1 %v15785_v12  ;;  %10412 = vmatprep.mubr.bf16.mxu1 %v21127_v6  ;;  %v9651_v31 = vor.u32 %v9650_v33, %v9649_v25  ;;  %v15796_v52 = vld [vmem:[#allocation10 + $0x1f4] ss:$8 sps:$4 sm:$0xff]   ;;  %v15794_v39 = vld [vmem:[#allocation10 + $0x1f0] ss:$8 sps:$4 sm:$0xff]   ;;  %v22649_v23 = vld [vmem:[#allocation98_spill] sm:$0xff] }
 0x92d   : > { %v5245_v18 = vsel %vm2219_vm3, %v22647_v48, %v5244_v34  ;;  %10447 = vmatprep.subr.bf16.mxu1 %v15790_v40  ;;  %v15799_v12 = vld [vmem:[#allocation10 + $0x204] ss:$8 sps:$4 sm:$0xff]   ;;  %v5248_v40 = vrot.slane %v22596_v13, 1  ;;  %v15800_v34 = vld [vmem:[#allocation10 + $0x210] ss:$8 sps:$4 sm:$0xff]  }
 0x92e   : > { %7292 = vmatmul.mubr.bf16.gmra.mrb[116].mxu0 %v5245_v18  ;;  %v21191_v55 = vsel %vm3399_vm15, %v9647_v49, %v9651_v31  ;;  %v15797_v49 = vld [vmem:[#allocation10 + $0x200] ss:$8 sps:$4 sm:$0xff]   ;;  %v15805_v43 = vld [vmem:[#allocation10 + $0x224] ss:$8 sps:$4 sm:$0xff]   ;;  %v5250_v18 = vrot.slane %v22599_v60, 1  ;;  %v22651_v31 = vld [vmem:[#allocation100_spill] sm:$0xff] }
 0x92f   : > { %7301 = vmatprep.mubr.bf16.mxu0 %v22648_v50  ;;  %v22650_v33 = vld [vmem:[#allocation99_spill] sm:$0xff]  ;;  %v15808_v13 = vld [vmem:[#allocation10 + $0x234] ss:$8 sps:$4 sm:$0xff]   ;;  %v5252_v50 = vrot.slane %v22602_v46, 1 }
 0x930   : > { %10448 = vmatpush1.bf16.msra.mxu1 %v15788_v14  ;;  %v15803_v48 = vld [vmem:[#allocation10 + $0x220] ss:$8 sps:$4 sm:$0xff]   ;;  %v15811_v14 = vld [vmem:[#allocation10 + $0x244] ss:$8 sps:$4 sm:$0xff]   ;;  %v15814_v60 = vld [vmem:[#allocation10 + $0x254] ss:$8 sps:$4 sm:$0xff]  }
 0x931   : > { %10449 = vmatprep.subr.bf16.mxu1 %v15793_v37  ;;  %v15809_v37 = vld [vmem:[#allocation10 + $0x240] ss:$8 sps:$4 sm:$0xff]   ;;  %v15820_v46 = vld [vmem:[#allocation10 + $0x274] ss:$8 sps:$4 sm:$0xff]  }
 0x933   : > { %10413 = vmatmul.mubr.bf16.gmra.mrb[100].mxu1 %v21113_v10 }
 0x934   : > { %10450 = vmatpush1.bf16.msra.mxu1 %v15791_v4  ;;  %10453 = vmatprep.mubr.bf16.mxu1 %v20896_v29  ;;  %v5249_v29 = vsel %vm2219_vm3, %v5246_v30, %v5248_v40  ;;  %v15817_v4 = vld [vmem:[#allocation10 + $0x264] ss:$8 sps:$4 sm:$0xff]   ;;  %v22652_v30 = vld [vmem:[#allocation101_spill] sm:$0xff] }
 0x935   : > { %10451 = vmatprep.subr.bf16.mxu1 %v15796_v52  ;;  %v15815_v52 = vld [vmem:[#allocation10 + $0x260] ss:$8 sps:$4 sm:$0xff]  }
 0x936   : > { %7302 = vmatmul.mubr.bf16.gmra.mrb[120].mxu0 %v5247_v54  ;;  %v5254_v54 = vrot.slane %v22605_v38, 1  ;;  %v15826_v38 = vld [vmem:[#allocation10 + $0x294] ss:$8 sps:$4 sm:$0xff]  }
 0x937   : > { %7311 = vmatprep.mubr.bf16.mxu0 %v22649_v23  ;;  %v15821_v23 = vld [vmem:[#allocation10 + $0x280] ss:$8 sps:$4 sm:$0xff]  }
 0x938   : > { %10452 = vmatpush1.bf16.msra.mxu1 %v15794_v39  ;;  %v15823_v39 = vld [vmem:[#allocation10 + $0x284] ss:$8 sps:$4 sm:$0xff]  }
 0x939   : > { %10530 = vmatprep.subr.bf16.mxu1 %v15799_v12  ;;  %v22653_v12 = vld [vmem:[#allocation102_spill] sm:$0xff] }
 0x93b   : > { %10454 = vmatmul.mubr.bf16.vlgmr.msra.gmra.mrb[72].mxu1 %v20864_v59  ;;  %v5251_v59 = vsel %vm2219_vm3, %v5248_v40, %v5250_v18  ;;  %v15829_v40 = vld [vmem:[#allocation10 + $0x2a4] ss:$8 sps:$4 sm:$0xff]  }
 0x93c   : > { %10531 = vmatpush1.bf16.msra.mxu1 %v15797_v49  ;;  %10463 = vmatprep.mubr.bf16.mxu1 %v20933_v20  ;;  %v15806_v20 = vld [vmem:[#allocation10 + $0x230] ss:$8 sps:$4 sm:$0xff]   ;;  %v5256_v49 = vrot.slane %v22608_v19, 1  ;;  %v15832_v19 = vld [vmem:[#allocation10 + $0x2b4] ss:$8 sps:$4 sm:$0xff]  }
 0x93d   : > { %10532 = vmatprep.subr.bf16.mxu1 %v15802_v32  ;;  %v22654_v32 = vld [vmem:[#allocation103_spill] sm:$0xff] }
 0x93e   : > { %7312 = vmatmul.mubr.bf16.gmra.mrb[124].mxu0 %v5249_v29  ;;  %v15827_v29 = vld [vmem:[#allocation10 + $0x2a0] ss:$8 sps:$4 sm:$0xff]  }
 0x93f   : > { %7321 = vmatprep.mubr.bf16.mxu0 %v22650_v33  ;;  %v22655_v33 = vld [vmem:[#allocation104_spill] sm:$0xff] }
 0x940   : > { %10533 = vmatpush1.bf16.msra.mxu1 %v15800_v34  ;;  %v5258_v34 = vrot.slane %v22611_v17, 1  ;;  %v15838_v17 = vld [vmem:[#allocation10 + $0x2d4] ss:$8 sps:$4 sm:$0xff]  }
 0x941   : > { %10534 = vmatprep.subr.bf16.mxu1 %v15805_v43  ;;  %v15835_v43 = vld [vmem:[#allocation10 + $0x2c4] ss:$8 sps:$4 sm:$0xff]  }
 0x943   : > { %10464 = vmatmul.mubr.bf16.gmra.mrb[76].mxu1 %v20910_v62  ;;  %v5253_v62 = vsel %vm2219_vm3, %v5250_v18, %v5252_v50  ;;  %v5260_v18 = vrot.slane %v22614_v28, 1  ;;  %v5262_v28 = vrot.slane %v22617_v44, 1  ;;  %v15850_v44 = vld [vmem:[#allocation10 + $0x314] ss:$8 sps:$4 sm:$0xff]  }
 0x944   : > { %10535 = vmatpush1.bf16.msra.mxu1 %v15803_v48  ;;  %10473 = vmatprep.mubr.bf16.mxu1 %v20981_v57  ;;  %v15812_v57 = vld [vmem:[#allocation10 + $0x250] ss:$8 sps:$4 sm:$0xff]   ;;  %v15833_v48 = vld [vmem:[#allocation10 + $0x2c0] ss:$8 sps:$4 sm:$0xff]  }
 0x945   : > { %10536 = vmatprep.subr.bf16.mxu1 %v15808_v13  ;;  %v15841_v13 = vld [vmem:[#allocation10 + $0x2e4] ss:$8 sps:$4 sm:$0xff]  }
 0x946   : > { %7322 = vmatmul.mubr.bf16.gmra.mrb[176].mxu0 %v5251_v59  ;;  %v22656_v59 = vld [vmem:[#allocation106_spill] sm:$0xff] }
 0x947   : > { %7327 = vmatprep.mubr.bf16.mxu0 %v22651_v31  ;;  %v15842_v31 = vld [vmem:[#allocation10 + $0x2f0] ss:$8 sps:$4 sm:$0xff]  }
 0x948   : > { %10537 = vmatpush1.bf16.msra.mxu1 %v15806_v20  ;;  %v15839_v20 = vld [vmem:[#allocation10 + $0x2e0] ss:$8 sps:$4 sm:$0xff]  }
 0x949   : > { %10538 = vmatprep.subr.bf16.mxu1 %v15811_v14  ;;  %v15844_v14 = vld [vmem:[#allocation10 + $0x2f4] ss:$8 sps:$4 sm:$0xff]  }
 0x94b   : > { %10474 = vmatmul.mubr.bf16.gmra.mrb[80].mxu1 %v20961_v27  ;;  %v5255_v27 = vsel %vm2219_vm3, %v5252_v50, %v5254_v54  ;;  %v22658_v50 = vld [vmem:[#allocation105_spill] sm:$0xff] }
 0x94c   : > { %10539 = vmatpush1.bf16.msra.mxu1 %v15809_v37  ;;  %10483 = vmatprep.mubr.bf16.mxu1 %v21035_v0  ;;  %v15818_v0 = vld [vmem:[#allocation10 + $0x270] ss:$8 sps:$4 sm:$0xff]   ;;  %v15847_v37 = vld [vmem:[#allocation10 + $0x304] ss:$8 sps:$4 sm:$0xff]  }
 0x94d   : > { %10540 = vmatprep.subr.bf16.mxu1 %v15814_v60  ;;  %v15845_v60 = vld [vmem:[#allocation10 + $0x300] ss:$8 sps:$4 sm:$0xff]  }
 0x94e   : > { %7328 = vmatmul.mubr.bf16.gmra.mrb[132].mxu0 %v5253_v62  ;;  %v22659_v62 = vld [vmem:[#allocation21_spill] sm:$0xff] }
 0x94f   : > { %7337 = vmatprep.mubr.bf16.mxu0 %v22652_v30  ;;  %v15851_v30 = vld [vmem:[#allocation10 + $0x320] ss:$8 sps:$4 sm:$0xff]  }
 0x950   : > { %10541 = vmatpush1.bf16.msra.mxu1 %v15812_v57  ;;  %v22660_v57 = vld [vmem:[#allocation31_spill] sm:$0xff] }
 0x951   : > { %10542 = vmatprep.subr.bf16.mxu1 %v15817_v4  ;;  %v15848_v4 = vld [vmem:[#allocation10 + $0x310] ss:$8 sps:$4 sm:$0xff]  }
 0x953   : > { %10484 = vmatmul.mubr.bf16.gmra.mrb[84].mxu1 %v21015_v15  ;;  %v5257_v15 = vsel %vm2219_vm3, %v5254_v54, %v5256_v49  ;;  %v22661_v54 = vld [vmem:[#allocation26_spill] sm:$0xff] }
 0x954   : > { %10543 = vmatpush1.bf16.msra.mxu1 %v15815_v52  ;;  %10491 = vmatprep.mubr.bf16.mxu1 %v21087_v16  ;;  %v15824_v16 = vld [vmem:[#allocation10 + $0x290] ss:$8 sps:$4 sm:$0xff]   ;;  %v15856_v52 = vld [vmem:[#allocation10 + $0x334] ss:$8 sps:$4 sm:$0xff]  }
 0x955   : > { %10544 = vmatprep.subr.bf16.mxu1 %v15820_v46  ;;  %v15854_v46 = vld [vmem:[#allocation10 + $0x330] ss:$8 sps:$4 sm:$0xff]  }
 0x956   : > { %7338 = vmatmul.mubr.bf16.gmra.mrb[136].mxu0 %v5255_v27  ;;  %v15859_v27 = vld [vmem:[#allocation10 + $0x344] ss:$8 sps:$4 sm:$0xff]  }
 0x957   : > { %7347 = vmatprep.mubr.bf16.mxu0 %v22653_v12  ;;  %v15860_v12 = vld [vmem:[#allocation10 + $0x350] ss:$8 sps:$4 sm:$0xff]  }
 0x958   : > { %10545 = vmatpush1.bf16.msra.mxu1 %v15818_v0  ;;  %v15857_v0 = vld [vmem:[#allocation10 + $0x340] ss:$8 sps:$4 sm:$0xff]  }
 0x959   : > { %10546 = vmatprep.subr.bf16.mxu1 %v15823_v39  ;;  %v15862_v39 = vld [vmem:[#allocation10 + $0x354] ss:$8 sps:$4 sm:$0xff]  }
 0x95b   : > { %10492 = vmatmul.mubr.bf16.gmra.mrb[88].mxu1 %v21067_v5  ;;  %v5259_v5 = vsel %vm2219_vm3, %v5256_v49, %v5258_v34  ;;  %v15863_v49 = vld [vmem:[#allocation10 + $0x360] ss:$8 sps:$4 sm:$0xff]  }
 0x95c   : > { %10547 = vmatpush1.bf16.msra.mxu1 %v15821_v23  ;;  %10501 = vmatprep.mubr.bf16.mxu1 %v21130_v9  ;;  %v15830_v9 = vld [vmem:[#allocation10 + $0x2b0] ss:$8 sps:$4 sm:$0xff]   ;;  %v15865_v23 = vld [vmem:[#allocation10 + $0x364] ss:$8 sps:$4 sm:$0xff]  }
 0x95d   : > { %10548 = vmatprep.subr.bf16.mxu1 %v15826_v38  ;;  %v15868_v38 = vld [vmem:[#allocation10 + $0x374] ss:$8 sps:$4 sm:$0xff]  }
 0x95e   : > { %7348 = vmatmul.mubr.bf16.gmra.mrb[140].mxu0 %v5257_v15  ;;  %v15871_v15 = vld [vmem:[#allocation10 + $0x384] ss:$8 sps:$4 sm:$0xff]  }
 0x95f   : > { %7357 = vmatprep.mubr.bf16.mxu0 %v22654_v32 }
 0x960   : > { %10549 = vmatpush1.bf16.msra.mxu1 %v15824_v16  ;;  %v15874_v16 = vld [vmem:[#allocation10 + $0x394] ss:$8 sps:$4 sm:$0xff]  }
 0x961   : > { %10550 = vmatprep.subr.bf16.mxu1 %v15829_v40  ;;  %v15877_v40 = vld [vmem:[#allocation10 + $0x3a4] ss:$8 sps:$4 sm:$0xff]  }
 0x963   : > { %10502 = vmatmul.mubr.bf16.gmra.mrb[92].mxu1 %v21111_v56  ;;  %v5261_v56 = vsel %vm2219_vm3, %v5258_v34, %v5260_v18  ;;  %v15880_v34 = vld [vmem:[#allocation10 + $0x3b4] ss:$8 sps:$4 sm:$0xff]  }
 0x964   : > { %10551 = vmatpush1.bf16.msra.mxu1 %v15827_v29  ;;  %10511 = vmatprep.mubr.bf16.mxu1 %v21161_v45  ;;  %v15836_v45 = vld [vmem:[#allocation10 + $0x2d0] ss:$8 sps:$4 sm:$0xff]   ;;  %v15875_v29 = vld [vmem:[#allocation10 + $0x3a0] ss:$8 sps:$4 sm:$0xff]  }
 0x965   : > { %10552 = vmatprep.subr.bf16.mxu1 %v15832_v19 }
 0x966   : > { %7358 = vmatmul.mubr.bf16.gmra.mrb[144].mxu0 %v5259_v5  ;;  %v15883_v5 = vld [vmem:[#allocation10 + $0x3c4] ss:$8 sps:$4 sm:$0xff]  }
 0x967   : > { %7367 = vmatprep.mubr.bf16.mxu0 %v22655_v33  ;;  %v15889_v33 = vld [vmem:[#allocation10 + $0x3e4] ss:$8 sps:$4 sm:$0xff]  }
 0x968   : > { %10553 = vmatpush1.bf16.msra.mxu1 %v15830_v9  ;;  %v15886_v9 = vld [vmem:[#allocation10 + $0x3d4] ss:$8 sps:$4 sm:$0xff]  }
 0x969   : > { %10554 = vmatprep.subr.bf16.mxu1 %v15835_v43  ;;  %v15884_v43 = vld [vmem:[#allocation10 + $0x3d0] ss:$8 sps:$4 sm:$0xff]  }
 0x96b   : > { %10512 = vmatmul.mubr.bf16.gmra.mrb[96].mxu1 %v21145_v36  ;;  %v22657_v36 = vrot.slane %v21113_v10, 1 }
 0x96c   : > { %10555 = vmatpush1.bf16.msra.mxu1 %v15833_v48  ;;  %10521 = vmatprep.mubr.bf16.mxu1 %v9525_v22  ;;  %v5263_v22 = vsel %vm2219_vm3, %v5260_v18, %v5262_v28  ;;  %v15890_v48 = vld [vmem:[#allocation10 + $0x3f0] ss:$8 sps:$4 sm:$0xff]   ;;  %vm10752_vm3 = vcmask 1040384  }
 0x96d   : > { %10556 = vmatprep.subr.bf16.mxu1 %v15838_v17  ;;  %v22663_v18 = vld [vmem:[#allocation79_spill] sm:$0xff] }
 0x96e   : > { %7368 = vmatmul.mubr.bf16.gmra.mrb[148].mxu0 %v5261_v56  ;;  %v22665_v17 = vld [vmem:[#allocation55_spill] sm:$0xff]  ;;  %v22666_v56 = vld [vmem:[#allocation85_spill] sm:$0xff] }
 0x96f   : > { %7377 = vmatprep.mubr.bf16.mxu0 %v22656_v59 }
 0x970   : > { %10557 = vmatpush1.bf16.msra.mxu1 %v15836_v45  ;;  %v22667_v45 = vld [vmem:[#allocation62_spill] sm:$0xff] }
 0x971   : > { %10558 = vmatprep.subr.bf16.mxu1 %v15841_v13  ;;  %v22668_v13 = vld [vmem:[#allocation32_spill] sm:$0xff] }
 0x973   : > { %10522 = vmatmul.mubr.bf16.gmra.mrb[100].mxu1 %v22657_v36 }
 0x974   : > { %10559 = vmatpush1.bf16.msra.mxu1 %v15839_v20  ;;  %10562 = vmatprep.mubr.bf16.mxu1 %v20900_v3  ;;  %v15853_v3 = vld [vmem:[#allocation10 + $0x324] ss:$8 sps:$4 sm:$0xff]  }
 0x975   : > { %10560 = vmatprep.subr.bf16.mxu1 %v15844_v14  ;;  %v22671_v14 = vld [vmem:[#allocation18_spill] sm:$0xff] }
 0x976   : > { %7378 = vmatmul.mubr.bf16.gmra.mrb[152].mxu0 %v5263_v22  ;;  %v21269_v36 = vsub.s32 1, %v22671_v14 }
 0x977   : > { %7387 = vmatprep.mubr.bf16.mxu0 %v22658_v50 }
 0x978   : > { %10561 = vmatpush1.bf16.msra.mxu1 %v15842_v31 }
 0x979   : > { %10639 = vmatprep.subr.bf16.mxu1 %v15847_v37  ;;  %v22672_v37 = vld [vmem:[#allocation19_spill] sm:$0xff] }
 0x97b   : > { %10563 = vmatmul.mubr.bf16.vlgmr.msra.gmra.mrb[72].mxu1 %v22659_v62 }
 0x97c   : > { %10640 = vmatpush1.bf16.msra.mxu1 %v15845_v60  ;;  %10572 = vmatprep.mubr.bf16.mxu1 %v22660_v57 }
 0x97d   : > { %10641 = vmatprep.subr.bf16.mxu1 %v15850_v44 }
 0x97e   : > { %7388 = vmatmul.mubr.bf16.gmra.mrb[156].mxu0 %v5262_v28  ;;  %v1575_v28 = vld [vmem:[#allocation5] sm:$0x3] }
 0x97f   : > { %v21273_v50 = vrot.slane %v1575_v28, %v22672_v37  ;;  %v21277_v60 = vrot.slane %v1575_v28, %v21269_v36 }
 0x980   : > { %10642 = vmatpush1.bf16.msra.mxu1 %v15848_v4 }
 0x981   : > { %10643 = vmatprep.subr.bf16.mxu1 %v15853_v3 }
 0x983   : > { %10573 = vmatmul.mubr.bf16.gmra.mrb[76].mxu1 %v22661_v54 }
 0x984   : > { %10644 = vmatpush1.bf16.msra.mxu1 %v15851_v30  ;;  %10582 = vmatprep.mubr.bf16.mxu1 %v20984_v47  ;;  %v15866_v47 = vld [vmem:[#allocation10 + $0x370] ss:$8 sps:$4 sm:$0xff]  }
 0x985   : > { %10645 = vmatprep.subr.bf16.mxu1 %v15856_v52 }
 0x988   : > { %10646 = vmatpush1.bf16.msra.mxu1 %v15854_v46 }
 0x989   : > { %10647 = vmatprep.subr.bf16.mxu1 %v15859_v27 }
 0x98b   : > { %10583 = vmatmul.mubr.bf16.gmra.mrb[80].mxu1 %v20987_v24  ;;  %v15869_v24 = vld [vmem:[#allocation10 + $0x380] ss:$8 sps:$4 sm:$0xff]  }
 0x98c   : > { %10648 = vmatpush1.bf16.msra.mxu1 %v15857_v0  ;;  %10592 = vmatprep.mubr.bf16.mxu1 %v21038_v21  ;;  %v15872_v21 = vld [vmem:[#allocation10 + $0x390] ss:$8 sps:$4 sm:$0xff]  }
 0x98d   : > { %10649 = vmatprep.subr.bf16.mxu1 %v15862_v39 }
 0x990   : > { %10650 = vmatpush1.bf16.msra.mxu1 %v15860_v12 }
 0x991   : > { %10651 = vmatprep.subr.bf16.mxu1 %v15865_v23 }
 0x993   : > { %10593 = vmatmul.mubr.bf16.gmra.mrb[84].mxu1 %v21041_v63 }
 0x994   : > { %10652 = vmatpush1.bf16.msra.mxu1 %v15863_v49  ;;  %10600 = vmatprep.mubr.bf16.mxu1 %v21090_v53 }
 0x995   : > { %10653 = vmatprep.subr.bf16.mxu1 %v15868_v38 }
 0x998   : > { %10654 = vmatpush1.bf16.msra.mxu1 %v15866_v47 }
 0x999   : > { %10655 = vmatprep.subr.bf16.mxu1 %v15871_v15 }
 0x99b   : > { %10601 = vmatmul.mubr.bf16.gmra.mrb[88].mxu1 %v21093_v41  ;;  %v15878_v41 = vld [vmem:[#allocation10 + $0x3b0] ss:$8 sps:$4 sm:$0xff]  }
 0x99c   : > { %10656 = vmatpush1.bf16.msra.mxu1 %v15869_v24  ;;  %10610 = vmatprep.mubr.bf16.mxu1 %v21135_v51  ;;  %v15881_v51 = vld [vmem:[#allocation10 + $0x3c0] ss:$8 sps:$4 sm:$0xff]  }
 0x99d   : > { %10657 = vmatprep.subr.bf16.mxu1 %v15874_v16 }
 0x9a0   : > { %10658 = vmatpush1.bf16.msra.mxu1 %v15872_v21 }
 0x9a1   : > { %v7144_v32 = vpop.f32.mrb[172].mxu0  ;;  %10659 = vmatprep.subr.bf16.mxu1 %v15877_v40 }
 0x9a2   : > { %v7145_v63 = vpop.f32.mrb[173].mxu0 }
 0x9a3   : > { %v7146_v53 = vpop.f32.mrb[174].mxu0  ;;  %10611 = vmatmul.mubr.bf16.gmra.mrb[92].mxu1 %v21138_v2  ;;  %v15887_v2 = vld [vmem:[#allocation10 + $0x3e0] ss:$8 sps:$4 sm:$0xff]  }
 0x9a4   : > { %v7147_v19 = vpop.f32.mrb[175].mxu0  ;;  %10660 = vmatpush1.bf16.msra.mxu1 %v15875_v29  ;;  %10620 = vmatprep.mubr.bf16.mxu1 %v21165_v26  ;;  %v15892_v26 = vld [vmem:[#allocation10 + $0x3f4] ss:$8 sps:$4 sm:$0xff]  }
 0x9a5   : > { %10661 = vmatprep.subr.bf16.mxu1 %v15880_v34 }
 0x9a8   : > { %10662 = vmatpush1.bf16.msra.mxu1 %v15878_v41 }
 0x9a9   : > { %10663 = vmatprep.subr.bf16.mxu1 %v15883_v5 }
 0x9ab   : > { %10621 = vmatmul.mubr.bf16.gmra.mrb[96].mxu1 %v21174_v8  ;;  %v22662_v8 = vld [vmem:[#allocation24_spill] sm:$0xff] }
 0x9ac   : > { %10664 = vmatpush1.bf16.msra.mxu1 %v15881_v51  ;;  %10630 = vmatprep.mubr.bf16.mxu1 %v9587_v1  ;;  %v22664_v1 = vld [vmem:[#allocation68_spill] sm:$0xff] }
 0x9ad   : > { %10665 = vmatprep.subr.bf16.mxu1 %v15886_v9 }
 0x9b0   : > { %10666 = vmatpush1.bf16.msra.mxu1 %v15884_v43 }
 0x9b1   : > { %10667 = vmatprep.subr.bf16.mxu1 %v15889_v33 }
 0x9b3   : > { %10631 = vmatmul.mubr.bf16.gmra.mrb[100].mxu1 %v9550_v7  ;;  %v22669_v7 = vld [vmem:[#allocation38_spill] sm:$0xff] }
 0x9b4   : > { %10668 = vmatpush1.bf16.msra.mxu1 %v15887_v2  ;;  %10671 = vmatprep.mubr.bf16.mxu1 %v20968_v11  ;;  %v22670_v11 = vld [vmem:[#allocation58_spill] sm:$0xff] }
 0x9b5   : > { %10669 = vmatprep.subr.bf16.mxu1 %v15892_v26 }
 0x9b8   : > { %10670 = vmatpush1.bf16.msra.mxu1 %v15890_v48 }
 0x9bb   : > { %10672 = vmatmul.mubr.bf16.vlgmr.msra.gmra.mrb[72].mxu1 %v22662_v8 }
 0x9bc   : > { %10681 = vmatprep.mubr.bf16.mxu1 %v22663_v18 }
 0x9c3   : > { %10682 = vmatmul.mubr.bf16.gmra.mrb[76].mxu1 %v22664_v1 }
 0x9c4   : > { %10691 = vmatprep.mubr.bf16.mxu1 %v22665_v17 }
 0x9cb   : > { %10692 = vmatmul.mubr.bf16.gmra.mrb[80].mxu1 %v22666_v56 }
 0x9cc   : > { %10701 = vmatprep.mubr.bf16.mxu1 %v22667_v45 }
 0x9d3   : > { %10702 = vmatmul.mubr.bf16.gmra.mrb[84].mxu1 %v22668_v13 }
 0x9d4   : > { %10709 = vmatprep.mubr.bf16.mxu1 %v22669_v7 }
 0x9db   : > { %10710 = vmatmul.mubr.bf16.gmra.mrb[88].mxu1 %v22670_v11 }
 0x9dc   : > { %10719 = vmatprep.mubr.bf16.mxu1 %v21168_v61 }
 0x9e1   : > { %v7253_v59 = vpop.f32.mrb[100].mxu0 }
 0x9e2   : > { %v7255_v20 = vpop.f32.mrb[101].mxu0  ;;  %v14562_v61 = vadd.f32 %v7253_v59, %v21273_v50 }
 0x9e3   : > { %v7257_v22 = vpop.f32.mrb[102].mxu0  ;;  %10720 = vmatmul.mubr.bf16.gmra.mrb[92].mxu1 %v21155_v35  ;;  %v14563_v4 = vadd.f32 %v7255_v20, %v21277_v60 }
 0x9e4   : > { %v7259_v31 = vpop.f32.mrb[103].mxu0  ;;  %10729 = vmatprep.mubr.bf16.mxu1 %v21191_v55  ;;  %v14564_v35 = vadd.f32 %v7257_v22, %v21273_v50 }
 0x9e5   : > { %v14565_v46 = vadd.f32 %v7259_v31, %v21277_v60 }
 0x9e9   : > { %v7263_v44 = vpop.f32.mrb[104].mxu0 }
 0x9ea   : > { %v14566_v62 = vadd.f32 %v7263_v44, %v21273_v50  ;;  %v7265_v57 = vpop.f32.mrb[105].mxu0 }
 0x9eb   : > { %v14567_v3 = vadd.f32 %v7265_v57, %v21277_v60  ;;  %v7267_v30 = vpop.f32.mrb[106].mxu0  ;;  %10730 = vmatmul.mubr.bf16.gmra.mrb[96].mxu1 %v21181_v42 }
 0x9ec   : > { %v7398_v52 = vmax.f32 %v14562_v61, %v14566_v62  ;;  %v14568_v54 = vadd.f32 %v7267_v30, %v21273_v50  ;;  %v7269_v55 = vpop.f32.mrb[107].mxu0  ;;  %10739 = vmatprep.mubr.bf16.mxu1 %v9649_v25 }
 0x9ed   : > { %v7419_v27 = vmax.f32 %v14563_v4, %v14567_v3  ;;  %v14569_v0 = vadd.f32 %v7269_v55, %v21277_v60 }
 0x9ee   : > { %v7399_v39 = vmax.f32 %v14564_v35, %v14568_v54 }
 0x9ef   : > { %v7420_v12 = vmax.f32 %v14565_v46, %v14569_v0 }
 0x9f1   : > { %v7273_v23 = vpop.f32.mrb[108].mxu0 }
 0x9f2   : > { %v14570_v49 = vadd.f32 %v7273_v23, %v21273_v50  ;;  %v7275_v38 = vpop.f32.mrb[109].mxu0 }
 0x9f3   : > { %v14571_v47 = vadd.f32 %v7275_v38, %v21277_v60  ;;  %v7277_v15 = vpop.f32.mrb[110].mxu0  ;;  %10740 = vmatmul.mubr.bf16.gmra.mrb[100].mxu1 %v9612_v58 }
 0x9f4   : > { %v7400_v24 = vmax.f32 %v7398_v52, %v14570_v49  ;;  %v14572_v16 = vadd.f32 %v7277_v15, %v21273_v50  ;;  %v7279_v21 = vpop.f32.mrb[111].mxu0 }
 0x9f5   : > { %v7421_v40 = vmax.f32 %v7419_v27, %v14571_v47  ;;  %v14573_v42 = vadd.f32 %v7279_v21, %v21277_v60  ;;  %v15893_v21 = vld [vmem:[%s22025_s19 + $0x8] ss:$16 sps:$4 sm:$0xff]  }
 0x9f6   : > { %v7401_v6 = vmax.f32 %v7399_v39, %v14572_v16 }
 0x9f7   : > { %v7422_v25 = vmax.f32 %v7420_v12, %v14573_v42 }
 0x9f9   : > { %v7283_v32 = vpop.f32.mrb[112].mxu0 }
 0x9fa   : > { %v14574_v63 = vadd.f32 %v7283_v32, %v21273_v50  ;;  %v7285_v29 = vpop.f32.mrb[113].mxu0 }
 0x9fb   : > { %v14575_v53 = vadd.f32 %v7285_v29, %v21277_v60  ;;  %v7287_v34 = vpop.f32.mrb[114].mxu0  ;;  %v16395_v29 = vmov 1966171168  }
 0x9fc   : > { %v7402_v19 = vmax.f32 %v7400_v24, %v14574_v63  ;;  %v14576_v41 = vadd.f32 %v7287_v34, %v21273_v50  ;;  %v7289_v5 = vpop.f32.mrb[115].mxu0 }
 0x9fd   : > { %v7423_v51 = vmax.f32 %v7421_v40, %v14575_v53  ;;  %v14577_v9 = vadd.f32 %v7289_v5, %v21277_v60  ;;  %v15895_v40 = vld [vmem:[%s22025_s19 + $0xc] ss:$16 sps:$4 sm:$0xff]   ;;  %v7443_v53 = vunpack.c.l.s4 %v16395_v29 }
 0x9fe   : > { %v7403_v10 = vmax.f32 %v7401_v6, %v14576_v41  ;;  %11984 = vmatprep.subr.bf16.mxu0 %v15895_v40 }
 0x9ff   : > { %v7424_v58 = vmax.f32 %v7422_v25, %v14577_v9  ;;  %11985 = vmatpush1.bf16.msra.mxu0 %v15893_v21  ;;  %v7444_v9 = vunpack.c.0.s8 %v7443_v53 }
 0xa01   : > { %v7293_v43 = vpop.f32.mrb[116].mxu0 }
 0xa02   : > { %v14578_v33 = vadd.f32 %v7293_v43, %v21273_v50  ;;  %v7295_v2 = vpop.f32.mrb[117].mxu0  ;;  %v15896_v43 = vld [vmem:[%s22025_s19 + $0x28] ss:$16 sps:$4 sm:$0xff]  }
 0xa03   : > { %v14579_v26 = vadd.f32 %v7295_v2, %v21277_v60  ;;  %v7297_v48 = vpop.f32.mrb[118].mxu0 }
 0xa04   : > { %v7404_v8 = vmax.f32 %v7402_v19, %v14578_v33  ;;  %v14580_v18 = vadd.f32 %v7297_v48, %v21273_v50  ;;  %v7299_v1 = vpop.f32.mrb[119].mxu0  ;;  %v15898_v33 = vld [vmem:[%s22025_s19 + $0x2c] ss:$16 sps:$4 sm:$0xff]  }
 0xa05   : > { %v7425_v17 = vmax.f32 %v7423_v51, %v14579_v26  ;;  %v14581_v56 = vadd.f32 %v7299_v1, %v21277_v60  ;;  %11986 = vmatprep.subr.bf16.mxu0 %v15898_v33  ;;  %v15899_v1 = vld [vmem:[%s22025_s19 + $0x48] ss:$16 sps:$4 sm:$0xff]   ;;  %v15904_v33 = vld [vmem:[%s22025_s19 + $0x6c] ss:$16 sps:$4 sm:$0xff]  }
 0xa06   : > { %v7405_v45 = vmax.f32 %v7403_v10, %v14580_v18  ;;  %11987 = vmatpush1.bf16.msra.mxu0 %v15896_v43  ;;  %v15902_v43 = vld [vmem:[%s22025_s19 + $0x68] ss:$16 sps:$4 sm:$0xff]  }
 0xa07   : > { %v7426_v13 = vmax.f32 %v7424_v58, %v14581_v56  ;;  %v21333_v56 = vsub.s32 %v7444_v9, %v22671_v14 }
 0xa09   : > { %v7303_v7 = vpop.f32.mrb[120].mxu0 }
 0xa0a   : > { %v14582_v11 = vadd.f32 %v7303_v7, %v21273_v50  ;;  %v7305_v59 = vpop.f32.mrb[121].mxu0 }
 0xa0b   : > { %v14583_v20 = vadd.f32 %v7305_v59, %v21277_v60  ;;  %v7307_v28 = vpop.f32.mrb[122].mxu0 }
 0xa0c   : > { %v7406_v22 = vmax.f32 %v7404_v8, %v14582_v11  ;;  %v14584_v31 = vadd.f32 %v7307_v28, %v21273_v50  ;;  %v7309_v44 = vpop.f32.mrb[123].mxu0 }
 0xa0d   : > { %v7427_v61 = vmax.f32 %v7425_v17, %v14583_v20  ;;  %v14585_v62 = vadd.f32 %v7309_v44, %v21277_v60  ;;  %v15901_v17 = vld [vmem:[%s22025_s19 + $0x4c] ss:$16 sps:$4 sm:$0xff]  }
 0xa0e   : > { %v7407_v57 = vmax.f32 %v7405_v45, %v14584_v31  ;;  %11988 = vmatprep.subr.bf16.mxu0 %v15901_v17 }
 0xa0f   : > { %v7428_v4 = vmax.f32 %v7426_v13, %v14585_v62  ;;  %11989 = vmatpush1.bf16.msra.mxu0 %v15899_v1 }
 0xa10   : > { %11990 = vmatprep.subr.bf16.mxu0 %v15904_v33 }
 0xa11   : > { %v7313_v3 = vpop.f32.mrb[124].mxu0 }
 0xa12   : > { %v14586_v30 = vadd.f32 %v7313_v3, %v21273_v50  ;;  %v7315_v35 = vpop.f32.mrb[125].mxu0 }
 0xa13   : > { %v14587_v52 = vadd.f32 %v7315_v35, %v21277_v60  ;;  %v7317_v54 = vpop.f32.mrb[126].mxu0  ;;  %11991 = vmatpush1.bf16.msra.mxu0 %v15902_v43 }
 0xa14   : > { %v7408_v55 = vmax.f32 %v7406_v22, %v14586_v30  ;;  %v14588_v46 = vadd.f32 %v7317_v54, %v21273_v50  ;;  %v7319_v27 = vpop.f32.mrb[127].mxu0  ;;  %v22673_v22 = vlaneseq }
 0xa15   : > { %v7429_v0 = vmax.f32 %v7427_v61, %v14587_v52  ;;  %v14589_v39 = vadd.f32 %v7319_v27, %v21277_v60 }
 0xa16   : > { %v7410_v12 = vsel %vm7409_vm1, %v14588_v46, -inf  ;;  %vm21339_vm2 = vcmp.lt.s32.totalorder %v22673_v22, 256 }
 0xa17   : > { %v7411_v23 = vmax.f32 %v7407_v57, %v7410_v12  ;;  %v7430_v49 = vsel %vm7409_vm1, %v14589_v39, -inf }
 0xa18   : > { %v7431_v38 = vmax.f32 %v7428_v4, %v7430_v49 }
 0xa19   : > { %v7412_v47 = vmax.f32 %v7408_v55, %v7411_v23  ;;  %v7323_v15 = vpop.f32.mrb[176].mxu0 }
 0xa1a   : > { %v7432_v24 = vmax.f32 %v7429_v0, %v7431_v38  ;;  %v7324_v16 = vpop.f32.mrb[177].mxu0 }
 0xa1b   : > { %v7413_v42 = vrot.slane %v7412_v47, 4  ;;  %v7325_v6 = vpop.f32.mrb[178].mxu0 }
 0xa1c   : > { %v7433_v25 = vrot.slane %v7432_v24, 4  ;;  %v7326_v32 = vpop.f32.mrb[179].mxu0 }
 0xa1d   : > { %v7414_v63 = vmax.f32 %v7412_v47, %v7413_v42 }
 0xa1e   : > { %v7434_v34 = vmax.f32 %v7432_v24, %v7433_v25 }
 0xa1f   : > { %v7415_v19 = vrot.slane %v7414_v63, 2 }
 0xa20   : > { %v7435_v41 = vrot.slane %v7434_v34, 2 }
 0xa21   : > { %v7416_v5 = vmax.f32 %v7414_v63, %v7415_v19  ;;  %v7329_v51 = vpop.f32.mrb[132].mxu0 }
 0xa22   : > { %v7436_v10 = vmax.f32 %v7434_v34, %v7435_v41  ;;  %v7331_v58 = vpop.f32.mrb[133].mxu0  ;;  %v14590_v59 = vadd.f32 %v7329_v51, %v21273_v50 }
 0xa23   : > { %v7417_v2 = vrot.slane %v7416_v5, 1  ;;  %v7333_v26 = vpop.f32.mrb[134].mxu0  ;;  %v14591_v44 = vadd.f32 %v7331_v58, %v21277_v60 }
 0xa24   : > { %v7437_v48 = vrot.slane %v7436_v10, 1  ;;  %v7335_v8 = vpop.f32.mrb[135].mxu0  ;;  %v14592_v4 = vadd.f32 %v7333_v26, %v21273_v50 }
 0xa25   : > { %v7418_v18 = vmax.f32 %v7416_v5, %v7417_v2  ;;  %v14593_v52 = vadd.f32 %v7335_v8, %v21277_v60  ;;  %v15907_v8 = vld [vmem:[%s22025_s19 + $0x4] ss:$16 sps:$4 sm:$0xff]  }
 0xa26   : > { %v7438_v45 = vmax.f32 %v7436_v10, %v7437_v48  ;;  %v15905_v48 = vld [vmem:[%s22025_s19] ss:$16 sps:$4 sm:$0xff]   ;;  %11861 = vmatprep.subr.bf16.mxu1 %v15907_v8 }
 0xa27   : > { %11862 = vmatpush1.bf16.msra.mxu1 %v15905_v48 }
 0xa28   : > { %v7441_v13 = vcombine.low %v7418_v18, %v7438_v45  ;;  %v15910_v45 = vld [vmem:[%s22025_s19 + $0x24] ss:$16 sps:$4 sm:$0xff]  }
 0xa29   : > { %v7339_v7 = vpop.f32.mrb[136].mxu0  ;;  %11863 = vmatprep.subr.bf16.mxu1 %v15910_v45  ;;  %v15937_v45 = vld [vmem:[%s22025_s19 + $0xe4] ss:$16 sps:$4 sm:$0xff]  }
 0xa2a   : > { %v7448_v11 = vrot.slane %v7441_v13, %v21333_v56  ;;  %v14594_v20 = vadd.f32 %v7339_v7, %v21273_v50  ;;  %v7341_v28 = vpop.f32.mrb[137].mxu0 }
 0xa2b   : > { %v14595_v61 = vadd.f32 %v7341_v28, %v21277_v60  ;;  %v7343_v62 = vpop.f32.mrb[138].mxu0  ;;  %v15908_v28 = vld [vmem:[%s22025_s19 + $0x20] ss:$16 sps:$4 sm:$0xff]  }
 0xa2c   : > { %v7455_v57 = vrot.slane %v7448_v11, %v21333_v56  ;;  %v7462_v3 = vmax.f32 %v14590_v59, %v14594_v20  ;;  %v14596_v30 = vadd.f32 %v7343_v62, %v21273_v50  ;;  %v7345_v35 = vpop.f32.mrb[139].mxu0  ;;  %v15911_v11 = vld [vmem:[%s22025_s19 + $0x88] ss:$16 sps:$4 sm:$0xff]   ;;  %v15913_v59 = vld [vmem:[%s22025_s19 + $0x8c] ss:$16 sps:$4 sm:$0xff]   ;;  %11864 = vmatpush1.bf16.msra.mxu1 %v15908_v28 }
 0xa2d   : > { %v7482_v54 = vmax.f32 %v14591_v44, %v14595_v61  ;;  %v14597_v55 = vadd.f32 %v7345_v35, %v21277_v60  ;;  %11992 = vmatprep.subr.bf16.mxu0 %v15913_v59  ;;  %v15916_v44 = vld [vmem:[%s22025_s19 + $0x44] ss:$16 sps:$4 sm:$0xff]   ;;  %v15922_v61 = vld [vmem:[%s22025_s19 + $0xac] ss:$16 sps:$4 sm:$0xff]  }
 0xa2e   : > { %7461 = vst.msk [vmem:[#allocation2] ss:$2 sm:$0x3] %vm21339_vm2, %v7455_v57  ;;  %v7463_v46 = vmax.f32 %v14592_v4, %v14596_v30  ;;  %11993 = vmatpush1.bf16.msra.mxu0 %v15911_v11  ;;  %v15920_v57 = vld [vmem:[%s22025_s19 + $0xa8] ss:$16 sps:$4 sm:$0xff]   ;;  %11865 = vmatprep.subr.bf16.mxu1 %v15916_v44 }
 0xa2f   : > { %v7483_v27 = vmax.f32 %v14593_v52, %v14597_v55  ;;  %v15914_v30 = vld [vmem:[%s22025_s19 + $0x40] ss:$16 sps:$4 sm:$0xff]   ;;  %11994 = vmatprep.subr.bf16.mxu0 %v15922_v61  ;;  %v15931_v35 = vld [vmem:[%s22025_s19 + $0xcc] ss:$16 sps:$4 sm:$0xff]   ;;  %v15919_v55 = vld [vmem:[%s22025_s19 + $0x64] ss:$16 sps:$4 sm:$0xff]  }
 0xa30   : > { %11866 = vmatpush1.bf16.msra.mxu1 %v15914_v30  ;;  %v15940_v11 = vld [vmem:[%s22025_s19 + $0xec] ss:$16 sps:$4 sm:$0xff]   ;;  %v15943_v44 = vld [vmem:[%s22025_s19 + $0x104] ss:$16 sps:$4 sm:$0xff]   ;;  %v15944_v61 = vld [vmem:[%s22025_s19 + $0x108] ss:$16 sps:$4 sm:$0xff]  }
 0xa31   : > { %v7349_v0 = vpop.f32.mrb[140].mxu0  ;;  %11867 = vmatprep.subr.bf16.mxu1 %v15919_v55  ;;  %v15946_v28 = vld [vmem:[%s22025_s19 + $0x10c] ss:$16 sps:$4 sm:$0xff]   ;;  %v15949_v30 = vld [vmem:[%s22025_s19 + $0x124] ss:$16 sps:$4 sm:$0xff]  }
 0xa32   : > { %v14598_v39 = vadd.f32 %v7349_v0, %v21273_v50  ;;  %v7351_v12 = vpop.f32.mrb[141].mxu0  ;;  %11995 = vmatpush1.bf16.msra.mxu0 %v15920_v57  ;;  %v15952_v57 = vld [vmem:[%s22025_s19 + $0x12c] ss:$16 sps:$4 sm:$0xff]   ;;  %v15947_v55 = vld [vmem:[%s22025_s19 + $0x120] ss:$16 sps:$4 sm:$0xff]  }
 0xa33   : > { %v14599_v23 = vadd.f32 %v7351_v12, %v21277_v60  ;;  %v7353_v49 = vpop.f32.mrb[142].mxu0  ;;  %11996 = vmatprep.subr.bf16.mxu0 %v15931_v35  ;;  %v15950_v35 = vld [vmem:[%s22025_s19 + $0x128] ss:$16 sps:$4 sm:$0xff]  }
 0xa34   : > { %v7464_v38 = vmax.f32 %v7462_v3, %v14598_v39  ;;  %v14600_v47 = vadd.f32 %v7353_v49, %v21273_v50  ;;  %v7355_v15 = vpop.f32.mrb[143].mxu0 }
 0xa35   : > { %v7484_v24 = vmax.f32 %v7482_v54, %v14599_v23  ;;  %v14601_v16 = vadd.f32 %v7355_v15, %v21277_v60  ;;  %v15929_v23 = vld [vmem:[%s22025_s19 + $0xc8] ss:$16 sps:$4 sm:$0xff]   ;;  %v15925_v15 = vld [vmem:[%s22025_s19 + $0x84] ss:$16 sps:$4 sm:$0xff]  }
 0xa36   : > { %v7465_v21 = vmax.f32 %v7463_v46, %v14600_v47  ;;  %11997 = vmatpush1.bf16.msra.mxu0 %v15929_v23  ;;  %v15962_v23 = vld [vmem:[%s22025_s19 + $0x168] ss:$16 sps:$4 sm:$0xff]  }
 0xa37   : > { %v7485_v40 = vmax.f32 %v7483_v27, %v14601_v16  ;;  %11998 = vmatprep.subr.bf16.mxu0 %v15940_v11 }
 0xa39   : > { %v7359_v42 = vpop.f32.mrb[144].mxu0 }
 0xa3a   : > { %v14602_v6 = vadd.f32 %v7359_v42, %v21273_v50  ;;  %v7361_v25 = vpop.f32.mrb[145].mxu0 }
 0xa3b   : > { %v14603_v32 = vadd.f32 %v7361_v25, %v21277_v60  ;;  %v7363_v63 = vpop.f32.mrb[146].mxu0  ;;  %v15928_v25 = vld [vmem:[%s22025_s19 + $0xa4] ss:$16 sps:$4 sm:$0xff]  }
 0xa3c   : > { %v7466_v29 = vmax.f32 %v7464_v38, %v14602_v6  ;;  %v14604_v53 = vadd.f32 %v7363_v63, %v21273_v50  ;;  %v7365_v34 = vpop.f32.mrb[147].mxu0  ;;  %v15917_v38 = vld [vmem:[%s22025_s19 + $0x60] ss:$16 sps:$4 sm:$0xff]  }
 0xa3d   : > { %v7486_v19 = vmax.f32 %v7484_v24, %v14603_v32  ;;  %v14605_v41 = vadd.f32 %v7365_v34, %v21277_v60  ;;  %11868 = vmatpush1.bf16.msra.mxu1 %v15917_v38  ;;  %v15959_v38 = vld [vmem:[%s22025_s19 + $0x160] ss:$16 sps:$4 sm:$0xff]  }
 0xa3e   : > { %v7467_v5 = vmax.f32 %v7465_v21, %v14604_v53  ;;  %11869 = vmatprep.subr.bf16.mxu1 %v15925_v15  ;;  %v15968_v15 = vld [vmem:[%s22025_s19 + $0x188] ss:$16 sps:$4 sm:$0xff]  }
 0xa3f   : > { %v7487_v51 = vmax.f32 %v7485_v40, %v14605_v41  ;;  %v15923_v40 = vld [vmem:[%s22025_s19 + $0x80] ss:$16 sps:$4 sm:$0xff]  }
 0xa40   : > { %v15926_v41 = vld [vmem:[%s22025_s19 + $0xa0] ss:$16 sps:$4 sm:$0xff]  }
 0xa41   : > { %v7369_v9 = vpop.f32.mrb[148].mxu0  ;;  %11870 = vmatpush1.bf16.msra.mxu1 %v15923_v40  ;;  %v15974_v40 = vld [vmem:[%s22025_s19 + $0x1a8] ss:$16 sps:$4 sm:$0xff]  }
 0xa42   : > { %v14606_v10 = vadd.f32 %v7369_v9, %v21273_v50  ;;  %v7371_v58 = vpop.f32.mrb[149].mxu0  ;;  %11871 = vmatprep.subr.bf16.mxu1 %v15928_v25  ;;  %v15979_v25 = vld [vmem:[%s22025_s19 + $0x1c4] ss:$16 sps:$4 sm:$0xff]  }
 0xa43   : > { %v14607_v2 = vadd.f32 %v7371_v58, %v21277_v60  ;;  %v7373_v26 = vpop.f32.mrb[150].mxu0 }
 0xa44   : > { %v7468_v18 = vmax.f32 %v7466_v29, %v14606_v10  ;;  %v14608_v1 = vadd.f32 %v7373_v26, %v21273_v50  ;;  %v7375_v17 = vpop.f32.mrb[151].mxu0 }
 0xa45   : > { %v7488_v13 = vmax.f32 %v7486_v19, %v14607_v2  ;;  %v14609_v7 = vadd.f32 %v7375_v17, %v21277_v60  ;;  %11872 = vmatpush1.bf16.msra.mxu1 %v15926_v41  ;;  %v15983_v41 = vld [vmem:[%s22025_s19 + $0x1e0] ss:$16 sps:$4 sm:$0xff]  }
 0xa46   : > { %v7469_v20 = vmax.f32 %v7467_v5, %v14608_v1  ;;  %v15934_v1 = vld [vmem:[%s22025_s19 + $0xc4] ss:$16 sps:$4 sm:$0xff]  }
 0xa47   : > { %v7489_v22 = vmax.f32 %v7487_v51, %v14609_v7  ;;  %11873 = vmatprep.subr.bf16.mxu1 %v15934_v1 }
 0xa49   : > { %v7379_v62 = vpop.f32.mrb[152].mxu0 }
 0xa4a   : > { %v14610_v4 = vadd.f32 %v7379_v62, %v21273_v50  ;;  %v7381_v3 = vpop.f32.mrb[153].mxu0 }
 0xa4b   : > { %v14611_v52 = vadd.f32 %v7381_v3, %v21277_v60  ;;  %v7383_v54 = vpop.f32.mrb[154].mxu0 }
 0xa4c   : > { %v7470_v46 = vmax.f32 %v7468_v18, %v14610_v4  ;;  %v14612_v27 = vadd.f32 %v7383_v54, %v21273_v50  ;;  %v7385_v0 = vpop.f32.mrb[155].mxu0  ;;  %v15932_v18 = vld [vmem:[%s22025_s19 + $0xc0] ss:$16 sps:$4 sm:$0xff]   ;;  %v15958_v54 = vld [vmem:[%s22025_s19 + $0x14c] ss:$16 sps:$4 sm:$0xff]  }
 0xa4d   : > { %v7490_v39 = vmax.f32 %v7488_v13, %v14611_v52  ;;  %v14613_v12 = vadd.f32 %v7385_v0, %v21277_v60  ;;  %v15938_v13 = vld [vmem:[%s22025_s19 + $0xe8] ss:$16 sps:$4 sm:$0xff]   ;;  %11874 = vmatpush1.bf16.msra.mxu1 %v15932_v18  ;;  %v15941_v4 = vld [vmem:[%s22025_s19 + $0x100] ss:$16 sps:$4 sm:$0xff]   ;;  %v15964_v0 = vld [vmem:[%s22025_s19 + $0x16c] ss:$16 sps:$4 sm:$0xff]  }
 0xa4e   : > { %v7471_v49 = vmax.f32 %v7469_v20, %v14612_v27  ;;  %v15935_v20 = vld [vmem:[%s22025_s19 + $0xe0] ss:$16 sps:$4 sm:$0xff]   ;;  %11875 = vmatprep.subr.bf16.mxu1 %v15937_v45  ;;  %11999 = vmatpush1.bf16.msra.mxu0 %v15938_v13  ;;  %v15956_v27 = vld [vmem:[%s22025_s19 + $0x148] ss:$16 sps:$4 sm:$0xff]  }
 0xa4f   : > { %v7491_v47 = vmax.f32 %v7489_v22, %v14613_v12  ;;  %12000 = vmatprep.subr.bf16.mxu0 %v15946_v28  ;;  %v15961_v12 = vld [vmem:[%s22025_s19 + $0x164] ss:$16 sps:$4 sm:$0xff]  }
 0xa51   : > { %v7389_v24 = vpop.f32.mrb[156].mxu0  ;;  %11876 = vmatpush1.bf16.msra.mxu1 %v15935_v20 }
 0xa52   : > { %v14614_v16 = vadd.f32 %v7389_v24, %v21273_v50  ;;  %v7391_v21 = vpop.f32.mrb[157].mxu0  ;;  %11877 = vmatprep.subr.bf16.mxu1 %v15943_v44  ;;  %12001 = vmatpush1.bf16.msra.mxu0 %v15944_v61  ;;  %v15976_v24 = vld [vmem:[%s22025_s19 + $0x1ac] ss:$16 sps:$4 sm:$0xff]  }
 0xa53   : > { %v14615_v42 = vadd.f32 %v7391_v21, %v21277_v60  ;;  %v7393_v6 = vpop.f32.mrb[158].mxu0  ;;  %12002 = vmatprep.subr.bf16.mxu0 %v15952_v57  ;;  %v15973_v21 = vld [vmem:[%s22025_s19 + $0x1a4] ss:$16 sps:$4 sm:$0xff]  }
 0xa54   : > { %v7472_v32 = vmax.f32 %v7470_v46, %v14614_v16  ;;  %v14616_v63 = vadd.f32 %v7393_v6, %v21273_v50  ;;  %v7395_v29 = vpop.f32.mrb[159].mxu0  ;;  %v15955_v46 = vld [vmem:[%s22025_s19 + $0x144] ss:$16 sps:$4 sm:$0xff]   ;;  %v15965_v16 = vld [vmem:[%s22025_s19 + $0x180] ss:$16 sps:$4 sm:$0xff]  }
 0xa55   : > { %v7492_v53 = vmax.f32 %v7490_v39, %v14615_v42  ;;  %v14617_v34 = vadd.f32 %v7395_v29, %v21277_v60  ;;  %11878 = vmatpush1.bf16.msra.mxu1 %v15941_v4  ;;  %v15953_v39 = vld [vmem:[%s22025_s19 + $0x140] ss:$16 sps:$4 sm:$0xff]   ;;  %v15982_v42 = vld [vmem:[%s22025_s19 + $0x1cc] ss:$16 sps:$4 sm:$0xff]  }
 0xa56   : > { %v7473_v19 = vsel %vm7409_vm1, %v14616_v63, -inf  ;;  %11879 = vmatprep.subr.bf16.mxu1 %v15949_v30  ;;  %12003 = vmatpush1.bf16.msra.mxu0 %v15950_v35  ;;  %v15971_v6 = vld [vmem:[%s22025_s19 + $0x1a0] ss:$16 sps:$4 sm:$0xff]   ;;  %v15988_v63 = vld [vmem:[%s22025_s19 + $0x1ec] ss:$16 sps:$4 sm:$0xff]  }
 0xa57   : > { %v7474_v5 = vmax.f32 %v7471_v49, %v7473_v19  ;;  %v7493_v51 = vsel %vm7409_vm1, %v14617_v34, -inf  ;;  %12004 = vmatprep.subr.bf16.mxu0 %v15958_v54  ;;  %v15970_v49 = vld [vmem:[%s22025_s19 + $0x18c] ss:$16 sps:$4 sm:$0xff]   ;;  %v15977_v29 = vld [vmem:[%s22025_s19 + $0x1c0] ss:$16 sps:$4 sm:$0xff]  }
 0xa58   : > { %v7494_v9 = vmax.f32 %v7491_v47, %v7493_v51  ;;  %v15967_v47 = vld [vmem:[%s22025_s19 + $0x184] ss:$16 sps:$4 sm:$0xff]   ;;  %v15986_v34 = vld [vmem:[%s22025_s19 + $0x1e8] ss:$16 sps:$4 sm:$0xff]   ;;  %v15994_v19 = vld [vmem:[%s22025_s19 + $0x20c] ss:$16 sps:$4 sm:$0xff]  }
 0xa59   : > { %v7475_v10 = vmax.f32 %v7472_v32, %v7474_v5  ;;  %11880 = vmatpush1.bf16.msra.mxu1 %v15947_v55  ;;  %v15980_v32 = vld [vmem:[%s22025_s19 + $0x1c8] ss:$16 sps:$4 sm:$0xff]   ;;  %v15991_v5 = vld [vmem:[%s22025_s19 + $0x204] ss:$16 sps:$4 sm:$0xff]  }
 0xa5a   : > { %v7495_v58 = vmax.f32 %v7492_v53, %v7494_v9  ;;  %11881 = vmatprep.subr.bf16.mxu1 %v15955_v46  ;;  %12005 = vmatpush1.bf16.msra.mxu0 %v15956_v27  ;;  %v15985_v53 = vld [vmem:[%s22025_s19 + $0x1e4] ss:$16 sps:$4 sm:$0xff]  }
 0xa5b   : > { %v7476_v50 = vrot.slane %v7475_v10, 4  ;;  %12006 = vmatprep.subr.bf16.mxu0 %v15964_v0 }
 0xa5c   : > { %v7496_v43 = vrot.slane %v7495_v58, 4 }
 0xa5d   : > { %v7477_v33 = vmax.f32 %v7475_v10, %v7476_v50  ;;  %11882 = vmatpush1.bf16.msra.mxu1 %v15953_v39  ;;  %v7796_v10 = vld [vmem:[#allocation11] sm:$0x3] }
 0xa5e   : > { %v7497_v2 = vmax.f32 %v7495_v58, %v7496_v43  ;;  %11883 = vmatprep.subr.bf16.mxu1 %v15961_v12  ;;  %12007 = vmatpush1.bf16.msra.mxu0 %v15962_v23  ;;  %v21559_v43 = vrot.slane %v7796_v10, %v22672_v37 }
 0xa5f   : > { %v7478_v60 = vrot.slane %v7477_v33, 2  ;;  %12008 = vmatprep.subr.bf16.mxu0 %v15970_v49 }
 0xa60   : > { %v7498_v26 = vrot.slane %v7497_v2, 2 }
 0xa61   : > { %v7479_v48 = vmax.f32 %v7477_v33, %v7478_v60  ;;  %11884 = vmatpush1.bf16.msra.mxu1 %v15959_v38  ;;  %v21562_v33 = vrot.slane %v7796_v10, %v21269_v36 }
 0xa62   : > { %v7499_v8 = vmax.f32 %v7497_v2, %v7498_v26  ;;  %11885 = vmatprep.subr.bf16.mxu1 %v15967_v47  ;;  %12009 = vmatpush1.bf16.msra.mxu0 %v15968_v15 }
 0xa63   : > { %v7480_v17 = vrot.slane %v7479_v48, 1  ;;  %12010 = vmatprep.subr.bf16.mxu0 %v15976_v24 }
 0xa64   : > { %v7500_v7 = vrot.slane %v7499_v8, 1 }
 0xa65   : > { %v7481_v59 = vmax.f32 %v7479_v48, %v7480_v17  ;;  %11886 = vmatpush1.bf16.msra.mxu1 %v15965_v16 }
 0xa66   : > { %v7501_v22 = vmax.f32 %v7499_v8, %v7500_v7  ;;  %11887 = vmatprep.subr.bf16.mxu1 %v15973_v21  ;;  %12011 = vmatpush1.bf16.msra.mxu0 %v15974_v40 }
 0xa67   : > { %12012 = vmatprep.subr.bf16.mxu0 %v15982_v42 }
 0xa68   : > { %v7504_v62 = vcombine.low %v7481_v59, %v7501_v22 }
 0xa69   : > { %11888 = vmatpush1.bf16.msra.mxu1 %v15971_v6 }
 0xa6a   : > { %v7511_v3 = vrot.slane %v7504_v62, %v21333_v56  ;;  %11889 = vmatprep.subr.bf16.mxu1 %v15979_v25  ;;  %12013 = vmatpush1.bf16.msra.mxu0 %v15980_v32 }
 0xa6b   : > { %12014 = vmatprep.subr.bf16.mxu0 %v15988_v63 }
 0xa6c   : > { %v7518_v52 = vrot.slane %v7511_v3, %v21333_v56 }
 0xa6d   : > { %11890 = vmatpush1.bf16.msra.mxu1 %v15977_v29 }
 0xa6e   : > { %7521 = vst.msk [vmem:[#allocation2 + $0x1] ss:$2 sm:$0x3] %vm21339_vm2, %v7518_v52  ;;  %11891 = vmatprep.subr.bf16.mxu1 %v15985_v53  ;;  %12015 = vmatpush1.bf16.msra.mxu0 %v15986_v34 }
 0xa6f   : > { %12025 = vmatprep.subr.bf16.mxu0 %v15994_v19 }
 0xa71   : > { %11892 = vmatpush1.bf16.msra.mxu1 %v15983_v41 }
 0xa72   : > { %11902 = vmatprep.subr.bf16.mxu1 %v15991_v5 }
 0xa8e   : > { %v10673_v51 = vpop.f32.mrb[72].mxu1 }
 0xa8f   : > { %v10675_v9 = vpop.f32.mrb[73].mxu1  ;;  %v14618_v60 = vadd.f32 %v10673_v51, %v21559_v43 }
 0xa90   : > { %v10677_v58 = vpop.f32.mrb[74].mxu1  ;;  %v14619_v8 = vadd.f32 %v10675_v9, %v21562_v33 }
 0xa91   : > { %v10679_v50 = vpop.f32.mrb[75].mxu1  ;;  %v14620_v17 = vadd.f32 %v10677_v58, %v21559_v43 }
 0xa92   : > { %v14621_v11 = vadd.f32 %v10679_v50, %v21562_v33 }
 0xa96   : > { %v10683_v2 = vpop.f32.mrb[76].mxu1 }
 0xa97   : > { %v14622_v26 = vadd.f32 %v10683_v2, %v21559_v43  ;;  %v10685_v48 = vpop.f32.mrb[77].mxu1 }
 0xa98   : > { %v14623_v18 = vadd.f32 %v10685_v48, %v21562_v33  ;;  %v10687_v1 = vpop.f32.mrb[78].mxu1 }
 0xa99   : > { %v10748_v45 = vmax.f32 %v14618_v60, %v14622_v26  ;;  %v14624_v13 = vadd.f32 %v10687_v1, %v21559_v43  ;;  %v10689_v7 = vpop.f32.mrb[79].mxu1 }
 0xa9a   : > { %v10762_v59 = vmax.f32 %v14619_v8, %v14623_v18  ;;  %v14625_v20 = vadd.f32 %v10689_v7, %v21562_v33 }
 0xa9b   : > { %v10749_v28 = vmax.f32 %v14620_v17, %v14624_v13 }
 0xa9c   : > { %v10763_v22 = vmax.f32 %v14621_v11, %v14625_v20 }
 0xa9e   : > { %v10693_v44 = vpop.f32.mrb[80].mxu1 }
 0xa9f   : > { %v14626_v61 = vadd.f32 %v10693_v44, %v21559_v43  ;;  %v10695_v62 = vpop.f32.mrb[81].mxu1 }
 0xaa0   : > { %v14627_v57 = vadd.f32 %v10695_v62, %v21562_v33  ;;  %v10697_v4 = vpop.f32.mrb[82].mxu1 }
 0xaa1   : > { %v10750_v3 = vmax.f32 %v10748_v45, %v14626_v61  ;;  %v14628_v30 = vadd.f32 %v10697_v4, %v21559_v43  ;;  %v10699_v35 = vpop.f32.mrb[83].mxu1 }
 0xaa2   : > { %v10764_v52 = vmax.f32 %v10762_v59, %v14627_v57  ;;  %v14629_v54 = vadd.f32 %v10699_v35, %v21562_v33 }
 0xaa3   : > { %v10751_v55 = vmax.f32 %v10749_v28, %v14628_v30 }
 0xaa4   : > { %v10765_v46 = vmax.f32 %v10763_v22, %v14629_v54 }
 0xaa6   : > { %v10703_v27 = vpop.f32.mrb[84].mxu1 }
 0xaa7   : > { %v14630_v0 = vadd.f32 %v10703_v27, %v21559_v43  ;;  %v10705_v39 = vpop.f32.mrb[85].mxu1 }
 0xaa8   : > { %v14631_v12 = vadd.f32 %v10705_v39, %v21562_v33  ;;  %v10707_v23 = vpop.f32.mrb[86].mxu1 }
 0xaa9   : > { %v10753_v49 = vsel %vm10752_vm3, %v14630_v0, -inf  ;;  %v10708_v38 = vpop.f32.mrb[87].mxu1 }
 0xaaa   : > { %v10754_v47 = vmax.f32 %v10750_v3, %v10753_v49  ;;  %v10766_v15 = vsel %vm10752_vm3, %v14631_v12, -inf }
 0xaab   : > { %v10767_v24 = vmax.f32 %v10764_v52, %v10766_v15 }
 0xaac   : > { %v10755_v16 = vmax.f32 %v10754_v47, %v10751_v55 }
 0xaad   : > { %v10768_v21 = vmax.f32 %v10767_v24, %v10765_v46 }
 0xaae   : > { %v10756_v40 = vrot.slane %v10755_v16, 4  ;;  %v10711_v42 = vpop.f32.mrb[88].mxu1 }
 0xaaf   : > { %v10769_v6 = vrot.slane %v10768_v21, 4  ;;  %v10713_v25 = vpop.f32.mrb[89].mxu1  ;;  %v14632_v58 = vadd.f32 %v10711_v42, %v21559_v43 }
 0xab0   : > { %v10757_v32 = vmax.f32 %v10755_v16, %v10756_v40  ;;  %v10715_v63 = vpop.f32.mrb[90].mxu1  ;;  %v14633_v26 = vadd.f32 %v10713_v25, %v21562_v33 }
 0xab1   : > { %v10770_v29 = vmax.f32 %v10768_v21, %v10769_v6  ;;  %v10717_v53 = vpop.f32.mrb[91].mxu1  ;;  %v14634_v1 = vadd.f32 %v10715_v63, %v21559_v43 }
 0xab2   : > { %v10758_v34 = vrot.slane %v10757_v32, 2  ;;  %v14635_v7 = vadd.f32 %v10717_v53, %v21562_v33 }
 0xab3   : > { %v10771_v19 = vrot.slane %v10770_v29, 2 }
 0xab4   : > { %v10759_v41 = vmax.f32 %v10757_v32, %v10758_v34 }
 0xab5   : > { %v10772_v5 = vmax.f32 %v10770_v29, %v10771_v19 }
 0xab6   : > { %v10760_v51 = vrot.slane %v10759_v41, 1  ;;  %v10721_v9 = vpop.f32.mrb[92].mxu1 }
 0xab7   : > { %v10773_v10 = vrot.slane %v10772_v5, 1  ;;  %v14636_v50 = vadd.f32 %v10721_v9, %v21559_v43  ;;  %v10723_v2 = vpop.f32.mrb[93].mxu1 }
 0xab8   : > { %v10761_v60 = vmax.f32 %v10759_v41, %v10760_v51  ;;  %v14637_v48 = vadd.f32 %v10723_v2, %v21562_v33  ;;  %v10725_v8 = vpop.f32.mrb[94].mxu1 }
 0xab9   : > { %v10774_v18 = vmax.f32 %v10772_v5, %v10773_v10  ;;  %v10795_v17 = vmax.f32 %v14632_v58, %v14636_v50  ;;  %v14638_v45 = vadd.f32 %v10725_v8, %v21559_v43  ;;  %v10727_v13 = vpop.f32.mrb[95].mxu1  ;;  %v16396_v10 = vmov 1983009808  }
 0xaba   : > { %v10808_v11 = vmax.f32 %v14633_v26, %v14637_v48  ;;  %v14639_v59 = vadd.f32 %v10727_v13, %v21562_v33  ;;  %v10847_v58 = vunpack.c.l.s4 %v16396_v10  ;;  %v16067_v10 = vld [vmem:[%s22025_s19 + $0x38c] ss:$16 sps:$4 sm:$0xff]  }
 0xabb   : > { %v10777_v20 = vcombine.low %v10761_v60, %v10774_v18  ;;  %v10796_v28 = vmax.f32 %v14634_v1, %v14638_v45  ;;  %v15989_v45 = vld [vmem:[%s22025_s19 + $0x200] ss:$16 sps:$4 sm:$0xff]  }
 0xabc   : > { %v10809_v22 = vmax.f32 %v14635_v7, %v14639_v59  ;;  %v10848_v2 = vunpack.c.0.s8 %v10847_v58  ;;  %v16001_v59 = vld [vmem:[%s22025_s19 + $0x22c] ss:$16 sps:$4 sm:$0xff]   ;;  %v16062_v58 = vld [vmem:[%s22025_s19 + $0x380] ss:$16 sps:$4 sm:$0xff]  }
 0xabd   : > { %v10784_v44 = vrot.slane %v10777_v20, %v21333_v56  ;;  %v15996_v20 = vld [vmem:[%s22025_s19 + $0x220] ss:$16 sps:$4 sm:$0xff]  }
 0xabe   : > { %v10731_v61 = vpop.f32.mrb[96].mxu1  ;;  %v10851_v60 = vsub.s32 %v10848_v2, %v22671_v14  ;;  %v16070_v2 = vld [vmem:[%s22025_s19 + $0x3a4] ss:$16 sps:$4 sm:$0xff]  }
 0xabf   : > { %v10791_v62 = vrot.slane %v10784_v44, %v21333_v56  ;;  %v14640_v57 = vadd.f32 %v10731_v61, %v21559_v43  ;;  %v10733_v4 = vpop.f32.mrb[97].mxu1  ;;  %v16007_v44 = vld [vmem:[%s22025_s19 + $0x24c] ss:$16 sps:$4 sm:$0xff]   ;;  %v16002_v61 = vld [vmem:[%s22025_s19 + $0x240] ss:$16 sps:$4 sm:$0xff]  }
 0xac0   : > { %v14641_v3 = vadd.f32 %v10733_v4, %v21562_v33  ;;  %v10735_v30 = vpop.f32.mrb[98].mxu1  ;;  %v16013_v4 = vld [vmem:[%s22025_s19 + $0x26c] ss:$16 sps:$4 sm:$0xff]  }
 0xac1   : > { %10794 = vst.msk [vmem:[#allocation2 + $0x4] ss:$2 sm:$0x3] %vm21339_vm2, %v10791_v62  ;;  %v10797_v35 = vmax.f32 %v10795_v17, %v14640_v57  ;;  %v14642_v52 = vadd.f32 %v10735_v30, %v21559_v43  ;;  %v10737_v54 = vpop.f32.mrb[99].mxu1  ;;  %v16005_v62 = vld [vmem:[%s22025_s19 + $0x248] ss:$16 sps:$4 sm:$0xff]  }
 0xac2   : > { %v10810_v55 = vmax.f32 %v10808_v11, %v14641_v3  ;;  %v14643_v46 = vadd.f32 %v10737_v54, %v21562_v33  ;;  %v15998_v11 = vld [vmem:[%s22025_s19 + $0x224] ss:$16 sps:$4 sm:$0xff]   ;;  %v16008_v3 = vld [vmem:[%s22025_s19 + $0x260] ss:$16 sps:$4 sm:$0xff]   ;;  %v16011_v30 = vld [vmem:[%s22025_s19 + $0x268] ss:$16 sps:$4 sm:$0xff]  }
 0xac3   : > { %v10798_v27 = vmax.f32 %v10796_v28, %v14642_v52  ;;  %v15999_v28 = vld [vmem:[%s22025_s19 + $0x228] ss:$16 sps:$4 sm:$0xff]   ;;  %v16010_v57 = vld [vmem:[%s22025_s19 + $0x264] ss:$16 sps:$4 sm:$0xff]   ;;  %v16019_v52 = vld [vmem:[%s22025_s19 + $0x28c] ss:$16 sps:$4 sm:$0xff]  }
 0xac4   : > { %v10811_v0 = vmax.f32 %v10809_v22, %v14643_v46  ;;  %v16004_v22 = vld [vmem:[%s22025_s19 + $0x244] ss:$16 sps:$4 sm:$0xff]   ;;  %v16014_v54 = vld [vmem:[%s22025_s19 + $0x280] ss:$16 sps:$4 sm:$0xff]  }
 0xac5   : > { %v16022_v46 = vld [vmem:[%s22025_s19 + $0x2a4] ss:$16 sps:$4 sm:$0xff]  }
 0xac6   : > { %v10741_v39 = vpop.f32.mrb[100].mxu1 }
 0xac7   : > { %v14644_v12 = vadd.f32 %v10741_v39, %v21559_v43  ;;  %v10743_v23 = vpop.f32.mrb[101].mxu1  ;;  %v16023_v39 = vld [vmem:[%s22025_s19 + $0x2a8] ss:$16 sps:$4 sm:$0xff]  }
 0xac8   : > { %v14645_v49 = vadd.f32 %v10743_v23, %v21562_v33  ;;  %v10745_v38 = vpop.f32.mrb[102].mxu1  ;;  %v16031_v23 = vld [vmem:[%s22025_s19 + $0x2cc] ss:$16 sps:$4 sm:$0xff]  }
 0xac9   : > { %v10799_v47 = vsel %vm10752_vm3, %v14644_v12, -inf  ;;  %v10746_v15 = vpop.f32.mrb[103].mxu1  ;;  %v16028_v12 = vld [vmem:[%s22025_s19 + $0x2c4] ss:$16 sps:$4 sm:$0xff]   ;;  %v16029_v38 = vld [vmem:[%s22025_s19 + $0x2c8] ss:$16 sps:$4 sm:$0xff]  }
 0xaca   : > { %v10800_v24 = vmax.f32 %v10797_v35, %v10799_v47  ;;  %v10812_v16 = vsel %vm10752_vm3, %v14645_v49, -inf  ;;  %v16016_v35 = vld [vmem:[%s22025_s19 + $0x284] ss:$16 sps:$4 sm:$0xff]   ;;  %v16026_v49 = vld [vmem:[%s22025_s19 + $0x2c0] ss:$16 sps:$4 sm:$0xff]  }
 0xacb   : > { %v10813_v21 = vmax.f32 %v10810_v55, %v10812_v16  ;;  %v16017_v55 = vld [vmem:[%s22025_s19 + $0x288] ss:$16 sps:$4 sm:$0xff]   ;;  %v16034_v47 = vld [vmem:[%s22025_s19 + $0x2e4] ss:$16 sps:$4 sm:$0xff]   ;;  %v16037_v15 = vld [vmem:[%s22025_s19 + $0x2ec] ss:$16 sps:$4 sm:$0xff]  }
 0xacc   : > { %v10801_v40 = vmax.f32 %v10800_v24, %v10798_v27  ;;  %v16025_v27 = vld [vmem:[%s22025_s19 + $0x2ac] ss:$16 sps:$4 sm:$0xff]   ;;  %v16032_v24 = vld [vmem:[%s22025_s19 + $0x2e0] ss:$16 sps:$4 sm:$0xff]   ;;  %v16035_v16 = vld [vmem:[%s22025_s19 + $0x2e8] ss:$16 sps:$4 sm:$0xff]  }
 0xacd   : > { %v10814_v42 = vmax.f32 %v10813_v21, %v10811_v0  ;;  %v16020_v0 = vld [vmem:[%s22025_s19 + $0x2a0] ss:$16 sps:$4 sm:$0xff]   ;;  %v16040_v21 = vld [vmem:[%s22025_s19 + $0x304] ss:$16 sps:$4 sm:$0xff]  }
 0xace   : > { %v10802_v6 = vrot.slane %v10801_v40, 4 }
 0xacf   : > { %v10815_v25 = vrot.slane %v10814_v42, 4 }
 0xad0   : > { %v10803_v32 = vmax.f32 %v10801_v40, %v10802_v6  ;;  %v16043_v40 = vld [vmem:[%s22025_s19 + $0x30c] ss:$16 sps:$4 sm:$0xff]   ;;  %v16041_v6 = vld [vmem:[%s22025_s19 + $0x308] ss:$16 sps:$4 sm:$0xff]  }
 0xad1   : > { %v10816_v63 = vmax.f32 %v10814_v42, %v10815_v25  ;;  %v16038_v42 = vld [vmem:[%s22025_s19 + $0x300] ss:$16 sps:$4 sm:$0xff]   ;;  %v16046_v25 = vld [vmem:[%s22025_s19 + $0x324] ss:$16 sps:$4 sm:$0xff]  }
 0xad2   : > { %v10804_v29 = vrot.slane %v10803_v32, 2 }
 0xad3   : > { %v10817_v53 = vrot.slane %v10816_v63, 2 }
 0xad4   : > { %v10805_v43 = vmax.f32 %v10803_v32, %v10804_v29  ;;  %v16049_v32 = vld [vmem:[%s22025_s19 + $0x32c] ss:$16 sps:$4 sm:$0xff]   ;;  %v16047_v29 = vld [vmem:[%s22025_s19 + $0x328] ss:$16 sps:$4 sm:$0xff]  }
 0xad5   : > { %v10818_v34 = vmax.f32 %v10816_v63, %v10817_v53  ;;  %v16044_v63 = vld [vmem:[%s22025_s19 + $0x320] ss:$16 sps:$4 sm:$0xff]   ;;  %v16052_v53 = vld [vmem:[%s22025_s19 + $0x344] ss:$16 sps:$4 sm:$0xff]  }
 0xad6   : > { %v10806_v19 = vrot.slane %v10805_v43, 1 }
 0xad7   : > { %v10819_v33 = vrot.slane %v10818_v34, 1 }
 0xad8   : > { %v10807_v41 = vmax.f32 %v10805_v43, %v10806_v19  ;;  %v16055_v43 = vld [vmem:[%s22025_s19 + $0x34c] ss:$16 sps:$4 sm:$0xff]   ;;  %v16053_v19 = vld [vmem:[%s22025_s19 + $0x348] ss:$16 sps:$4 sm:$0xff]  }
 0xad9   : > { %v10820_v5 = vmax.f32 %v10818_v34, %v10819_v33  ;;  %v16050_v34 = vld [vmem:[%s22025_s19 + $0x340] ss:$16 sps:$4 sm:$0xff]   ;;  %v16058_v33 = vld [vmem:[%s22025_s19 + $0x364] ss:$16 sps:$4 sm:$0xff]  }
 0xadb   : > { %v10823_v51 = vcombine.low %v10807_v41, %v10820_v5  ;;  %v16061_v41 = vld [vmem:[%s22025_s19 + $0x36c] ss:$16 sps:$4 sm:$0xff]   ;;  %v16056_v5 = vld [vmem:[%s22025_s19 + $0x360] ss:$16 sps:$4 sm:$0xff]  }
 0xadd   : > { %v10830_v9 = vrot.slane %v10823_v51, %v21333_v56  ;;  %v16059_v51 = vld [vmem:[%s22025_s19 + $0x368] ss:$16 sps:$4 sm:$0xff]  }
 0xadf   : > { %v10837_v50 = vrot.slane %v10830_v9, %v21333_v56  ;;  %v15992_v56 = vld [vmem:[%s22025_s19 + $0x208] ss:$16 sps:$4 sm:$0xff]   ;;  %v16064_v9 = vld [vmem:[%s22025_s19 + $0x384] ss:$16 sps:$4 sm:$0xff]  }
 0xae1   : > { %10840 = vst.msk [vmem:[#allocation2 + $0x5] ss:$2 sm:$0x3] %vm21339_vm2, %v10837_v50  ;;  %v16065_v50 = vld [vmem:[%s22025_s19 + $0x388] ss:$16 sps:$4 sm:$0xff]  }
 0xae8   : > { %v10841_v26 = vld [vmem:[#allocation2] sm:$0xff] }
 0xae9   : > { %v10852_v48 = vrot.slane %v10841_v26, %v10851_v60  ;;  %v10845_v8 = vcombine.high %v10841_v26, %v10841_v26  ;;  %v16068_v26 = vld [vmem:[%s22025_s19 + $0x3a0] ss:$16 sps:$4 sm:$0xff]  }
 0xaeb   : > { %v10860_v18 = vcombine.high %v10852_v48, %v10852_v48  ;;  %v21605_v1 = vrot.slane %v10845_v8, %v10851_v60  ;;  %v10874_v13 = vpack.c.bf16 %v10852_v48, %v10852_v48  ;;  %v16073_v60 = vld [vmem:[%s22025_s19 + $0x3ac] ss:$16 sps:$4 sm:$0xff]   ;;  %v16071_v48 = vld [vmem:[%s22025_s19 + $0x3a8] ss:$16 sps:$4 sm:$0xff]   ;;  %v16076_v8 = vld [vmem:[%s22025_s19 + $0x3c4] ss:$16 sps:$4 sm:$0xff]  }
 0xaed   : > { %v10875_v17 = vpack.c.bf16 %v10860_v18, %v10860_v18  ;;  %v10861_v31 = vcombine.high %v21605_v1, %v21605_v1  ;;  %v16079_v18 = vld [vmem:[%s22025_s19 + $0x3cc] ss:$16 sps:$4 sm:$0xff]  }
 0xaef   : > { %11893 = vmatprep.mubr.bf16.mxu1 %v10875_v17  ;;  %12016 = vmatprep.mubr.bf16.mxu0 %v10875_v17  ;;  %v10877_v7 = vpack.c.bf16 %v10861_v31, %v10861_v31  ;;  %v16074_v17 = vld [vmem:[%s22025_s19 + $0x3c0] ss:$16 sps:$4 sm:$0xff]   ;;  %v16085_v31 = vld [vmem:[%s22025_s19 + $0x3ec] ss:$16 sps:$4 sm:$0xff]  }
 0xaf0   : > { %11894 = vmatmul.mubr.bf16.vlgmr.msra.gmra.mrb[104].mxu1 %v10874_v13  ;;  %12017 = vmatmul.mubr.bf16.vlgmr.msra.gmra.mrb[180].mxu0 %v10874_v13  ;;  %v16080_v13 = vld [vmem:[%s22025_s19 + $0x3e0] ss:$16 sps:$4 sm:$0xff]  }
 0xaf1   : > { %11903 = vmatpush1.bf16.msra.mxu1 %v15989_v45  ;;  %12026 = vmatpush1.bf16.msra.mxu0 %v15992_v56  ;;  %v16077_v45 = vld [vmem:[%s22025_s19 + $0x3c8] ss:$16 sps:$4 sm:$0xff]   ;;  %v16082_v56 = vld [vmem:[%s22025_s19 + $0x3e4] ss:$16 sps:$4 sm:$0xff]  }
 0xaf2   : > { %11934 = vmatprep.mubr.bf16.mxu1 %v10877_v7  ;;  %12057 = vmatprep.mubr.bf16.mxu0 %v10877_v7  ;;  %v16083_v7 = vld [vmem:[%s22025_s19 + $0x3e8] ss:$16 sps:$4 sm:$0xff]  }
 0xaf3   : > { %11904 = vmatprep.subr.bf16.mxu1 %v15998_v11  ;;  %12027 = vmatprep.subr.bf16.mxu0 %v16001_v59  ;;  %v16088_v11 = vld [vmem:[%s22025_s19 + $0x404] ss:$16 sps:$4 sm:$0xff]   ;;  %v16091_v59 = vld [vmem:[%s22025_s19 + $0x40c] ss:$16 sps:$4 sm:$0xff]  }
 0xaf5   : > { %11905 = vmatpush1.bf16.msra.mxu1 %v15996_v20  ;;  %12028 = vmatpush1.bf16.msra.mxu0 %v15999_v28  ;;  %v16086_v20 = vld [vmem:[%s22025_s19 + $0x400] ss:$16 sps:$4 sm:$0xff]   ;;  %v16089_v28 = vld [vmem:[%s22025_s19 + $0x408] ss:$16 sps:$4 sm:$0xff]  }
 0xaf6   : > { %11906 = vmatprep.subr.bf16.mxu1 %v16004_v22  ;;  %12029 = vmatprep.subr.bf16.mxu0 %v16007_v44  ;;  %v10876_v22 = vpack.c.bf16 %v21605_v1, %v21605_v1  ;;  %v16094_v44 = vld [vmem:[%s22025_s19 + $0x424] ss:$16 sps:$4 sm:$0xff]   ;;  %v16095_v1 = vld [vmem:[%s22025_s19 + $0x428] ss:$16 sps:$4 sm:$0xff]  }
 0xaf9   : > { %11907 = vmatpush1.bf16.msra.mxu1 %v16002_v61  ;;  %12030 = vmatpush1.bf16.msra.mxu0 %v16005_v62  ;;  %v16097_v61 = vld [vmem:[%s22025_s19 + $0x42c] ss:$16 sps:$4 sm:$0xff]   ;;  %v16092_v62 = vld [vmem:[%s22025_s19 + $0x420] ss:$16 sps:$4 sm:$0xff]  }
 0xafa   : > { %11908 = vmatprep.subr.bf16.mxu1 %v16010_v57  ;;  %12031 = vmatprep.subr.bf16.mxu0 %v16013_v4  ;;  %v16100_v57 = vld [vmem:[%s22025_s19 + $0x444] ss:$16 sps:$4 sm:$0xff]   ;;  %v16103_v4 = vld [vmem:[%s22025_s19 + $0x44c] ss:$16 sps:$4 sm:$0xff]  }
 0xafd   : > { %11909 = vmatpush1.bf16.msra.mxu1 %v16008_v3  ;;  %12032 = vmatpush1.bf16.msra.mxu0 %v16011_v30  ;;  %v16397_v3 = vmov 0   ;;  %v16098_v30 = vld [vmem:[%s22025_s19 + $0x440] ss:$16 sps:$4 sm:$0xff]  }
 0xafe   : > { %11910 = vmatprep.subr.bf16.mxu1 %v16016_v35  ;;  %12033 = vmatprep.subr.bf16.mxu0 %v16019_v52  ;;  %v16101_v35 = vld [vmem:[%s22025_s19 + $0x448] ss:$16 sps:$4 sm:$0xff]   ;;  %v16106_v52 = vld [vmem:[%s22025_s19 + $0x464] ss:$16 sps:$4 sm:$0xff]  }
 0xb01   : > { %11911 = vmatpush1.bf16.msra.mxu1 %v16014_v54  ;;  %12034 = vmatpush1.bf16.msra.mxu0 %v16017_v55  ;;  %v16109_v54 = vld [vmem:[%s22025_s19 + $0x46c] ss:$16 sps:$4 sm:$0xff]   ;;  %v16104_v55 = vld [vmem:[%s22025_s19 + $0x460] ss:$16 sps:$4 sm:$0xff]  }
 0xb02   : > { %11912 = vmatprep.subr.bf16.mxu1 %v16022_v46  ;;  %12035 = vmatprep.subr.bf16.mxu0 %v16025_v27  ;;  %v16107_v46 = vld [vmem:[%s22025_s19 + $0x468] ss:$16 sps:$4 sm:$0xff]   ;;  %v16112_v27 = vld [vmem:[%s22025_s19 + $0x484] ss:$16 sps:$4 sm:$0xff]  }
 0xb05   : > { %11913 = vmatpush1.bf16.msra.mxu1 %v16020_v0  ;;  %12036 = vmatpush1.bf16.msra.mxu0 %v16023_v39  ;;  %v16115_v0 = vld [vmem:[%s22025_s19 + $0x48c] ss:$16 sps:$4 sm:$0xff]   ;;  %v16110_v39 = vld [vmem:[%s22025_s19 + $0x480] ss:$16 sps:$4 sm:$0xff]  }
 0xb06   : > { %11914 = vmatprep.subr.bf16.mxu1 %v16028_v12  ;;  %12037 = vmatprep.subr.bf16.mxu0 %v16031_v23  ;;  %v16113_v12 = vld [vmem:[%s22025_s19 + $0x488] ss:$16 sps:$4 sm:$0xff]   ;;  %v16118_v23 = vld [vmem:[%s22025_s19 + $0x4a4] ss:$16 sps:$4 sm:$0xff]  }
 0xb09   : > { %11915 = vmatpush1.bf16.msra.mxu1 %v16026_v49  ;;  %12038 = vmatpush1.bf16.msra.mxu0 %v16029_v38  ;;  %v16121_v49 = vld [vmem:[%s22025_s19 + $0x4ac] ss:$16 sps:$4 sm:$0xff]   ;;  %v16116_v38 = vld [vmem:[%s22025_s19 + $0x4a0] ss:$16 sps:$4 sm:$0xff]  }
 0xb0a   : > { %11916 = vmatprep.subr.bf16.mxu1 %v16034_v47  ;;  %12039 = vmatprep.subr.bf16.mxu0 %v16037_v15  ;;  %v16119_v47 = vld [vmem:[%s22025_s19 + $0x4a8] ss:$16 sps:$4 sm:$0xff]   ;;  %v16124_v15 = vld [vmem:[%s22025_s19 + $0x4c4] ss:$16 sps:$4 sm:$0xff]  }
 0xb0d   : > { %11917 = vmatpush1.bf16.msra.mxu1 %v16032_v24  ;;  %12040 = vmatpush1.bf16.msra.mxu0 %v16035_v16  ;;  %v16127_v24 = vld [vmem:[%s22025_s19 + $0x4cc] ss:$16 sps:$4 sm:$0xff]   ;;  %v16122_v16 = vld [vmem:[%s22025_s19 + $0x4c0] ss:$16 sps:$4 sm:$0xff]  }
 0xb0e   : > { %11918 = vmatprep.subr.bf16.mxu1 %v16040_v21  ;;  %12041 = vmatprep.subr.bf16.mxu0 %v16043_v40  ;;  %v16125_v21 = vld [vmem:[%s22025_s19 + $0x4c8] ss:$16 sps:$4 sm:$0xff]   ;;  %v16130_v40 = vld [vmem:[%s22025_s19 + $0x4e4] ss:$16 sps:$4 sm:$0xff]  }
 0xb11   : > { %11919 = vmatpush1.bf16.msra.mxu1 %v16038_v42  ;;  %12042 = vmatpush1.bf16.msra.mxu0 %v16041_v6  ;;  %v16133_v42 = vld [vmem:[%s22025_s19 + $0x4ec] ss:$16 sps:$4 sm:$0xff]   ;;  %v16128_v6 = vld [vmem:[%s22025_s19 + $0x4e0] ss:$16 sps:$4 sm:$0xff]  }
 0xb12   : > { %11920 = vmatprep.subr.bf16.mxu1 %v16046_v25  ;;  %12043 = vmatprep.subr.bf16.mxu0 %v16049_v32  ;;  %v16131_v25 = vld [vmem:[%s22025_s19 + $0x4e8] ss:$16 sps:$4 sm:$0xff]   ;;  %v16134_v32 = vld [vmem:[%s22027_s21 + $0x40] sm:$0xff]  }
 0xb15   : > { %11921 = vmatpush1.bf16.msra.mxu1 %v16044_v63  ;;  %12044 = vmatpush1.bf16.msra.mxu0 %v16047_v29  ;;  %v13236_v63 = vld.sshfl [vmem:[#allocation2 + $0x8] sm:$0x3 pattern:$0x76325410]  ;;  %v16135_v29 = vld [vmem:[%s22027_s21] sm:$0xff]  }
 0xb16   : > { %11922 = vmatprep.subr.bf16.mxu1 %v16052_v53  ;;  %12045 = vmatprep.subr.bf16.mxu0 %v16055_v43  ;;  %v10878_v53 = vpack.c.bf16 %v13236_v63, %v13236_v63  ;;  %v16136_v43 = vld [vmem:[%s22027_s21 + $0x48] sm:$0xff]  }
 0xb19   : > { %11923 = vmatpush1.bf16.msra.mxu1 %v16050_v34  ;;  %12046 = vmatpush1.bf16.msra.mxu0 %v16053_v19  ;;  %v16137_v34 = vld [vmem:[%s22027_s21 + $0x8] sm:$0xff]   ;;  %v16138_v19 = vld [vmem:[%s22027_s21 + $0x50] sm:$0xff]  }
 0xb1a   : > { %11924 = vmatprep.subr.bf16.mxu1 %v16058_v33  ;;  %12047 = vmatprep.subr.bf16.mxu0 %v16061_v41  ;;  %v16139_v33 = vld [vmem:[%s22027_s21 + $0x10] sm:$0xff]   ;;  %v16140_v41 = vld [vmem:[%s22027_s21 + $0x58] sm:$0xff]  }
 0xb1d   : > { %11925 = vmatpush1.bf16.msra.mxu1 %v16056_v5  ;;  %12048 = vmatpush1.bf16.msra.mxu0 %v16059_v51  ;;  %v16141_v5 = vld [vmem:[%s22027_s21 + $0x18] sm:$0xff]   ;;  %v16142_v51 = vld [vmem:[%s22027_s21 + $0x60] sm:$0xff]  }
 0xb1e   : > { %11926 = vmatprep.subr.bf16.mxu1 %v16064_v9  ;;  %12049 = vmatprep.subr.bf16.mxu0 %v16067_v10  ;;  %v16143_v9 = vld [vmem:[%s22027_s21 + $0x20] sm:$0xff]   ;;  %v16144_v10 = vld [vmem:[%s22027_s21 + $0x68] sm:$0xff]  }
 0xb21   : > { %11927 = vmatpush1.bf16.msra.mxu1 %v16062_v58  ;;  %12050 = vmatpush1.bf16.msra.mxu0 %v16065_v50  ;;  %v16145_v58 = vld [vmem:[%s22027_s21 + $0x28] sm:$0xff]   ;;  %v16146_v50 = vld [vmem:[%s22027_s21 + $0x70] sm:$0xff]  }
 0xb22   : > { %11928 = vmatprep.subr.bf16.mxu1 %v16070_v2  ;;  %12051 = vmatprep.subr.bf16.mxu0 %v16073_v60  ;;  %v16147_v2 = vld [vmem:[%s22027_s21 + $0x30] sm:$0xff]   ;;  %v16148_v60 = vld [vmem:[%s22027_s21 + $0x78] sm:$0xff]  }
 0xb25   : > { %11929 = vmatpush1.bf16.msra.mxu1 %v16068_v26  ;;  %12052 = vmatpush1.bf16.msra.mxu0 %v16071_v48  ;;  %v16149_v26 = vld [vmem:[%s22027_s21 + $0x38] sm:$0xff]   ;;  %v16150_v48 = vld [vmem:[%s22027_s21 + $0xc0] sm:$0xff]  }
 0xb26   : > { %11930 = vmatprep.subr.bf16.mxu1 %v16076_v8  ;;  %12053 = vmatprep.subr.bf16.mxu0 %v16079_v18  ;;  %v11039_v8 = vld [vmem:[%s22026_s20] sm:$0xf]  ;;  %v11055_v18 = vsub.s32 3, %v22671_v14 }
 0xb29   : > { %11931 = vmatpush1.bf16.msra.mxu1 %v16074_v17  ;;  %12054 = vmatpush1.bf16.msra.mxu0 %v16077_v45  ;;  %v11044_v17 = vrot.slane %v11039_v8, %v22672_v37  ;;  %v11048_v45 = vrot.slane %v11039_v8, %v21269_v36  ;;  %v16151_v36 = vld [vmem:[%s22027_s21 + $0x80] sm:$0xff]  }
 0xb2a   : > { %11932 = vmatprep.subr.bf16.mxu1 %v16082_v56  ;;  %12055 = vmatprep.subr.bf16.mxu0 %v16085_v31  ;;  %v11056_v56 = vrot.slane %v11039_v8, %v11055_v18 }
 0xb2d   : > { %11933 = vmatpush1.bf16.msra.mxu1 %v16080_v13  ;;  %12056 = vmatpush1.bf16.msra.mxu0 %v16083_v7 }
 0xb2e   : > { %11943 = vmatprep.subr.bf16.mxu1 %v16088_v11  ;;  %12066 = vmatprep.subr.bf16.mxu0 %v16091_v59 }
 0xb30   : > { %11935 = vmatmul.mubr.bf16.vlgmr.msra.gmra.mrb[104].mxu1 %v10876_v22  ;;  %12058 = vmatmul.mubr.bf16.vlgmr.msra.gmra.mrb[180].mxu0 %v10876_v22 }
 0xb31   : > { %11944 = vmatpush1.bf16.msra.mxu1 %v16086_v20  ;;  %12067 = vmatpush1.bf16.msra.mxu0 %v16089_v28 }
 0xb32   : > { %11945 = vmatprep.subr.bf16.mxu1 %v16094_v44  ;;  %12068 = vmatprep.subr.bf16.mxu0 %v16097_v61 }
 0xb33   : > { %11975 = vmatprep.mubr.bf16.mxu1 %v16397_v3  ;;  %12098 = vmatprep.mubr.bf16.mxu0 %v16397_v3 }
 0xb35   : > { %11946 = vmatpush1.bf16.msra.mxu1 %v16092_v62  ;;  %12069 = vmatpush1.bf16.msra.mxu0 %v16095_v1 }
 0xb36   : > { %11947 = vmatprep.subr.bf16.mxu1 %v16100_v57  ;;  %12070 = vmatprep.subr.bf16.mxu0 %v16103_v4 }
 0xb39   : > { %11948 = vmatpush1.bf16.msra.mxu1 %v16098_v30  ;;  %12071 = vmatpush1.bf16.msra.mxu0 %v16101_v35  ;;  %v16152_v30 = vld [vmem:[%s22027_s21 + $0xc8] sm:$0xff]  }
 0xb3a   : > { %11949 = vmatprep.subr.bf16.mxu1 %v16106_v52  ;;  %12072 = vmatprep.subr.bf16.mxu0 %v16109_v54  ;;  %v16153_v52 = vld [vmem:[%s22027_s21 + $0x88] sm:$0xff]   ;;  %v16154_v54 = vld [vmem:[%s22027_s21 + $0xd0] sm:$0xff]  }
 0xb3d   : > { %11950 = vmatpush1.bf16.msra.mxu1 %v16104_v55  ;;  %12073 = vmatpush1.bf16.msra.mxu0 %v16107_v46  ;;  %v16155_v55 = vld [vmem:[%s22027_s21 + $0x90] sm:$0xff]   ;;  %v16156_v46 = vld [vmem:[%s22027_s21 + $0xd8] sm:$0xff]  }
 0xb3e   : > { %11951 = vmatprep.subr.bf16.mxu1 %v16112_v27  ;;  %12074 = vmatprep.subr.bf16.mxu0 %v16115_v0  ;;  %v16157_v27 = vld [vmem:[%s22027_s21 + $0x98] sm:$0xff]   ;;  %v16158_v0 = vld [vmem:[%s22027_s21 + $0xe0] sm:$0xff]  }
 0xb41   : > { %11952 = vmatpush1.bf16.msra.mxu1 %v16110_v39  ;;  %12075 = vmatpush1.bf16.msra.mxu0 %v16113_v12  ;;  %v16159_v39 = vld [vmem:[%s22027_s21 + $0xa0] sm:$0xff]   ;;  %v11051_v12 = vsub.s32 2, %v22671_v14  ;;  %v16163_v14 = vld [vmem:[%s22027_s21 + $0xb0] sm:$0xff]  }
 0xb42   : > { %11953 = vmatprep.subr.bf16.mxu1 %v16118_v23  ;;  %12076 = vmatprep.subr.bf16.mxu0 %v16121_v49  ;;  %v16160_v23 = vld [vmem:[%s22027_s21 + $0xe8] sm:$0xff]  }
 0xb43   : > { %v16161_v49 = vld [vmem:[%s22027_s21 + $0xa8] sm:$0xff]  }
 0xb45   : > { %11954 = vmatpush1.bf16.msra.mxu1 %v16116_v38  ;;  %12077 = vmatpush1.bf16.msra.mxu0 %v16119_v47  ;;  %v11052_v38 = vrot.slane %v11039_v8, %v11051_v12  ;;  %v16162_v47 = vld [vmem:[%s22027_s21 + $0xf0] sm:$0xff]  }
 0xb46   : > { %11955 = vmatprep.subr.bf16.mxu1 %v16124_v15  ;;  %12078 = vmatprep.subr.bf16.mxu0 %v16127_v24  ;;  %v16164_v24 = vld [vmem:[%s22027_s21 + $0xf8] sm:$0xff]  }
 0xb49   : > { %11956 = vmatpush1.bf16.msra.mxu1 %v16122_v16  ;;  %12079 = vmatpush1.bf16.msra.mxu0 %v16125_v21  ;;  %v16165_v16 = vld [vmem:[%s22027_s21 + $0xb8] sm:$0xff]  }
 0xb4a   : > { %11957 = vmatprep.subr.bf16.mxu1 %v16130_v40  ;;  %12080 = vmatprep.subr.bf16.mxu0 %v16133_v42 }
 0xb4d   : > { %11958 = vmatpush1.bf16.msra.mxu1 %v16128_v6  ;;  %12081 = vmatpush1.bf16.msra.mxu0 %v16131_v25 }
 0xb4e   : > { %14218 = vmatprep.subr.bf16.mxu1 %v16134_v32 }
 0xb50   : > { %11976 = vmatmul.mubr.bf16.vlgmr.msra.gmra.mrb[104].mxu1 %v10878_v53  ;;  %12099 = vmatmul.mubr.bf16.vlgmr.msra.gmra.mrb[180].mxu0 %v10878_v53 }
 0xb51   : > { %14219 = vmatpush3.bf16.msra.mxu1 %v16135_v29  ;;  %v13397_v29 = vld [vmem:[%s22676_s24] ss:$0 sm:$0xff] }
 0xb52   : > { %14220 = vmatprep.subr.bf16.mxu1 %v16136_v43 }
 0xb55   : > { %14221 = vmatpush3.bf16.msra.mxu1 %v16137_v34 }
 0xb56   : > { %14222 = vmatprep.subr.bf16.mxu1 %v16138_v19 }
 0xb59   : > { %14223 = vmatpush3.bf16.msra.mxu1 %v16139_v33 }
 0xb5a   : > { %14224 = vmatprep.subr.bf16.mxu1 %v16140_v41 }
 0xb5d   : > { %14225 = vmatpush3.bf16.msra.mxu1 %v16141_v5 }
 0xb5e   : > { %14226 = vmatprep.subr.bf16.mxu1 %v16142_v51 }
 0xb61   : > { %14227 = vmatpush3.bf16.msra.mxu1 %v16143_v9 }
 0xb62   : > { %14228 = vmatprep.subr.bf16.mxu1 %v16144_v10 }
 0xb65   : > { %14229 = vmatpush3.bf16.msra.mxu1 %v16145_v58 }
 0xb66   : > { %14230 = vmatprep.subr.bf16.mxu1 %v16146_v50 }
 0xb69   : > { %14231 = vmatpush3.bf16.msra.mxu1 %v16147_v2 }
 0xb6a   : > { %14232 = vmatprep.subr.bf16.mxu1 %v16148_v60 }
 0xb6d   : > { %14233 = vmatpush3.bf16.msra.mxu1 %v16149_v26 }
 0xb6e   : > { %14240 = vmatprep.subr.bf16.mxu1 %v16150_v48 }
 0xc23   : > { %v11977_v31 = vpop.f32.mrb[104].mxu1  ;;  %v12100_v13 = vpop.f32.mrb[180].mxu0 }
 0xc24   : > { %v14646_v7 = vadd.f32 %v11977_v31, %v11044_v17  ;;  %v11979_v11 = vpop.f32.mrb[105].mxu1  ;;  %v12102_v59 = vpop.f32.mrb[181].mxu0  ;;  %v14648_v15 = vadd.f32 %v12100_v13, %v11052_v38 }
 0xc25   : > { %v14647_v20 = vadd.f32 %v11979_v11, %v11048_v45  ;;  %v14649_v28 = vadd.f32 %v12102_v59, %v11056_v56  ;;  %v11981_v22 = vpop.f32.mrb[106].mxu1  ;;  %v12104_v44 = vpop.f32.mrb[182].mxu0 }
 0xc26   : > { %v12107_v61 = vmax.f32 %v14646_v7, 0.0  ;;  %v11982_v62 = vpop.f32.mrb[107].mxu1  ;;  %v12105_v1 = vpop.f32.mrb[183].mxu0  ;;  %v12109_v21 = vmax.f32 %v14648_v15, 0.0 }
 0xc27   : > { %v12108_v57 = vmax.f32 %v14647_v20, 0.0  ;;  %v12110_v4 = vmax.f32 %v14649_v28, 0.0 }
 0xc28   : > { %v12111_v37 = vpack.c.bf16 %v12107_v61, %v12107_v61  ;;  %v12113_v40 = vpack.c.bf16 %v12109_v21, %v12109_v21 }
 0xc29   : > { %v12112_v3 = vpack.c.bf16 %v12108_v57, %v12108_v57  ;;  %v12114_v35 = vpack.c.bf16 %v12110_v4, %v12110_v4 }
 0xc2b   : > { %12410 = vmatprep.mubr.bf16.mxu1 %v12112_v3 }
 0xc2c   : > { %12411 = vmatmul.mubr.bf16.vlgmr.msra.gmra.mrb[108].mxu1 %v12111_v37 }
 0xc2d   : > { %14241 = vmatpush3.bf16.msra.mxu1 %v16151_v36  ;;  %12450 = vmatprep.mubr.bf16.mxu1 %v12114_v35 }
 0xc2e   : > { %14242 = vmatprep.subr.bf16.mxu1 %v16152_v30 }
 0xc31   : > { %14243 = vmatpush3.bf16.msra.mxu1 %v16153_v52 }
 0xc32   : > { %14244 = vmatprep.subr.bf16.mxu1 %v16154_v54 }
 0xc35   : > { %14245 = vmatpush3.bf16.msra.mxu1 %v16155_v55 }
 0xc36   : > { %14246 = vmatprep.subr.bf16.mxu1 %v16156_v46 }
 0xc39   : > { %14247 = vmatpush3.bf16.msra.mxu1 %v16157_v27 }
 0xc3a   : > { %14248 = vmatprep.subr.bf16.mxu1 %v16158_v0 }
 0xc3d   : > { %14249 = vmatpush3.bf16.msra.mxu1 %v16159_v39 }
 0xc3e   : > { %14250 = vmatprep.subr.bf16.mxu1 %v16160_v23 }
 0xc41   : > { %14251 = vmatpush3.bf16.msra.mxu1 %v16161_v49 }
 0xc42   : > { %14252 = vmatprep.subr.bf16.mxu1 %v16162_v47 }
 0xc45   : > { %14253 = vmatpush3.bf16.msra.mxu1 %v16163_v14 }
 0xc46   : > { %14254 = vmatprep.subr.bf16.mxu1 %v16164_v24 }
 0xc49   : > { %14255 = vmatpush3.bf16.msra.mxu1 %v16165_v16 }
 0xc4c   : > { %12451 = vmatmul.mubr.bf16.vlgmr.msra.gmra.mrb[112].mxu1 %v12113_v40 }
 0xcff   : > { %v14234_v42 = vpop.f32.mrb[108].mxu1 }
 0xd00   : > { %v14235_v6 = vpop.f32.mrb[109].mxu1 }
 0xd01   : > { %v14236_v25 = vadd.f32 %v14235_v6, %v14234_v42  ;;  %v14237_v32 = vpop.f32.mrb[110].mxu1 }
 0xd02   : > { %v14238_v63 = vpop.f32.mrb[111].mxu1 }
 0xd03   : > { %v12413_v34 = vadd.f32 %v14236_v25, %v13397_v29 }
 0xd1f   : > { %v14256_v53 = vpop.f32.mrb[112].mxu1 }
 0xd20   : > { %v14257_v43 = vpop.f32.mrb[113].mxu1 }
 0xd21   : > { %v14258_v19 = vadd.f32 %v14257_v43, %v14256_v53  ;;  %v14259_v33 = vpop.f32.mrb[114].mxu1 }
 0xd22   : > { %v14260_v41 = vpop.f32.mrb[115].mxu1 }
 0xd23   : > { %v12453_v5 = vadd.f32 %v14258_v19, %v12413_v34 }
 0xd25   : > { %12458 = vst [vmem:[%s852_s10] sm:$0x3] %v12453_v5 }
 0xd26 PF: > { %s22678_s5 = sld [smem:[#allocation17_spill]] }
 0xd2c   : > { %s37_s4 = sadd.s32 1, %s22678_s5  }
 0xd2d   : > { %p34_p0 = scmp.ge.s32.totalorder %s37_s4, 4  }
 0xd2f   :  { %36 = sbr.rel (!%p34_p0) target bundleno = 16 (0x10), region = 179 }
 0xd36   :  { %12478 = vsyncpa [#allocation4], 1 }
 0xd37   :  { %12480 = vsyncpa [#allocation4 + $0x1], 1 }
 0xd38   :  { %12481 = vsyncpa [#allocation6], 1 }
 0xd39   :  { %12482 = vsyncpa [#allocation9], 1 }
 0xd3a   :  { %12483 = vsyncpa [#allocation12], 1 }

</bundles_post_ra>
